<compile_context>
chip_gen: v7x
topology: tpu7x:2x2x1
jax: 0.10.0
libtpu: 0.0.40
codegen_flags: <defaults>
</compile_context>

<pallas_src>
import functools

import jax
import jax.numpy as jnp
from jax import lax
from jax.experimental import pallas as pl
from jax.experimental.pallas import tpu as pltpu


# ----------------------------------------------------------------------------
# Helpers
# ----------------------------------------------------------------------------
def _round_up(x, m):
    return (x + m - 1) // m * m


def _vmem_limit():
    """Per-generation VMEM budget (~3/4 of physical, capped at 96 MiB)."""
    try:
        info = pltpu.get_tpu_info()
        cap = int(getattr(info, "vmem_capacity_bytes", 0)) or 64 * 1024 * 1024
    except Exception:
        cap = 64 * 1024 * 1024          # conservative (v7x-sized) fallback
    return min(cap * 3 // 4, 96 * 1024 * 1024)


_VMEM_LIMIT = _vmem_limit()


# ----------------------------------------------------------------------------
# Pallas kernel 1: single-pass GEMM + bias + activation (resident weight)
# ----------------------------------------------------------------------------
def _gemm_bias_act_kernel(a_ref, w_ref, b_ref, o_ref, *, act):
    acc = jnp.dot(a_ref[...], w_ref[...], preferred_element_type=jnp.float32)
    acc = acc + b_ref[...]                       # (1, Np) broadcast over rows
    if act == "relu":
        acc = jnp.maximum(acc, 0.0)
    elif act == "tanh":
        acc = jnp.tanh(acc)
    o_ref[...] = acc.astype(o_ref.dtype)


def matmul_bias_act(a, w, bias, *, act="none", out_dtype=jnp.bfloat16):
    """(M, K) @ (K, Np) + bias with fused activation.

    `w` is a pre-converted bf16 weight with Np a multiple of 128; it is kept
    VMEM-resident (constant block index) since every weight in this model is
    <= ~1.2 MiB.  K is not tiled (full-extent block); M is tiled by `tm`.
    """
    m, k = a.shape
    k2, npad = w.shape
    assert k2 == k and npad % 128 == 0
    if a.dtype != jnp.bfloat16:
        a = a.astype(jnp.bfloat16)

    if m >= 128:
        mp = _round_up(m, 128)
        tm = 512 if mp % 512 == 0 else (256 if mp % 256 == 0 else 128)
    else:
        mp = _round_up(m, 16)           # bf16 packs 16 rows per sublane group
        tm = mp
    # Give both v7x TensorCores work when the grid would otherwise be (1,).
    if mp // tm == 1 and tm > 128:
        tm //= 2

    out_bytes = jnp.dtype(out_dtype).itemsize

    def _working_set(t):
        return 2 * t * k * 2 + 2 * k * npad * 2 + 2 * t * npad * out_bytes + 4 * npad

    while tm > 128 and _working_set(tm) > _VMEM_LIMIT // 2:
        tm //= 2

    if mp != m:
        a = jnp.pad(a, ((0, mp - m), (0, 0)))

    kern = functools.partial(_gemm_bias_act_kernel, act=act)
    out = pl.pallas_call(
        kern,
        out_shape=jax.ShapeDtypeStruct((mp, npad), out_dtype),
        grid=(mp // tm,),
        in_specs=[
            pl.BlockSpec((tm, k), lambda i: (i, 0)),       # activations
            pl.BlockSpec((k, npad), lambda i: (0, 0)),     # weight (resident)
            pl.BlockSpec((1, npad), lambda i: (0, 0)),     # bias (resident)
        ],
        out_specs=pl.BlockSpec((tm, npad), lambda i: (i, 0)),
        compiler_params=pltpu.CompilerParams(
            dimension_semantics=("parallel",),
            vmem_limit_bytes=_VMEM_LIMIT),
        cost_estimate=pl.CostEstimate(
            flops=2 * mp * k * npad,
            transcendentals=mp * npad if act == "tanh" else 0,
            bytes_accessed=mp * k * 2 + k * npad * 2 + mp * npad * out_bytes),
    )(a, w, bias)
    if mp != m:
        out = out[:m]
    return out


# ----------------------------------------------------------------------------
# Pallas kernels 2/3: two-pass InstanceNorm (HW-tiled), fused ReLU / residual
# ----------------------------------------------------------------------------
def _in_stats_kernel(x_ref, sum_ref, ssq_ref):
    @pl.when(pl.program_id(2) == 0)
    def _():
        sum_ref[...] = jnp.zeros_like(sum_ref)
        ssq_ref[...] = jnp.zeros_like(ssq_ref)

    x = x_ref[0].astype(jnp.float32)                       # (thw, tc)
    sum_ref[0] += jnp.sum(x, axis=0, keepdims=True)
    ssq_ref[0] += jnp.sum(x * x, axis=0, keepdims=True)


def _in_scale_shift(x, sum_v, ssq_v, g, b, *, inv_hw, eps):
    mean = sum_v * inv_hw
    var = jnp.maximum(ssq_v * inv_hw - mean * mean, 0.0)   # biased variance
    scale = g * lax.rsqrt(var + eps)
    shift = b - mean * scale
    return x * scale + shift


def _in_apply_kernel(x_ref, sum_ref, ssq_ref, g_ref, b_ref, o_ref,
                     *, inv_hw, eps, relu):
    x = x_ref[0].astype(jnp.float32)
    y = _in_scale_shift(x, sum_ref[0], ssq_ref[0], g_ref[...], b_ref[...],
                        inv_hw=inv_hw, eps=eps)
    if relu:
        y = jnp.maximum(y, 0.0)
    o_ref[0] = y.astype(o_ref.dtype)


def _in_add_kernel(x_ref, sum_ref, ssq_ref, g_ref, b_ref, r_ref, o_ref,
                   *, inv_hw, eps):
    x = x_ref[0].astype(jnp.float32)
    y = _in_scale_shift(x, sum_ref[0], ssq_ref[0], g_ref[...], b_ref[...],
                        inv_hw=inv_hw, eps=eps)
    o_ref[0] = (y + r_ref[0].astype(jnp.float32)).astype(o_ref.dtype)


def _pick_hw_tile(hw):
    if hw <= 2048:
        return hw
    for t in (2048, 1024, 512, 256, 128, 64, 32, 16, 8):
        if hw % t == 0:
            return t
    return hw


def instance_norm(x, p, *, relu=False, residual=None, eps=1e-5,
                  out_dtype=jnp.bfloat16):
    """InstanceNorm2d(affine=True), training-mode per-instance statistics.

    Operates on channel-padded NHWC; gamma is padded with 1s / beta with 0s so
    padded channels remain exactly zero.  Two Pallas passes (stats, apply)
    tiled over HW so the working set stays small on v7x at large resolutions.
    """
    n, h, w, cs = x.shape
    hw = h * w
    xr = x.reshape(n, hw, cs)
    g, b = p["g"], p["b"]                                  # (1, Cs) fp32

    tc = 128 if cs % 128 == 0 else cs
    thw = _pick_hw_tile(hw)
    nc, nh = cs // tc, hw // thw

    x_spec = pl.BlockSpec((1, thw, tc), lambda ni, ci, hi: (ni, hi, ci))
    stat_spec = pl.BlockSpec((1, 1, tc), lambda ni, ci, hi: (ni, 0, ci))
    gb_spec = pl.BlockSpec((1, tc), lambda ni, ci, hi: (0, ci))

    stats_params = pltpu.CompilerParams(
        dimension_semantics=("parallel", "parallel", "arbitrary"),
        vmem_limit_bytes=_VMEM_LIMIT)
    apply_params = pltpu.CompilerParams(
        dimension_semantics=("parallel", "parallel", "parallel"),
        vmem_limit_bytes=_VMEM_LIMIT)

    sums, ssqs = pl.pallas_call(
        _in_stats_kernel,
        out_shape=(jax.ShapeDtypeStruct((n, 1, cs), jnp.float32),
                   jax.ShapeDtypeStruct((n, 1, cs), jnp.float32)),
        grid=(n, nc, nh),
        in_specs=[x_spec],
        out_specs=(stat_spec, stat_spec),
        compiler_params=stats_params,
    )(xr)

    inv_hw = 1.0 / float(hw)
    out_sds = jax.ShapeDtypeStruct((n, hw, cs), out_dtype)
    if residual is None:
        kern = functools.partial(_in_apply_kernel, inv_hw=inv_hw, eps=eps,
                                 relu=relu)
        ins = [xr, sums, ssqs, g, b]
        specs = [x_spec, stat_spec, stat_spec, gb_spec, gb_spec]
    else:
        rr = residual.reshape(n, hw, cs)
        kern = functools.partial(_in_add_kernel, inv_hw=inv_hw, eps=eps)
        ins = [xr, sums, ssqs, g, b, rr]
        specs = [x_spec, stat_spec, stat_spec, gb_spec, gb_spec, x_spec]

    y = pl.pallas_call(
        kern, out_shape=out_sds, grid=(n, nc, nh),
        in_specs=specs, out_specs=x_spec,
        compiler_params=apply_params,
    )(*ins)
    return y.reshape(n, h, w, cs)


# ----------------------------------------------------------------------------
# Convolution glue (im2col gather in XLA, GEMM in Pallas)
# ----------------------------------------------------------------------------
def _im2col(x, kh, kw, cin, stride, pad):
    """pad: ((top, bottom), (left, right)).  Slices x to its true `cin`
    channels inside the same gather (fuses the channel-depad into the pad)."""
    n, h, w, _ = x.shape
    (pt, pb), (pl_, pr) = pad
    xp = jnp.pad(x[..., :cin], ((0, 0), (pt, pb), (pl_, pr), (0, 0)))
    ho = (h + pt + pb - kh) // stride + 1
    wo = (w + pl_ + pr - kw) // stride + 1
    cols = [xp[:, i:i + stride * ho:stride, j:j + stride * wo:stride, :]
            for i in range(kh) for j in range(kw)]
    patches = jnp.concatenate(cols, axis=-1).reshape(n * ho * wo, kh * kw * cin)
    return patches, (n, ho, wo)


def conv2d(x, cp, *, k, stride, pad, act="none", out_dtype=jnp.bfloat16):
    """cp: prepared conv params {'w': (k*k*cin, Np) bf16, 'b': (1, Np) f32}.
    Returns NHWC output with the channel dim stored 128-padded."""
    if isinstance(pad, int):
        pad = ((pad, pad), (pad, pad))
    cin = cp["w"].shape[0] // (k * k)
    patches, (n, ho, wo) = _im2col(x, k, k, cin, stride, pad)
    out = matmul_bias_act(patches, cp["w"], cp["b"], act=act,
                          out_dtype=out_dtype)
    return out.reshape(n, ho, wo, cp["w"].shape[1])


def conv_transpose2d(x, cps, *, act="none", out_dtype=jnp.bfloat16):
    """ConvTranspose2d(k=4, s=2, p=1) via the sub-pixel decomposition.

    `cps` is a list of 4 prepared 2x2 sub-conv params, one per output parity
    (pi, pj).  The input is padded once with ((1,1),(1,1)); the per-parity
    patch matrices are shifted windows of that single padded tensor, and the
    four GEMM outputs are interleaved with one stack + transpose + reshape.
    """
    cin = cps[0]["w"].shape[0] // 4
    npad = cps[0]["w"].shape[1]
    n, h, w, _ = x.shape
    xp = jnp.pad(x[..., :cin], ((0, 0), (1, 1), (1, 1), (0, 0)))
    outs = []
    for idx, (pi, pj) in enumerate(((0, 0), (0, 1), (1, 0), (1, 1))):
        cols = [xp[:, pi + di:pi + di + h, pj + dj:pj + dj + w, :]
                for di in (0, 1) for dj in (0, 1)]
        patches = jnp.concatenate(cols, axis=-1).reshape(n * h * w, 4 * cin)
        o = matmul_bias_act(patches, cps[idx]["w"], cps[idx]["b"], act=act,
                            out_dtype=out_dtype)
        outs.append(o.reshape(n, h, w, npad))
    y = jnp.stack(outs, axis=3).reshape(n, h, w, 2, 2, npad)   # (n,y,x,pi,pj,c)
    y = y.transpose(0, 1, 3, 2, 4, 5).reshape(n, 2 * h, 2 * w, npad)
    return y


def residual_block(x, rp):
    h = conv2d(x, rp["c1"], k=3, stride=1, pad=1)               # bias=False
    h = instance_norm(h, rp["n1"], relu=True)
    h = conv2d(h, rp["c2"], k=3, stride=1, pad=1)
    return instance_norm(h, rp["n2"], residual=x)               # fused add


# ----------------------------------------------------------------------------
# Parameter initialization (synthetic) and one-time GEMM-layout preparation
# ----------------------------------------------------------------------------
class _Init:
    def __init__(self, key):
        self.key = key

    def normal(self, shape, scale=0.05):
        self.key, k = jax.random.split(self.key)
        return scale * jax.random.normal(k, shape, jnp.float32)


def init_params(key):
    it = _Init(key)

    def conv(cin, cout, k):
        return dict(w=it.normal((k, k, cin, cout)), b=it.normal((cout,)))

    def norm(c):
        return dict(g=jnp.ones((c,), jnp.float32) + it.normal((c,)),
                    b=it.normal((c,)))

    def res(c):
        return dict(w1=it.normal((3, 3, c, c)), n1=norm(c),
                    w2=it.normal((3, 3, c, c)), n2=norm(c))

    return dict(
        c1=conv(3, 64, 4),
        r1=res(64),
        c2=conv(64, 128, 4), n2=norm(128),
        r2=res(128),
        c3=conv(128, 256, 4), n3=norm(256),
        r3=res(256), r4=res(256),
        d1=conv(256, 128, 4), nd1=norm(128),
        r5=res(128),
        d2=conv(128, 64, 4), nd2=norm(64),
        r6=res(64),
        d3=conv(64, 3, 4),
    )


def _prep_conv(w, b=None):
    kh, kw, cin, cout = w.shape
    kdim = kh * kw * cin
    npad = _round_up(cout, 128)
    wp = jnp.pad(w.reshape(kdim, cout).astype(jnp.bfloat16),
                 ((0, 0), (0, npad - cout)))
    if b is None:
        b = jnp.zeros((cout,), jnp.float32)
    bp = jnp.pad(b.astype(jnp.float32), (0, npad - cout)).reshape(1, npad)
    return dict(w=wp, b=bp)


def _prep_norm(g, b):
    c = g.shape[0]
    cs = _round_up(c, 128)
    gp = jnp.pad(g.astype(jnp.float32), (0, cs - c),
                 constant_values=1.0).reshape(1, cs)
    bp = jnp.pad(b.astype(jnp.float32), (0, cs - c)).reshape(1, cs)
    return dict(g=gp, b=bp)


def _prep_convT(w, b):
    # Sub-pixel decomposition: one 2x2 sub-kernel per output parity (pi, pj).
    return [_prep_conv(w[pi::2, pj::2], b) for pi in (0, 1) for pj in (0, 1)]


def prepare_params(raw):
    """One-time (outside jit) conversion to GEMM-ready bf16, 128-padded layout."""
    def pres(r):
        return dict(c1=_prep_conv(r["w1"]), n1=_prep_norm(**r["n1"]),
                    c2=_prep_conv(r["w2"]), n2=_prep_norm(**r["n2"]))

    return dict(
        c1=_prep_conv(raw["c1"]["w"], raw["c1"]["b"]),
        r1=pres(raw["r1"]),
        c2=_prep_conv(raw["c2"]["w"], raw["c2"]["b"]),
        n2=_prep_norm(**raw["n2"]), r2=pres(raw["r2"]),
        c3=_prep_conv(raw["c3"]["w"], raw["c3"]["b"]),
        n3=_prep_norm(**raw["n3"]), r3=pres(raw["r3"]), r4=pres(raw["r4"]),
        d1=_prep_convT(raw["d1"]["w"], raw["d1"]["b"]),
        nd1=_prep_norm(**raw["nd1"]), r5=pres(raw["r5"]),
        d2=_prep_convT(raw["d2"]["w"], raw["d2"]["b"]),
        nd2=_prep_norm(**raw["nd2"]), r6=pres(raw["r6"]),
        d3=_prep_convT(raw["d3"]["w"], raw["d3"]["b"]),
    )


# ----------------------------------------------------------------------------
# Generator forward
# ----------------------------------------------------------------------------
def generator_forward(p, x_nhwc):
    h = conv2d(x_nhwc, p["c1"], k=4, stride=2, pad=1, act="relu")   # H/2, 64
    h = residual_block(h, p["r1"])
    h = conv2d(h, p["c2"], k=4, stride=2, pad=1)
    h = instance_norm(h, p["n2"], relu=True)                        # H/4, 128
    h = residual_block(h, p["r2"])
    h = conv2d(h, p["c3"], k=4, stride=2, pad=1)
    h = instance_norm(h, p["n3"], relu=True)                        # H/8, 256
    h = residual_block(h, p["r3"])
    h = residual_block(h, p["r4"])
    h = conv_transpose2d(h, p["d1"])
    h = instance_norm(h, p["nd1"], relu=True)                       # H/4, 128
    h = residual_block(h, p["r5"])
    h = conv_transpose2d(h, p["d2"])
    h = instance_norm(h, p["nd2"], relu=True)                       # H/2, 64
    h = residual_block(h, p["r6"])
    h = conv_transpose2d(h, p["d3"], act="tanh", out_dtype=jnp.float32)  # H, 3
    return h[..., :3]            # drop lane-padding channels at the boundary


@jax.jit
def generator_nchw(params, x_nchw):
    x = jnp.transpose(x_nchw, (0, 2, 3, 1)).astype(jnp.bfloat16)   # boundary
    y = generator_forward(params, x)
    return jnp.transpose(y, (0, 3, 1, 2))                          # NHWC->NCHW


if __name__ == "__main__":
    key = jax.random.PRNGKey(0)
    pkey, xkey = jax.random.split(key)
    params = prepare_params(init_params(pkey))       # one-time, outside jit

    # Small NCHW input consistent with the module (3 input channels; spatial
    # divisible by 8 for the 3x down / 3x up sampling path).
    x = jax.random.normal(xkey, (2, 3, 32, 32), jnp.float32)

    y = generator_nchw(params, x)
    y = jax.block_until_ready(y)

    assert y.shape == (2, 3, 32, 32), y.shape
    assert bool(jnp.all(jnp.isfinite(y)))
    assert bool(jnp.all(jnp.abs(y) <= 1.0))          # tanh output range
    print("KERNEL_OK")
</pallas_src>

<mosaic_0001>
module attributes {stable_mosaic.version = 11 : i64} {
  func.func @_gemm_bias_act_kernel(%arg0: i32, %arg1: memref<256x48xbf16, #tpu.memory_space<vmem>>, %arg2: memref<48x128xbf16, #tpu.memory_space<vmem>>, %arg3: memref<1x128xf32, #tpu.memory_space<vmem>>, %arg4: memref<256x128xbf16, #tpu.memory_space<vmem>>) attributes {dimension_semantics = [#tpu.dimension_semantics<parallel>], iteration_bounds = array<i64: 2>, scalar_prefetch = 0 : i64, scratch_operands = 0 : i64, tpu.core_type = #tpu.core_type<tc>, window_params = [{transform_indices = @transform_0, window_bounds = array<i64: 256, 48>}, {pipeline_mode = #tpu.pipeline_mode<synchronous>, transform_indices = @transform_1, window_bounds = array<i64: 48, 128>}, {pipeline_mode = #tpu.pipeline_mode<synchronous>, transform_indices = @transform_2, window_bounds = array<i64: 1, 128>}, {transform_indices = @transform_3, window_bounds = array<i64: 256, 128>}]} {
    %c0 = arith.constant 0 : index
    %c0_0 = arith.constant 0 : index
    %0 = vector.load %arg1[%c0, %c0_0] : memref<256x48xbf16, #tpu.memory_space<vmem>>, vector<256x48xbf16>
    %c0_1 = arith.constant 0 : index
    %c0_2 = arith.constant 0 : index
    %1 = vector.load %arg2[%c0_1, %c0_2] : memref<48x128xbf16, #tpu.memory_space<vmem>>, vector<48x128xbf16>
    %cst = arith.constant dense<0.000000e+00> : vector<256x128xf32>
    %2 = tpu.matmul %0, %1, %cst {dimension_numbers = #tpu.dot_dimension_numbers<[1], [0], [0], [1], [0, 0, 1, 1], [], []>} : vector<256x48xbf16>, vector<48x128xbf16>, vector<256x128xf32> -> vector<256x128xf32>
    %c0_3 = arith.constant 0 : index
    %c0_4 = arith.constant 0 : index
    %3 = vector.load %arg3[%c0_3, %c0_4] : memref<1x128xf32, #tpu.memory_space<vmem>>, vector<1x128xf32>
    %4 = vector.broadcast %3 : vector<1x128xf32> to vector<256x128xf32>
    %5 = arith.addf %2, %4 : vector<256x128xf32>
    %cst_5 = arith.constant 0.000000e+00 : f32
    %6 = vector.broadcast %cst_5 : f32 to vector<256x128xf32>
    %7 = arith.maximumf %5, %6 : vector<256x128xf32>
    %8 = arith.truncf %7 : vector<256x128xf32> to vector<256x128xbf16>
    %c0_6 = arith.constant 0 : index
    %c0_7 = arith.constant 0 : index
    %9 = vector.load %arg4[%c0_6, %c0_7] : memref<256x128xbf16, #tpu.memory_space<vmem>>, vector<256x128xbf16>
    tpu.vector_store %arg4[%c0_6, %c0_7], %8 {strides = array<i32>} : memref<256x128xbf16, #tpu.memory_space<vmem>>, vector<256x128xbf16>,
    return
  }
  func.func @transform_0(%arg0: i32) -> (i32, i32) {
    %c0_i32 = arith.constant 0 : i32
    %c0_i32_0 = arith.constant 0 : i32
    return %arg0, %c0_i32 : i32, i32
  }
  func.func @transform_1(%arg0: i32) -> (i32, i32) {
    %c0_i32 = arith.constant 0 : i32
    %c0_i32_0 = arith.constant 0 : i32
    %c0_i32_1 = arith.constant 0 : i32
    return %c0_i32, %c0_i32_0 : i32, i32
  }
  func.func @transform_2(%arg0: i32) -> (i32, i32) {
    %c0_i32 = arith.constant 0 : i32
    %c0_i32_0 = arith.constant 0 : i32
    %c0_i32_1 = arith.constant 0 : i32
    return %c0_i32, %c0_i32_0 : i32, i32
  }
  func.func @transform_3(%arg0: i32) -> (i32, i32) {
    %c0_i32 = arith.constant 0 : i32
    %c0_i32_0 = arith.constant 0 : i32
    return %arg0, %c0_i32 : i32, i32
  }
}

module attributes {stable_mosaic.version = 11 : i64} {
  func.func @_gemm_bias_act_kernel(%arg0: i32, %arg1: memref<256x576xbf16, #tpu.memory_space<vmem>>, %arg2: memref<576x128xbf16, #tpu.memory_space<vmem>>, %arg3: memref<1x128xf32, #tpu.memory_space<vmem>>, %arg4: memref<256x128xbf16, #tpu.memory_space<vmem>>) attributes {dimension_semantics = [#tpu.dimension_semantics<parallel>], iteration_bounds = array<i64: 2>, scalar_prefetch = 0 : i64, scratch_operands = 0 : i64, tpu.core_type = #tpu.core_type<tc>, window_params = [{transform_indices = @transform_0, window_bounds = array<i64: 256, 576>}, {pipeline_mode = #tpu.pipeline_mode<synchronous>, transform_indices = @transform_1, window_bounds = array<i64: 576, 128>}, {pipeline_mode = #tpu.pipeline_mode<synchronous>, transform_indices = @transform_2, window_bounds = array<i64: 1, 128>}, {transform_indices = @transform_3, window_bounds = array<i64: 256, 128>}]} {
    %c0 = arith.constant 0 : index
    %c0_0 = arith.constant 0 : index
    %0 = vector.load %arg1[%c0, %c0_0] : memref<256x576xbf16, #tpu.memory_space<vmem>>, vector<256x576xbf16>
    %c0_1 = arith.constant 0 : index
    %c0_2 = arith.constant 0 : index
    %1 = vector.load %arg2[%c0_1, %c0_2] : memref<576x128xbf16, #tpu.memory_space<vmem>>, vector<576x128xbf16>
    %cst = arith.constant dense<0.000000e+00> : vector<256x128xf32>
    %2 = tpu.matmul %0, %1, %cst {dimension_numbers = #tpu.dot_dimension_numbers<[1], [0], [0], [1], [0, 0, 1, 1], [], []>} : vector<256x576xbf16>, vector<576x128xbf16>, vector<256x128xf32> -> vector<256x128xf32>
    %c0_3 = arith.constant 0 : index
    %c0_4 = arith.constant 0 : index
    %3 = vector.load %arg3[%c0_3, %c0_4] : memref<1x128xf32, #tpu.memory_space<vmem>>, vector<1x128xf32>
    %4 = vector.broadcast %3 : vector<1x128xf32> to vector<256x128xf32>
    %5 = arith.addf %2, %4 : vector<256x128xf32>
    %6 = arith.truncf %5 : vector<256x128xf32> to vector<256x128xbf16>
    %c0_5 = arith.constant 0 : index
    %c0_6 = arith.constant 0 : index
    %7 = vector.load %arg4[%c0_5, %c0_6] : memref<256x128xbf16, #tpu.memory_space<vmem>>, vector<256x128xbf16>
    tpu.vector_store %arg4[%c0_5, %c0_6], %6 {strides = array<i32>} : memref<256x128xbf16, #tpu.memory_space<vmem>>, vector<256x128xbf16>,
    return
  }
  func.func @transform_0(%arg0: i32) -> (i32, i32) {
    %c0_i32 = arith.constant 0 : i32
    %c0_i32_0 = arith.constant 0 : i32
    return %arg0, %c0_i32 : i32, i32
  }
  func.func @transform_1(%arg0: i32) -> (i32, i32) {
    %c0_i32 = arith.constant 0 : i32
    %c0_i32_0 = arith.constant 0 : i32
    %c0_i32_1 = arith.constant 0 : i32
    return %c0_i32, %c0_i32_0 : i32, i32
  }
  func.func @transform_2(%arg0: i32) -> (i32, i32) {
    %c0_i32 = arith.constant 0 : i32
    %c0_i32_0 = arith.constant 0 : i32
    %c0_i32_1 = arith.constant 0 : i32
    return %c0_i32, %c0_i32_0 : i32, i32
  }
  func.func @transform_3(%arg0: i32) -> (i32, i32) {
    %c0_i32 = arith.constant 0 : i32
    %c0_i32_0 = arith.constant 0 : i32
    return %arg0, %c0_i32 : i32, i32
  }
}

module attributes {stable_mosaic.version = 11 : i64} {
  func.func @_in_stats_kernel(%arg0: i32, %arg1: i32, %arg2: i32, %arg3: memref<1x256x128xbf16, #tpu.memory_space<vmem>>, %arg4: memref<1x1x128xf32, #tpu.memory_space<vmem>>, %arg5: memref<1x1x128xf32, #tpu.memory_space<vmem>>) attributes {dimension_semantics = [#tpu.dimension_semantics<parallel>, #tpu.dimension_semantics<parallel>, #tpu.dimension_semantics<arbitrary>], iteration_bounds = array<i64: 2, 1, 1>, scalar_prefetch = 0 : i64, scratch_operands = 0 : i64, tpu.core_type = #tpu.core_type<tc>, window_params = [{transform_indices = @transform_0, window_bounds = array<i64: 1, 256, 128>}, {transform_indices = @transform_1, window_bounds = array<i64: 1, 1, 128>}, {transform_indices = @transform_2, window_bounds = array<i64: 1, 1, 128>}]} {
    %c0_i32 = arith.constant 0 : i32
    %0 = arith.cmpi eq, %arg2, %c0_i32 : i32
    %1 = arith.extui %0 : i1 to i32
    %c0_i32_0 = arith.constant 0 : i32
    %2 = arith.cmpi ne, %1, %c0_i32_0 : i32
    scf.if %2 {
      %cst_16 = arith.constant 0.000000e+00 : f32
      %23 = vector.broadcast %cst_16 : f32 to vector<1x1x128xf32>
      %c0_17 = arith.constant 0 : index
      %c0_18 = arith.constant 0 : index
      %c0_19 = arith.constant 0 : index
      %24 = vector.load %arg4[%c0_17, %c0_18, %c0_19] : memref<1x1x128xf32, #tpu.memory_space<vmem>>, vector<1x1x128xf32>
      tpu.vector_store %arg4[%c0_17, %c0_18, %c0_19], %23 {strides = array<i32>} : memref<1x1x128xf32, #tpu.memory_space<vmem>>, vector<1x1x128xf32>,
      %cst_20 = arith.constant 0.000000e+00 : f32
      %25 = vector.broadcast %cst_20 : f32 to vector<1x1x128xf32>
      %c0_21 = arith.constant 0 : index
      %c0_22 = arith.constant 0 : index
      %c0_23 = arith.constant 0 : index
      %26 = vector.load %arg5[%c0_21, %c0_22, %c0_23] : memref<1x1x128xf32, #tpu.memory_space<vmem>>, vector<1x1x128xf32>
      tpu.vector_store %arg5[%c0_21, %c0_22, %c0_23], %25 {strides = array<i32>} : memref<1x1x128xf32, #tpu.memory_space<vmem>>, vector<1x1x128xf32>,
    } else {
    }
    %c0 = arith.constant 0 : index
    %c0_1 = arith.constant 0 : index
    %c0_2 = arith.constant 0 : index
    %3 = vector.load %arg3[%c0, %c0_1, %c0_2] : memref<1x256x128xbf16, #tpu.memory_space<vmem>>, vector<1x256x128xbf16>
    %4 = vector.shape_cast %3 : vector<1x256x128xbf16> to vector<256x128xbf16>
    %5 = arith.extf %4 : vector<256x128xbf16> to vector<256x128xf32>
    %c0_3 = arith.constant 0 : index
    %c0_4 = arith.constant 0 : index
    %c0_5 = arith.constant 0 : index
    %6 = vector.load %arg4[%c0_3, %c0_4, %c0_5] : memref<1x1x128xf32, #tpu.memory_space<vmem>>, vector<1x1x128xf32>
    %7 = vector.shape_cast %6 : vector<1x1x128xf32> to vector<1x128xf32>
    %cst = arith.constant dense<0.000000e+00> : vector<128xf32>
    %8 = vector.multi_reduction <add>, %5, %cst [0] : vector<256x128xf32> to vector<128xf32>
    %9 = vector.shape_cast %8 : vector<128xf32> to vector<1x128xf32>
    %10 = arith.addf %7, %9 : vector<1x128xf32>
    %c0_6 = arith.constant 0 : index
    %c0_7 = arith.constant 0 : index
    %c0_8 = arith.constant 0 : index
    %11 = vector.load %arg4[%c0_6, %c0_7, %c0_8] : memref<1x1x128xf32, #tpu.memory_space<vmem>>, vector<1x1x128xf32>
    %12 = vector.shape_cast %11 : vector<1x1x128xf32> to vector<1x128xf32>
    %13 = vector.shape_cast %10 : vector<1x128xf32> to vector<1x1x128xf32>
    tpu.vector_store %arg4[%c0_6, %c0_7, %c0_8], %13 {strides = array<i32>} : memref<1x1x128xf32, #tpu.memory_space<vmem>>, vector<1x1x128xf32>,
    %c0_9 = arith.constant 0 : index
    %c0_10 = arith.constant 0 : index
    %c0_11 = arith.constant 0 : index
    %14 = vector.load %arg5[%c0_9, %c0_10, %c0_11] : memref<1x1x128xf32, #tpu.memory_space<vmem>>, vector<1x1x128xf32>
    %15 = vector.shape_cast %14 : vector<1x1x128xf32> to vector<1x128xf32>
    %16 = arith.mulf %5, %5 : vector<256x128xf32>
    %cst_12 = arith.constant dense<0.000000e+00> : vector<128xf32>
    %17 = vector.multi_reduction <add>, %16, %cst_12 [0] : vector<256x128xf32> to vector<128xf32>
    %18 = vector.shape_cast %17 : vector<128xf32> to vector<1x128xf32>
    %19 = arith.addf %15, %18 : vector<1x128xf32>
    %c0_13 = arith.constant 0 : index
    %c0_14 = arith.constant 0 : index
    %c0_15 = arith.constant 0 : index
    %20 = vector.load %arg5[%c0_13, %c0_14, %c0_15] : memref<1x1x128xf32, #tpu.memory_space<vmem>>, vector<1x1x128xf32>
    %21 = vector.shape_cast %20 : vector<1x1x128xf32> to vector<1x128xf32>
    %22 = vector.shape_cast %19 : vector<1x128xf32> to vector<1x1x128xf32>
    tpu.vector_store %arg5[%c0_13, %c0_14, %c0_15], %22 {strides = array<i32>} : memref<1x1x128xf32, #tpu.memory_space<vmem>>, vector<1x1x128xf32>,
    return
  }
  func.func @transform_0(%arg0: i32, %arg1: i32, %arg2: i32) -> (i32, i32, i32) {
    %c0_i32 = arith.constant 0 : i32
    return %arg0, %arg2, %arg1 : i32, i32, i32
  }
  func.func @transform_1(%arg0: i32, %arg1: i32, %arg2: i32) -> (i32, i32, i32) {
    %c0_i32 = arith.constant 0 : i32
    %c0_i32_0 = arith.constant 0 : i32
    return %arg0, %c0_i32, %arg1 : i32, i32, i32
  }
  func.func @transform_2(%arg0: i32, %arg1: i32, %arg2: i32) -> (i32, i32, i32) {
    %c0_i32 = arith.constant 0 : i32
    %c0_i32_0 = arith.constant 0 : i32
    return %arg0, %c0_i32, %arg1 : i32, i32, i32
  }
}

module attributes {stable_mosaic.version = 11 : i64} {
  func.func @_in_apply_kernel(%arg0: i32, %arg1: i32, %arg2: i32, %arg3: memref<1x256x128xbf16, #tpu.memory_space<vmem>>, %arg4: memref<1x1x128xf32, #tpu.memory_space<vmem>>, %arg5: memref<1x1x128xf32, #tpu.memory_space<vmem>>, %arg6: memref<1x128xf32, #tpu.memory_space<vmem>>, %arg7: memref<1x128xf32, #tpu.memory_space<vmem>>, %arg8: memref<1x256x128xbf16, #tpu.memory_space<vmem>>) attributes {dimension_semantics = [#tpu.dimension_semantics<parallel>, #tpu.dimension_semantics<parallel>, #tpu.dimension_semantics<parallel>], iteration_bounds = array<i64: 2, 1, 1>, scalar_prefetch = 0 : i64, scratch_operands = 0 : i64, tpu.core_type = #tpu.core_type<tc>, window_params = [{transform_indices = @transform_0, window_bounds = array<i64: 1, 256, 128>}, {transform_indices = @transform_1, window_bounds = array<i64: 1, 1, 128>}, {transform_indices = @transform_2, window_bounds = array<i64: 1, 1, 128>}, {transform_indices = @transform_3, window_bounds = array<i64: 1, 128>}, {transform_indices = @transform_4, window_bounds = array<i64: 1, 128>}, {transform_indices = @transform_5, window_bounds = array<i64: 1, 256, 128>}]} {
    %c0 = arith.constant 0 : index
    %c0_0 = arith.constant 0 : index
    %c0_1 = arith.constant 0 : index
    %0 = vector.load %arg3[%c0, %c0_0, %c0_1] : memref<1x256x128xbf16, #tpu.memory_space<vmem>>, vector<1x256x128xbf16>
    %1 = vector.shape_cast %0 : vector<1x256x128xbf16> to vector<256x128xbf16>
    %2 = arith.extf %1 : vector<256x128xbf16> to vector<256x128xf32>
    %c0_2 = arith.constant 0 : index
    %c0_3 = arith.constant 0 : index
    %c0_4 = arith.constant 0 : index
    %3 = vector.load %arg4[%c0_2, %c0_3, %c0_4] : memref<1x1x128xf32, #tpu.memory_space<vmem>>, vector<1x1x128xf32>
    %4 = vector.shape_cast %3 : vector<1x1x128xf32> to vector<1x128xf32>
    %c0_5 = arith.constant 0 : index
    %c0_6 = arith.constant 0 : index
    %c0_7 = arith.constant 0 : index
    %5 = vector.load %arg5[%c0_5, %c0_6, %c0_7] : memref<1x1x128xf32, #tpu.memory_space<vmem>>, vector<1x1x128xf32>
    %6 = vector.shape_cast %5 : vector<1x1x128xf32> to vector<1x128xf32>
    %c0_8 = arith.constant 0 : index
    %c0_9 = arith.constant 0 : index
    %7 = vector.load %arg6[%c0_8, %c0_9] : memref<1x128xf32, #tpu.memory_space<vmem>>, vector<1x128xf32>
    %c0_10 = arith.constant 0 : index
    %c0_11 = arith.constant 0 : index
    %8 = vector.load %arg7[%c0_10, %c0_11] : memref<1x128xf32, #tpu.memory_space<vmem>>, vector<1x128xf32>
    %cst = arith.constant 3.906250e-03 : f32
    %9 = vector.broadcast %cst : f32 to vector<1x128xf32>
    %10 = arith.mulf %4, %9 : vector<1x128xf32>
    %cst_12 = arith.constant 3.906250e-03 : f32
    %11 = vector.broadcast %cst_12 : f32 to vector<1x128xf32>
    %12 = arith.mulf %6, %11 : vector<1x128xf32>
    %13 = arith.mulf %10, %10 : vector<1x128xf32>
    %14 = arith.subf %12, %13 : vector<1x128xf32>
    %cst_13 = arith.constant 0.000000e+00 : f32
    %15 = vector.broadcast %cst_13 : f32 to vector<1x128xf32>
    %16 = arith.maximumf %14, %15 : vector<1x128xf32>
    %cst_14 = arith.constant 9.99999974E-6 : f32
    %17 = vector.broadcast %cst_14 : f32 to vector<1x128xf32>
    %18 = arith.addf %16, %17 : vector<1x128xf32>
    %19 = math.rsqrt %18 : vector<1x128xf32>
    %20 = arith.mulf %7, %19 : vector<1x128xf32>
    %21 = arith.mulf %10, %20 : vector<1x128xf32>
    %22 = arith.subf %8, %21 : vector<1x128xf32>
    %23 = vector.broadcast %20 : vector<1x128xf32> to vector<256x128xf32>
    %24 = arith.mulf %2, %23 : vector<256x128xf32>
    %25 = vector.broadcast %22 : vector<1x128xf32> to vector<256x128xf32>
    %26 = arith.addf %24, %25 : vector<256x128xf32>
    %cst_15 = arith.constant 0.000000e+00 : f32
    %27 = vector.broadcast %cst_15 : f32 to vector<256x128xf32>
    %28 = arith.maximumf %26, %27 : vector<256x128xf32>
    %29 = arith.truncf %28 : vector<256x128xf32> to vector<256x128xbf16>
    %c0_16 = arith.constant 0 : index
    %c0_17 = arith.constant 0 : index
    %c0_18 = arith.constant 0 : index
    %30 = vector.load %arg8[%c0_16, %c0_17, %c0_18] : memref<1x256x128xbf16, #tpu.memory_space<vmem>>, vector<1x256x128xbf16>
    %31 = vector.shape_cast %30 : vector<1x256x128xbf16> to vector<256x128xbf16>
    %32 = vector.shape_cast %29 : vector<256x128xbf16> to vector<1x256x128xbf16>
    tpu.vector_store %arg8[%c0_16, %c0_17, %c0_18], %32 {strides = array<i32>} : memref<1x256x128xbf16, #tpu.memory_space<vmem>>, vector<1x256x128xbf16>,
    return
  }
  func.func @transform_0(%arg0: i32, %arg1: i32, %arg2: i32) -> (i32, i32, i32) {
    %c0_i32 = arith.constant 0 : i32
    return %arg0, %arg2, %arg1 : i32, i32, i32
  }
  func.func @transform_1(%arg0: i32, %arg1: i32, %arg2: i32) -> (i32, i32, i32) {
    %c0_i32 = arith.constant 0 : i32
    %c0_i32_0 = arith.constant 0 : i32
    return %arg0, %c0_i32, %arg1 : i32, i32, i32
  }
  func.func @transform_2(%arg0: i32, %arg1: i32, %arg2: i32) -> (i32, i32, i32) {
    %c0_i32 = arith.constant 0 : i32
    %c0_i32_0 = arith.constant 0 : i32
    return %arg0, %c0_i32, %arg1 : i32, i32, i32
  }
  func.func @transform_3(%arg0: i32, %arg1: i32, %arg2: i32) -> (i32, i32) {
    %c0_i32 = arith.constant 0 : i32
    %c0_i32_0 = arith.constant 0 : i32
    return %c0_i32, %arg1 : i32, i32
  }
  func.func @transform_4(%arg0: i32, %arg1: i32, %arg2: i32) -> (i32, i32) {
    %c0_i32 = arith.constant 0 : i32
    %c0_i32_0 = arith.constant 0 : i32
    return %c0_i32, %arg1 : i32, i32
  }
  func.func @transform_5(%arg0: i32, %arg1: i32, %arg2: i32) -> (i32, i32, i32) {
    %c0_i32 = arith.constant 0 : i32
    return %arg0, %arg2, %arg1 : i32, i32, i32
  }
}

module attributes {stable_mosaic.version = 11 : i64} {
  func.func @_in_add_kernel(%arg0: i32, %arg1: i32, %arg2: i32, %arg3: memref<1x256x128xbf16, #tpu.memory_space<vmem>>, %arg4: memref<1x1x128xf32, #tpu.memory_space<vmem>>, %arg5: memref<1x1x128xf32, #tpu.memory_space<vmem>>, %arg6: memref<1x128xf32, #tpu.memory_space<vmem>>, %arg7: memref<1x128xf32, #tpu.memory_space<vmem>>, %arg8: memref<1x256x128xbf16, #tpu.memory_space<vmem>>, %arg9: memref<1x256x128xbf16, #tpu.memory_space<vmem>>) attributes {dimension_semantics = [#tpu.dimension_semantics<parallel>, #tpu.dimension_semantics<parallel>, #tpu.dimension_semantics<parallel>], iteration_bounds = array<i64: 2, 1, 1>, scalar_prefetch = 0 : i64, scratch_operands = 0 : i64, tpu.core_type = #tpu.core_type<tc>, window_params = [{transform_indices = @transform_0, window_bounds = array<i64: 1, 256, 128>}, {transform_indices = @transform_1, window_bounds = array<i64: 1, 1, 128>}, {transform_indices = @transform_2, window_bounds = array<i64: 1, 1, 128>}, {transform_indices = @transform_3, window_bounds = array<i64: 1, 128>}, {transform_indices = @transform_4, window_bounds = array<i64: 1, 128>}, {transform_indices = @transform_5, window_bounds = array<i64: 1, 256, 128>}, {transform_indices = @transform_6, window_bounds = array<i64: 1, 256, 128>}]} {
    %c0 = arith.constant 0 : index
    %c0_0 = arith.constant 0 : index
    %c0_1 = arith.constant 0 : index
    %0 = vector.load %arg3[%c0, %c0_0, %c0_1] : memref<1x256x128xbf16, #tpu.memory_space<vmem>>, vector<1x256x128xbf16>
    %1 = vector.shape_cast %0 : vector<1x256x128xbf16> to vector<256x128xbf16>
    %2 = arith.extf %1 : vector<256x128xbf16> to vector<256x128xf32>
    %c0_2 = arith.constant 0 : index
    %c0_3 = arith.constant 0 : index
    %c0_4 = arith.constant 0 : index
    %3 = vector.load %arg4[%c0_2, %c0_3, %c0_4] : memref<1x1x128xf32, #tpu.memory_space<vmem>>, vector<1x1x128xf32>
    %4 = vector.shape_cast %3 : vector<1x1x128xf32> to vector<1x128xf32>
    %c0_5 = arith.constant 0 : index
    %c0_6 = arith.constant 0 : index
    %c0_7 = arith.constant 0 : index
    %5 = vector.load %arg5[%c0_5, %c0_6, %c0_7] : memref<1x1x128xf32, #tpu.memory_space<vmem>>, vector<1x1x128xf32>
    %6 = vector.shape_cast %5 : vector<1x1x128xf32> to vector<1x128xf32>
    %c0_8 = arith.constant 0 : index
    %c0_9 = arith.constant 0 : index
    %7 = vector.load %arg6[%c0_8, %c0_9] : memref<1x128xf32, #tpu.memory_space<vmem>>, vector<1x128xf32>
    %c0_10 = arith.constant 0 : index
    %c0_11 = arith.constant 0 : index
    %8 = vector.load %arg7[%c0_10, %c0_11] : memref<1x128xf32, #tpu.memory_space<vmem>>, vector<1x128xf32>
    %cst = arith.constant 3.906250e-03 : f32
    %9 = vector.broadcast %cst : f32 to vector<1x128xf32>
    %10 = arith.mulf %4, %9 : vector<1x128xf32>
    %cst_12 = arith.constant 3.906250e-03 : f32
    %11 = vector.broadcast %cst_12 : f32 to vector<1x128xf32>
    %12 = arith.mulf %6, %11 : vector<1x128xf32>
    %13 = arith.mulf %10, %10 : vector<1x128xf32>
    %14 = arith.subf %12, %13 : vector<1x128xf32>
    %cst_13 = arith.constant 0.000000e+00 : f32
    %15 = vector.broadcast %cst_13 : f32 to vector<1x128xf32>
    %16 = arith.maximumf %14, %15 : vector<1x128xf32>
    %cst_14 = arith.constant 9.99999974E-6 : f32
    %17 = vector.broadcast %cst_14 : f32 to vector<1x128xf32>
    %18 = arith.addf %16, %17 : vector<1x128xf32>
    %19 = math.rsqrt %18 : vector<1x128xf32>
    %20 = arith.mulf %7, %19 : vector<1x128xf32>
    %21 = arith.mulf %10, %20 : vector<1x128xf32>
    %22 = arith.subf %8, %21 : vector<1x128xf32>
    %23 = vector.broadcast %20 : vector<1x128xf32> to vector<256x128xf32>
    %24 = arith.mulf %2, %23 : vector<256x128xf32>
    %25 = vector.broadcast %22 : vector<1x128xf32> to vector<256x128xf32>
    %26 = arith.addf %24, %25 : vector<256x128xf32>
    %c0_15 = arith.constant 0 : index
    %c0_16 = arith.constant 0 : index
    %c0_17 = arith.constant 0 : index
    %27 = vector.load %arg8[%c0_15, %c0_16, %c0_17] : memref<1x256x128xbf16, #tpu.memory_space<vmem>>, vector<1x256x128xbf16>
    %28 = vector.shape_cast %27 : vector<1x256x128xbf16> to vector<256x128xbf16>
    %29 = arith.extf %28 : vector<256x128xbf16> to vector<256x128xf32>
    %30 = arith.addf %26, %29 : vector<256x128xf32>
    %31 = arith.truncf %30 : vector<256x128xf32> to vector<256x128xbf16>
    %c0_18 = arith.constant 0 : index
    %c0_19 = arith.constant 0 : index
    %c0_20 = arith.constant 0 : index
    %32 = vector.load %arg9[%c0_18, %c0_19, %c0_20] : memref<1x256x128xbf16, #tpu.memory_space<vmem>>, vector<1x256x128xbf16>
    %33 = vector.shape_cast %32 : vector<1x256x128xbf16> to vector<256x128xbf16>
    %34 = vector.shape_cast %31 : vector<256x128xbf16> to vector<1x256x128xbf16>
    tpu.vector_store %arg9[%c0_18, %c0_19, %c0_20], %34 {strides = array<i32>} : memref<1x256x128xbf16, #tpu.memory_space<vmem>>, vector<1x256x128xbf16>,
    return
  }
  func.func @transform_0(%arg0: i32, %arg1: i32, %arg2: i32) -> (i32, i32, i32) {
    %c0_i32 = arith.constant 0 : i32
    return %arg0, %arg2, %arg1 : i32, i32, i32
  }
  func.func @transform_1(%arg0: i32, %arg1: i32, %arg2: i32) -> (i32, i32, i32) {
    %c0_i32 = arith.constant 0 : i32
    %c0_i32_0 = arith.constant 0 : i32
    return %arg0, %c0_i32, %arg1 : i32, i32, i32
  }
  func.func @transform_2(%arg0: i32, %arg1: i32, %arg2: i32) -> (i32, i32, i32) {
    %c0_i32 = arith.constant 0 : i32
    %c0_i32_0 = arith.constant 0 : i32
    return %arg0, %c0_i32, %arg1 : i32, i32, i32
  }
  func.func @transform_3(%arg0: i32, %arg1: i32, %arg2: i32) -> (i32, i32) {
    %c0_i32 = arith.constant 0 : i32
    %c0_i32_0 = arith.constant 0 : i32
    return %c0_i32, %arg1 : i32, i32
  }
  func.func @transform_4(%arg0: i32, %arg1: i32, %arg2: i32) -> (i32, i32) {
    %c0_i32 = arith.constant 0 : i32
    %c0_i32_0 = arith.constant 0 : i32
    return %c0_i32, %arg1 : i32, i32
  }
  func.func @transform_5(%arg0: i32, %arg1: i32, %arg2: i32) -> (i32, i32, i32) {
    %c0_i32 = arith.constant 0 : i32
    return %arg0, %arg2, %arg1 : i32, i32, i32
  }
  func.func @transform_6(%arg0: i32, %arg1: i32, %arg2: i32) -> (i32, i32, i32) {
    %c0_i32 = arith.constant 0 : i32
    return %arg0, %arg2, %arg1 : i32, i32, i32
  }
}

module attributes {stable_mosaic.version = 11 : i64} {
  func.func @_in_stats_kernel(%arg0: i32, %arg1: i32, %arg2: i32, %arg3: memref<1x64x128xbf16, #tpu.memory_space<vmem>>, %arg4: memref<1x1x128xf32, #tpu.memory_space<vmem>>, %arg5: memref<1x1x128xf32, #tpu.memory_space<vmem>>) attributes {dimension_semantics = [#tpu.dimension_semantics<parallel>, #tpu.dimension_semantics<parallel>, #tpu.dimension_semantics<arbitrary>], iteration_bounds = array<i64: 2, 1, 1>, scalar_prefetch = 0 : i64, scratch_operands = 0 : i64, tpu.core_type = #tpu.core_type<tc>, window_params = [{transform_indices = @transform_0, window_bounds = array<i64: 1, 64, 128>}, {transform_indices = @transform_1, window_bounds = array<i64: 1, 1, 128>}, {transform_indices = @transform_2, window_bounds = array<i64: 1, 1, 128>}]} {
    %c0_i32 = arith.constant 0 : i32
    %0 = arith.cmpi eq, %arg2, %c0_i32 : i32
    %1 = arith.extui %0 : i1 to i32
    %c0_i32_0 = arith.constant 0 : i32
    %2 = arith.cmpi ne, %1, %c0_i32_0 : i32
    scf.if %2 {
      %cst_16 = arith.constant 0.000000e+00 : f32
      %23 = vector.broadcast %cst_16 : f32 to vector<1x1x128xf32>
      %c0_17 = arith.constant 0 : index
      %c0_18 = arith.constant 0 : index
      %c0_19 = arith.constant 0 : index
      %24 = vector.load %arg4[%c0_17, %c0_18, %c0_19] : memref<1x1x128xf32, #tpu.memory_space<vmem>>, vector<1x1x128xf32>
      tpu.vector_store %arg4[%c0_17, %c0_18, %c0_19], %23 {strides = array<i32>} : memref<1x1x128xf32, #tpu.memory_space<vmem>>, vector<1x1x128xf32>,
      %cst_20 = arith.constant 0.000000e+00 : f32
      %25 = vector.broadcast %cst_20 : f32 to vector<1x1x128xf32>
      %c0_21 = arith.constant 0 : index
      %c0_22 = arith.constant 0 : index
      %c0_23 = arith.constant 0 : index
      %26 = vector.load %arg5[%c0_21, %c0_22, %c0_23] : memref<1x1x128xf32, #tpu.memory_space<vmem>>, vector<1x1x128xf32>
      tpu.vector_store %arg5[%c0_21, %c0_22, %c0_23], %25 {strides = array<i32>} : memref<1x1x128xf32, #tpu.memory_space<vmem>>, vector<1x1x128xf32>,
    } else {
    }
    %c0 = arith.constant 0 : index
    %c0_1 = arith.constant 0 : index
    %c0_2 = arith.constant 0 : index
    %3 = vector.load %arg3[%c0, %c0_1, %c0_2] : memref<1x64x128xbf16, #tpu.memory_space<vmem>>, vector<1x64x128xbf16>
    %4 = vector.shape_cast %3 : vector<1x64x128xbf16> to vector<64x128xbf16>
    %5 = arith.extf %4 : vector<64x128xbf16> to vector<64x128xf32>
    %c0_3 = arith.constant 0 : index
    %c0_4 = arith.constant 0 : index
    %c0_5 = arith.constant 0 : index
    %6 = vector.load %arg4[%c0_3, %c0_4, %c0_5] : memref<1x1x128xf32, #tpu.memory_space<vmem>>, vector<1x1x128xf32>
    %7 = vector.shape_cast %6 : vector<1x1x128xf32> to vector<1x128xf32>
    %cst = arith.constant dense<0.000000e+00> : vector<128xf32>
    %8 = vector.multi_reduction <add>, %5, %cst [0] : vector<64x128xf32> to vector<128xf32>
    %9 = vector.shape_cast %8 : vector<128xf32> to vector<1x128xf32>
    %10 = arith.addf %7, %9 : vector<1x128xf32>
    %c0_6 = arith.constant 0 : index
    %c0_7 = arith.constant 0 : index
    %c0_8 = arith.constant 0 : index
    %11 = vector.load %arg4[%c0_6, %c0_7, %c0_8] : memref<1x1x128xf32, #tpu.memory_space<vmem>>, vector<1x1x128xf32>
    %12 = vector.shape_cast %11 : vector<1x1x128xf32> to vector<1x128xf32>
    %13 = vector.shape_cast %10 : vector<1x128xf32> to vector<1x1x128xf32>
    tpu.vector_store %arg4[%c0_6, %c0_7, %c0_8], %13 {strides = array<i32>} : memref<1x1x128xf32, #tpu.memory_space<vmem>>, vector<1x1x128xf32>,
    %c0_9 = arith.constant 0 : index
    %c0_10 = arith.constant 0 : index
    %c0_11 = arith.constant 0 : index
    %14 = vector.load %arg5[%c0_9, %c0_10, %c0_11] : memref<1x1x128xf32, #tpu.memory_space<vmem>>, vector<1x1x128xf32>
    %15 = vector.shape_cast %14 : vector<1x1x128xf32> to vector<1x128xf32>
    %16 = arith.mulf %5, %5 : vector<64x128xf32>
    %cst_12 = arith.constant dense<0.000000e+00> : vector<128xf32>
    %17 = vector.multi_reduction <add>, %16, %cst_12 [0] : vector<64x128xf32> to vector<128xf32>
    %18 = vector.shape_cast %17 : vector<128xf32> to vector<1x128xf32>
    %19 = arith.addf %15, %18 : vector<1x128xf32>
    %c0_13 = arith.constant 0 : index
    %c0_14 = arith.constant 0 : index
    %c0_15 = arith.constant 0 : index
    %20 = vector.load %arg5[%c0_13, %c0_14, %c0_15] : memref<1x1x128xf32, #tpu.memory_space<vmem>>, vector<1x1x128xf32>
    %21 = vector.shape_cast %20 : vector<1x1x128xf32> to vector<1x128xf32>
    %22 = vector.shape_cast %19 : vector<1x128xf32> to vector<1x1x128xf32>
    tpu.vector_store %arg5[%c0_13, %c0_14, %c0_15], %22 {strides = array<i32>} : memref<1x1x128xf32, #tpu.memory_space<vmem>>, vector<1x1x128xf32>,
    return
  }
  func.func @transform_0(%arg0: i32, %arg1: i32, %arg2: i32) -> (i32, i32, i32) {
    %c0_i32 = arith.constant 0 : i32
    return %arg0, %arg2, %arg1 : i32, i32, i32
  }
  func.func @transform_1(%arg0: i32, %arg1: i32, %arg2: i32) -> (i32, i32, i32) {
    %c0_i32 = arith.constant 0 : i32
    %c0_i32_0 = arith.constant 0 : i32
    return %arg0, %c0_i32, %arg1 : i32, i32, i32
  }
  func.func @transform_2(%arg0: i32, %arg1: i32, %arg2: i32) -> (i32, i32, i32) {
    %c0_i32 = arith.constant 0 : i32
    %c0_i32_0 = arith.constant 0 : i32
    return %arg0, %c0_i32, %arg1 : i32, i32, i32
  }
}

module attributes {stable_mosaic.version = 11 : i64} {
  func.func @_gemm_bias_act_kernel(%arg0: i32, %arg1: memref<128x1024xbf16, #tpu.memory_space<vmem>>, %arg2: memref<1024x128xbf16, #tpu.memory_space<vmem>>, %arg3: memref<1x128xf32, #tpu.memory_space<vmem>>, %arg4: memref<128x128xbf16, #tpu.memory_space<vmem>>) attributes {dimension_semantics = [#tpu.dimension_semantics<parallel>], iteration_bounds = array<i64: 1>, scalar_prefetch = 0 : i64, scratch_operands = 0 : i64, tpu.core_type = #tpu.core_type<tc>, window_params = [{transform_indices = @transform_0, window_bounds = array<i64: 128, 1024>}, {pipeline_mode = #tpu.pipeline_mode<synchronous>, transform_indices = @transform_1, window_bounds = array<i64: 1024, 128>}, {pipeline_mode = #tpu.pipeline_mode<synchronous>, transform_indices = @transform_2, window_bounds = array<i64: 1, 128>}, {transform_indices = @transform_3, window_bounds = array<i64: 128, 128>}]} {
    %c0 = arith.constant 0 : index
    %c0_0 = arith.constant 0 : index
    %0 = vector.load %arg1[%c0, %c0_0] : memref<128x1024xbf16, #tpu.memory_space<vmem>>, vector<128x1024xbf16>
    %c0_1 = arith.constant 0 : index
    %c0_2 = arith.constant 0 : index
    %1 = vector.load %arg2[%c0_1, %c0_2] : memref<1024x128xbf16, #tpu.memory_space<vmem>>, vector<1024x128xbf16>
    %cst = arith.constant dense<0.000000e+00> : vector<128x128xf32>
    %2 = tpu.matmul %0, %1, %cst {dimension_numbers = #tpu.dot_dimension_numbers<[1], [0], [0], [1], [0, 0, 1, 1], [], []>} : vector<128x1024xbf16>, vector<1024x128xbf16>, vector<128x128xf32> -> vector<128x128xf32>
    %c0_3 = arith.constant 0 : index
    %c0_4 = arith.constant 0 : index
    %3 = vector.load %arg3[%c0_3, %c0_4] : memref<1x128xf32, #tpu.memory_space<vmem>>, vector<1x128xf32>
    %4 = vector.broadcast %3 : vector<1x128xf32> to vector<128x128xf32>
    %5 = arith.addf %2, %4 : vector<128x128xf32>
    %6 = arith.truncf %5 : vector<128x128xf32> to vector<128x128xbf16>
    %c0_5 = arith.constant 0 : index
    %c0_6 = arith.constant 0 : index
    %7 = vector.load %arg4[%c0_5, %c0_6] : memref<128x128xbf16, #tpu.memory_space<vmem>>, vector<128x128xbf16>
    tpu.vector_store %arg4[%c0_5, %c0_6], %6 {strides = array<i32>} : memref<128x128xbf16, #tpu.memory_space<vmem>>, vector<128x128xbf16>,
    return
  }
  func.func @transform_0(%arg0: i32) -> (i32, i32) {
    %c0_i32 = arith.constant 0 : i32
    %c0_i32_0 = arith.constant 0 : i32
    return %arg0, %c0_i32 : i32, i32
  }
  func.func @transform_1(%arg0: i32) -> (i32, i32) {
    %c0_i32 = arith.constant 0 : i32
    %c0_i32_0 = arith.constant 0 : i32
    %c0_i32_1 = arith.constant 0 : i32
    return %c0_i32, %c0_i32_0 : i32, i32
  }
  func.func @transform_2(%arg0: i32) -> (i32, i32) {
    %c0_i32 = arith.constant 0 : i32
    %c0_i32_0 = arith.constant 0 : i32
    %c0_i32_1 = arith.constant 0 : i32
    return %c0_i32, %c0_i32_0 : i32, i32
  }
  func.func @transform_3(%arg0: i32) -> (i32, i32) {
    %c0_i32 = arith.constant 0 : i32
    %c0_i32_0 = arith.constant 0 : i32
    return %arg0, %c0_i32 : i32, i32
  }
}

module attributes {stable_mosaic.version = 11 : i64} {
  func.func @_in_apply_kernel(%arg0: i32, %arg1: i32, %arg2: i32, %arg3: memref<1x64x128xbf16, #tpu.memory_space<vmem>>, %arg4: memref<1x1x128xf32, #tpu.memory_space<vmem>>, %arg5: memref<1x1x128xf32, #tpu.memory_space<vmem>>, %arg6: memref<1x128xf32, #tpu.memory_space<vmem>>, %arg7: memref<1x128xf32, #tpu.memory_space<vmem>>, %arg8: memref<1x64x128xbf16, #tpu.memory_space<vmem>>) attributes {dimension_semantics = [#tpu.dimension_semantics<parallel>, #tpu.dimension_semantics<parallel>, #tpu.dimension_semantics<parallel>], iteration_bounds = array<i64: 2, 1, 1>, scalar_prefetch = 0 : i64, scratch_operands = 0 : i64, tpu.core_type = #tpu.core_type<tc>, window_params = [{transform_indices = @transform_0, window_bounds = array<i64: 1, 64, 128>}, {transform_indices = @transform_1, window_bounds = array<i64: 1, 1, 128>}, {transform_indices = @transform_2, window_bounds = array<i64: 1, 1, 128>}, {transform_indices = @transform_3, window_bounds = array<i64: 1, 128>}, {transform_indices = @transform_4, window_bounds = array<i64: 1, 128>}, {transform_indices = @transform_5, window_bounds = array<i64: 1, 64, 128>}]} {
    %c0 = arith.constant 0 : index
    %c0_0 = arith.constant 0 : index
    %c0_1 = arith.constant 0 : index
    %0 = vector.load %arg3[%c0, %c0_0, %c0_1] : memref<1x64x128xbf16, #tpu.memory_space<vmem>>, vector<1x64x128xbf16>
    %1 = vector.shape_cast %0 : vector<1x64x128xbf16> to vector<64x128xbf16>
    %2 = arith.extf %1 : vector<64x128xbf16> to vector<64x128xf32>
    %c0_2 = arith.constant 0 : index
    %c0_3 = arith.constant 0 : index
    %c0_4 = arith.constant 0 : index
    %3 = vector.load %arg4[%c0_2, %c0_3, %c0_4] : memref<1x1x128xf32, #tpu.memory_space<vmem>>, vector<1x1x128xf32>
    %4 = vector.shape_cast %3 : vector<1x1x128xf32> to vector<1x128xf32>
    %c0_5 = arith.constant 0 : index
    %c0_6 = arith.constant 0 : index
    %c0_7 = arith.constant 0 : index
    %5 = vector.load %arg5[%c0_5, %c0_6, %c0_7] : memref<1x1x128xf32, #tpu.memory_space<vmem>>, vector<1x1x128xf32>
    %6 = vector.shape_cast %5 : vector<1x1x128xf32> to vector<1x128xf32>
    %c0_8 = arith.constant 0 : index
    %c0_9 = arith.constant 0 : index
    %7 = vector.load %arg6[%c0_8, %c0_9] : memref<1x128xf32, #tpu.memory_space<vmem>>, vector<1x128xf32>
    %c0_10 = arith.constant 0 : index
    %c0_11 = arith.constant 0 : index
    %8 = vector.load %arg7[%c0_10, %c0_11] : memref<1x128xf32, #tpu.memory_space<vmem>>, vector<1x128xf32>
    %cst = arith.constant 1.562500e-02 : f32
    %9 = vector.broadcast %cst : f32 to vector<1x128xf32>
    %10 = arith.mulf %4, %9 : vector<1x128xf32>
    %cst_12 = arith.constant 1.562500e-02 : f32
    %11 = vector.broadcast %cst_12 : f32 to vector<1x128xf32>
    %12 = arith.mulf %6, %11 : vector<1x128xf32>
    %13 = arith.mulf %10, %10 : vector<1x128xf32>
    %14 = arith.subf %12, %13 : vector<1x128xf32>
    %cst_13 = arith.constant 0.000000e+00 : f32
    %15 = vector.broadcast %cst_13 : f32 to vector<1x128xf32>
    %16 = arith.maximumf %14, %15 : vector<1x128xf32>
    %cst_14 = arith.constant 9.99999974E-6 : f32
    %17 = vector.broadcast %cst_14 : f32 to vector<1x128xf32>
    %18 = arith.addf %16, %17 : vector<1x128xf32>
    %19 = math.rsqrt %18 : vector<1x128xf32>
    %20 = arith.mulf %7, %19 : vector<1x128xf32>
    %21 = arith.mulf %10, %20 : vector<1x128xf32>
    %22 = arith.subf %8, %21 : vector<1x128xf32>
    %23 = vector.broadcast %20 : vector<1x128xf32> to vector<64x128xf32>
    %24 = arith.mulf %2, %23 : vector<64x128xf32>
    %25 = vector.broadcast %22 : vector<1x128xf32> to vector<64x128xf32>
    %26 = arith.addf %24, %25 : vector<64x128xf32>
    %cst_15 = arith.constant 0.000000e+00 : f32
    %27 = vector.broadcast %cst_15 : f32 to vector<64x128xf32>
    %28 = arith.maximumf %26, %27 : vector<64x128xf32>
    %29 = arith.truncf %28 : vector<64x128xf32> to vector<64x128xbf16>
    %c0_16 = arith.constant 0 : index
    %c0_17 = arith.constant 0 : index
    %c0_18 = arith.constant 0 : index
    %30 = vector.load %arg8[%c0_16, %c0_17, %c0_18] : memref<1x64x128xbf16, #tpu.memory_space<vmem>>, vector<1x64x128xbf16>
    %31 = vector.shape_cast %30 : vector<1x64x128xbf16> to vector<64x128xbf16>
    %32 = vector.shape_cast %29 : vector<64x128xbf16> to vector<1x64x128xbf16>
    tpu.vector_store %arg8[%c0_16, %c0_17, %c0_18], %32 {strides = array<i32>} : memref<1x64x128xbf16, #tpu.memory_space<vmem>>, vector<1x64x128xbf16>,
    return
  }
  func.func @transform_0(%arg0: i32, %arg1: i32, %arg2: i32) -> (i32, i32, i32) {
    %c0_i32 = arith.constant 0 : i32
    return %arg0, %arg2, %arg1 : i32, i32, i32
  }
  func.func @transform_1(%arg0: i32, %arg1: i32, %arg2: i32) -> (i32, i32, i32) {
    %c0_i32 = arith.constant 0 : i32
    %c0_i32_0 = arith.constant 0 : i32
    return %arg0, %c0_i32, %arg1 : i32, i32, i32
  }
  func.func @transform_2(%arg0: i32, %arg1: i32, %arg2: i32) -> (i32, i32, i32) {
    %c0_i32 = arith.constant 0 : i32
    %c0_i32_0 = arith.constant 0 : i32
    return %arg0, %c0_i32, %arg1 : i32, i32, i32
  }
  func.func @transform_3(%arg0: i32, %arg1: i32, %arg2: i32) -> (i32, i32) {
    %c0_i32 = arith.constant 0 : i32
    %c0_i32_0 = arith.constant 0 : i32
    return %c0_i32, %arg1 : i32, i32
  }
  func.func @transform_4(%arg0: i32, %arg1: i32, %arg2: i32) -> (i32, i32) {
    %c0_i32 = arith.constant 0 : i32
    %c0_i32_0 = arith.constant 0 : i32
    return %c0_i32, %arg1 : i32, i32
  }
  func.func @transform_5(%arg0: i32, %arg1: i32, %arg2: i32) -> (i32, i32, i32) {
    %c0_i32 = arith.constant 0 : i32
    return %arg0, %arg2, %arg1 : i32, i32, i32
  }
}

module attributes {stable_mosaic.version = 11 : i64} {
  func.func @_gemm_bias_act_kernel(%arg0: i32, %arg1: memref<128x1152xbf16, #tpu.memory_space<vmem>>, %arg2: memref<1152x128xbf16, #tpu.memory_space<vmem>>, %arg3: memref<1x128xf32, #tpu.memory_space<vmem>>, %arg4: memref<128x128xbf16, #tpu.memory_space<vmem>>) attributes {dimension_semantics = [#tpu.dimension_semantics<parallel>], iteration_bounds = array<i64: 1>, scalar_prefetch = 0 : i64, scratch_operands = 0 : i64, tpu.core_type = #tpu.core_type<tc>, window_params = [{transform_indices = @transform_0, window_bounds = array<i64: 128, 1152>}, {pipeline_mode = #tpu.pipeline_mode<synchronous>, transform_indices = @transform_1, window_bounds = array<i64: 1152, 128>}, {pipeline_mode = #tpu.pipeline_mode<synchronous>, transform_indices = @transform_2, window_bounds = array<i64: 1, 128>}, {transform_indices = @transform_3, window_bounds = array<i64: 128, 128>}]} {
    %c0 = arith.constant 0 : index
    %c0_0 = arith.constant 0 : index
    %0 = vector.load %arg1[%c0, %c0_0] : memref<128x1152xbf16, #tpu.memory_space<vmem>>, vector<128x1152xbf16>
    %c0_1 = arith.constant 0 : index
    %c0_2 = arith.constant 0 : index
    %1 = vector.load %arg2[%c0_1, %c0_2] : memref<1152x128xbf16, #tpu.memory_space<vmem>>, vector<1152x128xbf16>
    %cst = arith.constant dense<0.000000e+00> : vector<128x128xf32>
    %2 = tpu.matmul %0, %1, %cst {dimension_numbers = #tpu.dot_dimension_numbers<[1], [0], [0], [1], [0, 0, 1, 1], [], []>} : vector<128x1152xbf16>, vector<1152x128xbf16>, vector<128x128xf32> -> vector<128x128xf32>
    %c0_3 = arith.constant 0 : index
    %c0_4 = arith.constant 0 : index
    %3 = vector.load %arg3[%c0_3, %c0_4] : memref<1x128xf32, #tpu.memory_space<vmem>>, vector<1x128xf32>
    %4 = vector.broadcast %3 : vector<1x128xf32> to vector<128x128xf32>
    %5 = arith.addf %2, %4 : vector<128x128xf32>
    %6 = arith.truncf %5 : vector<128x128xf32> to vector<128x128xbf16>
    %c0_5 = arith.constant 0 : index
    %c0_6 = arith.constant 0 : index
    %7 = vector.load %arg4[%c0_5, %c0_6] : memref<128x128xbf16, #tpu.memory_space<vmem>>, vector<128x128xbf16>
    tpu.vector_store %arg4[%c0_5, %c0_6], %6 {strides = array<i32>} : memref<128x128xbf16, #tpu.memory_space<vmem>>, vector<128x128xbf16>,
    return
  }
  func.func @transform_0(%arg0: i32) -> (i32, i32) {
    %c0_i32 = arith.constant 0 : i32
    %c0_i32_0 = arith.constant 0 : i32
    return %arg0, %c0_i32 : i32, i32
  }
  func.func @transform_1(%arg0: i32) -> (i32, i32) {
    %c0_i32 = arith.constant 0 : i32
    %c0_i32_0 = arith.constant 0 : i32
    %c0_i32_1 = arith.constant 0 : i32
    return %c0_i32, %c0_i32_0 : i32, i32
  }
  func.func @transform_2(%arg0: i32) -> (i32, i32) {
    %c0_i32 = arith.constant 0 : i32
    %c0_i32_0 = arith.constant 0 : i32
    %c0_i32_1 = arith.constant 0 : i32
    return %c0_i32, %c0_i32_0 : i32, i32
  }
  func.func @transform_3(%arg0: i32) -> (i32, i32) {
    %c0_i32 = arith.constant 0 : i32
    %c0_i32_0 = arith.constant 0 : i32
    return %arg0, %c0_i32 : i32, i32
  }
}

module attributes {stable_mosaic.version = 11 : i64} {
  func.func @_in_add_kernel(%arg0: i32, %arg1: i32, %arg2: i32, %arg3: memref<1x64x128xbf16, #tpu.memory_space<vmem>>, %arg4: memref<1x1x128xf32, #tpu.memory_space<vmem>>, %arg5: memref<1x1x128xf32, #tpu.memory_space<vmem>>, %arg6: memref<1x128xf32, #tpu.memory_space<vmem>>, %arg7: memref<1x128xf32, #tpu.memory_space<vmem>>, %arg8: memref<1x64x128xbf16, #tpu.memory_space<vmem>>, %arg9: memref<1x64x128xbf16, #tpu.memory_space<vmem>>) attributes {dimension_semantics = [#tpu.dimension_semantics<parallel>, #tpu.dimension_semantics<parallel>, #tpu.dimension_semantics<parallel>], iteration_bounds = array<i64: 2, 1, 1>, scalar_prefetch = 0 : i64, scratch_operands = 0 : i64, tpu.core_type = #tpu.core_type<tc>, window_params = [{transform_indices = @transform_0, window_bounds = array<i64: 1, 64, 128>}, {transform_indices = @transform_1, window_bounds = array<i64: 1, 1, 128>}, {transform_indices = @transform_2, window_bounds = array<i64: 1, 1, 128>}, {transform_indices = @transform_3, window_bounds = array<i64: 1, 128>}, {transform_indices = @transform_4, window_bounds = array<i64: 1, 128>}, {transform_indices = @transform_5, window_bounds = array<i64: 1, 64, 128>}, {transform_indices = @transform_6, window_bounds = array<i64: 1, 64, 128>}]} {
    %c0 = arith.constant 0 : index
    %c0_0 = arith.constant 0 : index
    %c0_1 = arith.constant 0 : index
    %0 = vector.load %arg3[%c0, %c0_0, %c0_1] : memref<1x64x128xbf16, #tpu.memory_space<vmem>>, vector<1x64x128xbf16>
    %1 = vector.shape_cast %0 : vector<1x64x128xbf16> to vector<64x128xbf16>
    %2 = arith.extf %1 : vector<64x128xbf16> to vector<64x128xf32>
    %c0_2 = arith.constant 0 : index
    %c0_3 = arith.constant 0 : index
    %c0_4 = arith.constant 0 : index
    %3 = vector.load %arg4[%c0_2, %c0_3, %c0_4] : memref<1x1x128xf32, #tpu.memory_space<vmem>>, vector<1x1x128xf32>
    %4 = vector.shape_cast %3 : vector<1x1x128xf32> to vector<1x128xf32>
    %c0_5 = arith.constant 0 : index
    %c0_6 = arith.constant 0 : index
    %c0_7 = arith.constant 0 : index
    %5 = vector.load %arg5[%c0_5, %c0_6, %c0_7] : memref<1x1x128xf32, #tpu.memory_space<vmem>>, vector<1x1x128xf32>
    %6 = vector.shape_cast %5 : vector<1x1x128xf32> to vector<1x128xf32>
    %c0_8 = arith.constant 0 : index
    %c0_9 = arith.constant 0 : index
    %7 = vector.load %arg6[%c0_8, %c0_9] : memref<1x128xf32, #tpu.memory_space<vmem>>, vector<1x128xf32>
    %c0_10 = arith.constant 0 : index
    %c0_11 = arith.constant 0 : index
    %8 = vector.load %arg7[%c0_10, %c0_11] : memref<1x128xf32, #tpu.memory_space<vmem>>, vector<1x128xf32>
    %cst = arith.constant 1.562500e-02 : f32
    %9 = vector.broadcast %cst : f32 to vector<1x128xf32>
    %10 = arith.mulf %4, %9 : vector<1x128xf32>
    %cst_12 = arith.constant 1.562500e-02 : f32
    %11 = vector.broadcast %cst_12 : f32 to vector<1x128xf32>
    %12 = arith.mulf %6, %11 : vector<1x128xf32>
    %13 = arith.mulf %10, %10 : vector<1x128xf32>
    %14 = arith.subf %12, %13 : vector<1x128xf32>
    %cst_13 = arith.constant 0.000000e+00 : f32
    %15 = vector.broadcast %cst_13 : f32 to vector<1x128xf32>
    %16 = arith.maximumf %14, %15 : vector<1x128xf32>
    %cst_14 = arith.constant 9.99999974E-6 : f32
    %17 = vector.broadcast %cst_14 : f32 to vector<1x128xf32>
    %18 = arith.addf %16, %17 : vector<1x128xf32>
    %19 = math.rsqrt %18 : vector<1x128xf32>
    %20 = arith.mulf %7, %19 : vector<1x128xf32>
    %21 = arith.mulf %10, %20 : vector<1x128xf32>
    %22 = arith.subf %8, %21 : vector<1x128xf32>
    %23 = vector.broadcast %20 : vector<1x128xf32> to vector<64x128xf32>
    %24 = arith.mulf %2, %23 : vector<64x128xf32>
    %25 = vector.broadcast %22 : vector<1x128xf32> to vector<64x128xf32>
    %26 = arith.addf %24, %25 : vector<64x128xf32>
    %c0_15 = arith.constant 0 : index
    %c0_16 = arith.constant 0 : index
    %c0_17 = arith.constant 0 : index
    %27 = vector.load %arg8[%c0_15, %c0_16, %c0_17] : memref<1x64x128xbf16, #tpu.memory_space<vmem>>, vector<1x64x128xbf16>
    %28 = vector.shape_cast %27 : vector<1x64x128xbf16> to vector<64x128xbf16>
    %29 = arith.extf %28 : vector<64x128xbf16> to vector<64x128xf32>
    %30 = arith.addf %26, %29 : vector<64x128xf32>
    %31 = arith.truncf %30 : vector<64x128xf32> to vector<64x128xbf16>
    %c0_18 = arith.constant 0 : index
    %c0_19 = arith.constant 0 : index
    %c0_20 = arith.constant 0 : index
    %32 = vector.load %arg9[%c0_18, %c0_19, %c0_20] : memref<1x64x128xbf16, #tpu.memory_space<vmem>>, vector<1x64x128xbf16>
    %33 = vector.shape_cast %32 : vector<1x64x128xbf16> to vector<64x128xbf16>
    %34 = vector.shape_cast %31 : vector<64x128xbf16> to vector<1x64x128xbf16>
    tpu.vector_store %arg9[%c0_18, %c0_19, %c0_20], %34 {strides = array<i32>} : memref<1x64x128xbf16, #tpu.memory_space<vmem>>, vector<1x64x128xbf16>,
    return
  }
  func.func @transform_0(%arg0: i32, %arg1: i32, %arg2: i32) -> (i32, i32, i32) {
    %c0_i32 = arith.constant 0 : i32
    return %arg0, %arg2, %arg1 : i32, i32, i32
  }
  func.func @transform_1(%arg0: i32, %arg1: i32, %arg2: i32) -> (i32, i32, i32) {
    %c0_i32 = arith.constant 0 : i32
    %c0_i32_0 = arith.constant 0 : i32
    return %arg0, %c0_i32, %arg1 : i32, i32, i32
  }
  func.func @transform_2(%arg0: i32, %arg1: i32, %arg2: i32) -> (i32, i32, i32) {
    %c0_i32 = arith.constant 0 : i32
    %c0_i32_0 = arith.constant 0 : i32
    return %arg0, %c0_i32, %arg1 : i32, i32, i32
  }
  func.func @transform_3(%arg0: i32, %arg1: i32, %arg2: i32) -> (i32, i32) {
    %c0_i32 = arith.constant 0 : i32
    %c0_i32_0 = arith.constant 0 : i32
    return %c0_i32, %arg1 : i32, i32
  }
  func.func @transform_4(%arg0: i32, %arg1: i32, %arg2: i32) -> (i32, i32) {
    %c0_i32 = arith.constant 0 : i32
    %c0_i32_0 = arith.constant 0 : i32
    return %c0_i32, %arg1 : i32, i32
  }
  func.func @transform_5(%arg0: i32, %arg1: i32, %arg2: i32) -> (i32, i32, i32) {
    %c0_i32 = arith.constant 0 : i32
    return %arg0, %arg2, %arg1 : i32, i32, i32
  }
  func.func @transform_6(%arg0: i32, %arg1: i32, %arg2: i32) -> (i32, i32, i32) {
    %c0_i32 = arith.constant 0 : i32
    return %arg0, %arg2, %arg1 : i32, i32, i32
  }
}

module attributes {stable_mosaic.version = 11 : i64} {
  func.func @_gemm_bias_act_kernel(%arg0: i32, %arg1: memref<32x2048xbf16, #tpu.memory_space<vmem>>, %arg2: memref<2048x256xbf16, #tpu.memory_space<vmem>>, %arg3: memref<1x256xf32, #tpu.memory_space<vmem>>, %arg4: memref<32x256xbf16, #tpu.memory_space<vmem>>) attributes {dimension_semantics = [#tpu.dimension_semantics<parallel>], iteration_bounds = array<i64: 1>, scalar_prefetch = 0 : i64, scratch_operands = 0 : i64, tpu.core_type = #tpu.core_type<tc>, window_params = [{transform_indices = @transform_0, window_bounds = array<i64: 32, 2048>}, {pipeline_mode = #tpu.pipeline_mode<synchronous>, transform_indices = @transform_1, window_bounds = array<i64: 2048, 256>}, {pipeline_mode = #tpu.pipeline_mode<synchronous>, transform_indices = @transform_2, window_bounds = array<i64: 1, 256>}, {transform_indices = @transform_3, window_bounds = array<i64: 32, 256>}]} {
    %c0 = arith.constant 0 : index
    %c0_0 = arith.constant 0 : index
    %0 = vector.load %arg1[%c0, %c0_0] : memref<32x2048xbf16, #tpu.memory_space<vmem>>, vector<32x2048xbf16>
    %c0_1 = arith.constant 0 : index
    %c0_2 = arith.constant 0 : index
    %1 = vector.load %arg2[%c0_1, %c0_2] : memref<2048x256xbf16, #tpu.memory_space<vmem>>, vector<2048x256xbf16>
    %cst = arith.constant dense<0.000000e+00> : vector<32x256xf32>
    %2 = tpu.matmul %0, %1, %cst {dimension_numbers = #tpu.dot_dimension_numbers<[1], [0], [0], [1], [0, 0, 1, 1], [], []>} : vector<32x2048xbf16>, vector<2048x256xbf16>, vector<32x256xf32> -> vector<32x256xf32>
    %c0_3 = arith.constant 0 : index
    %c0_4 = arith.constant 0 : index
    %3 = vector.load %arg3[%c0_3, %c0_4] : memref<1x256xf32, #tpu.memory_space<vmem>>, vector<1x256xf32>
    %4 = vector.broadcast %3 : vector<1x256xf32> to vector<32x256xf32>
    %5 = arith.addf %2, %4 : vector<32x256xf32>
    %6 = arith.truncf %5 : vector<32x256xf32> to vector<32x256xbf16>
    %c0_5 = arith.constant 0 : index
    %c0_6 = arith.constant 0 : index
    %7 = vector.load %arg4[%c0_5, %c0_6] : memref<32x256xbf16, #tpu.memory_space<vmem>>, vector<32x256xbf16>
    tpu.vector_store %arg4[%c0_5, %c0_6], %6 {strides = array<i32>} : memref<32x256xbf16, #tpu.memory_space<vmem>>, vector<32x256xbf16>,
    return
  }
  func.func @transform_0(%arg0: i32) -> (i32, i32) {
    %c0_i32 = arith.constant 0 : i32
    %c0_i32_0 = arith.constant 0 : i32
    return %arg0, %c0_i32 : i32, i32
  }
  func.func @transform_1(%arg0: i32) -> (i32, i32) {
    %c0_i32 = arith.constant 0 : i32
    %c0_i32_0 = arith.constant 0 : i32
    %c0_i32_1 = arith.constant 0 : i32
    return %c0_i32, %c0_i32_0 : i32, i32
  }
  func.func @transform_2(%arg0: i32) -> (i32, i32) {
    %c0_i32 = arith.constant 0 : i32
    %c0_i32_0 = arith.constant 0 : i32
    %c0_i32_1 = arith.constant 0 : i32
    return %c0_i32, %c0_i32_0 : i32, i32
  }
  func.func @transform_3(%arg0: i32) -> (i32, i32) {
    %c0_i32 = arith.constant 0 : i32
    %c0_i32_0 = arith.constant 0 : i32
    return %arg0, %c0_i32 : i32, i32
  }
}

module attributes {stable_mosaic.version = 11 : i64} {
  func.func @_in_stats_kernel(%arg0: i32, %arg1: i32, %arg2: i32, %arg3: memref<1x16x128xbf16, #tpu.memory_space<vmem>>, %arg4: memref<1x1x128xf32, #tpu.memory_space<vmem>>, %arg5: memref<1x1x128xf32, #tpu.memory_space<vmem>>) attributes {dimension_semantics = [#tpu.dimension_semantics<parallel>, #tpu.dimension_semantics<parallel>, #tpu.dimension_semantics<arbitrary>], iteration_bounds = array<i64: 2, 2, 1>, scalar_prefetch = 0 : i64, scratch_operands = 0 : i64, tpu.core_type = #tpu.core_type<tc>, window_params = [{transform_indices = @transform_0, window_bounds = array<i64: 1, 16, 128>}, {transform_indices = @transform_1, window_bounds = array<i64: 1, 1, 128>}, {transform_indices = @transform_2, window_bounds = array<i64: 1, 1, 128>}]} {
    %c0_i32 = arith.constant 0 : i32
    %0 = arith.cmpi eq, %arg2, %c0_i32 : i32
    %1 = arith.extui %0 : i1 to i32
    %c0_i32_0 = arith.constant 0 : i32
    %2 = arith.cmpi ne, %1, %c0_i32_0 : i32
    scf.if %2 {
      %cst_16 = arith.constant 0.000000e+00 : f32
      %23 = vector.broadcast %cst_16 : f32 to vector<1x1x128xf32>
      %c0_17 = arith.constant 0 : index
      %c0_18 = arith.constant 0 : index
      %c0_19 = arith.constant 0 : index
      %24 = vector.load %arg4[%c0_17, %c0_18, %c0_19] : memref<1x1x128xf32, #tpu.memory_space<vmem>>, vector<1x1x128xf32>
      tpu.vector_store %arg4[%c0_17, %c0_18, %c0_19], %23 {strides = array<i32>} : memref<1x1x128xf32, #tpu.memory_space<vmem>>, vector<1x1x128xf32>,
      %cst_20 = arith.constant 0.000000e+00 : f32
      %25 = vector.broadcast %cst_20 : f32 to vector<1x1x128xf32>
      %c0_21 = arith.constant 0 : index
      %c0_22 = arith.constant 0 : index
      %c0_23 = arith.constant 0 : index
      %26 = vector.load %arg5[%c0_21, %c0_22, %c0_23] : memref<1x1x128xf32, #tpu.memory_space<vmem>>, vector<1x1x128xf32>
      tpu.vector_store %arg5[%c0_21, %c0_22, %c0_23], %25 {strides = array<i32>} : memref<1x1x128xf32, #tpu.memory_space<vmem>>, vector<1x1x128xf32>,
    } else {
    }
    %c0 = arith.constant 0 : index
    %c0_1 = arith.constant 0 : index
    %c0_2 = arith.constant 0 : index
    %3 = vector.load %arg3[%c0, %c0_1, %c0_2] : memref<1x16x128xbf16, #tpu.memory_space<vmem>>, vector<1x16x128xbf16>
    %4 = vector.shape_cast %3 : vector<1x16x128xbf16> to vector<16x128xbf16>
    %5 = arith.extf %4 : vector<16x128xbf16> to vector<16x128xf32>
    %c0_3 = arith.constant 0 : index
    %c0_4 = arith.constant 0 : index
    %c0_5 = arith.constant 0 : index
    %6 = vector.load %arg4[%c0_3, %c0_4, %c0_5] : memref<1x1x128xf32, #tpu.memory_space<vmem>>, vector<1x1x128xf32>
    %7 = vector.shape_cast %6 : vector<1x1x128xf32> to vector<1x128xf32>
    %cst = arith.constant dense<0.000000e+00> : vector<128xf32>
    %8 = vector.multi_reduction <add>, %5, %cst [0] : vector<16x128xf32> to vector<128xf32>
    %9 = vector.shape_cast %8 : vector<128xf32> to vector<1x128xf32>
    %10 = arith.addf %7, %9 : vector<1x128xf32>
    %c0_6 = arith.constant 0 : index
    %c0_7 = arith.constant 0 : index
    %c0_8 = arith.constant 0 : index
    %11 = vector.load %arg4[%c0_6, %c0_7, %c0_8] : memref<1x1x128xf32, #tpu.memory_space<vmem>>, vector<1x1x128xf32>
    %12 = vector.shape_cast %11 : vector<1x1x128xf32> to vector<1x128xf32>
    %13 = vector.shape_cast %10 : vector<1x128xf32> to vector<1x1x128xf32>
    tpu.vector_store %arg4[%c0_6, %c0_7, %c0_8], %13 {strides = array<i32>} : memref<1x1x128xf32, #tpu.memory_space<vmem>>, vector<1x1x128xf32>,
    %c0_9 = arith.constant 0 : index
    %c0_10 = arith.constant 0 : index
    %c0_11 = arith.constant 0 : index
    %14 = vector.load %arg5[%c0_9, %c0_10, %c0_11] : memref<1x1x128xf32, #tpu.memory_space<vmem>>, vector<1x1x128xf32>
    %15 = vector.shape_cast %14 : vector<1x1x128xf32> to vector<1x128xf32>
    %16 = arith.mulf %5, %5 : vector<16x128xf32>
    %cst_12 = arith.constant dense<0.000000e+00> : vector<128xf32>
    %17 = vector.multi_reduction <add>, %16, %cst_12 [0] : vector<16x128xf32> to vector<128xf32>
    %18 = vector.shape_cast %17 : vector<128xf32> to vector<1x128xf32>
    %19 = arith.addf %15, %18 : vector<1x128xf32>
    %c0_13 = arith.constant 0 : index
    %c0_14 = arith.constant 0 : index
    %c0_15 = arith.constant 0 : index
    %20 = vector.load %arg5[%c0_13, %c0_14, %c0_15] : memref<1x1x128xf32, #tpu.memory_space<vmem>>, vector<1x1x128xf32>
    %21 = vector.shape_cast %20 : vector<1x1x128xf32> to vector<1x128xf32>
    %22 = vector.shape_cast %19 : vector<1x128xf32> to vector<1x1x128xf32>
    tpu.vector_store %arg5[%c0_13, %c0_14, %c0_15], %22 {strides = array<i32>} : memref<1x1x128xf32, #tpu.memory_space<vmem>>, vector<1x1x128xf32>,
    return
  }
  func.func @transform_0(%arg0: i32, %arg1: i32, %arg2: i32) -> (i32, i32, i32) {
    %c0_i32 = arith.constant 0 : i32
    return %arg0, %arg2, %arg1 : i32, i32, i32
  }
  func.func @transform_1(%arg0: i32, %arg1: i32, %arg2: i32) -> (i32, i32, i32) {
    %c0_i32 = arith.constant 0 : i32
    %c0_i32_0 = arith.constant 0 : i32
    return %arg0, %c0_i32, %arg1 : i32, i32, i32
  }
  func.func @transform_2(%arg0: i32, %arg1: i32, %arg2: i32) -> (i32, i32, i32) {
    %c0_i32 = arith.constant 0 : i32
    %c0_i32_0 = arith.constant 0 : i32
    return %arg0, %c0_i32, %arg1 : i32, i32, i32
  }
}

module attributes {stable_mosaic.version = 11 : i64} {
  func.func @_in_apply_kernel(%arg0: i32, %arg1: i32, %arg2: i32, %arg3: memref<1x16x128xbf16, #tpu.memory_space<vmem>>, %arg4: memref<1x1x128xf32, #tpu.memory_space<vmem>>, %arg5: memref<1x1x128xf32, #tpu.memory_space<vmem>>, %arg6: memref<1x128xf32, #tpu.memory_space<vmem>>, %arg7: memref<1x128xf32, #tpu.memory_space<vmem>>, %arg8: memref<1x16x128xbf16, #tpu.memory_space<vmem>>) attributes {dimension_semantics = [#tpu.dimension_semantics<parallel>, #tpu.dimension_semantics<parallel>, #tpu.dimension_semantics<parallel>], iteration_bounds = array<i64: 2, 2, 1>, scalar_prefetch = 0 : i64, scratch_operands = 0 : i64, tpu.core_type = #tpu.core_type<tc>, window_params = [{transform_indices = @transform_0, window_bounds = array<i64: 1, 16, 128>}, {transform_indices = @transform_1, window_bounds = array<i64: 1, 1, 128>}, {transform_indices = @transform_2, window_bounds = array<i64: 1, 1, 128>}, {transform_indices = @transform_3, window_bounds = array<i64: 1, 128>}, {transform_indices = @transform_4, window_bounds = array<i64: 1, 128>}, {transform_indices = @transform_5, window_bounds = array<i64: 1, 16, 128>}]} {
    %c0 = arith.constant 0 : index
    %c0_0 = arith.constant 0 : index
    %c0_1 = arith.constant 0 : index
    %0 = vector.load %arg3[%c0, %c0_0, %c0_1] : memref<1x16x128xbf16, #tpu.memory_space<vmem>>, vector<1x16x128xbf16>
    %1 = vector.shape_cast %0 : vector<1x16x128xbf16> to vector<16x128xbf16>
    %2 = arith.extf %1 : vector<16x128xbf16> to vector<16x128xf32>
    %c0_2 = arith.constant 0 : index
    %c0_3 = arith.constant 0 : index
    %c0_4 = arith.constant 0 : index
    %3 = vector.load %arg4[%c0_2, %c0_3, %c0_4] : memref<1x1x128xf32, #tpu.memory_space<vmem>>, vector<1x1x128xf32>
    %4 = vector.shape_cast %3 : vector<1x1x128xf32> to vector<1x128xf32>
    %c0_5 = arith.constant 0 : index
    %c0_6 = arith.constant 0 : index
    %c0_7 = arith.constant 0 : index
    %5 = vector.load %arg5[%c0_5, %c0_6, %c0_7] : memref<1x1x128xf32, #tpu.memory_space<vmem>>, vector<1x1x128xf32>
    %6 = vector.shape_cast %5 : vector<1x1x128xf32> to vector<1x128xf32>
    %c0_8 = arith.constant 0 : index
    %c0_9 = arith.constant 0 : index
    %7 = vector.load %arg6[%c0_8, %c0_9] : memref<1x128xf32, #tpu.memory_space<vmem>>, vector<1x128xf32>
    %c0_10 = arith.constant 0 : index
    %c0_11 = arith.constant 0 : index
    %8 = vector.load %arg7[%c0_10, %c0_11] : memref<1x128xf32, #tpu.memory_space<vmem>>, vector<1x128xf32>
    %cst = arith.constant 6.250000e-02 : f32
    %9 = vector.broadcast %cst : f32 to vector<1x128xf32>
    %10 = arith.mulf %4, %9 : vector<1x128xf32>
    %cst_12 = arith.constant 6.250000e-02 : f32
    %11 = vector.broadcast %cst_12 : f32 to vector<1x128xf32>
    %12 = arith.mulf %6, %11 : vector<1x128xf32>
    %13 = arith.mulf %10, %10 : vector<1x128xf32>
    %14 = arith.subf %12, %13 : vector<1x128xf32>
    %cst_13 = arith.constant 0.000000e+00 : f32
    %15 = vector.broadcast %cst_13 : f32 to vector<1x128xf32>
    %16 = arith.maximumf %14, %15 : vector<1x128xf32>
    %cst_14 = arith.constant 9.99999974E-6 : f32
    %17 = vector.broadcast %cst_14 : f32 to vector<1x128xf32>
    %18 = arith.addf %16, %17 : vector<1x128xf32>
    %19 = math.rsqrt %18 : vector<1x128xf32>
    %20 = arith.mulf %7, %19 : vector<1x128xf32>
    %21 = arith.mulf %10, %20 : vector<1x128xf32>
    %22 = arith.subf %8, %21 : vector<1x128xf32>
    %23 = vector.broadcast %20 : vector<1x128xf32> to vector<16x128xf32>
    %24 = arith.mulf %2, %23 : vector<16x128xf32>
    %25 = vector.broadcast %22 : vector<1x128xf32> to vector<16x128xf32>
    %26 = arith.addf %24, %25 : vector<16x128xf32>
    %cst_15 = arith.constant 0.000000e+00 : f32
    %27 = vector.broadcast %cst_15 : f32 to vector<16x128xf32>
    %28 = arith.maximumf %26, %27 : vector<16x128xf32>
    %29 = arith.truncf %28 : vector<16x128xf32> to vector<16x128xbf16>
    %c0_16 = arith.constant 0 : index
    %c0_17 = arith.constant 0 : index
    %c0_18 = arith.constant 0 : index
    %30 = vector.load %arg8[%c0_16, %c0_17, %c0_18] : memref<1x16x128xbf16, #tpu.memory_space<vmem>>, vector<1x16x128xbf16>
    %31 = vector.shape_cast %30 : vector<1x16x128xbf16> to vector<16x128xbf16>
    %32 = vector.shape_cast %29 : vector<16x128xbf16> to vector<1x16x128xbf16>
    tpu.vector_store %arg8[%c0_16, %c0_17, %c0_18], %32 {strides = array<i32>} : memref<1x16x128xbf16, #tpu.memory_space<vmem>>, vector<1x16x128xbf16>,
    return
  }
  func.func @transform_0(%arg0: i32, %arg1: i32, %arg2: i32) -> (i32, i32, i32) {
    %c0_i32 = arith.constant 0 : i32
    return %arg0, %arg2, %arg1 : i32, i32, i32
  }
  func.func @transform_1(%arg0: i32, %arg1: i32, %arg2: i32) -> (i32, i32, i32) {
    %c0_i32 = arith.constant 0 : i32
    %c0_i32_0 = arith.constant 0 : i32
    return %arg0, %c0_i32, %arg1 : i32, i32, i32
  }
  func.func @transform_2(%arg0: i32, %arg1: i32, %arg2: i32) -> (i32, i32, i32) {
    %c0_i32 = arith.constant 0 : i32
    %c0_i32_0 = arith.constant 0 : i32
    return %arg0, %c0_i32, %arg1 : i32, i32, i32
  }
  func.func @transform_3(%arg0: i32, %arg1: i32, %arg2: i32) -> (i32, i32) {
    %c0_i32 = arith.constant 0 : i32
    %c0_i32_0 = arith.constant 0 : i32
    return %c0_i32, %arg1 : i32, i32
  }
  func.func @transform_4(%arg0: i32, %arg1: i32, %arg2: i32) -> (i32, i32) {
    %c0_i32 = arith.constant 0 : i32
    %c0_i32_0 = arith.constant 0 : i32
    return %c0_i32, %arg1 : i32, i32
  }
  func.func @transform_5(%arg0: i32, %arg1: i32, %arg2: i32) -> (i32, i32, i32) {
    %c0_i32 = arith.constant 0 : i32
    return %arg0, %arg2, %arg1 : i32, i32, i32
  }
}

module attributes {stable_mosaic.version = 11 : i64} {
  func.func @_gemm_bias_act_kernel(%arg0: i32, %arg1: memref<32x2304xbf16, #tpu.memory_space<vmem>>, %arg2: memref<2304x256xbf16, #tpu.memory_space<vmem>>, %arg3: memref<1x256xf32, #tpu.memory_space<vmem>>, %arg4: memref<32x256xbf16, #tpu.memory_space<vmem>>) attributes {dimension_semantics = [#tpu.dimension_semantics<parallel>], iteration_bounds = array<i64: 1>, scalar_prefetch = 0 : i64, scratch_operands = 0 : i64, tpu.core_type = #tpu.core_type<tc>, window_params = [{transform_indices = @transform_0, window_bounds = array<i64: 32, 2304>}, {pipeline_mode = #tpu.pipeline_mode<synchronous>, transform_indices = @transform_1, window_bounds = array<i64: 2304, 256>}, {pipeline_mode = #tpu.pipeline_mode<synchronous>, transform_indices = @transform_2, window_bounds = array<i64: 1, 256>}, {transform_indices = @transform_3, window_bounds = array<i64: 32, 256>}]} {
    %c0 = arith.constant 0 : index
    %c0_0 = arith.constant 0 : index
    %0 = vector.load %arg1[%c0, %c0_0] : memref<32x2304xbf16, #tpu.memory_space<vmem>>, vector<32x2304xbf16>
    %c0_1 = arith.constant 0 : index
    %c0_2 = arith.constant 0 : index
    %1 = vector.load %arg2[%c0_1, %c0_2] : memref<2304x256xbf16, #tpu.memory_space<vmem>>, vector<2304x256xbf16>
    %cst = arith.constant dense<0.000000e+00> : vector<32x256xf32>
    %2 = tpu.matmul %0, %1, %cst {dimension_numbers = #tpu.dot_dimension_numbers<[1], [0], [0], [1], [0, 0, 1, 1], [], []>} : vector<32x2304xbf16>, vector<2304x256xbf16>, vector<32x256xf32> -> vector<32x256xf32>
    %c0_3 = arith.constant 0 : index
    %c0_4 = arith.constant 0 : index
    %3 = vector.load %arg3[%c0_3, %c0_4] : memref<1x256xf32, #tpu.memory_space<vmem>>, vector<1x256xf32>
    %4 = vector.broadcast %3 : vector<1x256xf32> to vector<32x256xf32>
    %5 = arith.addf %2, %4 : vector<32x256xf32>
    %6 = arith.truncf %5 : vector<32x256xf32> to vector<32x256xbf16>
    %c0_5 = arith.constant 0 : index
    %c0_6 = arith.constant 0 : index
    %7 = vector.load %arg4[%c0_5, %c0_6] : memref<32x256xbf16, #tpu.memory_space<vmem>>, vector<32x256xbf16>
    tpu.vector_store %arg4[%c0_5, %c0_6], %6 {strides = array<i32>} : memref<32x256xbf16, #tpu.memory_space<vmem>>, vector<32x256xbf16>,
    return
  }
  func.func @transform_0(%arg0: i32) -> (i32, i32) {
    %c0_i32 = arith.constant 0 : i32
    %c0_i32_0 = arith.constant 0 : i32
    return %arg0, %c0_i32 : i32, i32
  }
  func.func @transform_1(%arg0: i32) -> (i32, i32) {
    %c0_i32 = arith.constant 0 : i32
    %c0_i32_0 = arith.constant 0 : i32
    %c0_i32_1 = arith.constant 0 : i32
    return %c0_i32, %c0_i32_0 : i32, i32
  }
  func.func @transform_2(%arg0: i32) -> (i32, i32) {
    %c0_i32 = arith.constant 0 : i32
    %c0_i32_0 = arith.constant 0 : i32
    %c0_i32_1 = arith.constant 0 : i32
    return %c0_i32, %c0_i32_0 : i32, i32
  }
  func.func @transform_3(%arg0: i32) -> (i32, i32) {
    %c0_i32 = arith.constant 0 : i32
    %c0_i32_0 = arith.constant 0 : i32
    return %arg0, %c0_i32 : i32, i32
  }
}

module attributes {stable_mosaic.version = 11 : i64} {
  func.func @_in_add_kernel(%arg0: i32, %arg1: i32, %arg2: i32, %arg3: memref<1x16x128xbf16, #tpu.memory_space<vmem>>, %arg4: memref<1x1x128xf32, #tpu.memory_space<vmem>>, %arg5: memref<1x1x128xf32, #tpu.memory_space<vmem>>, %arg6: memref<1x128xf32, #tpu.memory_space<vmem>>, %arg7: memref<1x128xf32, #tpu.memory_space<vmem>>, %arg8: memref<1x16x128xbf16, #tpu.memory_space<vmem>>, %arg9: memref<1x16x128xbf16, #tpu.memory_space<vmem>>) attributes {dimension_semantics = [#tpu.dimension_semantics<parallel>, #tpu.dimension_semantics<parallel>, #tpu.dimension_semantics<parallel>], iteration_bounds = array<i64: 2, 2, 1>, scalar_prefetch = 0 : i64, scratch_operands = 0 : i64, tpu.core_type = #tpu.core_type<tc>, window_params = [{transform_indices = @transform_0, window_bounds = array<i64: 1, 16, 128>}, {transform_indices = @transform_1, window_bounds = array<i64: 1, 1, 128>}, {transform_indices = @transform_2, window_bounds = array<i64: 1, 1, 128>}, {transform_indices = @transform_3, window_bounds = array<i64: 1, 128>}, {transform_indices = @transform_4, window_bounds = array<i64: 1, 128>}, {transform_indices = @transform_5, window_bounds = array<i64: 1, 16, 128>}, {transform_indices = @transform_6, window_bounds = array<i64: 1, 16, 128>}]} {
    %c0 = arith.constant 0 : index
    %c0_0 = arith.constant 0 : index
    %c0_1 = arith.constant 0 : index
    %0 = vector.load %arg3[%c0, %c0_0, %c0_1] : memref<1x16x128xbf16, #tpu.memory_space<vmem>>, vector<1x16x128xbf16>
    %1 = vector.shape_cast %0 : vector<1x16x128xbf16> to vector<16x128xbf16>
    %2 = arith.extf %1 : vector<16x128xbf16> to vector<16x128xf32>
    %c0_2 = arith.constant 0 : index
    %c0_3 = arith.constant 0 : index
    %c0_4 = arith.constant 0 : index
    %3 = vector.load %arg4[%c0_2, %c0_3, %c0_4] : memref<1x1x128xf32, #tpu.memory_space<vmem>>, vector<1x1x128xf32>
    %4 = vector.shape_cast %3 : vector<1x1x128xf32> to vector<1x128xf32>
    %c0_5 = arith.constant 0 : index
    %c0_6 = arith.constant 0 : index
    %c0_7 = arith.constant 0 : index
    %5 = vector.load %arg5[%c0_5, %c0_6, %c0_7] : memref<1x1x128xf32, #tpu.memory_space<vmem>>, vector<1x1x128xf32>
    %6 = vector.shape_cast %5 : vector<1x1x128xf32> to vector<1x128xf32>
    %c0_8 = arith.constant 0 : index
    %c0_9 = arith.constant 0 : index
    %7 = vector.load %arg6[%c0_8, %c0_9] : memref<1x128xf32, #tpu.memory_space<vmem>>, vector<1x128xf32>
    %c0_10 = arith.constant 0 : index
    %c0_11 = arith.constant 0 : index
    %8 = vector.load %arg7[%c0_10, %c0_11] : memref<1x128xf32, #tpu.memory_space<vmem>>, vector<1x128xf32>
    %cst = arith.constant 6.250000e-02 : f32
    %9 = vector.broadcast %cst : f32 to vector<1x128xf32>
    %10 = arith.mulf %4, %9 : vector<1x128xf32>
    %cst_12 = arith.constant 6.250000e-02 : f32
    %11 = vector.broadcast %cst_12 : f32 to vector<1x128xf32>
    %12 = arith.mulf %6, %11 : vector<1x128xf32>
    %13 = arith.mulf %10, %10 : vector<1x128xf32>
    %14 = arith.subf %12, %13 : vector<1x128xf32>
    %cst_13 = arith.constant 0.000000e+00 : f32
    %15 = vector.broadcast %cst_13 : f32 to vector<1x128xf32>
    %16 = arith.maximumf %14, %15 : vector<1x128xf32>
    %cst_14 = arith.constant 9.99999974E-6 : f32
    %17 = vector.broadcast %cst_14 : f32 to vector<1x128xf32>
    %18 = arith.addf %16, %17 : vector<1x128xf32>
    %19 = math.rsqrt %18 : vector<1x128xf32>
    %20 = arith.mulf %7, %19 : vector<1x128xf32>
    %21 = arith.mulf %10, %20 : vector<1x128xf32>
    %22 = arith.subf %8, %21 : vector<1x128xf32>
    %23 = vector.broadcast %20 : vector<1x128xf32> to vector<16x128xf32>
    %24 = arith.mulf %2, %23 : vector<16x128xf32>
    %25 = vector.broadcast %22 : vector<1x128xf32> to vector<16x128xf32>
    %26 = arith.addf %24, %25 : vector<16x128xf32>
    %c0_15 = arith.constant 0 : index
    %c0_16 = arith.constant 0 : index
    %c0_17 = arith.constant 0 : index
    %27 = vector.load %arg8[%c0_15, %c0_16, %c0_17] : memref<1x16x128xbf16, #tpu.memory_space<vmem>>, vector<1x16x128xbf16>
    %28 = vector.shape_cast %27 : vector<1x16x128xbf16> to vector<16x128xbf16>
    %29 = arith.extf %28 : vector<16x128xbf16> to vector<16x128xf32>
    %30 = arith.addf %26, %29 : vector<16x128xf32>
    %31 = arith.truncf %30 : vector<16x128xf32> to vector<16x128xbf16>
    %c0_18 = arith.constant 0 : index
    %c0_19 = arith.constant 0 : index
    %c0_20 = arith.constant 0 : index
    %32 = vector.load %arg9[%c0_18, %c0_19, %c0_20] : memref<1x16x128xbf16, #tpu.memory_space<vmem>>, vector<1x16x128xbf16>
    %33 = vector.shape_cast %32 : vector<1x16x128xbf16> to vector<16x128xbf16>
    %34 = vector.shape_cast %31 : vector<16x128xbf16> to vector<1x16x128xbf16>
    tpu.vector_store %arg9[%c0_18, %c0_19, %c0_20], %34 {strides = array<i32>} : memref<1x16x128xbf16, #tpu.memory_space<vmem>>, vector<1x16x128xbf16>,
    return
  }
  func.func @transform_0(%arg0: i32, %arg1: i32, %arg2: i32) -> (i32, i32, i32) {
    %c0_i32 = arith.constant 0 : i32
    return %arg0, %arg2, %arg1 : i32, i32, i32
  }
  func.func @transform_1(%arg0: i32, %arg1: i32, %arg2: i32) -> (i32, i32, i32) {
    %c0_i32 = arith.constant 0 : i32
    %c0_i32_0 = arith.constant 0 : i32
    return %arg0, %c0_i32, %arg1 : i32, i32, i32
  }
  func.func @transform_2(%arg0: i32, %arg1: i32, %arg2: i32) -> (i32, i32, i32) {
    %c0_i32 = arith.constant 0 : i32
    %c0_i32_0 = arith.constant 0 : i32
    return %arg0, %c0_i32, %arg1 : i32, i32, i32
  }
  func.func @transform_3(%arg0: i32, %arg1: i32, %arg2: i32) -> (i32, i32) {
    %c0_i32 = arith.constant 0 : i32
    %c0_i32_0 = arith.constant 0 : i32
    return %c0_i32, %arg1 : i32, i32
  }
  func.func @transform_4(%arg0: i32, %arg1: i32, %arg2: i32) -> (i32, i32) {
    %c0_i32 = arith.constant 0 : i32
    %c0_i32_0 = arith.constant 0 : i32
    return %c0_i32, %arg1 : i32, i32
  }
  func.func @transform_5(%arg0: i32, %arg1: i32, %arg2: i32) -> (i32, i32, i32) {
    %c0_i32 = arith.constant 0 : i32
    return %arg0, %arg2, %arg1 : i32, i32, i32
  }
  func.func @transform_6(%arg0: i32, %arg1: i32, %arg2: i32) -> (i32, i32, i32) {
    %c0_i32 = arith.constant 0 : i32
    return %arg0, %arg2, %arg1 : i32, i32, i32
  }
}

module attributes {stable_mosaic.version = 11 : i64} {
  func.func @_gemm_bias_act_kernel(%arg0: i32, %arg1: memref<32x1024xbf16, #tpu.memory_space<vmem>>, %arg2: memref<1024x128xbf16, #tpu.memory_space<vmem>>, %arg3: memref<1x128xf32, #tpu.memory_space<vmem>>, %arg4: memref<32x128xbf16, #tpu.memory_space<vmem>>) attributes {dimension_semantics = [#tpu.dimension_semantics<parallel>], iteration_bounds = array<i64: 1>, scalar_prefetch = 0 : i64, scratch_operands = 0 : i64, tpu.core_type = #tpu.core_type<tc>, window_params = [{transform_indices = @transform_0, window_bounds = array<i64: 32, 1024>}, {pipeline_mode = #tpu.pipeline_mode<synchronous>, transform_indices = @transform_1, window_bounds = array<i64: 1024, 128>}, {pipeline_mode = #tpu.pipeline_mode<synchronous>, transform_indices = @transform_2, window_bounds = array<i64: 1, 128>}, {transform_indices = @transform_3, window_bounds = array<i64: 32, 128>}]} {
    %c0 = arith.constant 0 : index
    %c0_0 = arith.constant 0 : index
    %0 = vector.load %arg1[%c0, %c0_0] : memref<32x1024xbf16, #tpu.memory_space<vmem>>, vector<32x1024xbf16>
    %c0_1 = arith.constant 0 : index
    %c0_2 = arith.constant 0 : index
    %1 = vector.load %arg2[%c0_1, %c0_2] : memref<1024x128xbf16, #tpu.memory_space<vmem>>, vector<1024x128xbf16>
    %cst = arith.constant dense<0.000000e+00> : vector<32x128xf32>
    %2 = tpu.matmul %0, %1, %cst {dimension_numbers = #tpu.dot_dimension_numbers<[1], [0], [0], [1], [0, 0, 1, 1], [], []>} : vector<32x1024xbf16>, vector<1024x128xbf16>, vector<32x128xf32> -> vector<32x128xf32>
    %c0_3 = arith.constant 0 : index
    %c0_4 = arith.constant 0 : index
    %3 = vector.load %arg3[%c0_3, %c0_4] : memref<1x128xf32, #tpu.memory_space<vmem>>, vector<1x128xf32>
    %4 = vector.broadcast %3 : vector<1x128xf32> to vector<32x128xf32>
    %5 = arith.addf %2, %4 : vector<32x128xf32>
    %6 = arith.truncf %5 : vector<32x128xf32> to vector<32x128xbf16>
    %c0_5 = arith.constant 0 : index
    %c0_6 = arith.constant 0 : index
    %7 = vector.load %arg4[%c0_5, %c0_6] : memref<32x128xbf16, #tpu.memory_space<vmem>>, vector<32x128xbf16>
    tpu.vector_store %arg4[%c0_5, %c0_6], %6 {strides = array<i32>} : memref<32x128xbf16, #tpu.memory_space<vmem>>, vector<32x128xbf16>,
    return
  }
  func.func @transform_0(%arg0: i32) -> (i32, i32) {
    %c0_i32 = arith.constant 0 : i32
    %c0_i32_0 = arith.constant 0 : i32
    return %arg0, %c0_i32 : i32, i32
  }
  func.func @transform_1(%arg0: i32) -> (i32, i32) {
    %c0_i32 = arith.constant 0 : i32
    %c0_i32_0 = arith.constant 0 : i32
    %c0_i32_1 = arith.constant 0 : i32
    return %c0_i32, %c0_i32_0 : i32, i32
  }
  func.func @transform_2(%arg0: i32) -> (i32, i32) {
    %c0_i32 = arith.constant 0 : i32
    %c0_i32_0 = arith.constant 0 : i32
    %c0_i32_1 = arith.constant 0 : i32
    return %c0_i32, %c0_i32_0 : i32, i32
  }
  func.func @transform_3(%arg0: i32) -> (i32, i32) {
    %c0_i32 = arith.constant 0 : i32
    %c0_i32_0 = arith.constant 0 : i32
    return %arg0, %c0_i32 : i32, i32
  }
}

module attributes {stable_mosaic.version = 11 : i64} {
  func.func @_gemm_bias_act_kernel(%arg0: i32, %arg1: memref<128x512xbf16, #tpu.memory_space<vmem>>, %arg2: memref<512x128xbf16, #tpu.memory_space<vmem>>, %arg3: memref<1x128xf32, #tpu.memory_space<vmem>>, %arg4: memref<128x128xbf16, #tpu.memory_space<vmem>>) attributes {dimension_semantics = [#tpu.dimension_semantics<parallel>], iteration_bounds = array<i64: 1>, scalar_prefetch = 0 : i64, scratch_operands = 0 : i64, tpu.core_type = #tpu.core_type<tc>, window_params = [{transform_indices = @transform_0, window_bounds = array<i64: 128, 512>}, {pipeline_mode = #tpu.pipeline_mode<synchronous>, transform_indices = @transform_1, window_bounds = array<i64: 512, 128>}, {pipeline_mode = #tpu.pipeline_mode<synchronous>, transform_indices = @transform_2, window_bounds = array<i64: 1, 128>}, {transform_indices = @transform_3, window_bounds = array<i64: 128, 128>}]} {
    %c0 = arith.constant 0 : index
    %c0_0 = arith.constant 0 : index
    %0 = vector.load %arg1[%c0, %c0_0] : memref<128x512xbf16, #tpu.memory_space<vmem>>, vector<128x512xbf16>
    %c0_1 = arith.constant 0 : index
    %c0_2 = arith.constant 0 : index
    %1 = vector.load %arg2[%c0_1, %c0_2] : memref<512x128xbf16, #tpu.memory_space<vmem>>, vector<512x128xbf16>
    %cst = arith.constant dense<0.000000e+00> : vector<128x128xf32>
    %2 = tpu.matmul %0, %1, %cst {dimension_numbers = #tpu.dot_dimension_numbers<[1], [0], [0], [1], [0, 0, 1, 1], [], []>} : vector<128x512xbf16>, vector<512x128xbf16>, vector<128x128xf32> -> vector<128x128xf32>
    %c0_3 = arith.constant 0 : index
    %c0_4 = arith.constant 0 : index
    %3 = vector.load %arg3[%c0_3, %c0_4] : memref<1x128xf32, #tpu.memory_space<vmem>>, vector<1x128xf32>
    %4 = vector.broadcast %3 : vector<1x128xf32> to vector<128x128xf32>
    %5 = arith.addf %2, %4 : vector<128x128xf32>
    %6 = arith.truncf %5 : vector<128x128xf32> to vector<128x128xbf16>
    %c0_5 = arith.constant 0 : index
    %c0_6 = arith.constant 0 : index
    %7 = vector.load %arg4[%c0_5, %c0_6] : memref<128x128xbf16, #tpu.memory_space<vmem>>, vector<128x128xbf16>
    tpu.vector_store %arg4[%c0_5, %c0_6], %6 {strides = array<i32>} : memref<128x128xbf16, #tpu.memory_space<vmem>>, vector<128x128xbf16>,
    return
  }
  func.func @transform_0(%arg0: i32) -> (i32, i32) {
    %c0_i32 = arith.constant 0 : i32
    %c0_i32_0 = arith.constant 0 : i32
    return %arg0, %c0_i32 : i32, i32
  }
  func.func @transform_1(%arg0: i32) -> (i32, i32) {
    %c0_i32 = arith.constant 0 : i32
    %c0_i32_0 = arith.constant 0 : i32
    %c0_i32_1 = arith.constant 0 : i32
    return %c0_i32, %c0_i32_0 : i32, i32
  }
  func.func @transform_2(%arg0: i32) -> (i32, i32) {
    %c0_i32 = arith.constant 0 : i32
    %c0_i32_0 = arith.constant 0 : i32
    %c0_i32_1 = arith.constant 0 : i32
    return %c0_i32, %c0_i32_0 : i32, i32
  }
  func.func @transform_3(%arg0: i32) -> (i32, i32) {
    %c0_i32 = arith.constant 0 : i32
    %c0_i32_0 = arith.constant 0 : i32
    return %arg0, %c0_i32 : i32, i32
  }
}

module attributes {stable_mosaic.version = 11 : i64} {
  func.func @_gemm_bias_act_kernel(%arg0: i32, %arg1: memref<256x256xbf16, #tpu.memory_space<vmem>>, %arg2: memref<256x128xbf16, #tpu.memory_space<vmem>>, %arg3: memref<1x128xf32, #tpu.memory_space<vmem>>, %arg4: memref<256x128xf32, #tpu.memory_space<vmem>>) attributes {dimension_semantics = [#tpu.dimension_semantics<parallel>], iteration_bounds = array<i64: 2>, scalar_prefetch = 0 : i64, scratch_operands = 0 : i64, tpu.core_type = #tpu.core_type<tc>, window_params = [{transform_indices = @transform_0, window_bounds = array<i64: 256, 256>}, {pipeline_mode = #tpu.pipeline_mode<synchronous>, transform_indices = @transform_1, window_bounds = array<i64: 256, 128>}, {pipeline_mode = #tpu.pipeline_mode<synchronous>, transform_indices = @transform_2, window_bounds = array<i64: 1, 128>}, {transform_indices = @transform_3, window_bounds = array<i64: 256, 128>}]} {
    %c0 = arith.constant 0 : index
    %c0_0 = arith.constant 0 : index
    %0 = vector.load %arg1[%c0, %c0_0] : memref<256x256xbf16, #tpu.memory_space<vmem>>, vector<256x256xbf16>
    %c0_1 = arith.constant 0 : index
    %c0_2 = arith.constant 0 : index
    %1 = vector.load %arg2[%c0_1, %c0_2] : memref<256x128xbf16, #tpu.memory_space<vmem>>, vector<256x128xbf16>
    %cst = arith.constant dense<0.000000e+00> : vector<256x128xf32>
    %2 = tpu.matmul %0, %1, %cst {dimension_numbers = #tpu.dot_dimension_numbers<[1], [0], [0], [1], [0, 0, 1, 1], [], []>} : vector<256x256xbf16>, vector<256x128xbf16>, vector<256x128xf32> -> vector<256x128xf32>
    %c0_3 = arith.constant 0 : index
    %c0_4 = arith.constant 0 : index
    %3 = vector.load %arg3[%c0_3, %c0_4] : memref<1x128xf32, #tpu.memory_space<vmem>>, vector<1x128xf32>
    %4 = vector.broadcast %3 : vector<1x128xf32> to vector<256x128xf32>
    %5 = arith.addf %2, %4 : vector<256x128xf32>
    %6 = math.tanh %5 : vector<256x128xf32>
    %c0_5 = arith.constant 0 : index
    %c0_6 = arith.constant 0 : index
    %7 = vector.load %arg4[%c0_5, %c0_6] : memref<256x128xf32, #tpu.memory_space<vmem>>, vector<256x128xf32>
    tpu.vector_store %arg4[%c0_5, %c0_6], %6 {strides = array<i32>} : memref<256x128xf32, #tpu.memory_space<vmem>>, vector<256x128xf32>,
    return
  }
  func.func @transform_0(%arg0: i32) -> (i32, i32) {
    %c0_i32 = arith.constant 0 : i32
    %c0_i32_0 = arith.constant 0 : i32
    return %arg0, %c0_i32 : i32, i32
  }
  func.func @transform_1(%arg0: i32) -> (i32, i32) {
    %c0_i32 = arith.constant 0 : i32
    %c0_i32_0 = arith.constant 0 : i32
    %c0_i32_1 = arith.constant 0 : i32
    return %c0_i32, %c0_i32_0 : i32, i32
  }
  func.func @transform_2(%arg0: i32) -> (i32, i32) {
    %c0_i32 = arith.constant 0 : i32
    %c0_i32_0 = arith.constant 0 : i32
    %c0_i32_1 = arith.constant 0 : i32
    return %c0_i32, %c0_i32_0 : i32, i32
  }
  func.func @transform_3(%arg0: i32) -> (i32, i32) {
    %c0_i32 = arith.constant 0 : i32
    %c0_i32_0 = arith.constant 0 : i32
    return %arg0, %c0_i32 : i32, i32
  }
}

</mosaic_0001>

<bundles_post_ra>
// kernel: generator_nchw.59
= control target key start
LH: loop header
LB: loop body
LE: loop exit
PB: predicated region body
PF: predicated region fallthrough
CT: control target
= control target key end

     0   :  { %s1100_s12 = smov 0   ;;  %s1222_s0 = inlined_call_operand.vmem [shape: bf16[512,48], index: 0, kind: input, shape index: {}]   ;;  %s1223_s1 = inlined_call_operand.vmem [shape: bf16[48,128], index: 1, kind: input, shape index: {}]   ;;  %s1224_s2 = inlined_call_operand.vmem [shape: f32[1,128], index: 2, kind: input, shape index: {}]   ;;  %s1225_s3 = inlined_call_operand.vmem [shape: bf16[512,128], index: 3, kind: output, shape index: {}]  }
   0x1 LB: > { %s776_s13 = sadd.s32 4294967295, %s1078_s12   ;;  %p780_p0 = scmp.ge.s32.totalorder %s1078_s12, 1  ;;  %s1078_s12 = sphi %s1100_s12, %s13_s12  }
   0x2   : > { %p138_p1 = scmp.lt.s32.totalorder %s1078_s12, 3 }
   0x4   : > { %p139_p2 = pnand %p780_p0, %p138_p1 }
   0x5   : > { %v1053_v0 = vld [vmem:[%s1223_s1] sm:$0xff] (!%p139_p2)   ;;  %s781_s16 = sshll.u32 (!%p139_p2), %s776_s13, 5  ;;  %v1054_v1 = vld [vmem:[%s1223_s1 + $0x8] sm:$0xff] (!%p139_p2)   ;;  %v1055_v2 = vld [vmem:[%s1223_s1 + $0x10] sm:$0xff] (!%p139_p2)   ;;  %vm318_vm0 = vcmask (!%p139_p2), 392192  }
   0x6   : > { %142 = sbr.rel (%p139_p2) target bundleno = 265 (0x109), region = 32  ;;  %p163_p3 = scmp.lt.s32.totalorder (!%p139_p2), %s781_s16, 63  ;;  %1001 = vmatprep.subr.bf16.mxu0 (!%p139_p2), %v1053_v0  ;;  %1039 = vmatprep.subr.bf16.mxu1 (!%p139_p2), %v1053_v0  ;;  %v1162_v19 = vld [vmem:[%s1224_s2] ss:$0 sm:$0xff] (!%p139_p2) }
   0x7   : > { %1002 = vmatpush3.bf16.msra.mxu0 (!%p139_p2), %v1053_v0  ;;  %1042 = vmatpush3.bf16.msra.mxu1 (!%p139_p2), %v1053_v0 }
   0x8   : > { %1003 = vmatprep.subr.bf16.mxu0 (!%p139_p2), %v1054_v1  ;;  %1040 = vmatprep.subr.bf16.mxu1 (!%p139_p2), %v1054_v1 }
   0xb   : > { %1004 = vmatpush3.bf16.msra.mxu0 (!%p139_p2), %v1054_v1  ;;  %1043 = vmatpush3.bf16.msra.mxu1 (!%p139_p2), %v1054_v1 }
   0xc   : > { %1005 = vmatprep.subr.bf16.mxu0 (!%p139_p2), %v1055_v2  ;;  %1041 = vmatprep.subr.bf16.mxu1 (!%p139_p2), %v1055_v2 }
   0xd   : > { %s1227_s16 = smov (!%p163_p3, %s781_s16), 63 }
   0xe   : > { %s782_s21 = sshll.u32 %s1227_s16, 2 }
   0xf   : > { %s1125_s24 = scalar_lea.vmem %s1222_s0, %s782_s21  ;;  %1006 = vmatpush3.bf16.msra.mxu0 %v1055_v2  ;;  %1044 = vmatpush3.bf16.msra.mxu1 %v1055_v2  ;;  %s1177_s29 = scalar_lea.vmem %s1225_s3, %s782_s21 }
  0x10   : > { %v1056_v3 = vld [vmem:[%s1125_s24] sm:$0xff]   ;;  %v1058_v5 = vld [vmem:[%s1125_s24 + $0x8] sm:$0xff]   ;;  %v1060_v7 = vld [vmem:[%s1125_s24 + $0x10] sm:$0xff]  }
  0x11   : > { %v1057_v4 = vld [vmem:[%s1125_s24 + $0x40] sm:$0xff]   ;;  %1007 = vmatprep.mubr.msk.bf16.mxu0 %vm318_vm0, %v1056_v3  ;;  %v1059_v6 = vld [vmem:[%s1125_s24 + $0x48] sm:$0xff]   ;;  %v1061_v8 = vld [vmem:[%s1125_s24 + $0x50] sm:$0xff]  }
  0x12   : > { %1023 = vmatprep.mubr.msk.bf16.mxu1 %vm318_vm0, %v1057_v4  ;;  %1008 = vmatmul.mubr.msk.bf16.vlgmr.msra.gmra.mrb[0].mxu0 %vm318_vm0, %v1058_v5  ;;  %v1062_v9 = vld [vmem:[%s1125_s24 + $0x18] sm:$0xff]   ;;  %v1064_v11 = vld [vmem:[%s1125_s24 + $0x20] sm:$0xff]   ;;  %v1066_v13 = vld [vmem:[%s1125_s24 + $0x28] sm:$0xff]  }
  0x13   : > { %1024 = vmatmul.mubr.msk.bf16.vlgmr.msra.gmra.mrb[0].mxu1 %vm318_vm0, %v1059_v6  ;;  %1011 = vmatprep.mubr.msk.bf16.mxu0 %vm318_vm0, %v1060_v7  ;;  %v1063_v10 = vld [vmem:[%s1125_s24 + $0x58] sm:$0xff]   ;;  %v1065_v12 = vld [vmem:[%s1125_s24 + $0x60] sm:$0xff]   ;;  %v1067_v14 = vld [vmem:[%s1125_s24 + $0x68] sm:$0xff]  }
  0x14   : > { %1027 = vmatprep.mubr.msk.bf16.mxu1 %vm318_vm0, %v1061_v8  ;;  %v1068_v15 = vld [vmem:[%s1125_s24 + $0x30] sm:$0xff]   ;;  %v1070_v17 = vld [vmem:[%s1125_s24 + $0x38] sm:$0xff]  }
  0x15   : > { %v1069_v16 = vld [vmem:[%s1125_s24 + $0x70] sm:$0xff]   ;;  %v1071_v18 = vld [vmem:[%s1125_s24 + $0x78] sm:$0xff]  }
  0x1a   : > { %1012 = vmatmul.mubr.msk.bf16.gmra.mrb[4].mxu0 %vm318_vm0, %v1062_v9 }
  0x1b   : > { %1028 = vmatmul.mubr.msk.bf16.gmra.mrb[4].mxu1 %vm318_vm0, %v1063_v10  ;;  %1015 = vmatprep.mubr.msk.bf16.mxu0 %vm318_vm0, %v1064_v11 }
  0x1c   : > { %1031 = vmatprep.mubr.msk.bf16.mxu1 %vm318_vm0, %v1065_v12 }
  0x22   : > { %1016 = vmatmul.mubr.msk.bf16.gmra.mrb[8].mxu0 %vm318_vm0, %v1066_v13 }
  0x23   : > { %1032 = vmatmul.mubr.msk.bf16.gmra.mrb[8].mxu1 %vm318_vm0, %v1067_v14  ;;  %1019 = vmatprep.mubr.msk.bf16.mxu0 %vm318_vm0, %v1068_v15 }
  0x24   : > { %1035 = vmatprep.mubr.msk.bf16.mxu1 %vm318_vm0, %v1069_v16 }
  0x2a   : > { %1020 = vmatmul.mubr.msk.bf16.gmra.mrb[12].mxu0 %vm318_vm0, %v1070_v17 }
  0x2b   : > { %1036 = vmatmul.mubr.msk.bf16.gmra.mrb[12].mxu1 %vm318_vm0, %v1071_v18 }
  0xe5   : > { %v1009_v20 = vpop.f32.mrb[0].mxu0 }
  0xe6   : > { %v1025_v21 = vpop.f32.mrb[0].mxu1  ;;  %v410_v22 = vadd.f32 %v1009_v20, %v1162_v19  ;;  %v401_v24 = vpop.f32.mrb[1].mxu0 }
  0xe7   : > { %v474_v23 = vadd.f32 %v1025_v21, %v1162_v19  ;;  %v465_v25 = vpop.f32.mrb[1].mxu1  ;;  %v402_v26 = vadd.f32 %v1162_v19, %v401_v24  ;;  %v1010_v28 = vpop.f32.mrb[2].mxu0 }
  0xe8   : > { %v466_v27 = vadd.f32 %v1162_v19, %v465_v25  ;;  %v1026_v29 = vpop.f32.mrb[2].mxu1  ;;  %v413_v30 = vadd.f32 %v1010_v28, %v1162_v19  ;;  %v404_v32 = vpop.f32.mrb[3].mxu0  ;;  %v530_v36 = vmax.f32 %v410_v22, 0.0 }
  0xe9   : > { %v477_v31 = vadd.f32 %v1026_v29, %v1162_v19  ;;  %v468_v33 = vpop.f32.mrb[3].mxu1  ;;  %v405_v34 = vadd.f32 %v1162_v19, %v404_v32  ;;  %v546_v37 = vmax.f32 %v474_v23, 0.0  ;;  %v528_v40 = vmax.f32 %v402_v26, 0.0 }
  0xea   : > { %v469_v35 = vadd.f32 %v1162_v19, %v468_v33  ;;  %v531_v38 = vmax.f32 %v413_v30, 0.0  ;;  %v544_v41 = vmax.f32 %v466_v27, 0.0 }
  0xeb   : > { %v547_v39 = vmax.f32 %v477_v31, 0.0  ;;  %v529_v42 = vmax.f32 %v405_v34, 0.0 }
  0xec   : > { %v545_v43 = vmax.f32 %v469_v35, 0.0  ;;  %v895_v44 = vpack.c.bf16 %v531_v38, %v530_v36 }
  0xed   : > { %v935_v45 = vpack.c.bf16 %v547_v39, %v546_v37  ;;  %v890_v46 = vpack.c.bf16 %v529_v42, %v528_v40  ;;  %v1013_v48 = vpop.f32.mrb[4].mxu0 }
  0xee   : > { %v930_v47 = vpack.c.bf16 %v545_v43, %v544_v41  ;;  %v1029_v49 = vpop.f32.mrb[4].mxu1  ;;  %967 = vst [vmem:[%s1177_s29 + $0x8] sm:$0xff] %v895_v44   ;;  %v426_v50 = vadd.f32 %v1013_v48, %v1162_v19  ;;  %v417_v52 = vpop.f32.mrb[5].mxu0 }
  0xef   : > { %975 = vst [vmem:[%s1177_s29 + $0x48] sm:$0xff] %v935_v45   ;;  %v490_v51 = vadd.f32 %v1029_v49, %v1162_v19  ;;  %v481_v53 = vpop.f32.mrb[5].mxu1  ;;  %891 = vst [vmem:[%s1177_s29] sm:$0xff] %v890_v46   ;;  %v418_v54 = vadd.f32 %v1162_v19, %v417_v52  ;;  %v1014_v56 = vpop.f32.mrb[6].mxu0 }
  0xf0   : > { %974 = vst [vmem:[%s1177_s29 + $0x40] sm:$0xff] %v930_v47   ;;  %v482_v55 = vadd.f32 %v1162_v19, %v481_v53  ;;  %v1030_v57 = vpop.f32.mrb[6].mxu1  ;;  %v429_v58 = vadd.f32 %v1014_v56, %v1162_v19  ;;  %v420_v60 = vpop.f32.mrb[7].mxu0  ;;  %v534_v0 = vmax.f32 %v426_v50, 0.0 }
  0xf1   : > { %v493_v59 = vadd.f32 %v1030_v57, %v1162_v19  ;;  %v484_v61 = vpop.f32.mrb[7].mxu1  ;;  %v421_v62 = vadd.f32 %v1162_v19, %v420_v60  ;;  %v550_v1 = vmax.f32 %v490_v51, 0.0  ;;  %v532_v4 = vmax.f32 %v418_v54, 0.0 }
  0xf2   : > { %v485_v63 = vadd.f32 %v1162_v19, %v484_v61  ;;  %v535_v2 = vmax.f32 %v429_v58, 0.0  ;;  %v548_v5 = vmax.f32 %v482_v55, 0.0 }
  0xf3   : > { %v551_v3 = vmax.f32 %v493_v59, 0.0  ;;  %v533_v6 = vmax.f32 %v421_v62, 0.0 }
  0xf4   : > { %v549_v7 = vmax.f32 %v485_v63, 0.0  ;;  %v905_v8 = vpack.c.bf16 %v535_v2, %v534_v0 }
  0xf5   : > { %v945_v9 = vpack.c.bf16 %v551_v3, %v550_v1  ;;  %v900_v10 = vpack.c.bf16 %v533_v6, %v532_v4  ;;  %v1017_v12 = vpop.f32.mrb[8].mxu0 }
  0xf6   : > { %v940_v11 = vpack.c.bf16 %v549_v7, %v548_v5  ;;  %v1033_v13 = vpop.f32.mrb[8].mxu1  ;;  %969 = vst [vmem:[%s1177_s29 + $0x18] sm:$0xff] %v905_v8   ;;  %v442_v14 = vadd.f32 %v1017_v12, %v1162_v19  ;;  %v433_v16 = vpop.f32.mrb[9].mxu0 }
  0xf7   : > { %977 = vst [vmem:[%s1177_s29 + $0x58] sm:$0xff] %v945_v9   ;;  %v506_v15 = vadd.f32 %v1033_v13, %v1162_v19  ;;  %v497_v17 = vpop.f32.mrb[9].mxu1  ;;  %968 = vst [vmem:[%s1177_s29 + $0x10] sm:$0xff] %v900_v10   ;;  %v434_v18 = vadd.f32 %v1162_v19, %v433_v16  ;;  %v1018_v21 = vpop.f32.mrb[10].mxu0 }
  0xf8   : > { %976 = vst [vmem:[%s1177_s29 + $0x50] sm:$0xff] %v940_v11   ;;  %v498_v20 = vadd.f32 %v1162_v19, %v497_v17  ;;  %v1034_v22 = vpop.f32.mrb[10].mxu1  ;;  %v445_v23 = vadd.f32 %v1018_v21, %v1162_v19  ;;  %v436_v25 = vpop.f32.mrb[11].mxu0  ;;  %v538_v29 = vmax.f32 %v442_v14, 0.0 }
  0xf9   : > { %v509_v24 = vadd.f32 %v1034_v22, %v1162_v19  ;;  %v500_v26 = vpop.f32.mrb[11].mxu1  ;;  %v437_v27 = vadd.f32 %v1162_v19, %v436_v25  ;;  %v554_v30 = vmax.f32 %v506_v15, 0.0  ;;  %v536_v33 = vmax.f32 %v434_v18, 0.0 }
  0xfa   : > { %v501_v28 = vadd.f32 %v1162_v19, %v500_v26  ;;  %v539_v31 = vmax.f32 %v445_v23, 0.0  ;;  %v552_v34 = vmax.f32 %v498_v20, 0.0 }
  0xfb   : > { %v555_v32 = vmax.f32 %v509_v24, 0.0  ;;  %v537_v35 = vmax.f32 %v437_v27, 0.0 }
  0xfc   : > { %v553_v36 = vmax.f32 %v501_v28, 0.0  ;;  %v915_v37 = vpack.c.bf16 %v539_v31, %v538_v29 }
  0xfd   : > { %v955_v38 = vpack.c.bf16 %v555_v32, %v554_v30  ;;  %v910_v39 = vpack.c.bf16 %v537_v35, %v536_v33  ;;  %v1021_v41 = vpop.f32.mrb[12].mxu0 }
  0xfe   : > { %v950_v40 = vpack.c.bf16 %v553_v36, %v552_v34  ;;  %v1037_v42 = vpop.f32.mrb[12].mxu1  ;;  %971 = vst [vmem:[%s1177_s29 + $0x28] sm:$0xff] %v915_v37   ;;  %v458_v43 = vadd.f32 %v1021_v41, %v1162_v19  ;;  %v449_v45 = vpop.f32.mrb[13].mxu0 }
  0xff   : > { %979 = vst [vmem:[%s1177_s29 + $0x68] sm:$0xff] %v955_v38   ;;  %v522_v44 = vadd.f32 %v1037_v42, %v1162_v19  ;;  %v513_v46 = vpop.f32.mrb[13].mxu1  ;;  %970 = vst [vmem:[%s1177_s29 + $0x20] sm:$0xff] %v910_v39   ;;  %v450_v47 = vadd.f32 %v1162_v19, %v449_v45  ;;  %v1022_v49 = vpop.f32.mrb[14].mxu0 }
 0x100   : > { %978 = vst [vmem:[%s1177_s29 + $0x60] sm:$0xff] %v950_v40   ;;  %v514_v48 = vadd.f32 %v1162_v19, %v513_v46  ;;  %v1038_v50 = vpop.f32.mrb[14].mxu1  ;;  %v461_v51 = vadd.f32 %v1022_v49, %v1162_v19  ;;  %v452_v53 = vpop.f32.mrb[15].mxu0  ;;  %v542_v57 = vmax.f32 %v458_v43, 0.0 }
 0x101   : > { %v525_v52 = vadd.f32 %v1038_v50, %v1162_v19  ;;  %v516_v54 = vpop.f32.mrb[15].mxu1  ;;  %v453_v55 = vadd.f32 %v1162_v19, %v452_v53  ;;  %v558_v58 = vmax.f32 %v522_v44, 0.0  ;;  %v540_v61 = vmax.f32 %v450_v47, 0.0 }
 0x102   : > { %v517_v56 = vadd.f32 %v1162_v19, %v516_v54  ;;  %v543_v59 = vmax.f32 %v461_v51, 0.0  ;;  %v556_v62 = vmax.f32 %v514_v48, 0.0 }
 0x103   : > { %v559_v60 = vmax.f32 %v525_v52, 0.0  ;;  %v541_v63 = vmax.f32 %v453_v55, 0.0 }
 0x104   : > { %v557_v0 = vmax.f32 %v517_v56, 0.0  ;;  %v925_v1 = vpack.c.bf16 %v543_v59, %v542_v57 }
 0x105   : > { %v965_v2 = vpack.c.bf16 %v559_v60, %v558_v58  ;;  %v920_v3 = vpack.c.bf16 %v541_v63, %v540_v61 }
 0x106   : > { %v960_v4 = vpack.c.bf16 %v557_v0, %v556_v62  ;;  %973 = vst [vmem:[%s1177_s29 + $0x38] sm:$0xff] %v925_v1  }
 0x107   : > { %981 = vst [vmem:[%s1177_s29 + $0x78] sm:$0xff] %v965_v2   ;;  %972 = vst [vmem:[%s1177_s29 + $0x30] sm:$0xff] %v920_v3  }
 0x108   : > { %980 = vst [vmem:[%s1177_s29 + $0x70] sm:$0xff] %v960_v4  }
 0x109 PF: > { %s13_s12 = sadd.s32 1, %s1078_s12  }
 0x10a   : > { %p10_p4 = scmp.ge.s32.totalorder %s13_s12, 4  }
 0x10c   :  { %12 = sbr.rel (!%p10_p4) target bundleno = 1 (0x1), region = 62 }

// kernel: generator_nchw.60
= control target key start
LH: loop header
LB: loop body
LE: loop exit
PB: predicated region body
PF: predicated region fallthrough
CT: control target
= control target key end

     0   :  { %s2505_s12 = smov 0   ;;  %s2889_s0 = inlined_call_operand.vmem [shape: bf16[512,576], index: 0, kind: input, shape index: {}]   ;;  %s2890_s1 = inlined_call_operand.vmem [shape: bf16[576,128], index: 1, kind: input, shape index: {}]   ;;  %s2891_s2 = inlined_call_operand.vmem [shape: f32[1,128], index: 2, kind: input, shape index: {}]   ;;  %s2892_s3 = inlined_call_operand.vmem [shape: bf16[512,128], index: 3, kind: output, shape index: {}]  }
   0x1 LB: > { %s1717_s13 = sadd.s32 4294967295, %s2483_s12   ;;  %p1721_p0 = scmp.ge.s32.totalorder %s2483_s12, 1  ;;  %s2483_s12 = sphi %s2505_s12, %s13_s12  }
   0x2   : > { %p139_p1 = scmp.lt.s32.totalorder %s2483_s12, 3 }
   0x4   : > { %p140_p2 = pnand %p1721_p0, %p139_p1 }
   0x5   : > { %v2329_v0 = vld [vmem:[%s2890_s1 + $0x40] sm:$0xff] (!%p140_p2)   ;;  %s1722_s16 = sshll.u32 (!%p140_p2), %s1717_s13, 5  ;;  %v2331_v2 = vld [vmem:[%s2890_s1 + $0x48] sm:$0xff] (!%p140_p2)   ;;  %v2333_v4 = vld [vmem:[%s2890_s1 + $0x50] sm:$0xff] (!%p140_p2)   ;;  %vm969_vm0 = vcmask (!%p140_p2), 523264  }
   0x6   : > { %143 = sbr.rel (%p140_p2) target bundleno = 414 (0x19e), region = 32  ;;  %v2330_v1 = vld [vmem:[%s2890_s1] sm:$0xff] (!%p140_p2)   ;;  %2020 = vmatprep.subr.bf16.mxu0 (!%p140_p2), %v2329_v0  ;;  %2304 = vmatprep.subr.bf16.mxu1 (!%p140_p2), %v2329_v0  ;;  %p165_p3 = scmp.lt.s32.totalorder (!%p140_p2), %s1722_s16, 63  ;;  %v2332_v3 = vld [vmem:[%s2890_s1 + $0x8] sm:$0xff] (!%p140_p2)   ;;  %v2334_v5 = vld [vmem:[%s2890_s1 + $0x10] sm:$0xff] (!%p140_p2)  }
   0x7   : > { %2021 = vmatpush3.bf16.msra.mxu0 (!%p140_p2), %v2330_v1  ;;  %2312 = vmatpush3.bf16.msra.mxu1 (!%p140_p2), %v2330_v1  ;;  %v2335_v6 = vld [vmem:[%s2890_s1 + $0x58] sm:$0xff] (!%p140_p2)   ;;  %v2337_v8 = vld [vmem:[%s2890_s1 + $0x60] sm:$0xff] (!%p140_p2)   ;;  %v2339_v10 = vld [vmem:[%s2890_s1 + $0x68] sm:$0xff] (!%p140_p2)  }
   0x8   : > { %2022 = vmatprep.subr.bf16.mxu0 (!%p140_p2), %v2331_v2  ;;  %2305 = vmatprep.subr.bf16.mxu1 (!%p140_p2), %v2331_v2  ;;  %v2336_v7 = vld [vmem:[%s2890_s1 + $0x18] sm:$0xff] (!%p140_p2)   ;;  %v2338_v9 = vld [vmem:[%s2890_s1 + $0x20] sm:$0xff] (!%p140_p2)   ;;  %v2340_v13 = vld [vmem:[%s2890_s1 + $0x28] sm:$0xff] (!%p140_p2)  }
   0x9   : > { %v2341_v14 = vld [vmem:[%s2890_s1 + $0x70] sm:$0xff] (!%p140_p2)   ;;  %v2343_v16 = vld [vmem:[%s2890_s1 + $0x78] sm:$0xff] (!%p140_p2)   ;;  %v2351_v18 = vld [vmem:[%s2890_s1 + $0xc0] sm:$0xff] (!%p140_p2)  }
   0xa   : > { %v2342_v15 = vld [vmem:[%s2890_s1 + $0x30] sm:$0xff] (!%p140_p2)   ;;  %v2344_v17 = vld [vmem:[%s2890_s1 + $0x38] sm:$0xff] (!%p140_p2)   ;;  %v2354_v19 = vld [vmem:[%s2890_s1 + $0x100] sm:$0xff] (!%p140_p2)  }
   0xb   : > { %2023 = vmatpush3.bf16.msra.mxu0 (!%p140_p2), %v2332_v3  ;;  %2313 = vmatpush3.bf16.msra.mxu1 (!%p140_p2), %v2332_v3  ;;  %v2352_v22 = vld [vmem:[%s2890_s1 + $0x80] sm:$0xff] (!%p140_p2)   ;;  %v2353_v23 = vld [vmem:[%s2890_s1 + $0xc8] sm:$0xff] (!%p140_p2)   ;;  %v2362_v28 = vld [vmem:[%s2890_s1 + $0xd0] sm:$0xff] (!%p140_p2)  }
   0xc   : > { %2024 = vmatprep.subr.bf16.mxu0 (!%p140_p2), %v2333_v4  ;;  %2306 = vmatprep.subr.bf16.mxu1 (!%p140_p2), %v2333_v4  ;;  %v2355_v26 = vld [vmem:[%s2890_s1 + $0x88] sm:$0xff] (!%p140_p2)   ;;  %v2363_v30 = vld [vmem:[%s2890_s1 + $0x90] sm:$0xff] (!%p140_p2)   ;;  %v2364_v31 = vld [vmem:[%s2890_s1 + $0xd8] sm:$0xff] (!%p140_p2)  }
   0xd   : > { %s2894_s16 = smov (!%p165_p3, %s1722_s16), 63  ;;  %v2365_v34 = vld [vmem:[%s2890_s1 + $0x98] sm:$0xff]   ;;  %v2385_v35 = vld [vmem:[%s2890_s1 + $0x108] sm:$0xff]   ;;  %v2372_v37 = vld [vmem:[%s2890_s1 + $0xe0] sm:$0xff]  }
   0xe   : > { %s2320_s29 = smul.u32 20, %s2894_s16  ;;  %v2373_v39 = vld [vmem:[%s2890_s1 + $0xa0] sm:$0xff]   ;;  %v2374_v40 = vld [vmem:[%s2890_s1 + $0xe8] sm:$0xff]   ;;  %v2382_v46 = vld [vmem:[%s2890_s1 + $0xf0] sm:$0xff]   ;;  %s1725_s19 = sshll.u32 %s2894_s16, 2 }
   0xf   : > { %2025 = vmatpush3.bf16.msra.mxu0 %v2334_v5  ;;  %2314 = vmatpush3.bf16.msra.mxu1 %v2334_v5  ;;  %v2375_v43 = vld [vmem:[%s2890_s1 + $0xa8] sm:$0xff]   ;;  %v2405_v47 = vld [vmem:[%s2890_s1 + $0x110] sm:$0xff]   ;;  %v2384_v49 = vld [vmem:[%s2890_s1 + $0xf8] sm:$0xff]   ;;  %s2821_s22 = scalar_lea.vmem %s2892_s3, %s1725_s19 }
  0x10   : > { %2026 = vmatprep.subr.bf16.mxu0 %v2335_v6  ;;  %2307 = vmatprep.subr.bf16.mxu1 %v2335_v6  ;;  %s2546_s9 = scalar_lea.vmem %s2889_s0, %s2320_s29  ;;  %v2383_v48 = vld [vmem:[%s2890_s1 + $0xb0] sm:$0xff]   ;;  %v2386_v52 = vld [vmem:[%s2890_s1 + $0xb8] sm:$0xff]  }
  0x11   : > { %v2347_v11 = vld [vmem:[%s2546_s9 + $0x4] ss:$20 sps:$4 sm:$0xff]   ;;  %v2345_v20 = vld [vmem:[%s2546_s9] ss:$20 sps:$4 sm:$0xff]   ;;  %v2360_v27 = vld [vmem:[%s2546_s9 + $0x28] ss:$20 sps:$4 sm:$0xff]  }
  0x12   : > { %v2350_v12 = vld [vmem:[%s2546_s9 + $0x1e4] ss:$20 sps:$4 sm:$0xff]   ;;  %1050 = vmatprep.mubr.bf16.mxu0 %v2347_v11  ;;  %v2348_v21 = vld [vmem:[%s2546_s9 + $0x1e0] ss:$20 sps:$4 sm:$0xff]   ;;  %v2361_v29 = vld [vmem:[%s2546_s9 + $0x208] ss:$20 sps:$4 sm:$0xff]  }
  0x13   : > { %2027 = vmatpush3.bf16.msra.mxu0 %v2336_v7  ;;  %2315 = vmatpush3.bf16.msra.mxu1 %v2336_v7  ;;  %v2356_v24 = vld [vmem:[%s2546_s9 + $0x2c] ss:$20 sps:$4 sm:$0xff]   ;;  %v2366_v32 = vld [vmem:[%s2546_s9 + $0x54] ss:$20 sps:$4 sm:$0xff]   ;;  %v2370_v36 = vld [vmem:[%s2546_s9 + $0x50] ss:$20 sps:$4 sm:$0xff]  }
  0x14   : > { %2028 = vmatprep.subr.bf16.mxu0 %v2337_v8  ;;  %2308 = vmatprep.subr.bf16.mxu1 %v2337_v8  ;;  %v2358_v25 = vld [vmem:[%s2546_s9 + $0x20c] ss:$20 sps:$4 sm:$0xff]   ;;  %v2368_v33 = vld [vmem:[%s2546_s9 + $0x234] ss:$20 sps:$4 sm:$0xff]   ;;  %v2371_v38 = vld [vmem:[%s2546_s9 + $0x230] ss:$20 sps:$4 sm:$0xff]  }
  0x15   : > { %1146 = vmatprep.mubr.bf16.mxu1 %v2350_v12  ;;  %v2376_v41 = vld [vmem:[%s2546_s9 + $0x7c] ss:$20 sps:$4 sm:$0xff]   ;;  %v2380_v44 = vld [vmem:[%s2546_s9 + $0x78] ss:$20 sps:$4 sm:$0xff]   ;;  %v2392_v54 = vld [vmem:[%s2546_s9 + $0xa0] ss:$20 sps:$4 sm:$0xff]  }
  0x16   : > { %v2378_v42 = vld [vmem:[%s2546_s9 + $0x25c] ss:$20 sps:$4 sm:$0xff]   ;;  %v2381_v45 = vld [vmem:[%s2546_s9 + $0x258] ss:$20 sps:$4 sm:$0xff]   ;;  %v2395_v57 = vld [vmem:[%s2546_s9 + $0x34] ss:$20 sps:$4 sm:$0xff]  }
  0x17   : > { %2029 = vmatpush3.bf16.msra.mxu0 %v2338_v9  ;;  %2316 = vmatpush3.bf16.msra.mxu1 %v2338_v9  ;;  %v2387_v50 = vld [vmem:[%s2546_s9 + $0xa4] ss:$20 sps:$4 sm:$0xff]   ;;  %v2391_v51 = vld [vmem:[%s2546_s9 + $0xc] ss:$20 sps:$4 sm:$0xff]   ;;  %v2389_v53 = vld [vmem:[%s2546_s9 + $0x8] ss:$20 sps:$4 sm:$0xff]  }
  0x18   : > { %2030 = vmatprep.subr.bf16.mxu0 %v2339_v10  ;;  %2309 = vmatprep.subr.bf16.mxu1 %v2339_v10  ;;  %v2393_v55 = vld [vmem:[%s2546_s9 + $0xcc] ss:$20 sps:$4 sm:$0xff]   ;;  %v2424_v56 = vld [vmem:[%s2890_s1 + $0x118] sm:$0xff]   ;;  %v2398_v59 = vld [vmem:[%s2546_s9 + $0x30] ss:$20 sps:$4 sm:$0xff]  }
  0x19   : > { %v2397_v58 = vld [vmem:[%s2546_s9 + $0xc8] ss:$20 sps:$4 sm:$0xff]   ;;  %v2403_v62 = vld [vmem:[%s2546_s9 + $0xf0] ss:$20 sps:$4 sm:$0xff]   ;;  %v2404_v63 = vld [vmem:[%s2546_s9 + $0x58] ss:$20 sps:$4 sm:$0xff]  }
  0x1a   : > { %v2399_v60 = vld [vmem:[%s2546_s9 + $0xf4] ss:$20 sps:$4 sm:$0xff]   ;;  %v2401_v61 = vld [vmem:[%s2546_s9 + $0x5c] ss:$20 sps:$4 sm:$0xff]   ;;  %v2408_v1 = vld [vmem:[%s2546_s9 + $0x84] ss:$20 sps:$4 sm:$0xff]  }
  0x1b   : > { %2031 = vmatpush3.bf16.msra.mxu0 %v2340_v13  ;;  %2317 = vmatpush3.bf16.msra.mxu1 %v2340_v13  ;;  %v2406_v0 = vld [vmem:[%s2546_s9 + $0x11c] ss:$20 sps:$4 sm:$0xff]   ;;  %v2410_v2 = vld [vmem:[%s2546_s9 + $0x118] ss:$20 sps:$4 sm:$0xff]   ;;  %v2411_v3 = vld [vmem:[%s2546_s9 + $0x80] ss:$20 sps:$4 sm:$0xff]  }
  0x1c   : > { %2032 = vmatprep.subr.bf16.mxu0 %v2341_v14  ;;  %2310 = vmatprep.subr.bf16.mxu1 %v2341_v14  ;;  %v2412_v4 = vld [vmem:[%s2546_s9 + $0x144] ss:$20 sps:$4 sm:$0xff]   ;;  %v2414_v5 = vld [vmem:[%s2546_s9 + $0xac] ss:$20 sps:$4 sm:$0xff]   ;;  %v2417_v7 = vld [vmem:[%s2546_s9 + $0xa8] ss:$20 sps:$4 sm:$0xff]  }
  0x1d   : > { %v2416_v6 = vld [vmem:[%s2546_s9 + $0x140] ss:$20 sps:$4 sm:$0xff]   ;;  %v2422_v10 = vld [vmem:[%s2546_s9 + $0x168] ss:$20 sps:$4 sm:$0xff]   ;;  %v2423_v11 = vld [vmem:[%s2546_s9 + $0xd0] ss:$20 sps:$4 sm:$0xff]  }
  0x1e   : > { %v2418_v8 = vld [vmem:[%s2546_s9 + $0x16c] ss:$20 sps:$4 sm:$0xff]   ;;  %v2420_v9 = vld [vmem:[%s2546_s9 + $0xd4] ss:$20 sps:$4 sm:$0xff]   ;;  %v2427_v13 = vld [vmem:[%s2546_s9 + $0xfc] ss:$20 sps:$4 sm:$0xff]  }
  0x1f   : > { %2033 = vmatpush3.bf16.msra.mxu0 %v2342_v15  ;;  %2318 = vmatpush3.bf16.msra.mxu1 %v2342_v15  ;;  %v2425_v12 = vld [vmem:[%s2546_s9 + $0x194] ss:$20 sps:$4 sm:$0xff]   ;;  %v2429_v14 = vld [vmem:[%s2546_s9 + $0x190] ss:$20 sps:$4 sm:$0xff]   ;;  %v2430_v15 = vld [vmem:[%s2546_s9 + $0xf8] ss:$20 sps:$4 sm:$0xff]  }
  0x20   : > { %2034 = vmatprep.subr.bf16.mxu0 %v2343_v16  ;;  %2311 = vmatprep.subr.bf16.mxu1 %v2343_v16  ;;  %v2431_v16 = vld [vmem:[%s2546_s9 + $0x1bc] ss:$20 sps:$4 sm:$0xff]  }
  0x23   : > { %2035 = vmatpush3.bf16.msra.mxu0 %v2344_v17  ;;  %2319 = vmatpush3.bf16.msra.mxu1 %v2344_v17  ;;  %v2433_v17 = vld [vmem:[%s2546_s9 + $0x124] ss:$20 sps:$4 sm:$0xff]  }
  0x24   : > { %2132 = vmatprep.subr.bf16.mxu1 %v2351_v18  ;;  %2264 = vmatprep.subr.bf16.mxu0 %v2354_v19  ;;  %v2435_v18 = vld [vmem:[%s2546_s9 + $0x1b8] ss:$20 sps:$4 sm:$0xff]  }
  0x26   : > { %1051 = vmatmul.mubr.bf16.vlgmr.msra.gmra.mrb[0].mxu0 %v2345_v20  ;;  %1147 = vmatmul.mubr.bf16.vlgmr.msra.gmra.mrb[0].mxu1 %v2348_v21  ;;  %v2437_v20 = vld [vmem:[%s2546_s9 + $0x14c] ss:$20 sps:$4 sm:$0xff]   ;;  %v2439_v21 = vld [vmem:[%s2546_s9 + $0x10] ss:$20 sps:$4 sm:$0xff]  }
  0x27   : > { %2133 = vmatpush3.bf16.msra.mxu1 %v2352_v22  ;;  %2265 = vmatpush3.bf16.msra.mxu0 %v2354_v19  ;;  %v2436_v19 = vld [vmem:[%s2546_s9 + $0x120] ss:$20 sps:$4 sm:$0xff]   ;;  %v2440_v22 = vld [vmem:[%s2546_s9 + $0x148] ss:$20 sps:$4 sm:$0xff]  }
  0x28   : > { %2134 = vmatprep.subr.bf16.mxu1 %v2353_v23  ;;  %1058 = vmatprep.mubr.bf16.mxu0 %v2356_v24  ;;  %v2441_v23 = vld [vmem:[%s2546_s9 + $0x38] ss:$20 sps:$4 sm:$0xff]   ;;  %v2442_v24 = vld [vmem:[%s2546_s9 + $0x174] ss:$20 sps:$4 sm:$0xff]  }
  0x29   : > { %1154 = vmatprep.mubr.bf16.mxu1 %v2358_v25  ;;  %2266 = vmatprep.subr.bf16.mxu0 %v2385_v35  ;;  %v2444_v25 = vld [vmem:[%s2546_s9 + $0x60] ss:$20 sps:$4 sm:$0xff]  }
  0x2b   : > { %2135 = vmatpush3.bf16.msra.mxu1 %v2355_v26  ;;  %2267 = vmatpush3.bf16.msra.mxu0 %v2385_v35  ;;  %v2445_v26 = vld [vmem:[%s2546_s9 + $0x170] ss:$20 sps:$4 sm:$0xff]   ;;  %v2456_v35 = vld [vmem:[%s2546_s9 + $0x128] ss:$20 sps:$4 sm:$0xff]  }
  0x2c   : > { %2136 = vmatprep.subr.bf16.mxu1 %v2362_v28  ;;  %2268 = vmatprep.subr.bf16.mxu0 %v2405_v47  ;;  %v2447_v28 = vld [vmem:[%s2546_s9 + $0x19c] ss:$20 sps:$4 sm:$0xff]  }
  0x2e   : > { %1059 = vmatmul.mubr.bf16.gmra.mrb[4].mxu0 %v2360_v27  ;;  %1155 = vmatmul.mubr.bf16.gmra.mrb[4].mxu1 %v2361_v29  ;;  %v2446_v27 = vld [vmem:[%s2546_s9 + $0x88] ss:$20 sps:$4 sm:$0xff]   ;;  %v2449_v29 = vld [vmem:[%s2546_s9 + $0xb0] ss:$20 sps:$4 sm:$0xff]  }
  0x2f   : > { %2137 = vmatpush3.bf16.msra.mxu1 %v2363_v30  ;;  %1066 = vmatprep.mubr.bf16.mxu0 %v2366_v32  ;;  %v2450_v30 = vld [vmem:[%s2546_s9 + $0x198] ss:$20 sps:$4 sm:$0xff]  }
  0x30   : > { %2138 = vmatprep.subr.bf16.mxu1 %v2364_v31  ;;  %1162 = vmatprep.mubr.bf16.mxu1 %v2368_v33  ;;  %v2451_v31 = vld [vmem:[%s2546_s9 + $0xd8] ss:$20 sps:$4 sm:$0xff]   ;;  %v2454_v33 = vld [vmem:[%s2546_s9 + $0x100] ss:$20 sps:$4 sm:$0xff]  }
  0x31   : > { %2269 = vmatpush3.bf16.msra.mxu0 %v2405_v47  ;;  %v2452_v32 = vld [vmem:[%s2546_s9 + $0x1c4] ss:$20 sps:$4 sm:$0xff]  }
  0x32   : > { %2270 = vmatprep.subr.bf16.mxu0 %v2424_v56  ;;  %v2471_v47 = vld [vmem:[%s2546_s9 + $0x218] ss:$20 sps:$4 sm:$0xff]  }
  0x33   : > { %2139 = vmatpush3.bf16.msra.mxu1 %v2365_v34  ;;  %v2455_v34 = vld [vmem:[%s2546_s9 + $0x1c0] ss:$20 sps:$4 sm:$0xff]  }
  0x34   : > { %2140 = vmatprep.subr.bf16.mxu1 %v2372_v37  ;;  %v2459_v37 = vld [vmem:[%s2546_s9 + $0x150] ss:$20 sps:$4 sm:$0xff]  }
  0x35   : > { %2271 = vmatpush3.bf16.msra.mxu0 %v2424_v56 }
  0x36   : > { %1067 = vmatmul.mubr.bf16.gmra.mrb[8].mxu0 %v2370_v36  ;;  %1163 = vmatmul.mubr.bf16.gmra.mrb[8].mxu1 %v2371_v38  ;;  %v2457_v36 = vld [vmem:[%s2546_s9 + $0x1ec] ss:$20 sps:$4 sm:$0xff]   ;;  %v2460_v38 = vld [vmem:[%s2546_s9 + $0x1e8] ss:$20 sps:$4 sm:$0xff]  }
  0x37   : > { %2141 = vmatpush3.bf16.msra.mxu1 %v2373_v39  ;;  %1074 = vmatprep.mubr.bf16.mxu0 %v2376_v41  ;;  %v2461_v39 = vld [vmem:[%s2546_s9 + $0x178] ss:$20 sps:$4 sm:$0xff]   ;;  %v2464_v41 = vld [vmem:[%s2546_s9 + $0x1a0] ss:$20 sps:$4 sm:$0xff]  }
  0x38   : > { %2142 = vmatprep.subr.bf16.mxu1 %v2374_v40  ;;  %1170 = vmatprep.mubr.bf16.mxu1 %v2378_v42  ;;  %v2462_v40 = vld [vmem:[%s2546_s9 + $0x214] ss:$20 sps:$4 sm:$0xff]   ;;  %v2465_v42 = vld [vmem:[%s2546_s9 + $0x210] ss:$20 sps:$4 sm:$0xff]  }
  0x3b   : > { %2143 = vmatpush3.bf16.msra.mxu1 %v2375_v43  ;;  %v2466_v43 = vld [vmem:[%s2546_s9 + $0x1c8] ss:$20 sps:$4 sm:$0xff]  }
  0x3c   : > { %2144 = vmatprep.subr.bf16.mxu1 %v2382_v46  ;;  %v2470_v46 = vld [vmem:[%s2546_s9 + $0x238] ss:$20 sps:$4 sm:$0xff]  }
  0x3e   : > { %1075 = vmatmul.mubr.bf16.gmra.mrb[12].mxu0 %v2380_v44  ;;  %1171 = vmatmul.mubr.bf16.gmra.mrb[12].mxu1 %v2381_v45  ;;  %v2467_v44 = vld [vmem:[%s2546_s9 + $0x23c] ss:$20 sps:$4 sm:$0xff]  }
  0x3f   : > { %2145 = vmatpush3.bf16.msra.mxu1 %v2383_v48  ;;  %1082 = vmatprep.mubr.bf16.mxu0 %v2387_v50  ;;  %v2469_v45 = vld [vmem:[%s2546_s9 + $0x1f0] ss:$20 sps:$4 sm:$0xff]   ;;  %v2475_v50 = vld [vmem:[%s2546_s9 + $0x260] ss:$20 sps:$4 sm:$0xff]  }
  0x40   : > { %2146 = vmatprep.subr.bf16.mxu1 %v2384_v49  ;;  %1211 = vmatprep.mubr.bf16.mxu1 %v2391_v51  ;;  %v2472_v48 = vld [vmem:[%s2546_s9 + $0x264] ss:$20 sps:$4 sm:$0xff]   ;;  %v2474_v49 = vld [vmem:[%s2546_s9 + $0x240] ss:$20 sps:$4 sm:$0xff]   ;;  %v2476_v51 = vld [vmem:[%s2546_s9 + $0x268] ss:$20 sps:$4 sm:$0xff]  }
  0x43   : > { %2147 = vmatpush3.bf16.msra.mxu1 %v2386_v52 }
  0x46   : > { %1083 = vmatmul.mubr.bf16.gmra.mrb[16].mxu0 %v2392_v54  ;;  %1212 = vmatmul.mubr.bf16.vlgmr.msra.gmra.mrb[16].mxu1 %v2389_v53 }
  0x47   : > { %1090 = vmatprep.mubr.bf16.mxu0 %v2393_v55  ;;  %1219 = vmatprep.mubr.bf16.mxu1 %v2395_v57 }
  0x4e   : > { %1091 = vmatmul.mubr.bf16.gmra.mrb[20].mxu0 %v2397_v58  ;;  %1220 = vmatmul.mubr.bf16.gmra.mrb[20].mxu1 %v2398_v59 }
  0x4f   : > { %1098 = vmatprep.mubr.bf16.mxu0 %v2399_v60  ;;  %1227 = vmatprep.mubr.bf16.mxu1 %v2401_v61 }
  0x56   : > { %1099 = vmatmul.mubr.bf16.gmra.mrb[24].mxu0 %v2403_v62  ;;  %1228 = vmatmul.mubr.bf16.gmra.mrb[24].mxu1 %v2404_v63 }
  0x57   : > { %1106 = vmatprep.mubr.bf16.mxu0 %v2406_v0  ;;  %1235 = vmatprep.mubr.bf16.mxu1 %v2408_v1 }
  0x5e   : > { %1107 = vmatmul.mubr.bf16.gmra.mrb[28].mxu0 %v2410_v2  ;;  %1236 = vmatmul.mubr.bf16.gmra.mrb[28].mxu1 %v2411_v3 }
  0x5f   : > { %1114 = vmatprep.mubr.bf16.mxu0 %v2412_v4  ;;  %1243 = vmatprep.mubr.bf16.mxu1 %v2414_v5 }
  0x66   : > { %1115 = vmatmul.mubr.bf16.gmra.mrb[32].mxu0 %v2416_v6  ;;  %1244 = vmatmul.mubr.bf16.gmra.mrb[32].mxu1 %v2417_v7 }
  0x67   : > { %1122 = vmatprep.mubr.bf16.mxu0 %v2418_v8  ;;  %1251 = vmatprep.mubr.bf16.mxu1 %v2420_v9 }
  0x6e   : > { %1123 = vmatmul.mubr.bf16.gmra.mrb[36].mxu0 %v2422_v10  ;;  %1252 = vmatmul.mubr.bf16.gmra.mrb[36].mxu1 %v2423_v11 }
  0x6f   : > { %1130 = vmatprep.mubr.bf16.mxu0 %v2425_v12  ;;  %1259 = vmatprep.mubr.bf16.mxu1 %v2427_v13 }
  0x76   : > { %1131 = vmatmul.mubr.bf16.gmra.mrb[40].mxu0 %v2429_v14  ;;  %1260 = vmatmul.mubr.bf16.gmra.mrb[40].mxu1 %v2430_v15 }
  0x77   : > { %1138 = vmatprep.mubr.bf16.mxu0 %v2431_v16  ;;  %1267 = vmatprep.mubr.bf16.mxu1 %v2433_v17 }
  0x7e   : > { %1139 = vmatmul.mubr.bf16.gmra.mrb[44].mxu0 %v2435_v18  ;;  %1268 = vmatmul.mubr.bf16.gmra.mrb[44].mxu1 %v2436_v19 }
  0x7f   : > { %1275 = vmatprep.mubr.bf16.mxu1 %v2437_v20  ;;  %2272 = vmatprep.mubr.msk.bf16.mxu0 %vm969_vm0, %v2439_v21 }
  0x86   : > { %1276 = vmatmul.mubr.bf16.gmra.mrb[48].mxu1 %v2440_v22  ;;  %2273 = vmatmul.mubr.msk.bf16.vlgmr.msra.gmra.mrb[48].mxu0 %vm969_vm0, %v2441_v23 }
  0x87   : > { %1283 = vmatprep.mubr.bf16.mxu1 %v2442_v24  ;;  %2276 = vmatprep.mubr.msk.bf16.mxu0 %vm969_vm0, %v2444_v25 }
  0x8e   : > { %1284 = vmatmul.mubr.bf16.gmra.mrb[52].mxu1 %v2445_v26  ;;  %2277 = vmatmul.mubr.msk.bf16.gmra.mrb[52].mxu0 %vm969_vm0, %v2446_v27 }
  0x8f   : > { %1291 = vmatprep.mubr.bf16.mxu1 %v2447_v28  ;;  %2280 = vmatprep.mubr.msk.bf16.mxu0 %vm969_vm0, %v2449_v29 }
  0x96   : > { %1292 = vmatmul.mubr.bf16.gmra.mrb[56].mxu1 %v2450_v30  ;;  %2281 = vmatmul.mubr.msk.bf16.gmra.mrb[56].mxu0 %vm969_vm0, %v2451_v31 }
  0x97   : > { %1299 = vmatprep.mubr.bf16.mxu1 %v2452_v32  ;;  %2284 = vmatprep.mubr.msk.bf16.mxu0 %vm969_vm0, %v2454_v33 }
  0x9e   : > { %1300 = vmatmul.mubr.bf16.gmra.mrb[60].mxu1 %v2455_v34  ;;  %2285 = vmatmul.mubr.msk.bf16.gmra.mrb[60].mxu0 %vm969_vm0, %v2456_v35 }
  0x9f   : > { %1307 = vmatprep.mubr.bf16.mxu1 %v2457_v36  ;;  %2288 = vmatprep.mubr.msk.bf16.mxu0 %vm969_vm0, %v2459_v37 }
  0xa6   : > { %1308 = vmatmul.mubr.bf16.gmra.mrb[64].mxu1 %v2460_v38  ;;  %2289 = vmatmul.mubr.msk.bf16.gmra.mrb[64].mxu0 %vm969_vm0, %v2461_v39  ;;  %v2744_v38 = vld [vmem:[%s2891_s2] ss:$0 sm:$0xff] }
  0xa7   : > { %1315 = vmatprep.mubr.bf16.mxu1 %v2462_v40  ;;  %2292 = vmatprep.mubr.msk.bf16.mxu0 %vm969_vm0, %v2464_v41 }
  0xae   : > { %1316 = vmatmul.mubr.bf16.gmra.mrb[68].mxu1 %v2465_v42  ;;  %2293 = vmatmul.mubr.msk.bf16.gmra.mrb[68].mxu0 %vm969_vm0, %v2466_v43 }
  0xaf   : > { %1323 = vmatprep.mubr.bf16.mxu1 %v2467_v44  ;;  %2296 = vmatprep.mubr.msk.bf16.mxu0 %vm969_vm0, %v2469_v45 }
  0xb6   : > { %1324 = vmatmul.mubr.bf16.gmra.mrb[72].mxu1 %v2470_v46  ;;  %2297 = vmatmul.mubr.msk.bf16.gmra.mrb[72].mxu0 %vm969_vm0, %v2471_v47 }
  0xb7   : > { %1331 = vmatprep.mubr.bf16.mxu1 %v2472_v48  ;;  %2300 = vmatprep.mubr.msk.bf16.mxu0 %vm969_vm0, %v2474_v49 }
  0xbe   : > { %1332 = vmatmul.mubr.bf16.gmra.mrb[76].mxu1 %v2475_v50  ;;  %2301 = vmatmul.mubr.msk.bf16.gmra.mrb[76].mxu0 %vm969_vm0, %v2476_v51 }
  0xf9   : > { %v2108_v52 = vpop.f32.mrb[0].mxu1  ;;  %v2036_v53 = vpop.f32.mrb[0].mxu0 }
  0xfa   : > { %v2109_v54 = vpop.f32.mrb[1].mxu1  ;;  %v2037_v55 = vpop.f32.mrb[1].mxu0 }
  0xfb   : > { %v2725_v56 = vadd.f32 %v2109_v54, %v2108_v52  ;;  %v2111_v57 = vpop.f32.mrb[2].mxu1  ;;  %v2038_v58 = vadd.f32 %v2037_v55, %v2036_v53  ;;  %v2039_v59 = vpop.f32.mrb[2].mxu0 }
  0xfc   : > { %v2112_v60 = vpop.f32.mrb[3].mxu1  ;;  %v2040_v61 = vpop.f32.mrb[3].mxu0 }
  0xfd   : > { %v2727_v62 = vadd.f32 %v2112_v60, %v2111_v57  ;;  %v2041_v63 = vadd.f32 %v2040_v61, %v2039_v59  ;;  %v1053_v41 = vadd.f32 %v2038_v58, %v2744_v38 }
  0xff   : > { %v1056_v48 = vadd.f32 %v2041_v63, %v2744_v38 }
 0x101   : > { %v2114_v0 = vpop.f32.mrb[4].mxu1  ;;  %v2042_v1 = vpop.f32.mrb[4].mxu0 }
 0x102   : > { %v2115_v2 = vpop.f32.mrb[5].mxu1  ;;  %v2043_v3 = vpop.f32.mrb[5].mxu0 }
 0x103   : > { %v2729_v4 = vadd.f32 %v2115_v2, %v2114_v0  ;;  %v2117_v5 = vpop.f32.mrb[6].mxu1  ;;  %v2044_v6 = vadd.f32 %v2043_v3, %v2042_v1  ;;  %v2045_v7 = vpop.f32.mrb[6].mxu0 }
 0x104   : > { %v2118_v8 = vpop.f32.mrb[7].mxu1  ;;  %v2046_v9 = vpop.f32.mrb[7].mxu0 }
 0x105   : > { %v2731_v10 = vadd.f32 %v2118_v8, %v2117_v5  ;;  %v2047_v11 = vadd.f32 %v2046_v9, %v2045_v7  ;;  %v1061_v58 = vadd.f32 %v2044_v6, %v2744_v38 }
 0x107   : > { %v1064_v63 = vadd.f32 %v2047_v11, %v2744_v38 }
 0x109   : > { %v2120_v12 = vpop.f32.mrb[8].mxu1  ;;  %v2048_v13 = vpop.f32.mrb[8].mxu0 }
 0x10a   : > { %v2121_v14 = vpop.f32.mrb[9].mxu1  ;;  %v2049_v15 = vpop.f32.mrb[9].mxu0 }
 0x10b   : > { %v2733_v16 = vadd.f32 %v2121_v14, %v2120_v12  ;;  %v2123_v17 = vpop.f32.mrb[10].mxu1  ;;  %v2050_v18 = vadd.f32 %v2049_v15, %v2048_v13  ;;  %v2051_v19 = vpop.f32.mrb[10].mxu0 }
 0x10c   : > { %v2124_v20 = vpop.f32.mrb[11].mxu1  ;;  %v2052_v21 = vpop.f32.mrb[11].mxu0 }
 0x10d   : > { %v2735_v22 = vadd.f32 %v2124_v20, %v2123_v17  ;;  %v2053_v23 = vadd.f32 %v2052_v21, %v2051_v19  ;;  %v1069_v6 = vadd.f32 %v2050_v18, %v2744_v38 }
 0x10f   : > { %v1072_v11 = vadd.f32 %v2053_v23, %v2744_v38 }
 0x111   : > { %v2126_v24 = vpop.f32.mrb[12].mxu1  ;;  %v2054_v25 = vpop.f32.mrb[12].mxu0 }
 0x112   : > { %v2127_v26 = vpop.f32.mrb[13].mxu1  ;;  %v2055_v27 = vpop.f32.mrb[13].mxu0 }
 0x113   : > { %v2737_v28 = vadd.f32 %v2127_v26, %v2126_v24  ;;  %v2129_v29 = vpop.f32.mrb[14].mxu1  ;;  %v2056_v30 = vadd.f32 %v2055_v27, %v2054_v25  ;;  %v2057_v31 = vpop.f32.mrb[14].mxu0 }
 0x114   : > { %v2130_v32 = vpop.f32.mrb[15].mxu1  ;;  %v2058_v33 = vpop.f32.mrb[15].mxu0 }
 0x115   : > { %v2739_v34 = vadd.f32 %v2130_v32, %v2129_v29  ;;  %v2059_v35 = vadd.f32 %v2058_v33, %v2057_v31  ;;  %v1077_v18 = vadd.f32 %v2056_v30, %v2744_v38 }
 0x117   : > { %v1080_v23 = vadd.f32 %v2059_v35, %v2744_v38 }
 0x119   : > { %v2148_v36 = vpop.f32.mrb[16].mxu1  ;;  %v2060_v37 = vpop.f32.mrb[16].mxu0 }
 0x11a   : > { %v2149_v39 = vpop.f32.mrb[17].mxu1  ;;  %v2061_v40 = vpop.f32.mrb[17].mxu0 }
 0x11b   : > { %v2150_v42 = vadd.f32 %v2149_v39, %v2148_v36  ;;  %v2151_v43 = vpop.f32.mrb[18].mxu1  ;;  %v2062_v44 = vadd.f32 %v2061_v40, %v2060_v37  ;;  %v2063_v45 = vpop.f32.mrb[18].mxu0 }
 0x11c   : > { %v2152_v46 = vpop.f32.mrb[19].mxu1  ;;  %v2064_v47 = vpop.f32.mrb[19].mxu0 }
 0x11d   : > { %v2153_v49 = vadd.f32 %v2152_v46, %v2151_v43  ;;  %v2065_v50 = vadd.f32 %v2064_v47, %v2063_v45  ;;  %v2748_v51 = vadd.f32 %v2150_v42, %v1053_v41  ;;  %v1085_v30 = vadd.f32 %v2062_v44, %v2744_v38 }
 0x11f   : > { %v2750_v52 = vadd.f32 %v2153_v49, %v1056_v48  ;;  %v1088_v35 = vadd.f32 %v2065_v50, %v2744_v38 }
 0x121   : > { %v2154_v53 = vpop.f32.mrb[20].mxu1  ;;  %v2066_v54 = vpop.f32.mrb[20].mxu0 }
 0x122   : > { %v2155_v55 = vpop.f32.mrb[21].mxu1  ;;  %v2067_v57 = vpop.f32.mrb[21].mxu0 }
 0x123   : > { %v2156_v59 = vadd.f32 %v2155_v55, %v2154_v53  ;;  %v2157_v60 = vpop.f32.mrb[22].mxu1  ;;  %v2068_v61 = vadd.f32 %v2067_v57, %v2066_v54  ;;  %v2069_v0 = vpop.f32.mrb[22].mxu0 }
 0x124   : > { %v2158_v1 = vpop.f32.mrb[23].mxu1  ;;  %v2070_v2 = vpop.f32.mrb[23].mxu0 }
 0x125   : > { %v2159_v3 = vadd.f32 %v2158_v1, %v2157_v60  ;;  %v2071_v5 = vadd.f32 %v2070_v2, %v2069_v0  ;;  %v2754_v7 = vadd.f32 %v2156_v59, %v1061_v58 }
 0x127   : > { %v2756_v8 = vadd.f32 %v2159_v3, %v1064_v63 }
 0x129   : > { %v2160_v9 = vpop.f32.mrb[24].mxu1  ;;  %v2072_v12 = vpop.f32.mrb[24].mxu0 }
 0x12a   : > { %v2161_v13 = vpop.f32.mrb[25].mxu1  ;;  %v2073_v14 = vpop.f32.mrb[25].mxu0 }
 0x12b   : > { %v2162_v15 = vadd.f32 %v2161_v13, %v2160_v9  ;;  %v2163_v17 = vpop.f32.mrb[26].mxu1  ;;  %v2074_v19 = vadd.f32 %v2073_v14, %v2072_v12  ;;  %v2075_v20 = vpop.f32.mrb[26].mxu0 }
 0x12c   : > { %v2164_v21 = vpop.f32.mrb[27].mxu1  ;;  %v2076_v24 = vpop.f32.mrb[27].mxu0 }
 0x12d   : > { %v2165_v25 = vadd.f32 %v2164_v21, %v2163_v17  ;;  %v2077_v26 = vadd.f32 %v2076_v24, %v2075_v20  ;;  %v2760_v27 = vadd.f32 %v2162_v15, %v1069_v6  ;;  %v1093_v6 = vadd.f32 %v2068_v61, %v2744_v38 }
 0x12f   : > { %v2762_v29 = vadd.f32 %v2165_v25, %v1072_v11  ;;  %v1096_v11 = vadd.f32 %v2071_v5, %v2744_v38 }
 0x131   : > { %v2166_v31 = vpop.f32.mrb[28].mxu1  ;;  %v2078_v32 = vpop.f32.mrb[28].mxu0 }
 0x132   : > { %v2167_v33 = vpop.f32.mrb[29].mxu1  ;;  %v2079_v36 = vpop.f32.mrb[29].mxu0 }
 0x133   : > { %v2168_v37 = vadd.f32 %v2167_v33, %v2166_v31  ;;  %v2169_v39 = vpop.f32.mrb[30].mxu1  ;;  %v2080_v40 = vadd.f32 %v2079_v36, %v2078_v32  ;;  %v2081_v41 = vpop.f32.mrb[30].mxu0 }
 0x134   : > { %v2170_v42 = vpop.f32.mrb[31].mxu1  ;;  %v2082_v43 = vpop.f32.mrb[31].mxu0 }
 0x135   : > { %v2171_v45 = vadd.f32 %v2170_v42, %v2169_v39  ;;  %v2083_v46 = vadd.f32 %v2082_v43, %v2081_v41  ;;  %v2766_v47 = vadd.f32 %v2168_v37, %v1077_v18  ;;  %v1101_v39 = vadd.f32 %v2074_v19, %v2744_v38 }
 0x137   : > { %v2768_v48 = vadd.f32 %v2171_v45, %v1080_v23 }
 0x139   : > { %v2172_v49 = vpop.f32.mrb[32].mxu1  ;;  %v2084_v53 = vpop.f32.mrb[32].mxu0 }
 0x13a   : > { %v2173_v54 = vpop.f32.mrb[33].mxu1  ;;  %v2085_v55 = vpop.f32.mrb[33].mxu0 }
 0x13b   : > { %v2174_v57 = vadd.f32 %v2173_v54, %v2172_v49  ;;  %v2175_v58 = vpop.f32.mrb[34].mxu1  ;;  %v2771_v59 = vadd.f32 %v2085_v55, %v2084_v53  ;;  %v2087_v60 = vpop.f32.mrb[34].mxu0  ;;  %v1104_v49 = vadd.f32 %v2077_v26, %v2744_v38 }
 0x13c   : > { %v2176_v0 = vpop.f32.mrb[35].mxu1  ;;  %v2088_v1 = vpop.f32.mrb[35].mxu0 }
 0x13d   : > { %v2177_v2 = vadd.f32 %v2176_v0, %v2175_v58  ;;  %v2774_v63 = vadd.f32 %v2088_v1, %v2087_v60  ;;  %v2776_v3 = vadd.f32 %v2174_v57, %v1085_v30  ;;  %v1109_v0 = vadd.f32 %v2080_v40, %v2744_v38 }
 0x13f   : > { %v2778_v9 = vadd.f32 %v2177_v2, %v1088_v35 }
 0x141   : > { %v2178_v12 = vpop.f32.mrb[36].mxu1  ;;  %v2090_v13 = vpop.f32.mrb[36].mxu0 }
 0x142   : > { %v2179_v14 = vpop.f32.mrb[37].mxu1  ;;  %v2091_v44 = vpop.f32.mrb[37].mxu0 }
 0x143   : > { %v2180_v15 = vadd.f32 %v2179_v14, %v2178_v12  ;;  %v2181_v17 = vpop.f32.mrb[38].mxu1  ;;  %v2781_v20 = vadd.f32 %v2091_v44, %v2090_v13  ;;  %v2093_v21 = vpop.f32.mrb[38].mxu0  ;;  %v1112_v14 = vadd.f32 %v2083_v46, %v2744_v38 }
 0x144   : > { %v2182_v24 = vpop.f32.mrb[39].mxu1  ;;  %v2094_v50 = vpop.f32.mrb[39].mxu0 }
 0x145   : > { %v2183_v25 = vadd.f32 %v2182_v24, %v2181_v17  ;;  %v2784_v31 = vadd.f32 %v2094_v50, %v2093_v21  ;;  %v2786_v32 = vadd.f32 %v2180_v15, %v1093_v6 }
 0x147   : > { %v2788_v33 = vadd.f32 %v2183_v25, %v1096_v11  ;;  %v1117_v25 = vadd.f32 %v2771_v59, %v2744_v38 }
 0x149   : > { %v2184_v36 = vpop.f32.mrb[40].mxu1  ;;  %v2096_v18 = vpop.f32.mrb[40].mxu0 }
 0x14a   : > { %v2185_v37 = vpop.f32.mrb[41].mxu1  ;;  %v2097_v61 = vpop.f32.mrb[41].mxu0 }
 0x14b   : > { %v2186_v41 = vadd.f32 %v2185_v37, %v2184_v36  ;;  %v2187_v42 = vpop.f32.mrb[42].mxu1  ;;  %v2791_v43 = vadd.f32 %v2097_v61, %v2096_v18  ;;  %v2099_v23 = vpop.f32.mrb[42].mxu0 }
 0x14c   : > { %v2188_v45 = vpop.f32.mrb[43].mxu1  ;;  %v2100_v5 = vpop.f32.mrb[43].mxu0 }
 0x14d   : > { %v2189_v53 = vadd.f32 %v2188_v45, %v2187_v42  ;;  %v2794_v54 = vadd.f32 %v2100_v5, %v2099_v23  ;;  %v2796_v55 = vadd.f32 %v2186_v41, %v1101_v39  ;;  %v1120_v42 = vadd.f32 %v2774_v63, %v2744_v38 }
 0x14f   : > { %v2798_v30 = vadd.f32 %v2189_v53, %v1104_v49 }
 0x151   : > { %v2190_v57 = vpop.f32.mrb[44].mxu1  ;;  %v2102_v58 = vpop.f32.mrb[44].mxu0 }
 0x152   : > { %v2191_v60 = vpop.f32.mrb[45].mxu1  ;;  %v2103_v19 = vpop.f32.mrb[45].mxu0 }
 0x153   : > { %v2192_v1 = vadd.f32 %v2191_v60, %v2190_v57  ;;  %v2193_v35 = vpop.f32.mrb[46].mxu1  ;;  %v2801_v2 = vadd.f32 %v2103_v19, %v2102_v58  ;;  %v2105_v12 = vpop.f32.mrb[46].mxu0  ;;  %v1125_v58 = vadd.f32 %v2781_v20, %v2744_v38 }
 0x154   : > { %v2194_v26 = vpop.f32.mrb[47].mxu1  ;;  %v2106_v13 = vpop.f32.mrb[47].mxu0 }
 0x155   : > { %v2195_v44 = vadd.f32 %v2194_v26, %v2193_v35  ;;  %v2804_v6 = vadd.f32 %v2106_v13, %v2105_v12  ;;  %v2806_v15 = vadd.f32 %v2192_v1, %v1109_v0  ;;  %v1128_v26 = vadd.f32 %v2784_v31, %v2744_v38 }
 0x157   : > { %v2808_v17 = vadd.f32 %v2195_v44, %v1112_v14 }
 0x159   : > { %v2196_v21 = vpop.f32.mrb[48].mxu1  ;;  %v2274_v24 = vpop.f32.mrb[48].mxu0 }
 0x15a   : > { %v1383_v40 = vadd.f32 %v2274_v24, %v2754_v7  ;;  %v2197_v50 = vpop.f32.mrb[49].mxu1  ;;  %v1374_v11 = vpop.f32.mrb[49].mxu0 }
 0x15b   : > { %v2198_v36 = vadd.f32 %v2197_v50, %v2196_v21  ;;  %v1375_v46 = vadd.f32 %v1374_v11, %v2748_v51  ;;  %v2199_v18 = vpop.f32.mrb[50].mxu1  ;;  %v2275_v37 = vpop.f32.mrb[50].mxu0  ;;  %v1133_v11 = vadd.f32 %v2791_v43, %v2744_v38 }
 0x15c   : > { %v1386_v61 = vadd.f32 %v2275_v37, %v2756_v8  ;;  %v2200_v39 = vpop.f32.mrb[51].mxu1  ;;  %v1377_v41 = vpop.f32.mrb[51].mxu0 }
 0x15d   : > { %v2201_v7 = vadd.f32 %v2200_v39, %v2199_v18  ;;  %v1378_v59 = vadd.f32 %v1377_v41, %v2750_v52  ;;  %v2824_v51 = vadd.f32 %v2198_v36, %v1117_v25 }
 0x15e   : > { %v1933_v23 = vpack.c.bf16 %v1386_v61, %v1383_v40  ;;  %v1136_v61 = vadd.f32 %v2794_v54, %v2744_v38 }
 0x15f   : > { %v1928_v45 = vpack.c.bf16 %v1378_v59, %v1375_v46  ;;  %v2826_v8 = vadd.f32 %v2201_v7, %v1120_v42 }
 0x160   : > { %2005 = vst [vmem:[%s2821_s22 + $0x8] sm:$0xff] %v1933_v23  }
 0x161   : > { %1929 = vst [vmem:[%s2821_s22] sm:$0xff] %v1928_v45   ;;  %v2202_v5 = vpop.f32.mrb[52].mxu1  ;;  %v2278_v63 = vpop.f32.mrb[52].mxu0 }
 0x162   : > { %v1399_v49 = vadd.f32 %v2278_v63, %v2766_v47  ;;  %v2203_v53 = vpop.f32.mrb[53].mxu1  ;;  %v1390_v57 = vpop.f32.mrb[53].mxu0 }
 0x163   : > { %v2204_v52 = vadd.f32 %v2203_v53, %v2202_v5  ;;  %v1391_v60 = vadd.f32 %v1390_v57, %v2760_v27  ;;  %v2205_v19 = vpop.f32.mrb[54].mxu1  ;;  %v2279_v0 = vpop.f32.mrb[54].mxu0  ;;  %v1141_v5 = vadd.f32 %v2801_v2, %v2744_v38 }
 0x164   : > { %v1402_v1 = vadd.f32 %v2279_v0, %v2768_v48  ;;  %v2206_v35 = vpop.f32.mrb[55].mxu1  ;;  %v1393_v12 = vpop.f32.mrb[55].mxu0 }
 0x165   : > { %v2207_v47 = vadd.f32 %v2206_v35, %v2205_v19  ;;  %v1394_v13 = vadd.f32 %v1393_v12, %v2762_v29  ;;  %v1286_v14 = vadd.f32 %v2204_v52, %v1125_v58  ;;  %v1144_v52 = vadd.f32 %v2804_v6, %v2744_v38 }
 0x166   : > { %v1943_v44 = vpack.c.bf16 %v1402_v1, %v1399_v49 }
 0x167   : > { %v1938_v21 = vpack.c.bf16 %v1394_v13, %v1391_v60  ;;  %v1289_v20 = vadd.f32 %v2207_v47, %v1128_v26 }
 0x168   : > { %2007 = vst [vmem:[%s2821_s22 + $0x18] sm:$0xff] %v1943_v44  }
 0x169   : > { %2006 = vst [vmem:[%s2821_s22 + $0x10] sm:$0xff] %v1938_v21   ;;  %v2208_v24 = vpop.f32.mrb[56].mxu1  ;;  %v2282_v27 = vpop.f32.mrb[56].mxu0 }
 0x16a   : > { %v1415_v40 = vadd.f32 %v2282_v27, %v2786_v32  ;;  %v2209_v50 = vpop.f32.mrb[57].mxu1  ;;  %v1406_v48 = vpop.f32.mrb[57].mxu0 }
 0x16b   : > { %v2210_v31 = vadd.f32 %v2209_v50, %v2208_v24  ;;  %v1407_v29 = vadd.f32 %v1406_v48, %v2776_v3  ;;  %v2211_v25 = vpop.f32.mrb[58].mxu1  ;;  %v2283_v36 = vpop.f32.mrb[58].mxu0 }
 0x16c   : > { %v1418_v46 = vadd.f32 %v2283_v36, %v2788_v33  ;;  %v2212_v18 = vpop.f32.mrb[59].mxu1  ;;  %v1409_v37 = vpop.f32.mrb[59].mxu0 }
 0x16d   : > { %v2213_v32 = vadd.f32 %v2212_v18, %v2211_v25  ;;  %v1410_v39 = vadd.f32 %v1409_v37, %v2778_v9  ;;  %v1294_v41 = vadd.f32 %v2210_v31, %v1133_v11 }
 0x16e   : > { %v1953_v42 = vpack.c.bf16 %v1418_v46, %v1415_v40  ;;  %v1152_v40 = vadd.f32 %v2727_v62, %v2744_v38 }
 0x16f   : > { %v1948_v7 = vpack.c.bf16 %v1410_v39, %v1407_v29  ;;  %v1297_v43 = vadd.f32 %v2213_v32, %v1136_v61 }
 0x170   : > { %2009 = vst [vmem:[%s2821_s22 + $0x28] sm:$0xff] %v1953_v42   ;;  %v1160_v42 = vadd.f32 %v2731_v10, %v2744_v38 }
 0x171   : > { %2008 = vst [vmem:[%s2821_s22 + $0x20] sm:$0xff] %v1948_v7   ;;  %v2214_v59 = vpop.f32.mrb[60].mxu1  ;;  %v2286_v3 = vpop.f32.mrb[60].mxu0 }
 0x172   : > { %v1431_v23 = vadd.f32 %v2286_v3, %v2806_v15  ;;  %v2215_v45 = vpop.f32.mrb[61].mxu1  ;;  %v1422_v33 = vpop.f32.mrb[61].mxu0 }
 0x173   : > { %v2216_v54 = vadd.f32 %v2215_v45, %v2214_v59  ;;  %v1423_v9 = vadd.f32 %v1422_v33, %v2796_v55  ;;  %v2217_v63 = vpop.f32.mrb[62].mxu1  ;;  %v2287_v49 = vpop.f32.mrb[62].mxu0 }
 0x174   : > { %v1434_v53 = vadd.f32 %v2287_v49, %v2808_v17  ;;  %v2218_v57 = vpop.f32.mrb[63].mxu1  ;;  %v1425_v58 = vpop.f32.mrb[63].mxu0  ;;  %v1149_v17 = vadd.f32 %v2725_v56, %v2744_v38 }
 0x175   : > { %v2219_v15 = vadd.f32 %v2218_v57, %v2217_v63  ;;  %v1426_v60 = vadd.f32 %v1425_v58, %v2798_v30  ;;  %v1302_v19 = vadd.f32 %v2216_v54, %v1141_v5  ;;  %v1165_v63 = vadd.f32 %v2733_v16, %v2744_v38 }
 0x176   : > { %v1963_v0 = vpack.c.bf16 %v1434_v53, %v1431_v23 }
 0x177   : > { %v1958_v1 = vpack.c.bf16 %v1426_v60, %v1423_v9  ;;  %v1305_v2 = vadd.f32 %v2219_v15, %v1144_v52  ;;  %v1168_v15 = vadd.f32 %v2735_v22, %v2744_v38 }
 0x178   : > { %2011 = vst [vmem:[%s2821_s22 + $0x38] sm:$0xff] %v1963_v0  }
 0x179   : > { %2010 = vst [vmem:[%s2821_s22 + $0x30] sm:$0xff] %v1958_v1   ;;  %v2220_v35 = vpop.f32.mrb[64].mxu1  ;;  %v2290_v55 = vpop.f32.mrb[64].mxu0 }
 0x17a   : > { %v1447_v12 = vadd.f32 %v2290_v55, %v1286_v14  ;;  %v2221_v26 = vpop.f32.mrb[65].mxu1  ;;  %v1438_v47 = vpop.f32.mrb[65].mxu0 }
 0x17b   : > { %v2222_v6 = vadd.f32 %v2221_v26, %v2220_v35  ;;  %v1439_v13 = vadd.f32 %v1438_v47, %v2824_v51  ;;  %v2223_v30 = vpop.f32.mrb[66].mxu1  ;;  %v2291_v44 = vpop.f32.mrb[66].mxu0  ;;  %v1173_v47 = vadd.f32 %v2737_v28, %v2744_v38 }
 0x17c   : > { %v1450_v21 = vadd.f32 %v2291_v44, %v1289_v20  ;;  %v2224_v24 = vpop.f32.mrb[67].mxu1  ;;  %v1441_v27 = vpop.f32.mrb[67].mxu0  ;;  %v1157_v20 = vadd.f32 %v2729_v4, %v2744_v38 }
 0x17d   : > { %v2225_v50 = vadd.f32 %v2224_v24, %v2223_v30  ;;  %v1442_v14 = vadd.f32 %v1441_v27, %v2826_v8  ;;  %v1310_v48 = vadd.f32 %v2222_v6, %v1149_v17 }
 0x17e   : > { %v1973_v11 = vpack.c.bf16 %v1450_v21, %v1447_v12  ;;  %v1176_v21 = vadd.f32 %v2739_v34, %v2744_v38 }
 0x17f   : > { %v1968_v31 = vpack.c.bf16 %v1442_v14, %v1439_v13  ;;  %v1313_v29 = vadd.f32 %v2225_v50, %v1152_v40 }
 0x180   : > { %2013 = vst [vmem:[%s2821_s22 + $0x48] sm:$0xff] %v1973_v11  }
 0x181   : > { %2012 = vst [vmem:[%s2821_s22 + $0x40] sm:$0xff] %v1968_v31   ;;  %v2226_v56 = vpop.f32.mrb[68].mxu1  ;;  %v2294_v25 = vpop.f32.mrb[68].mxu0 }
 0x182   : > { %v1463_v51 = vadd.f32 %v2294_v25, %v1302_v19  ;;  %v2227_v36 = vpop.f32.mrb[69].mxu1  ;;  %v1454_v46 = vpop.f32.mrb[69].mxu0 }
 0x183   : > { %v2228_v62 = vadd.f32 %v2227_v36, %v2226_v56  ;;  %v1455_v18 = vadd.f32 %v1454_v46, %v1294_v41  ;;  %v2229_v37 = vpop.f32.mrb[70].mxu1  ;;  %v2295_v8 = vpop.f32.mrb[70].mxu0 }
 0x184   : > { %v1466_v61 = vadd.f32 %v2295_v8, %v1305_v2  ;;  %v2230_v32 = vpop.f32.mrb[71].mxu1  ;;  %v1457_v39 = vpop.f32.mrb[71].mxu0 }
 0x185   : > { %v2231_v7 = vadd.f32 %v2230_v32, %v2229_v37  ;;  %v1458_v59 = vadd.f32 %v1457_v39, %v1297_v43  ;;  %v1318_v3 = vadd.f32 %v2228_v62, %v1157_v20 }
 0x186   : > { %v1983_v23 = vpack.c.bf16 %v1466_v61, %v1463_v51 }
 0x187   : > { %v1978_v45 = vpack.c.bf16 %v1458_v59, %v1455_v18  ;;  %v1321_v33 = vadd.f32 %v2231_v7, %v1160_v42 }
 0x188   : > { %2015 = vst [vmem:[%s2821_s22 + $0x58] sm:$0xff] %v1983_v23  }
 0x189   : > { %2014 = vst [vmem:[%s2821_s22 + $0x50] sm:$0xff] %v1978_v45   ;;  %v2232_v4 = vpop.f32.mrb[72].mxu1  ;;  %v2298_v5 = vpop.f32.mrb[72].mxu0 }
 0x18a   : > { %v1479_v54 = vadd.f32 %v2298_v5, %v1318_v3  ;;  %v2233_v41 = vpop.f32.mrb[73].mxu1  ;;  %v1470_v9 = vpop.f32.mrb[73].mxu0 }
 0x18b   : > { %v2234_v49 = vadd.f32 %v2233_v41, %v2232_v4  ;;  %v1471_v10 = vadd.f32 %v1470_v9, %v1310_v48  ;;  %v2235_v53 = vpop.f32.mrb[74].mxu1  ;;  %v2299_v43 = vpop.f32.mrb[74].mxu0 }
 0x18c   : > { %v1482_v57 = vadd.f32 %v2299_v43, %v1321_v33  ;;  %v2236_v58 = vpop.f32.mrb[75].mxu1  ;;  %v1473_v52 = vpop.f32.mrb[75].mxu0 }
 0x18d   : > { %v2237_v60 = vadd.f32 %v2236_v58, %v2235_v53  ;;  %v1474_v19 = vadd.f32 %v1473_v52, %v1313_v29  ;;  %v1326_v0 = vadd.f32 %v2234_v49, %v1165_v63 }
 0x18e   : > { %v1993_v1 = vpack.c.bf16 %v1482_v57, %v1479_v54 }
 0x18f   : > { %v1988_v2 = vpack.c.bf16 %v1474_v19, %v1471_v10  ;;  %v1329_v35 = vadd.f32 %v2237_v60, %v1168_v15 }
 0x190   : > { %2017 = vst [vmem:[%s2821_s22 + $0x68] sm:$0xff] %v1993_v1  }
 0x191   : > { %2016 = vst [vmem:[%s2821_s22 + $0x60] sm:$0xff] %v1988_v2   ;;  %v2238_v16 = vpop.f32.mrb[76].mxu1  ;;  %v2302_v55 = vpop.f32.mrb[76].mxu0 }
 0x192   : > { %v2239_v12 = vpop.f32.mrb[77].mxu1  ;;  %v1486_v26 = vpop.f32.mrb[77].mxu0 }
 0x193   : > { %v2240_v17 = vadd.f32 %v2239_v12, %v2238_v16  ;;  %v1487_v6 = vadd.f32 %v1486_v26, %v1326_v0  ;;  %v2241_v22 = vpop.f32.mrb[78].mxu1  ;;  %v2303_v13 = vpop.f32.mrb[78].mxu0 }
 0x194   : > { %v2242_v30 = vpop.f32.mrb[79].mxu1  ;;  %v1489_v44 = vpop.f32.mrb[79].mxu0 }
 0x195   : > { %v1334_v24 = vadd.f32 %v2240_v17, %v1173_v47  ;;  %v2243_v27 = vadd.f32 %v2242_v30, %v2241_v22  ;;  %v1490_v40 = vadd.f32 %v1489_v44, %v1329_v35 }
 0x197   : > { %v1495_v50 = vadd.f32 %v2302_v55, %v1334_v24  ;;  %v1337_v14 = vadd.f32 %v2243_v27, %v1176_v21  ;;  %v1998_v48 = vpack.c.bf16 %v1490_v40, %v1487_v6 }
 0x199   : > { %v1498_v11 = vadd.f32 %v2303_v13, %v1337_v14  ;;  %2018 = vst [vmem:[%s2821_s22 + $0x70] sm:$0xff] %v1998_v48  }
 0x19b   : > { %v2003_v31 = vpack.c.bf16 %v1498_v11, %v1495_v50 }
 0x19d   : > { %2019 = vst [vmem:[%s2821_s22 + $0x78] sm:$0xff] %v2003_v31  }
 0x19e PF: > { %s13_s12 = sadd.s32 1, %s2483_s12  }
 0x19f   : > { %p10_p4 = scmp.ge.s32.totalorder %s13_s12, 4  }
 0x1a1   :  { %12 = sbr.rel (!%p10_p4) target bundleno = 1 (0x1), region = 62 }

// kernel: generator_nchw.61
= control target key start
LH: loop header
LB: loop body
LE: loop exit
PB: predicated region body
PF: predicated region fallthrough
CT: control target
= control target key end

     0   :  { %s659_s9 = smov 0   ;;  %s661_s10 = smov 0   ;;  %s723_s0 = inlined_call_operand.vmem [shape: bf16[2,256,128], index: 0, kind: input, shape index: {}]   ;;  %s724_s1 = inlined_call_operand.vmem [shape: f32[2,1,128], index: 1, kind: output, shape index: {0}]   ;;  %s725_s2 = inlined_call_operand.vmem [shape: f32[2,1,128], index: 2, kind: output, shape index: {1}]  }
   0x1   :  { %s663_s11 = smov 0  }
   0x2 LB: > { %s32_s12 = sadd.s32 1, %s637_s10  ;;  %p509_p0 = scmp.ge.s32.totalorder %s641_s11, 1  ;;  %s641_s11 = sphi %s663_s11, %s13_s11   ;;  %s637_s10 = sphi %s661_s10, %s727_s10   ;;  %s633_s9 = sphi %s659_s9, %s726_s9  }
   0x3   : > { %p34_p1 = scmp.ge.s32.totalorder %s32_s12, 2  ;;  %p150_p2 = scmp.lt.s32.totalorder %s641_s11, 3 }
   0x5   : > { %s729_s12 = smov (%p34_p1, %s32_s12), 0  ;;  %p151_p3 = pnand %p509_p0, %p150_p2 }
   0x6   : > { %p187_p4 = scmp.lt.s32.totalorder (!%p151_p3), %s633_s9, 1  ;;  %v643_v0 = vmov (!%p151_p3), 0.0  }
   0x7   : > { %154 = sbr.rel (%p151_p3) target bundleno = 99 (0x63), region = 24 }
   0xe   : > { %s731_s9 = smov (!%p187_p4, %s633_s9), 1 }
   0xf   : > { %s514_s13 = sshll.u32 %s731_s9, 7  ;;  %s680_s16 = scalar_lea.vmem %s724_s1, %s731_s9 }
  0x10   : > { %215 = vst [vmem:[%s680_s16] sm:$0x1] %v643_v0  ;;  %s686_s19 = scalar_lea.vmem %s725_s2, %s731_s9  ;;  %s692_s22 = scalar_lea.vmem %s723_s0, %s514_s13 }
  0x11   : > { %216 = vst [vmem:[%s686_s19] sm:$0x1] %v643_v0  ;;  %v516_v1 = vld [vmem:[%s692_s22] sm:$0xff]   ;;  %v579_v2 = vld [vmem:[%s692_s22 + $0x8] sm:$0xff]   ;;  %v580_v7 = vld [vmem:[%s692_s22 + $0x10] sm:$0xff]  }
  0x12   : > { %v517_v3 = vunpack.c.l.bf16 %v516_v1  ;;  %v518_v4 = vunpack.c.h.bf16 %v516_v1  ;;  %v521_v5 = vunpack.c.l.bf16 %v579_v2  ;;  %v522_v8 = vunpack.c.h.bf16 %v579_v2  ;;  %v581_v12 = vld [vmem:[%s692_s22 + $0x18] sm:$0xff]   ;;  %v582_v20 = vld [vmem:[%s692_s22 + $0x20] sm:$0xff]   ;;  %v583_v29 = vld [vmem:[%s692_s22 + $0x28] sm:$0xff]  }
  0x13   : > { %v525_v10 = vunpack.c.l.bf16 %v580_v7  ;;  %v526_v15 = vunpack.c.h.bf16 %v580_v7  ;;  %v529_v18 = vunpack.c.l.bf16 %v581_v12  ;;  %v530_v23 = vunpack.c.h.bf16 %v581_v12  ;;  %v584_v38 = vld [vmem:[%s692_s22 + $0x30] sm:$0xff]   ;;  %v585_v47 = vld [vmem:[%s692_s22 + $0x38] sm:$0xff]   ;;  %v586_v56 = vld [vmem:[%s692_s22 + $0x40] sm:$0xff]  }
  0x14   : > { %v282_v6 = vadd.f32 %v518_v4, %v517_v3  ;;  %v322_v13 = vmul.f32 %v517_v3, %v517_v3  ;;  %v323_v14 = vmul.f32 %v518_v4, %v518_v4  ;;  %v324_v17 = vmul.f32 %v521_v5, %v521_v5  ;;  %v587_v1 = vld [vmem:[%s692_s22 + $0x48] sm:$0xff]  }
  0x15   : > { %v325_v21 = vmul.f32 %v522_v8, %v522_v8  ;;  %v326_v25 = vmul.f32 %v525_v10, %v525_v10  ;;  %v533_v27 = vunpack.c.l.bf16 %v582_v20  ;;  %v327_v30 = vmul.f32 %v526_v15, %v526_v15 }
  0x16   : > { %v283_v9 = vadd.f32 %v521_v5, %v282_v6  ;;  %v354_v22 = vadd.f32 %v323_v14, %v322_v13  ;;  %v534_v32 = vunpack.c.h.bf16 %v582_v20  ;;  %v328_v34 = vmul.f32 %v529_v18, %v529_v18 }
  0x17   : > { %v537_v36 = vunpack.c.l.bf16 %v583_v29  ;;  %v329_v39 = vmul.f32 %v530_v23, %v530_v23  ;;  %v538_v41 = vunpack.c.h.bf16 %v583_v29  ;;  %v330_v43 = vmul.f32 %v533_v27, %v533_v27 }
  0x18   : > { %v284_v11 = vadd.f32 %v522_v8, %v283_v9  ;;  %v355_v26 = vadd.f32 %v354_v22, %v324_v17  ;;  %v541_v45 = vunpack.c.l.bf16 %v584_v38  ;;  %v331_v48 = vmul.f32 %v534_v32, %v534_v32 }
  0x19   : > { %v542_v50 = vunpack.c.h.bf16 %v584_v38  ;;  %v332_v52 = vmul.f32 %v537_v36, %v537_v36  ;;  %v545_v54 = vunpack.c.l.bf16 %v585_v47  ;;  %v333_v57 = vmul.f32 %v538_v41, %v538_v41 }
  0x1a   : > { %v285_v16 = vadd.f32 %v525_v10, %v284_v11  ;;  %v356_v31 = vadd.f32 %v355_v26, %v325_v21  ;;  %v546_v59 = vunpack.c.h.bf16 %v585_v47  ;;  %v334_v61 = vmul.f32 %v541_v45, %v541_v45  ;;  %v588_v10 = vld [vmem:[%s692_s22 + $0x50] sm:$0xff]  }
  0x1b   : > { %v549_v63 = vunpack.c.l.bf16 %v586_v56  ;;  %v335_v2 = vmul.f32 %v542_v50, %v542_v50  ;;  %v550_v4 = vunpack.c.h.bf16 %v586_v56  ;;  %v336_v6 = vmul.f32 %v545_v54, %v545_v54 }
  0x1c   : > { %v286_v19 = vadd.f32 %v526_v15, %v285_v16  ;;  %v357_v35 = vadd.f32 %v356_v31, %v326_v25  ;;  %v553_v8 = vunpack.c.l.bf16 %v587_v1  ;;  %v337_v11 = vmul.f32 %v546_v59, %v546_v59 }
  0x1d   : > { %v554_v13 = vunpack.c.h.bf16 %v587_v1  ;;  %v338_v15 = vmul.f32 %v549_v63, %v549_v63  ;;  %v557_v17 = vunpack.c.l.bf16 %v588_v10  ;;  %v339_v20 = vmul.f32 %v550_v4, %v550_v4 }
  0x1e   : > { %v287_v24 = vadd.f32 %v529_v18, %v286_v19  ;;  %v358_v40 = vadd.f32 %v357_v35, %v327_v30  ;;  %v589_v19 = vld [vmem:[%s692_s22 + $0x58] sm:$0xff]   ;;  %v558_v22 = vunpack.c.h.bf16 %v588_v10 }
  0x1f   : > { %v561_v26 = vunpack.c.l.bf16 %v589_v19  ;;  %v341_v29 = vmul.f32 %v554_v13, %v554_v13  ;;  %v562_v31 = vunpack.c.h.bf16 %v589_v19 }
  0x20   : > { %v288_v28 = vadd.f32 %v530_v23, %v287_v24  ;;  %v359_v44 = vadd.f32 %v358_v40, %v328_v34  ;;  %v340_v24 = vmul.f32 %v553_v8, %v553_v8  ;;  %v343_v38 = vmul.f32 %v558_v22, %v558_v22 }
  0x21   : > { %v345_v47 = vmul.f32 %v562_v31, %v562_v31 }
  0x22   : > { %v289_v33 = vadd.f32 %v533_v27, %v288_v28  ;;  %v360_v49 = vadd.f32 %v359_v44, %v329_v39  ;;  %v590_v28 = vld [vmem:[%s692_s22 + $0x60] sm:$0xff]  }
  0x23   : > { %v565_v35 = vunpack.c.l.bf16 %v590_v28  ;;  %v566_v40 = vunpack.c.h.bf16 %v590_v28  ;;  %v321_v28 = vld [vmem:[%s686_s19] sm:$0x1] }
  0x24   : > { %v290_v37 = vadd.f32 %v534_v32, %v289_v33  ;;  %v361_v53 = vadd.f32 %v360_v49, %v330_v43  ;;  %v342_v33 = vmul.f32 %v557_v17, %v557_v17 }
  0x25   : > { %v347_v56 = vmul.f32 %v566_v40, %v566_v40 }
  0x26   : > { %v291_v42 = vadd.f32 %v537_v36, %v290_v37  ;;  %v362_v58 = vadd.f32 %v361_v53, %v331_v48  ;;  %v591_v37 = vld [vmem:[%s692_s22 + $0x68] sm:$0xff]  }
  0x27   : > { %v569_v44 = vunpack.c.l.bf16 %v591_v37  ;;  %v570_v49 = vunpack.c.h.bf16 %v591_v37 }
  0x28   : > { %v292_v46 = vadd.f32 %v538_v41, %v291_v42  ;;  %v363_v62 = vadd.f32 %v362_v58, %v332_v52  ;;  %v344_v42 = vmul.f32 %v561_v26, %v561_v26 }
  0x2a   : > { %v293_v51 = vadd.f32 %v541_v45, %v292_v46  ;;  %v364_v3 = vadd.f32 %v363_v62, %v333_v57  ;;  %v592_v46 = vld [vmem:[%s692_s22 + $0x70] sm:$0xff]  }
  0x2b   : > { %v573_v53 = vunpack.c.l.bf16 %v592_v46  ;;  %v574_v58 = vunpack.c.h.bf16 %v592_v46 }
  0x2c   : > { %v294_v55 = vadd.f32 %v542_v50, %v293_v51  ;;  %v365_v7 = vadd.f32 %v364_v3, %v334_v61  ;;  %v346_v51 = vmul.f32 %v565_v35, %v565_v35 }
  0x2e   : > { %v295_v60 = vadd.f32 %v545_v54, %v294_v55  ;;  %v366_v12 = vadd.f32 %v365_v7, %v335_v2  ;;  %v593_v55 = vld [vmem:[%s692_s22 + $0x78] sm:$0xff]   ;;  %v351_v7 = vmul.f32 %v574_v58, %v574_v58 }
  0x2f   : > { %v577_v62 = vunpack.c.l.bf16 %v593_v55  ;;  %v578_v2 = vunpack.c.h.bf16 %v593_v55 }
  0x30   : > { %v296_v0 = vadd.f32 %v546_v59, %v295_v60  ;;  %v367_v16 = vadd.f32 %v366_v12, %v336_v6  ;;  %v348_v60 = vmul.f32 %v569_v44, %v569_v44 }
  0x31   : > { %v352_v10 = vmul.f32 %v577_v62, %v577_v62 }
  0x32   : > { %v297_v5 = vadd.f32 %v549_v63, %v296_v0  ;;  %v368_v21 = vadd.f32 %v367_v16, %v337_v11  ;;  %v349_v0 = vmul.f32 %v570_v49, %v570_v49 }
  0x34   : > { %v298_v9 = vadd.f32 %v550_v4, %v297_v5  ;;  %v369_v25 = vadd.f32 %v368_v21, %v338_v15  ;;  %v350_v4 = vmul.f32 %v573_v53, %v573_v53 }
  0x36   : > { %v299_v14 = vadd.f32 %v553_v8, %v298_v9  ;;  %v370_v30 = vadd.f32 %v369_v25, %v339_v20  ;;  %v281_v20 = vld [vmem:[%s680_s16] sm:$0x1] }
  0x38   : > { %v300_v18 = vadd.f32 %v554_v13, %v299_v14  ;;  %v371_v34 = vadd.f32 %v370_v30, %v340_v24  ;;  %v353_v13 = vmul.f32 %v578_v2, %v578_v2 }
  0x3a   : > { %v301_v23 = vadd.f32 %v557_v17, %v300_v18  ;;  %v372_v39 = vadd.f32 %v371_v34, %v341_v29 }
  0x3c   : > { %v302_v27 = vadd.f32 %v558_v22, %v301_v23  ;;  %v373_v43 = vadd.f32 %v372_v39, %v342_v33 }
  0x3e   : > { %v303_v32 = vadd.f32 %v561_v26, %v302_v27  ;;  %v374_v48 = vadd.f32 %v373_v43, %v343_v38 }
  0x40   : > { %v304_v36 = vadd.f32 %v562_v31, %v303_v32  ;;  %v375_v52 = vadd.f32 %v374_v48, %v344_v42 }
  0x42   : > { %v305_v41 = vadd.f32 %v565_v35, %v304_v36  ;;  %v376_v57 = vadd.f32 %v375_v52, %v345_v47 }
  0x44   : > { %v306_v45 = vadd.f32 %v566_v40, %v305_v41  ;;  %v377_v61 = vadd.f32 %v376_v57, %v346_v51 }
  0x46   : > { %v307_v50 = vadd.f32 %v569_v44, %v306_v45  ;;  %v378_v1 = vadd.f32 %v377_v61, %v347_v56 }
  0x48   : > { %v308_v54 = vadd.f32 %v570_v49, %v307_v50  ;;  %v379_v5 = vadd.f32 %v378_v1, %v348_v60 }
  0x4a   : > { %v309_v59 = vadd.f32 %v573_v53, %v308_v54  ;;  %v380_v8 = vadd.f32 %v379_v5, %v349_v0 }
  0x4c   : > { %v310_v63 = vadd.f32 %v574_v58, %v309_v59  ;;  %v381_v11 = vadd.f32 %v380_v8, %v350_v4 }
  0x4e   : > { %v311_v3 = vadd.f32 %v577_v62, %v310_v63  ;;  %v382_v14 = vadd.f32 %v381_v11, %v351_v7 }
  0x50   : > { %v312_v6 = vadd.f32 %v578_v2, %v311_v3  ;;  %v383_v16 = vadd.f32 %v382_v14, %v352_v10 }
  0x52   : > { %v313_v9 = vrot.slane %v312_v6, 4  ;;  %v384_v18 = vadd.f32 %v383_v16, %v353_v13 }
  0x54   : > { %v314_v12 = vadd.f32 %v313_v9, %v312_v6  ;;  %v385_v21 = vrot.slane %v384_v18, 4 }
  0x56   : > { %v315_v15 = vrot.slane %v314_v12, 2  ;;  %v386_v23 = vadd.f32 %v385_v21, %v384_v18 }
  0x58   : > { %v316_v17 = vadd.f32 %v315_v15, %v314_v12  ;;  %v387_v25 = vrot.slane %v386_v23, 2 }
  0x5a   : > { %v317_v19 = vrot.slane %v316_v17, 1  ;;  %v388_v26 = vadd.f32 %v387_v25, %v386_v23 }
  0x5c   : > { %v318_v22 = vadd.f32 %v317_v19, %v316_v17  ;;  %v389_v27 = vrot.slane %v388_v26, 1 }
  0x5e   : > { %v319_v24 = vadd.f32 %v318_v22, %v281_v20  ;;  %v390_v29 = vadd.f32 %v389_v27, %v388_v26 }
  0x60   : > { %320 = vst [vmem:[%s680_s16] sm:$0x1] %v319_v24  ;;  %v391_v30 = vadd.f32 %v390_v29, %v321_v28 }
  0x62   : > { %392 = vst [vmem:[%s686_s19] sm:$0x1] %v391_v30 }
  0x63 PF: > { %s13_s11 = sadd.s32 1, %s641_s11   ;;  %s726_s9 = smov %s637_s10 }
  0x64   : > { %p10_p5 = scmp.ge.s32.totalorder %s13_s11, 4   ;;  %s727_s10 = smov %s729_s12 }
  0x66   :  { %12 = sbr.rel (!%p10_p5) target bundleno = 2 (0x2), region = 70 }

// kernel: generator_nchw.62
= control target key start
LH: loop header
LB: loop body
LE: loop exit
PB: predicated region body
PF: predicated region fallthrough
CT: control target
= control target key end

     0   :  { %s1198_s18 = smov 0   ;;  %s1200_s19 = smov 0   ;;  %s1439_s0 = inlined_call_operand.vmem [shape: bf16[2,256,128], index: 0, kind: input, shape index: {}]   ;;  %s1440_s1 = inlined_call_operand.vmem [shape: f32[2,1,128], index: 1, kind: input, shape index: {}]   ;;  %s1441_s2 = inlined_call_operand.vmem [shape: f32[2,1,128], index: 2, kind: input, shape index: {}]   ;;  %s1442_s3 = inlined_call_operand.vmem [shape: f32[1,128], index: 3, kind: input, shape index: {}]   ;;  %s1443_s4 = inlined_call_operand.vmem [shape: f32[1,128], index: 4, kind: input, shape index: {}]   ;;  %s1444_s5 = inlined_call_operand.vmem [shape: bf16[2,256,128], index: 5, kind: output, shape index: {}]  }
   0x1   :  { %s1202_s20 = smov 0  }
   0x2 LB: > { %s34_s21 = sadd.s32 1, %s1162_s19  ;;  %p871_p0 = scmp.ge.s32.totalorder %s1166_s20, 1  ;;  %s1166_s20 = sphi %s1202_s20, %s15_s20   ;;  %s1162_s19 = sphi %s1200_s19, %s1446_s19   ;;  %s1158_s18 = sphi %s1198_s18, %s1445_s18  }
   0x3   : > { %p36_p1 = scmp.ge.s32.totalorder %s34_s21, 2  ;;  %p264_p2 = scmp.lt.s32.totalorder %s1166_s20, 3 }
   0x5   : > { %s1448_s21 = smov (%p36_p1, %s34_s21), 0  ;;  %p265_p3 = pnand %p871_p0, %p264_p2 }
   0x6   : > { %p325_p4 = scmp.lt.s32.totalorder (!%p265_p3), %s1158_s18, 1  ;;  %v447_v8 = vlaneseq (!%p265_p3)  ;;  %v434_v28 = vld [vmem:[%s1442_s3] sm:$0x1] (!%p265_p3) }
   0x7   : > { %268 = sbr.rel (%p265_p3) target bundleno = 76 (0x4c), region = 40  ;;  %v435_v52 = vld [vmem:[%s1443_s4] sm:$0x1] (!%p265_p3) }
   0x8   : > { %v1234_v9 = vshrl.u32 (!%p265_p3), %v447_v8, 7 }
   0xa   : > { %v449_v18 = vsub.s32 (!%p265_p3), 0, %v1234_v9 }
   0xe   : > { %s1450_s18 = smov (!%p325_p4, %s1158_s18), 1 }
   0xf   : > { %s342_s24 = scalar_lea.vmem %s1440_s1, %s1450_s18  ;;  %s348_s27 = scalar_lea.vmem %s1441_s2, %s1450_s18 }
  0x10   : > { %v432_v0 = vld [vmem:[%s342_s24] sm:$0x1]  ;;  %s910_s28 = sshll.u32 %s1450_s18, 7 }
  0x11   : > { %v433_v1 = vld [vmem:[%s348_s27] sm:$0x1]  ;;  %v436_v2 = vmul.f32 0.00390625, %v432_v0  ;;  %s1232_s6 = scalar_lea.vmem %s1439_s0, %s910_s28  ;;  %s1334_s13 = scalar_lea.vmem %s1444_s5, %s910_s28 }
  0x12   : > { %v437_v3 = vmul.f32 0.00390625, %v433_v1  ;;  %v945_v10 = vld [vmem:[%s1232_s6] sm:$0xff]   ;;  %v1088_v11 = vld [vmem:[%s1232_s6 + $0x8] sm:$0xff]   ;;  %v1089_v12 = vld [vmem:[%s1232_s6 + $0x10] sm:$0xff]  }
  0x13   : > { %v438_v4 = vmul.f32 %v436_v2, %v436_v2  ;;  %v1090_v13 = vld [vmem:[%s1232_s6 + $0x18] sm:$0xff]   ;;  %v1241_v14 = vld [vmem:[%s1232_s6 + $0x20] sm:$0xff]   ;;  %v1244_v15 = vld [vmem:[%s1232_s6 + $0x28] sm:$0xff]   ;;  %v946_v16 = vunpack.c.l.bf16 %v945_v10  ;;  %v947_v17 = vunpack.c.h.bf16 %v945_v10  ;;  %v950_v19 = vunpack.c.l.bf16 %v1088_v11 }
  0x14   : > { %v1093_v20 = vld [vmem:[%s1232_s6 + $0x30] sm:$0xff]   ;;  %v1249_v21 = vld [vmem:[%s1232_s6 + $0x38] sm:$0xff]   ;;  %v951_v22 = vunpack.c.h.bf16 %v1088_v11  ;;  %v954_v23 = vunpack.c.l.bf16 %v1089_v12  ;;  %v955_v24 = vunpack.c.h.bf16 %v1089_v12  ;;  %v958_v25 = vunpack.c.l.bf16 %v1090_v13  ;;  %v1252_v26 = vld [vmem:[%s1232_s6 + $0x40] sm:$0xff]  }
  0x15   : > { %v439_v5 = vsub.f32 %v437_v3, %v438_v4  ;;  %v1255_v27 = vld [vmem:[%s1232_s6 + $0x48] sm:$0xff]   ;;  %v959_v29 = vunpack.c.h.bf16 %v1090_v13  ;;  %v962_v30 = vunpack.c.l.bf16 %v1241_v14  ;;  %v963_v31 = vunpack.c.h.bf16 %v1241_v14  ;;  %v1264_v33 = vld [vmem:[%s1232_s6 + $0x50] sm:$0xff]   ;;  %v1269_v38 = vld [vmem:[%s1232_s6 + $0x58] sm:$0xff]  }
  0x16   : > { %v966_v32 = vunpack.c.l.bf16 %v1244_v15  ;;  %v967_v34 = vunpack.c.h.bf16 %v1244_v15  ;;  %v970_v35 = vunpack.c.l.bf16 %v1093_v20  ;;  %v971_v36 = vunpack.c.h.bf16 %v1093_v20  ;;  %v1272_v39 = vld [vmem:[%s1232_s6 + $0x60] sm:$0xff]   ;;  %v1279_v45 = vld [vmem:[%s1232_s6 + $0x68] sm:$0xff]   ;;  %v1285_v50 = vld [vmem:[%s1232_s6 + $0x70] sm:$0xff]  }
  0x17   : > { %v440_v6 = vmax.f32 %v439_v5, 0.0  ;;  %v974_v37 = vunpack.c.l.bf16 %v1249_v21  ;;  %v975_v41 = vunpack.c.h.bf16 %v1249_v21  ;;  %v978_v42 = vunpack.c.l.bf16 %v1252_v26  ;;  %v1288_v51 = vld [vmem:[%s1232_s6 + $0x78] sm:$0xff]  }
  0x18   : > { %v979_v43 = vunpack.c.h.bf16 %v1252_v26  ;;  %v982_v44 = vunpack.c.l.bf16 %v1255_v27  ;;  %v983_v47 = vunpack.c.h.bf16 %v1255_v27  ;;  %v986_v48 = vunpack.c.l.bf16 %v1264_v33 }
  0x19   : > { %v441_v7 = vadd.f32 1e-05, %v440_v6  ;;  %v987_v49 = vunpack.c.h.bf16 %v1264_v33  ;;  %v990_v53 = vunpack.c.l.bf16 %v1269_v38  ;;  %v991_v54 = vunpack.c.h.bf16 %v1269_v38 }
  0x1a   : > { %v994_v55 = vunpack.c.l.bf16 %v1272_v39  ;;  %v995_v56 = vunpack.c.h.bf16 %v1272_v39  ;;  %v998_v59 = vunpack.c.l.bf16 %v1279_v45  ;;  %v999_v60 = vunpack.c.h.bf16 %v1279_v45 }
  0x1b   : > { %1142 = vrsqrt.f32 %v441_v7  ;;  %v1002_v61 = vunpack.c.l.bf16 %v1285_v50  ;;  %v1003_v62 = vunpack.c.h.bf16 %v1285_v50  ;;  %v1006_v63 = vunpack.c.l.bf16 %v1288_v51 }
  0x1c   : > { %v1007_v0 = vunpack.c.h.bf16 %v1288_v51 }
  0x25   : > { %v1143_v40 = vpop.eup %1142 }
  0x26   : > { %v443_v46 = vmul.f32 %v1143_v40, %v434_v28 }
  0x28   : > { %v444_v57 = vmul.f32 %v443_v46, %v436_v2  ;;  %v1297_v58 = vrot.slane %v443_v46, %v449_v18 }
  0x2a   : > { %v445_v1 = vsub.f32 %v435_v52, %v444_v57  ;;  %v452_v3 = vmul.f32 %v946_v16, %v1297_v58  ;;  %v453_v4 = vmul.f32 %v947_v17, %v1297_v58  ;;  %v454_v2 = vmul.f32 %v950_v19, %v1297_v58 }
  0x2b   : > { %v455_v5 = vmul.f32 %v951_v22, %v1297_v58  ;;  %v456_v6 = vmul.f32 %v954_v23, %v1297_v58  ;;  %v457_v7 = vmul.f32 %v955_v24, %v1297_v58  ;;  %v458_v8 = vmul.f32 %v958_v25, %v1297_v58 }
  0x2c   : > { %v1312_v9 = vrot.slane %v445_v1, %v449_v18  ;;  %v459_v10 = vmul.f32 %v959_v29, %v1297_v58  ;;  %v460_v11 = vmul.f32 %v962_v30, %v1297_v58  ;;  %v461_v12 = vmul.f32 %v963_v31, %v1297_v58 }
  0x2d   : > { %v462_v13 = vmul.f32 %v966_v32, %v1297_v58  ;;  %v463_v14 = vmul.f32 %v967_v34, %v1297_v58  ;;  %v464_v15 = vmul.f32 %v970_v35, %v1297_v58  ;;  %v465_v16 = vmul.f32 %v971_v36, %v1297_v58 }
  0x2e   : > { %v490_v17 = vadd.f32 %v1312_v9, %v452_v3  ;;  %v491_v18 = vadd.f32 %v1312_v9, %v453_v4  ;;  %v492_v19 = vadd.f32 %v1312_v9, %v454_v2  ;;  %v493_v20 = vadd.f32 %v1312_v9, %v455_v5 }
  0x2f   : > { %v494_v22 = vadd.f32 %v1312_v9, %v456_v6  ;;  %v495_v23 = vadd.f32 %v1312_v9, %v457_v7  ;;  %v496_v24 = vadd.f32 %v1312_v9, %v458_v8  ;;  %v497_v25 = vadd.f32 %v1312_v9, %v459_v10 }
  0x30   : > { %v522_v28 = vmax.f32 %v490_v17, 0.0  ;;  %v523_v29 = vmax.f32 %v491_v18, 0.0  ;;  %v524_v30 = vmax.f32 %v492_v19, 0.0  ;;  %v525_v31 = vmax.f32 %v493_v20, 0.0 }
  0x31   : > { %v526_v32 = vmax.f32 %v494_v22, 0.0  ;;  %v527_v34 = vmax.f32 %v495_v23, 0.0  ;;  %v528_v35 = vmax.f32 %v496_v24, 0.0  ;;  %v529_v36 = vmax.f32 %v497_v25, 0.0 }
  0x32   : > { %v1011_v40 = vpack.c.bf16 %v523_v29, %v522_v28  ;;  %v1016_v46 = vpack.c.bf16 %v525_v31, %v524_v30  ;;  %v498_v52 = vadd.f32 %v1312_v9, %v460_v11  ;;  %v499_v57 = vadd.f32 %v1312_v9, %v461_v12 }
  0x33   : > { %v1021_v1 = vpack.c.bf16 %v527_v34, %v526_v32  ;;  %v1026_v3 = vpack.c.bf16 %v529_v36, %v528_v35  ;;  %v500_v4 = vadd.f32 %v1312_v9, %v462_v13  ;;  %v501_v2 = vadd.f32 %v1312_v9, %v463_v14 }
  0x34   : > { %1012 = vst [vmem:[%s1334_s13] sm:$0xff] %v1011_v40   ;;  %1103 = vst [vmem:[%s1334_s13 + $0x8] sm:$0xff] %v1016_v46   ;;  %v530_v5 = vmax.f32 %v498_v52, 0.0  ;;  %v531_v6 = vmax.f32 %v499_v57, 0.0  ;;  %v502_v7 = vadd.f32 %v1312_v9, %v464_v15  ;;  %v503_v8 = vadd.f32 %v1312_v9, %v465_v16 }
  0x35   : > { %1104 = vst [vmem:[%s1334_s13 + $0x10] sm:$0xff] %v1021_v1   ;;  %1105 = vst [vmem:[%s1334_s13 + $0x18] sm:$0xff] %v1026_v3   ;;  %v532_v10 = vmax.f32 %v500_v4, 0.0  ;;  %v533_v11 = vmax.f32 %v501_v2, 0.0  ;;  %v466_v12 = vmul.f32 %v974_v37, %v1297_v58  ;;  %v467_v13 = vmul.f32 %v975_v41, %v1297_v58 }
  0x36   : > { %v1031_v14 = vpack.c.bf16 %v531_v6, %v530_v5  ;;  %v534_v17 = vmax.f32 %v502_v7, 0.0  ;;  %v535_v18 = vmax.f32 %v503_v8, 0.0  ;;  %v468_v15 = vmul.f32 %v978_v42, %v1297_v58 }
  0x37   : > { %v1036_v16 = vpack.c.bf16 %v533_v11, %v532_v10  ;;  %v504_v19 = vadd.f32 %v1312_v9, %v466_v12  ;;  %v505_v20 = vadd.f32 %v1312_v9, %v467_v13  ;;  %v469_v37 = vmul.f32 %v979_v43, %v1297_v58 }
  0x38   : > { %1106 = vst [vmem:[%s1334_s13 + $0x20] sm:$0xff] %v1031_v14   ;;  %v1041_v21 = vpack.c.bf16 %v535_v18, %v534_v17  ;;  %v506_v41 = vadd.f32 %v1312_v9, %v468_v15  ;;  %v470_v22 = vmul.f32 %v982_v44, %v1297_v58  ;;  %v471_v42 = vmul.f32 %v983_v47, %v1297_v58 }
  0x39   : > { %1107 = vst [vmem:[%s1334_s13 + $0x28] sm:$0xff] %v1036_v16   ;;  %v536_v23 = vmax.f32 %v504_v19, 0.0  ;;  %v537_v24 = vmax.f32 %v505_v20, 0.0  ;;  %v507_v25 = vadd.f32 %v1312_v9, %v469_v37  ;;  %v472_v26 = vmul.f32 %v986_v48, %v1297_v58 }
  0x3a   : > { %1108 = vst [vmem:[%s1334_s13 + $0x30] sm:$0xff] %v1041_v21   ;;  %v538_v43 = vmax.f32 %v506_v41, 0.0  ;;  %v508_v28 = vadd.f32 %v1312_v9, %v470_v22  ;;  %v509_v44 = vadd.f32 %v1312_v9, %v471_v42  ;;  %v473_v27 = vmul.f32 %v987_v49, %v1297_v58 }
  0x3b   : > { %v1046_v47 = vpack.c.bf16 %v537_v24, %v536_v23  ;;  %v539_v29 = vmax.f32 %v507_v25, 0.0  ;;  %v510_v30 = vadd.f32 %v1312_v9, %v472_v26  ;;  %v474_v31 = vmul.f32 %v990_v53, %v1297_v58 }
  0x3c   : > { %v540_v48 = vmax.f32 %v508_v28, 0.0  ;;  %v541_v32 = vmax.f32 %v509_v44, 0.0  ;;  %v511_v34 = vadd.f32 %v1312_v9, %v473_v27  ;;  %v475_v35 = vmul.f32 %v991_v54, %v1297_v58 }
  0x3d   : > { %1109 = vst [vmem:[%s1334_s13 + $0x38] sm:$0xff] %v1046_v47   ;;  %v1051_v33 = vpack.c.bf16 %v539_v29, %v538_v43  ;;  %v542_v49 = vmax.f32 %v510_v30, 0.0  ;;  %v512_v36 = vadd.f32 %v1312_v9, %v474_v31  ;;  %v476_v40 = vmul.f32 %v994_v55, %v1297_v58 }
  0x3e   : > { %v1056_v46 = vpack.c.bf16 %v541_v32, %v540_v48  ;;  %v543_v53 = vmax.f32 %v511_v34, 0.0  ;;  %v513_v52 = vadd.f32 %v1312_v9, %v475_v35  ;;  %v477_v38 = vmul.f32 %v995_v56, %v1297_v58 }
  0x3f   : > { %1110 = vst [vmem:[%s1334_s13 + $0x40] sm:$0xff] %v1051_v33   ;;  %v544_v54 = vmax.f32 %v512_v36, 0.0  ;;  %v514_v57 = vadd.f32 %v1312_v9, %v476_v40  ;;  %v478_v1 = vmul.f32 %v998_v59, %v1297_v58  ;;  %v479_v55 = vmul.f32 %v999_v60, %v1297_v58 }
  0x40   : > { %1111 = vst [vmem:[%s1334_s13 + $0x48] sm:$0xff] %v1056_v46   ;;  %v1061_v3 = vpack.c.bf16 %v543_v53, %v542_v49  ;;  %v545_v4 = vmax.f32 %v513_v52, 0.0  ;;  %v515_v39 = vadd.f32 %v1312_v9, %v477_v38  ;;  %v480_v56 = vmul.f32 %v1002_v61, %v1297_v58 }
  0x41   : > { %v546_v2 = vmax.f32 %v514_v57, 0.0  ;;  %v516_v5 = vadd.f32 %v1312_v9, %v478_v1  ;;  %v517_v6 = vadd.f32 %v1312_v9, %v479_v55  ;;  %v481_v45 = vmul.f32 %v1003_v62, %v1297_v58 }
  0x42   : > { %1112 = vst [vmem:[%s1334_s13 + $0x50] sm:$0xff] %v1061_v3   ;;  %v1066_v59 = vpack.c.bf16 %v545_v4, %v544_v54  ;;  %v547_v60 = vmax.f32 %v515_v39, 0.0  ;;  %v518_v7 = vadd.f32 %v1312_v9, %v480_v56  ;;  %v482_v61 = vmul.f32 %v1006_v63, %v1297_v58 }
  0x43   : > { %v548_v8 = vmax.f32 %v516_v5, 0.0  ;;  %v549_v10 = vmax.f32 %v517_v6, 0.0  ;;  %v519_v11 = vadd.f32 %v1312_v9, %v481_v45  ;;  %v483_v50 = vmul.f32 %v1007_v0, %v1297_v58 }
  0x44   : > { %1113 = vst [vmem:[%s1334_s13 + $0x58] sm:$0xff] %v1066_v59   ;;  %v1071_v62 = vpack.c.bf16 %v547_v60, %v546_v2  ;;  %v550_v12 = vmax.f32 %v518_v7, 0.0  ;;  %v520_v13 = vadd.f32 %v1312_v9, %v482_v61 }
  0x45   : > { %v1076_v14 = vpack.c.bf16 %v549_v10, %v548_v8  ;;  %v551_v17 = vmax.f32 %v519_v11, 0.0  ;;  %v521_v18 = vadd.f32 %v1312_v9, %v483_v50 }
  0x46   : > { %1114 = vst [vmem:[%s1334_s13 + $0x60] sm:$0xff] %v1071_v62   ;;  %v552_v63 = vmax.f32 %v520_v13, 0.0 }
  0x47   : > { %1115 = vst [vmem:[%s1334_s13 + $0x68] sm:$0xff] %v1076_v14   ;;  %v1081_v15 = vpack.c.bf16 %v551_v17, %v550_v12  ;;  %v553_v16 = vmax.f32 %v521_v18, 0.0 }
  0x49   : > { %1116 = vst [vmem:[%s1334_s13 + $0x70] sm:$0xff] %v1081_v15   ;;  %v1086_v19 = vpack.c.bf16 %v553_v16, %v552_v63 }
  0x4b   : > { %1117 = vst [vmem:[%s1334_s13 + $0x78] sm:$0xff] %v1086_v19  }
  0x4c PF: > { %s15_s20 = sadd.s32 1, %s1166_s20   ;;  %s1445_s18 = smov %s1162_s19 }
  0x4d   : > { %p12_p5 = scmp.ge.s32.totalorder %s15_s20, 4   ;;  %s1446_s19 = smov %s1448_s21 }
  0x4f   :  { %14 = sbr.rel (!%p12_p5) target bundleno = 2 (0x2), region = 82 }

// kernel: generator_nchw.65
= control target key start
LH: loop header
LB: loop body
LE: loop exit
PB: predicated region body
PF: predicated region fallthrough
CT: control target
= control target key end

     0   :  { %s1444_s21 = smov 0   ;;  %s1446_s22 = smov 0   ;;  %s1887_s0 = inlined_call_operand.vmem [shape: bf16[2,256,128], index: 0, kind: input, shape index: {}]   ;;  %s1888_s1 = inlined_call_operand.vmem [shape: f32[2,1,128], index: 1, kind: input, shape index: {}]   ;;  %s1889_s2 = inlined_call_operand.vmem [shape: f32[2,1,128], index: 2, kind: input, shape index: {}]   ;;  %s1890_s3 = inlined_call_operand.vmem [shape: f32[1,128], index: 3, kind: input, shape index: {}]   ;;  %s1891_s4 = inlined_call_operand.vmem [shape: f32[1,128], index: 4, kind: input, shape index: {}]   ;;  %s1892_s5 = inlined_call_operand.vmem [shape: bf16[2,256,128], index: 5, kind: input, shape index: {}]   ;;  %s1893_s6 = inlined_call_operand.vmem [shape: bf16[2,256,128], index: 6, kind: output, shape index: {}]  }
   0x1   :  { %s1448_s23 = smov 0  }
   0x2 LB: > { %s35_s24 = sadd.s32 1, %s1403_s22  ;;  %p1030_p0 = scmp.ge.s32.totalorder %s1407_s23, 1  ;;  %s1407_s23 = sphi %s1448_s23, %s16_s23   ;;  %s1403_s22 = sphi %s1446_s22, %s1937_s22   ;;  %s1399_s21 = sphi %s1444_s21, %s1936_s21  }
   0x3   : > { %p37_p1 = scmp.ge.s32.totalorder %s35_s24, 2  ;;  %p311_p2 = scmp.lt.s32.totalorder %s1407_s23, 3 }
   0x5   : > { %s1939_s24 = smov (%p37_p1, %s35_s24), 0  ;;  %p312_p3 = pnand %p1030_p0, %p311_p2 }
   0x6   : > { %p386_p4 = scmp.lt.s32.totalorder (!%p312_p3), %s1399_s21, 1  ;;  %v521_v1 = vlaneseq (!%p312_p3) }
   0x7   : > { %315 = sbr.rel (%p312_p3) target bundleno = 86 (0x56), region = 44 }
   0x8   : > { %v1486_v6 = vshrl.u32 (!%p312_p3), %v521_v1, 7 }
   0xa   : > { %v523_v14 = vsub.s32 (!%p312_p3), 0, %v1486_v6 }
   0xe   : > { %s1941_s21 = smov (!%p386_p4, %s1399_s21), 1 }
   0xf   : > { %s1462_s25 = sshll.u32 %s1941_s21, 7  ;;  %s403_s28 = scalar_lea.vmem %s1888_s1, %s1941_s21 }
  0x10   : > { %s409_s7 = scalar_lea.vmem %s1889_s2, %s1941_s21  ;;  %v506_v0 = vld [vmem:[%s403_s28] sm:$0x1]  ;;  %s1476_s10 = scalar_lea.vmem %s1887_s0, %s1462_s25 }
  0x11   : > { %v507_v2 = vld [vmem:[%s409_s7] sm:$0x1]  ;;  %v1470_v3 = vmul.f32 0.00390625, %v506_v0  ;;  %s1482_s13 = scalar_lea.vmem %s1892_s5, %s1462_s25  ;;  %v1495_v10 = vld [vmem:[%s1476_s10 + $0x8] sm:$0xff]   ;;  %v1503_v15 = vld [vmem:[%s1476_s10 + $0x10] sm:$0xff]   ;;  %s1726_s20 = scalar_lea.vmem %s1893_s6, %s1462_s25 }
  0x12   : > { %v511_v4 = vmul.f32 0.00390625, %v507_v2  ;;  %v1489_v7 = vld [vmem:[%s1476_s10] sm:$0xff]   ;;  %v1498_v12 = vld [vmem:[%s1482_s13 + $0x8] sm:$0xff]   ;;  %v1506_v16 = vld [vmem:[%s1482_s13 + $0x10] sm:$0xff]   ;;  %v1112_v20 = vunpack.c.l.bf16 %v1495_v10  ;;  %v1113_v24 = vunpack.c.h.bf16 %v1495_v10  ;;  %v1116_v29 = vunpack.c.l.bf16 %v1503_v15 }
  0x13   : > { %v512_v5 = vmul.f32 %v1470_v3, %v1470_v3  ;;  %v1492_v9 = vld [vmem:[%s1482_s13] sm:$0xff]   ;;  %v1108_v13 = vunpack.c.l.bf16 %v1489_v7  ;;  %v1109_v17 = vunpack.c.h.bf16 %v1489_v7  ;;  %v1512_v21 = vld [vmem:[%s1476_s10 + $0x18] sm:$0xff]   ;;  %v1176_v25 = vunpack.c.l.bf16 %v1498_v12  ;;  %v1531_v32 = vld [vmem:[%s1476_s10 + $0x28] sm:$0xff]  }
  0x14   : > { %v1172_v19 = vunpack.c.l.bf16 %v1492_v9  ;;  %v1515_v22 = vld [vmem:[%s1482_s13 + $0x18] sm:$0xff]   ;;  %v1173_v23 = vunpack.c.h.bf16 %v1492_v9  ;;  %v1522_v27 = vld [vmem:[%s1476_s10 + $0x20] sm:$0xff]   ;;  %v1117_v30 = vunpack.c.h.bf16 %v1503_v15  ;;  %v1534_v33 = vld [vmem:[%s1482_s13 + $0x28] sm:$0xff]   ;;  %v1120_v35 = vunpack.c.l.bf16 %v1512_v21 }
  0x15   : > { %v513_v8 = vsub.f32 %v511_v4, %v512_v5  ;;  %v1525_v28 = vld [vmem:[%s1482_s13 + $0x20] sm:$0xff]   ;;  %v1121_v36 = vunpack.c.h.bf16 %v1512_v21  ;;  %v1541_v38 = vld [vmem:[%s1476_s10 + $0x30] sm:$0xff]   ;;  %v1124_v41 = vunpack.c.l.bf16 %v1522_v27  ;;  %v1125_v42 = vunpack.c.h.bf16 %v1522_v27  ;;  %v1551_v44 = vld [vmem:[%s1476_s10 + $0x38] sm:$0xff]  }
  0x16   : > { %v1544_v39 = vld [vmem:[%s1482_s13 + $0x30] sm:$0xff]   ;;  %v1554_v45 = vld [vmem:[%s1482_s13 + $0x38] sm:$0xff]   ;;  %v1128_v47 = vunpack.c.l.bf16 %v1531_v32  ;;  %v1129_v48 = vunpack.c.h.bf16 %v1531_v32  ;;  %v1561_v50 = vld [vmem:[%s1476_s10 + $0x40] sm:$0xff]   ;;  %v1132_v53 = vunpack.c.l.bf16 %v1541_v38  ;;  %v1133_v54 = vunpack.c.h.bf16 %v1541_v38 }
  0x17   : > { %v514_v11 = vmax.f32 %v513_v8, 0.0  ;;  %v1564_v51 = vld [vmem:[%s1482_s13 + $0x40] sm:$0xff]   ;;  %v1571_v56 = vld [vmem:[%s1476_s10 + $0x48] sm:$0xff]   ;;  %v1581_v62 = vld [vmem:[%s1476_s10 + $0x50] sm:$0xff]  }
  0x18   : > { %v1574_v57 = vld [vmem:[%s1482_s13 + $0x48] sm:$0xff]   ;;  %v1584_v63 = vld [vmem:[%s1482_s13 + $0x50] sm:$0xff]   ;;  %v1591_v5 = vld [vmem:[%s1476_s10 + $0x58] sm:$0xff]  }
  0x19   : > { %v515_v18 = vadd.f32 1e-05, %v514_v11  ;;  %v1594_v8 = vld [vmem:[%s1482_s13 + $0x58] sm:$0xff]   ;;  %v1601_v1 = vld [vmem:[%s1476_s10 + $0x60] sm:$0xff]   ;;  %v1614_v61 = vld [vmem:[%s1476_s10 + $0x68] sm:$0xff]  }
  0x1a   : > { %v1604_v58 = vld [vmem:[%s1482_s13 + $0x60] sm:$0xff]   ;;  %v1621_v2 = vld [vmem:[%s1482_s13 + $0x68] sm:$0xff]   ;;  %v1624_v49 = vld [vmem:[%s1476_s10 + $0x70] sm:$0xff]  }
  0x1b   : > { %1383 = vrsqrt.f32 %v515_v18  ;;  %v508_v4 = vld [vmem:[%s1890_s3] sm:$0x1]  ;;  %v1631_v43 = vld [vmem:[%s1482_s13 + $0x70] sm:$0xff]   ;;  %v1637_v37 = vld [vmem:[%s1476_s10 + $0x78] sm:$0xff]  }
  0x1c   : > { %v1640_v34 = vld [vmem:[%s1482_s13 + $0x78] sm:$0xff]   ;;  %v509_v18 = vld [vmem:[%s1891_s4] sm:$0x1]  ;;  %v1168_v31 = vunpack.c.l.bf16 %v1637_v37  ;;  %v1169_v46 = vunpack.c.h.bf16 %v1637_v37 }
  0x1d   : > { %v1232_v0 = vunpack.c.l.bf16 %v1640_v34 }
  0x25   : > { %v1384_v11 = vpop.eup %1383 }
  0x26   : > { %v517_v60 = vmul.f32 %v1384_v11, %v508_v4  ;;  %v1165_v11 = vunpack.c.h.bf16 %v1624_v49  ;;  %v1233_v4 = vunpack.c.h.bf16 %v1640_v34 }
  0x28   : > { %v518_v59 = vmul.f32 %v517_v60, %v1470_v3  ;;  %v1652_v40 = vrot.slane %v517_v60, %v523_v14 }
  0x2a   : > { %v519_v26 = vsub.f32 %v509_v18, %v518_v59  ;;  %v526_v3 = vmul.f32 %v1108_v13, %v1652_v40  ;;  %v527_v60 = vmul.f32 %v1109_v17, %v1652_v40  ;;  %v528_v55 = vmul.f32 %v1112_v20, %v1652_v40 }
  0x2b   : > { %v529_v52 = vmul.f32 %v1113_v24, %v1652_v40  ;;  %v530_v59 = vmul.f32 %v1116_v29, %v1652_v40  ;;  %v531_v13 = vmul.f32 %v1117_v30, %v1652_v40  ;;  %v532_v7 = vmul.f32 %v1120_v35, %v1652_v40 }
  0x2c   : > { %v1683_v17 = vrot.slane %v519_v26, %v523_v14  ;;  %v533_v10 = vmul.f32 %v1121_v36, %v1652_v40  ;;  %v534_v20 = vmul.f32 %v1124_v41, %v1652_v40  ;;  %v535_v15 = vmul.f32 %v1125_v42, %v1652_v40 }
  0x2d   : > { %v536_v24 = vmul.f32 %v1128_v47, %v1652_v40  ;;  %v537_v6 = vmul.f32 %v1129_v48, %v1652_v40  ;;  %v538_v14 = vmul.f32 %v1132_v53, %v1652_v40  ;;  %v539_v21 = vmul.f32 %v1133_v54, %v1652_v40 }
  0x2e   : > { %v564_v26 = vadd.f32 %v1683_v17, %v526_v3  ;;  %v565_v27 = vadd.f32 %v1683_v17, %v527_v60  ;;  %v566_v29 = vadd.f32 %v1683_v17, %v528_v55  ;;  %v567_v30 = vadd.f32 %v1683_v17, %v529_v52 }
  0x2f   : > { %v568_v32 = vadd.f32 %v1683_v17, %v530_v59  ;;  %v569_v35 = vadd.f32 %v1683_v17, %v531_v13  ;;  %v570_v36 = vadd.f32 %v1683_v17, %v532_v7  ;;  %v571_v41 = vadd.f32 %v1683_v17, %v533_v10 }
  0x30   : > { %v660_v38 = vadd.f32 %v1172_v19, %v564_v26  ;;  %v661_v42 = vadd.f32 %v1173_v23, %v565_v27  ;;  %v662_v47 = vadd.f32 %v1176_v25, %v566_v29  ;;  %v1894_v48 = vunpack.c.h.bf16 %v1498_v12 }
  0x31   : > { %v1895_v53 = vunpack.c.l.bf16 %v1506_v16  ;;  %v1896_v19 = vunpack.c.h.bf16 %v1506_v16  ;;  %v1897_v23 = vunpack.c.l.bf16 %v1515_v22  ;;  %v1898_v25 = vunpack.c.h.bf16 %v1515_v22 }
  0x32   : > { %v663_v52 = vadd.f32 %v1894_v48, %v567_v30  ;;  %v1237_v18 = vpack.c.bf16 %v661_v42, %v660_v38  ;;  %v572_v60 = vadd.f32 %v1683_v17, %v534_v20  ;;  %v573_v59 = vadd.f32 %v1683_v17, %v535_v15 }
  0x33   : > { %v664_v54 = vadd.f32 %v1895_v53, %v568_v32  ;;  %v665_v9 = vadd.f32 %v1896_v19, %v569_v35  ;;  %v666_v55 = vadd.f32 %v1897_v23, %v570_v36  ;;  %v667_v12 = vadd.f32 %v1898_v25, %v571_v41 }
  0x34   : > { %v1242_v3 = vpack.c.bf16 %v663_v52, %v662_v47  ;;  %v574_v10 = vadd.f32 %v1683_v17, %v536_v24  ;;  %v575_v16 = vadd.f32 %v1683_v17, %v537_v6  ;;  %1238 = vst [vmem:[%s1726_s20] sm:$0xff] %v1237_v18   ;;  %v1899_v26 = vunpack.c.l.bf16 %v1525_v28 }
  0x35   : > { %v1247_v13 = vpack.c.bf16 %v665_v9, %v664_v54  ;;  %v1252_v7 = vpack.c.bf16 %v667_v12, %v666_v55  ;;  %v1900_v27 = vunpack.c.h.bf16 %v1525_v28  ;;  %v576_v30 = vadd.f32 %v1683_v17, %v538_v14 }
  0x36   : > { %1344 = vst [vmem:[%s1726_s20 + $0x8] sm:$0xff] %v1242_v3   ;;  %v668_v22 = vadd.f32 %v1899_v26, %v572_v60  ;;  %v577_v20 = vadd.f32 %v1683_v17, %v539_v21  ;;  %v1901_v15 = vunpack.c.l.bf16 %v1534_v33  ;;  %v1902_v6 = vunpack.c.h.bf16 %v1534_v33 }
  0x37   : > { %v669_v29 = vadd.f32 %v1900_v27, %v573_v59  ;;  %1345 = vst [vmem:[%s1726_s20 + $0x10] sm:$0xff] %v1247_v13   ;;  %1346 = vst [vmem:[%s1726_s20 + $0x18] sm:$0xff] %v1252_v7   ;;  %v1903_v35 = vunpack.c.l.bf16 %v1551_v44  ;;  %v1904_v28 = vunpack.c.h.bf16 %v1551_v44  ;;  %v1905_v21 = vunpack.c.l.bf16 %v1544_v39 }
  0x38   : > { %v670_v24 = vadd.f32 %v1901_v15, %v574_v10  ;;  %v671_v32 = vadd.f32 %v1902_v6, %v575_v16  ;;  %v1906_v42 = vunpack.c.h.bf16 %v1544_v39  ;;  %v1907_v33 = vunpack.c.l.bf16 %v1561_v50 }
  0x39   : > { %v540_v36 = vmul.f32 %v1903_v35, %v1652_v40  ;;  %v541_v14 = vmul.f32 %v1904_v28, %v1652_v40  ;;  %v1257_v41 = vpack.c.bf16 %v669_v29, %v668_v22  ;;  %v672_v38 = vadd.f32 %v1905_v21, %v576_v30 }
  0x3a   : > { %v673_v47 = vadd.f32 %v1906_v42, %v577_v20  ;;  %v542_v48 = vmul.f32 %v1907_v33, %v1652_v40  ;;  %v1262_v52 = vpack.c.bf16 %v671_v32, %v670_v24  ;;  %v1908_v44 = vunpack.c.h.bf16 %v1561_v50 }
  0x3b   : > { %v578_v53 = vadd.f32 %v1683_v17, %v540_v36  ;;  %v579_v54 = vadd.f32 %v1683_v17, %v541_v14  ;;  %1347 = vst [vmem:[%s1726_s20 + $0x20] sm:$0xff] %v1257_v41   ;;  %v1909_v39 = vunpack.c.l.bf16 %v1571_v56  ;;  %v1910_v25 = vunpack.c.h.bf16 %v1571_v56 }
  0x3c   : > { %v543_v19 = vmul.f32 %v1908_v44, %v1652_v40  ;;  %v1267_v9 = vpack.c.bf16 %v673_v47, %v672_v38  ;;  %v580_v23 = vadd.f32 %v1683_v17, %v542_v48  ;;  %1348 = vst [vmem:[%s1726_s20 + $0x28] sm:$0xff] %v1262_v52   ;;  %v1911_v18 = vunpack.c.l.bf16 %v1554_v45 }
  0x3d   : > { %v544_v55 = vmul.f32 %v1909_v39, %v1652_v40  ;;  %v545_v12 = vmul.f32 %v1910_v25, %v1652_v40  ;;  %v1912_v60 = vunpack.c.h.bf16 %v1554_v45  ;;  %v1913_v13 = vunpack.c.l.bf16 %v1581_v62 }
  0x3e   : > { %v674_v3 = vadd.f32 %v1911_v18, %v578_v53  ;;  %v581_v59 = vadd.f32 %v1683_v17, %v543_v19  ;;  %1349 = vst [vmem:[%s1726_s20 + $0x30] sm:$0xff] %v1267_v9   ;;  %v1914_v10 = vunpack.c.l.bf16 %v1564_v51  ;;  %v1915_v22 = vunpack.c.h.bf16 %v1581_v62 }
  0x3f   : > { %v675_v50 = vadd.f32 %v1912_v60, %v579_v54  ;;  %v546_v7 = vmul.f32 %v1913_v13, %v1652_v40  ;;  %v582_v56 = vadd.f32 %v1683_v17, %v544_v55  ;;  %v583_v26 = vadd.f32 %v1683_v17, %v545_v12 }
  0x40   : > { %v676_v16 = vadd.f32 %v1914_v10, %v580_v23  ;;  %v547_v45 = vmul.f32 %v1915_v22, %v1652_v40  ;;  %v1916_v29 = vunpack.c.h.bf16 %v1564_v51  ;;  %v1917_v15 = vunpack.c.l.bf16 %v1591_v5 }
  0x41   : > { %v1272_v27 = vpack.c.bf16 %v675_v50, %v674_v3  ;;  %v584_v20 = vadd.f32 %v1683_v17, %v546_v7  ;;  %v1918_v6 = vunpack.c.l.bf16 %v1574_v57  ;;  %v1919_v35 = vunpack.c.h.bf16 %v1574_v57 }
  0x42   : > { %v677_v30 = vadd.f32 %v1916_v29, %v581_v59  ;;  %v548_v24 = vmul.f32 %v1917_v15, %v1652_v40  ;;  %v585_v62 = vadd.f32 %v1683_v17, %v547_v45  ;;  %v1920_v28 = vunpack.c.h.bf16 %v1591_v5 }
  0x43   : > { %v678_v32 = vadd.f32 %v1918_v6, %v582_v56  ;;  %v679_v36 = vadd.f32 %v1919_v35, %v583_v26  ;;  %1350 = vst [vmem:[%s1726_s20 + $0x38] sm:$0xff] %v1272_v27   ;;  %v1921_v41 = vunpack.c.l.bf16 %v1584_v63  ;;  %v1922_v42 = vunpack.c.l.bf16 %v1601_v1 }
  0x44   : > { %v549_v51 = vmul.f32 %v1920_v28, %v1652_v40  ;;  %v1277_v14 = vpack.c.bf16 %v677_v30, %v676_v16  ;;  %v586_v38 = vadd.f32 %v1683_v17, %v548_v24  ;;  %v1923_v33 = vunpack.c.h.bf16 %v1584_v63 }
  0x45   : > { %v680_v21 = vadd.f32 %v1921_v41, %v584_v20  ;;  %v550_v47 = vmul.f32 %v1922_v42, %v1652_v40  ;;  %v1282_v57 = vpack.c.bf16 %v679_v36, %v678_v32  ;;  %v1924_v5 = vunpack.c.h.bf16 %v1601_v1 }
  0x46   : > { %v681_v48 = vadd.f32 %v1923_v33, %v585_v62  ;;  %v587_v52 = vadd.f32 %v1683_v17, %v549_v51  ;;  %1351 = vst [vmem:[%s1726_s20 + $0x40] sm:$0xff] %v1277_v14   ;;  %v1925_v54 = vunpack.c.l.bf16 %v1594_v8  ;;  %v1926_v9 = vunpack.c.l.bf16 %v1614_v61 }
  0x47   : > { %v551_v53 = vmul.f32 %v1924_v5, %v1652_v40  ;;  %v588_v19 = vadd.f32 %v1683_v17, %v550_v47  ;;  %v1927_v63 = vunpack.c.h.bf16 %v1614_v61  ;;  %1352 = vst [vmem:[%s1726_s20 + $0x48] sm:$0xff] %v1282_v57   ;;  %v1928_v1 = vunpack.c.h.bf16 %v1594_v8 }
  0x48   : > { %v682_v44 = vadd.f32 %v1925_v54, %v586_v38  ;;  %v552_v23 = vmul.f32 %v1926_v9, %v1652_v40  ;;  %v1287_v55 = vpack.c.bf16 %v681_v48, %v680_v21  ;;  %v1929_v18 = vunpack.c.l.bf16 %v1624_v49 }
  0x49   : > { %v553_v39 = vmul.f32 %v1927_v63, %v1652_v40  ;;  %v683_v25 = vadd.f32 %v1928_v1, %v587_v52  ;;  %v589_v12 = vadd.f32 %v1683_v17, %v551_v53  ;;  %v1930_v60 = vunpack.c.l.bf16 %v1604_v58 }
  0x4a   : > { %v554_v3 = vmul.f32 %v1929_v18, %v1652_v40  ;;  %v590_v59 = vadd.f32 %v1683_v17, %v552_v23  ;;  %v555_v13 = vmul.f32 %v1165_v11, %v1652_v40  ;;  %1353 = vst [vmem:[%s1726_s20 + $0x50] sm:$0xff] %v1287_v55   ;;  %v1931_v7 = vunpack.c.h.bf16 %v1604_v58 }
  0x4b   : > { %v684_v50 = vadd.f32 %v1930_v60, %v588_v19  ;;  %v591_v61 = vadd.f32 %v1683_v17, %v553_v39  ;;  %v1292_v8 = vpack.c.bf16 %v683_v25, %v682_v44  ;;  %v556_v56 = vmul.f32 %v1168_v31, %v1652_v40 }
  0x4c   : > { %v685_v10 = vadd.f32 %v1931_v7, %v589_v12  ;;  %v592_v16 = vadd.f32 %v1683_v17, %v554_v3  ;;  %v1932_v26 = vunpack.c.l.bf16 %v1621_v2  ;;  %v1933_v45 = vunpack.c.h.bf16 %v1621_v2 }
  0x4d   : > { %v593_v11 = vadd.f32 %v1683_v17, %v555_v13  ;;  %v557_v58 = vmul.f32 %v1169_v46, %v1652_v40  ;;  %1354 = vst [vmem:[%s1726_s20 + $0x58] sm:$0xff] %v1292_v8   ;;  %v1934_v29 = vunpack.c.l.bf16 %v1631_v43  ;;  %v594_v31 = vadd.f32 %v1683_v17, %v556_v56 }
  0x4e   : > { %v686_v22 = vadd.f32 %v1932_v26, %v590_v59  ;;  %v687_v49 = vadd.f32 %v1933_v45, %v591_v61  ;;  %v1297_v27 = vpack.c.bf16 %v685_v10, %v684_v50  ;;  %v1935_v15 = vunpack.c.h.bf16 %v1631_v43 }
  0x4f   : > { %v688_v30 = vadd.f32 %v1934_v29, %v592_v16  ;;  %v595_v24 = vadd.f32 %v1683_v17, %v557_v58  ;;  %v690_v6 = vadd.f32 %v1232_v0, %v594_v31 }
  0x50   : > { %v1302_v20 = vpack.c.bf16 %v687_v49, %v686_v22  ;;  %v689_v2 = vadd.f32 %v1935_v15, %v593_v11  ;;  %1355 = vst [vmem:[%s1726_s20 + $0x60] sm:$0xff] %v1297_v27  }
  0x51   : > { %v691_v40 = vadd.f32 %v1233_v4, %v595_v24 }
  0x52   : > { %1356 = vst [vmem:[%s1726_s20 + $0x68] sm:$0xff] %v1302_v20   ;;  %v1307_v37 = vpack.c.bf16 %v689_v2, %v688_v30 }
  0x53   : > { %v1312_v46 = vpack.c.bf16 %v691_v40, %v690_v6 }
  0x54   : > { %1357 = vst [vmem:[%s1726_s20 + $0x70] sm:$0xff] %v1307_v37  }
  0x55   : > { %1358 = vst [vmem:[%s1726_s20 + $0x78] sm:$0xff] %v1312_v46  }
  0x56 PF: > { %s16_s23 = sadd.s32 1, %s1407_s23   ;;  %s1936_s21 = smov %s1403_s22 }
  0x57   : > { %p13_p5 = scmp.ge.s32.totalorder %s16_s23, 4   ;;  %s1937_s22 = smov %s1939_s24 }
  0x59   :  { %15 = sbr.rel (!%p13_p5) target bundleno = 2 (0x2), region = 89 }

// kernel: generator_nchw.67
= control target key start
LH: loop header
LB: loop body
LE: loop exit
PB: predicated region body
PF: predicated region fallthrough
CT: control target
= control target key end

     0   :  { %s479_s9 = smov 0   ;;  %s481_s10 = smov 0   ;;  %s525_s0 = inlined_call_operand.vmem [shape: bf16[2,64,128], index: 0, kind: input, shape index: {}]   ;;  %s526_s1 = inlined_call_operand.vmem [shape: f32[2,1,128], index: 1, kind: output, shape index: {0}]   ;;  %s527_s2 = inlined_call_operand.vmem [shape: f32[2,1,128], index: 2, kind: output, shape index: {1}]  }
   0x1   :  { %s483_s11 = smov 0  }
   0x2 LB: > { %s32_s12 = sadd.s32 1, %s457_s10  ;;  %p389_p0 = scmp.ge.s32.totalorder %s461_s11, 1  ;;  %s461_s11 = sphi %s483_s11, %s13_s11   ;;  %s457_s10 = sphi %s481_s10, %s529_s10   ;;  %s453_s9 = sphi %s479_s9, %s528_s9  }
   0x3   : > { %p34_p1 = scmp.ge.s32.totalorder %s32_s12, 2  ;;  %p150_p2 = scmp.lt.s32.totalorder %s461_s11, 3 }
   0x5   : > { %s531_s12 = smov (%p34_p1, %s32_s12), 0  ;;  %p151_p3 = pnand %p389_p0, %p150_p2 }
   0x6   : > { %p187_p4 = scmp.lt.s32.totalorder (!%p151_p3), %s453_s9, 1  ;;  %v463_v0 = vmov (!%p151_p3), 0.0  }
   0x7   : > { %154 = sbr.rel (%p151_p3) target bundleno = 51 (0x33), region = 24 }
   0xe   : > { %s533_s9 = smov (!%p187_p4, %s453_s9), 1 }
   0xf   : > { %s394_s13 = sshll.u32 %s533_s9, 5  ;;  %s500_s16 = scalar_lea.vmem %s526_s1, %s533_s9 }
  0x10   : > { %s197_s19 = scalar_lea.vmem %s525_s0, %s394_s13  ;;  %215 = vst [vmem:[%s500_s16] sm:$0x1] %v463_v0  ;;  %s509_s22 = scalar_lea.vmem %s527_s2, %s533_s9 }
  0x11   : > { %v396_v1 = vld [vmem:[%s197_s19] sm:$0xff]   ;;  %v411_v2 = vld [vmem:[%s197_s19 + $0x8] sm:$0xff]   ;;  %v412_v3 = vld [vmem:[%s197_s19 + $0x10] sm:$0xff]   ;;  %216 = vst [vmem:[%s509_s22] sm:$0x1] %v463_v0 }
  0x12   : > { %v397_v4 = vunpack.c.l.bf16 %v396_v1  ;;  %v398_v5 = vunpack.c.h.bf16 %v396_v1  ;;  %v401_v6 = vunpack.c.l.bf16 %v411_v2  ;;  %v402_v7 = vunpack.c.h.bf16 %v411_v2  ;;  %v413_v13 = vld [vmem:[%s197_s19 + $0x18] sm:$0xff]  }
  0x13   : > { %v405_v8 = vunpack.c.l.bf16 %v412_v3  ;;  %v406_v14 = vunpack.c.h.bf16 %v412_v3  ;;  %v409_v18 = vunpack.c.l.bf16 %v413_v13  ;;  %v410_v25 = vunpack.c.h.bf16 %v413_v13 }
  0x14   : > { %v234_v9 = vadd.f32 %v398_v5, %v397_v4  ;;  %v250_v10 = vmul.f32 %v397_v4, %v397_v4  ;;  %v251_v11 = vmul.f32 %v398_v5, %v398_v5  ;;  %v252_v12 = vmul.f32 %v401_v6, %v401_v6 }
  0x15   : > { %v253_v16 = vmul.f32 %v402_v7, %v402_v7  ;;  %v254_v20 = vmul.f32 %v405_v8, %v405_v8  ;;  %v255_v23 = vmul.f32 %v406_v14, %v406_v14  ;;  %v256_v27 = vmul.f32 %v409_v18, %v409_v18 }
  0x16   : > { %v235_v15 = vadd.f32 %v401_v6, %v234_v9  ;;  %v258_v17 = vadd.f32 %v251_v11, %v250_v10  ;;  %v257_v30 = vmul.f32 %v410_v25, %v410_v25 }
  0x17   : > { %v233_v44 = vld [vmem:[%s500_s16] sm:$0x1] }
  0x18   : > { %v236_v19 = vadd.f32 %v402_v7, %v235_v15  ;;  %v259_v21 = vadd.f32 %v258_v17, %v252_v12  ;;  %v249_v47 = vld [vmem:[%s509_s22] sm:$0x1] }
  0x1a   : > { %v237_v22 = vadd.f32 %v405_v8, %v236_v19  ;;  %v260_v24 = vadd.f32 %v259_v21, %v253_v16 }
  0x1c   : > { %v238_v26 = vadd.f32 %v406_v14, %v237_v22  ;;  %v261_v28 = vadd.f32 %v260_v24, %v254_v20 }
  0x1e   : > { %v239_v29 = vadd.f32 %v409_v18, %v238_v26  ;;  %v262_v31 = vadd.f32 %v261_v28, %v255_v23 }
  0x20   : > { %v240_v32 = vadd.f32 %v410_v25, %v239_v29  ;;  %v263_v33 = vadd.f32 %v262_v31, %v256_v27 }
  0x22   : > { %v241_v34 = vrot.slane %v240_v32, 4  ;;  %v264_v35 = vadd.f32 %v263_v33, %v257_v30 }
  0x24   : > { %v242_v36 = vadd.f32 %v241_v34, %v240_v32  ;;  %v265_v37 = vrot.slane %v264_v35, 4 }
  0x26   : > { %v243_v38 = vrot.slane %v242_v36, 2  ;;  %v266_v39 = vadd.f32 %v265_v37, %v264_v35 }
  0x28   : > { %v244_v40 = vadd.f32 %v243_v38, %v242_v36  ;;  %v267_v41 = vrot.slane %v266_v39, 2 }
  0x2a   : > { %v245_v42 = vrot.slane %v244_v40, 1  ;;  %v268_v43 = vadd.f32 %v267_v41, %v266_v39 }
  0x2c   : > { %v246_v45 = vadd.f32 %v245_v42, %v244_v40  ;;  %v269_v46 = vrot.slane %v268_v43, 1 }
  0x2e   : > { %v247_v48 = vadd.f32 %v246_v45, %v233_v44  ;;  %v270_v49 = vadd.f32 %v269_v46, %v268_v43 }
  0x30   : > { %248 = vst [vmem:[%s500_s16] sm:$0x1] %v247_v48  ;;  %v271_v50 = vadd.f32 %v270_v49, %v249_v47 }
  0x32   : > { %272 = vst [vmem:[%s509_s22] sm:$0x1] %v271_v50 }
  0x33 PF: > { %s13_s11 = sadd.s32 1, %s461_s11   ;;  %s528_s9 = smov %s457_s10 }
  0x34   : > { %p10_p5 = scmp.ge.s32.totalorder %s13_s11, 4   ;;  %s529_s10 = smov %s531_s12 }
  0x36   :  { %12 = sbr.rel (!%p10_p5) target bundleno = 2 (0x2), region = 70 }

// kernel: generator_nchw.68
= control target key start
LH: loop header
LB: loop body
LE: loop exit
PB: predicated region body
PF: predicated region fallthrough
CT: control target
= control target key end

     0   :  { %s778_s18 = smov 0   ;;  %s780_s19 = smov 0   ;;  %s832_s0 = inlined_call_operand.vmem [shape: bf16[2,64,128], index: 0, kind: input, shape index: {}]   ;;  %s833_s1 = inlined_call_operand.vmem [shape: f32[2,1,128], index: 1, kind: input, shape index: {}]   ;;  %s834_s2 = inlined_call_operand.vmem [shape: f32[2,1,128], index: 2, kind: input, shape index: {}]   ;;  %s835_s3 = inlined_call_operand.vmem [shape: f32[1,128], index: 3, kind: input, shape index: {}]   ;;  %s836_s4 = inlined_call_operand.vmem [shape: f32[1,128], index: 4, kind: input, shape index: {}]   ;;  %s837_s5 = inlined_call_operand.vmem [shape: bf16[2,64,128], index: 5, kind: output, shape index: {}]  }
   0x1   :  { %s782_s20 = smov 0  }
   0x2 LB: > { %s34_s21 = sadd.s32 1, %s742_s19  ;;  %p631_p0 = scmp.ge.s32.totalorder %s746_s20, 1  ;;  %s746_s20 = sphi %s782_s20, %s15_s20   ;;  %s742_s19 = sphi %s780_s19, %s839_s19   ;;  %s738_s18 = sphi %s778_s18, %s838_s18  }
   0x3   : > { %p36_p1 = scmp.ge.s32.totalorder %s34_s21, 2  ;;  %p264_p2 = scmp.lt.s32.totalorder %s746_s20, 3 }
   0x5   : > { %s841_s21 = smov (%p36_p1, %s34_s21), 0  ;;  %p265_p3 = pnand %p631_p0, %p264_p2 }
   0x6   : > { %p325_p4 = scmp.lt.s32.totalorder (!%p265_p3), %s738_s18, 1  ;;  %v399_v8 = vlaneseq (!%p265_p3)  ;;  %v386_v11 = vld [vmem:[%s835_s3] sm:$0x1] (!%p265_p3) }
   0x7   : > { %268 = sbr.rel (%p265_p3) target bundleno = 54 (0x36), region = 40  ;;  %v387_v21 = vld [vmem:[%s836_s4] sm:$0x1] (!%p265_p3) }
   0x8   : > { %v400_v9 = vshrl.u32 (!%p265_p3), %v399_v8, 7 }
   0xa   : > { %v401_v13 = vsub.s32 (!%p265_p3), 0, %v400_v9 }
   0xe   : > { %s843_s18 = smov (!%p325_p4, %s738_s18), 1 }
   0xf   : > { %s342_s24 = scalar_lea.vmem %s833_s1, %s843_s18  ;;  %s348_s27 = scalar_lea.vmem %s834_s2, %s843_s18 }
  0x10   : > { %v384_v0 = vld [vmem:[%s342_s24] sm:$0x1]  ;;  %s646_s28 = sshll.u32 %s843_s18, 5 }
  0x11   : > { %v385_v1 = vld [vmem:[%s348_s27] sm:$0x1]  ;;  %v388_v2 = vmul.f32 0.015625, %v384_v0  ;;  %s335_s6 = scalar_lea.vmem %s832_s0, %s646_s28  ;;  %s366_s13 = scalar_lea.vmem %s837_s5, %s646_s28 }
  0x12   : > { %v389_v3 = vmul.f32 0.015625, %v385_v1  ;;  %v657_v10 = vld [vmem:[%s335_s6] sm:$0xff]   ;;  %v692_v12 = vld [vmem:[%s335_s6 + $0x8] sm:$0xff]   ;;  %v693_v14 = vld [vmem:[%s335_s6 + $0x10] sm:$0xff]  }
  0x13   : > { %v390_v4 = vmul.f32 %v388_v2, %v388_v2  ;;  %v694_v15 = vld [vmem:[%s335_s6 + $0x18] sm:$0xff]   ;;  %v658_v17 = vunpack.c.l.bf16 %v657_v10  ;;  %v659_v18 = vunpack.c.h.bf16 %v657_v10  ;;  %v662_v20 = vunpack.c.l.bf16 %v692_v12 }
  0x14   : > { %v663_v22 = vunpack.c.h.bf16 %v692_v12  ;;  %v666_v23 = vunpack.c.l.bf16 %v693_v14  ;;  %v667_v24 = vunpack.c.h.bf16 %v693_v14  ;;  %v670_v25 = vunpack.c.l.bf16 %v694_v15 }
  0x15   : > { %v391_v5 = vsub.f32 %v389_v3, %v390_v4  ;;  %v671_v28 = vunpack.c.h.bf16 %v694_v15 }
  0x17   : > { %v392_v6 = vmax.f32 %v391_v5, 0.0 }
  0x19   : > { %v393_v7 = vadd.f32 1e-05, %v392_v6 }
  0x1b   : > { %722 = vrsqrt.f32 %v393_v7 }
  0x25   : > { %v723_v16 = vpop.eup %722 }
  0x26   : > { %v395_v19 = vmul.f32 %v723_v16, %v386_v11 }
  0x28   : > { %v396_v26 = vmul.f32 %v395_v19, %v388_v2  ;;  %v402_v27 = vrot.slane %v395_v19, %v401_v13 }
  0x2a   : > { %v397_v29 = vsub.f32 %v387_v21, %v396_v26  ;;  %v404_v30 = vmul.f32 %v658_v17, %v402_v27  ;;  %v405_v31 = vmul.f32 %v659_v18, %v402_v27  ;;  %v406_v32 = vmul.f32 %v662_v20, %v402_v27 }
  0x2b   : > { %v407_v33 = vmul.f32 %v663_v22, %v402_v27  ;;  %v408_v34 = vmul.f32 %v666_v23, %v402_v27  ;;  %v409_v35 = vmul.f32 %v667_v24, %v402_v27  ;;  %v410_v36 = vmul.f32 %v670_v25, %v402_v27 }
  0x2c   : > { %v416_v37 = vrot.slane %v397_v29, %v401_v13  ;;  %v411_v38 = vmul.f32 %v671_v28, %v402_v27 }
  0x2e   : > { %v418_v39 = vadd.f32 %v416_v37, %v404_v30  ;;  %v419_v40 = vadd.f32 %v416_v37, %v405_v31  ;;  %v420_v41 = vadd.f32 %v416_v37, %v406_v32  ;;  %v421_v42 = vadd.f32 %v416_v37, %v407_v33 }
  0x2f   : > { %v422_v43 = vadd.f32 %v416_v37, %v408_v34  ;;  %v423_v44 = vadd.f32 %v416_v37, %v409_v35  ;;  %v424_v45 = vadd.f32 %v416_v37, %v410_v36  ;;  %v425_v46 = vadd.f32 %v416_v37, %v411_v38 }
  0x30   : > { %v426_v47 = vmax.f32 %v418_v39, 0.0  ;;  %v427_v48 = vmax.f32 %v419_v40, 0.0  ;;  %v428_v49 = vmax.f32 %v420_v41, 0.0  ;;  %v429_v50 = vmax.f32 %v421_v42, 0.0 }
  0x31   : > { %v430_v51 = vmax.f32 %v422_v43, 0.0  ;;  %v431_v52 = vmax.f32 %v423_v44, 0.0  ;;  %v432_v53 = vmax.f32 %v424_v45, 0.0  ;;  %v433_v54 = vmax.f32 %v425_v46, 0.0 }
  0x32   : > { %v675_v55 = vpack.c.bf16 %v427_v48, %v426_v47  ;;  %v680_v56 = vpack.c.bf16 %v429_v50, %v428_v49 }
  0x33   : > { %v685_v57 = vpack.c.bf16 %v431_v52, %v430_v51  ;;  %v690_v58 = vpack.c.bf16 %v433_v54, %v432_v53 }
  0x34   : > { %676 = vst [vmem:[%s366_s13] sm:$0xff] %v675_v55   ;;  %695 = vst [vmem:[%s366_s13 + $0x8] sm:$0xff] %v680_v56  }
  0x35   : > { %696 = vst [vmem:[%s366_s13 + $0x10] sm:$0xff] %v685_v57   ;;  %697 = vst [vmem:[%s366_s13 + $0x18] sm:$0xff] %v690_v58  }
  0x36 PF: > { %s15_s20 = sadd.s32 1, %s746_s20   ;;  %s838_s18 = smov %s742_s19 }
  0x37   : > { %p12_p5 = scmp.ge.s32.totalorder %s15_s20, 4   ;;  %s839_s19 = smov %s841_s21 }
  0x39   :  { %14 = sbr.rel (!%p12_p5) target bundleno = 2 (0x2), region = 82 }

// kernel: generator_nchw.66
= control target key start
LH: loop header
LB: loop body
LE: loop exit
PB: predicated region body
PF: predicated region fallthrough
CT: control target
= control target key end

     0   :  { %s2415_s1 = inlined_call_operand.vmem [shape: bf16[1024,128], index: 1, kind: input, shape index: {}]   ;;  %s2416_s0 = inlined_call_operand.vmem [shape: bf16[128,1024], index: 0, kind: input, shape index: {}]   ;;  %s2417_s2 = inlined_call_operand.vmem [shape: f32[1,128], index: 2, kind: input, shape index: {}]   ;;  %s2418_s3 = inlined_call_operand.vmem [shape: bf16[128,128], index: 3, kind: output, shape index: {}]  }
   0x1   :  { %v1854_v0 = vld [vmem:[%s2415_s1 + $0x40] sm:$0xff]   ;;  %v1858_v4 = vld [vmem:[%s2415_s1 + $0x48] sm:$0xff]   ;;  %v1862_v8 = vld [vmem:[%s2415_s1 + $0x50] sm:$0xff]  }
   0x2   :  { %v1855_v1 = vld [vmem:[%s2415_s1 + $0xc0] sm:$0xff]   ;;  %1598 = vmatprep.subr.bf16.mxu0 %v1854_v0  ;;  %v1859_v5 = vld [vmem:[%s2415_s1 + $0xc8] sm:$0xff]   ;;  %v1863_v9 = vld [vmem:[%s2415_s1 + $0xd0] sm:$0xff]  }
   0x3   :  { %v1856_v2 = vld [vmem:[%s2415_s1] sm:$0xff]   ;;  %1662 = vmatprep.subr.bf16.mxu1 %v1855_v1  ;;  %v1860_v6 = vld [vmem:[%s2415_s1 + $0x8] sm:$0xff]   ;;  %v1864_v10 = vld [vmem:[%s2415_s1 + $0x10] sm:$0xff]  }
   0x4   :  { %v1857_v3 = vld [vmem:[%s2415_s1 + $0x80] sm:$0xff]   ;;  %1599 = vmatpush3.bf16.msra.mxu0 %v1856_v2  ;;  %v1861_v7 = vld [vmem:[%s2415_s1 + $0x88] sm:$0xff]   ;;  %v1865_v11 = vld [vmem:[%s2415_s1 + $0x90] sm:$0xff]  }
   0x5   :  { %1663 = vmatpush3.bf16.msra.mxu1 %v1857_v3  ;;  %1600 = vmatprep.subr.bf16.mxu0 %v1858_v4  ;;  %v1866_v12 = vld [vmem:[%s2415_s1 + $0x58] sm:$0xff]   ;;  %v1870_v16 = vld [vmem:[%s2415_s1 + $0x60] sm:$0xff]   ;;  %v1874_v20 = vld [vmem:[%s2415_s1 + $0x68] sm:$0xff]  }
   0x6   :  { %1664 = vmatprep.subr.bf16.mxu1 %v1859_v5  ;;  %v1867_v13 = vld [vmem:[%s2415_s1 + $0xd8] sm:$0xff]   ;;  %v1871_v17 = vld [vmem:[%s2415_s1 + $0xe0] sm:$0xff]   ;;  %v1875_v21 = vld [vmem:[%s2415_s1 + $0xe8] sm:$0xff]  }
   0x7   :  { %v1868_v14 = vld [vmem:[%s2415_s1 + $0x18] sm:$0xff]   ;;  %v1872_v18 = vld [vmem:[%s2415_s1 + $0x20] sm:$0xff]   ;;  %v1876_v22 = vld [vmem:[%s2415_s1 + $0x28] sm:$0xff]  }
   0x8   :  { %1601 = vmatpush3.bf16.msra.mxu0 %v1860_v6  ;;  %v1869_v15 = vld [vmem:[%s2415_s1 + $0x98] sm:$0xff]   ;;  %v1873_v19 = vld [vmem:[%s2415_s1 + $0xa0] sm:$0xff]   ;;  %v1877_v23 = vld [vmem:[%s2415_s1 + $0xa8] sm:$0xff]  }
   0x9   :  { %1665 = vmatpush3.bf16.msra.mxu1 %v1861_v7  ;;  %1602 = vmatprep.subr.bf16.mxu0 %v1862_v8  ;;  %v1878_v24 = vld [vmem:[%s2415_s1 + $0x70] sm:$0xff]   ;;  %v1882_v28 = vld [vmem:[%s2415_s1 + $0x78] sm:$0xff]   ;;  %v15_v32 = vld [vmem:[%s2416_s0] sm:$0xff] }
   0xa   :  { %1666 = vmatprep.subr.bf16.mxu1 %v1863_v9  ;;  %v1879_v25 = vld [vmem:[%s2415_s1 + $0xf0] sm:$0xff]   ;;  %v1883_v29 = vld [vmem:[%s2415_s1 + $0xf8] sm:$0xff]   ;;  %v19_v33 = vld [vmem:[%s2416_s0 + $0x20] sm:$0xff] }
   0xb   :  { %v1880_v26 = vld [vmem:[%s2415_s1 + $0x30] sm:$0xff]   ;;  %v1884_v30 = vld [vmem:[%s2415_s1 + $0x38] sm:$0xff]   ;;  %v16_v34 = vld [vmem:[%s2416_s0 + $0x8] sm:$0xff]  ;;  %v1391_v35 = vcombine.low %v15_v32, %v19_v33  ;;  %v1392_v36 = vcombine.high %v15_v32, %v19_v33 }
   0xc   :  { %1603 = vmatpush3.bf16.msra.mxu0 %v1864_v10  ;;  %v1881_v27 = vld [vmem:[%s2415_s1 + $0xb0] sm:$0xff]   ;;  %v1885_v31 = vld [vmem:[%s2415_s1 + $0xb8] sm:$0xff]   ;;  %v20_v37 = vld [vmem:[%s2416_s0 + $0x28] sm:$0xff] }
   0xd   :  { %1667 = vmatpush3.bf16.msra.mxu1 %v1865_v11  ;;  %1604 = vmatprep.subr.bf16.mxu0 %v1866_v12  ;;  %v1393_v38 = vcombine.low %v16_v34, %v20_v37  ;;  %v1394_v39 = vcombine.high %v16_v34, %v20_v37  ;;  %v1886_v40 = vld [vmem:[%s2415_s1 + $0x140] sm:$0xff]   ;;  %v24_v47 = vld [vmem:[%s2416_s0 + $0x48] sm:$0xff]  ;;  %v1894_v62 = vld [vmem:[%s2415_s1 + $0x150] sm:$0xff]  }
   0xe   :  { %1668 = vmatprep.subr.bf16.mxu1 %v1867_v13  ;;  %950 = vmatprep.mubr.bf16.mxu0 %v1392_v36  ;;  %v1887_v41 = vld [vmem:[%s2415_s1 + $0x100] sm:$0xff]   ;;  %v28_v48 = vld [vmem:[%s2416_s0 + $0x68] sm:$0xff]  ;;  %v1895_v63 = vld [vmem:[%s2415_s1 + $0x110] sm:$0xff]  }
   0xf   :  { %1047 = vmatprep.mubr.bf16.mxu1 %v1394_v39  ;;  %v1888_v42 = vld [vmem:[%s2415_s1 + $0x1c0] sm:$0xff]   ;;  %v1402_v49 = vcombine.high %v24_v47, %v28_v48  ;;  %v1890_v50 = vld [vmem:[%s2415_s1 + $0x148] sm:$0xff]   ;;  %v1401_v53 = vcombine.low %v24_v47, %v28_v48  ;;  %v1896_v0 = vld [vmem:[%s2415_s1 + $0x1d0] sm:$0xff]  }
  0x10   :  { %1605 = vmatpush3.bf16.msra.mxu0 %v1868_v14  ;;  %v1889_v43 = vld [vmem:[%s2415_s1 + $0x180] sm:$0xff]   ;;  %v1891_v52 = vld [vmem:[%s2415_s1 + $0x108] sm:$0xff]   ;;  %v1897_v1 = vld [vmem:[%s2415_s1 + $0x190] sm:$0xff]  }
  0x11   :  { %1669 = vmatpush3.bf16.msra.mxu1 %v1869_v15  ;;  %1606 = vmatprep.subr.bf16.mxu0 %v1870_v16  ;;  %v23_v44 = vld [vmem:[%s2416_s0 + $0x40] sm:$0xff]  ;;  %v1892_v54 = vld [vmem:[%s2415_s1 + $0x1c8] sm:$0xff]   ;;  %v1898_v10 = vld [vmem:[%s2415_s1 + $0x158] sm:$0xff]  }
  0x12   :  { %1670 = vmatprep.subr.bf16.mxu1 %v1871_v17  ;;  %v27_v45 = vld [vmem:[%s2416_s0 + $0x60] sm:$0xff]  ;;  %v1893_v55 = vld [vmem:[%s2415_s1 + $0x188] sm:$0xff]   ;;  %v1899_v11 = vld [vmem:[%s2415_s1 + $0x118] sm:$0xff]  }
  0x13   :  { %v1400_v46 = vcombine.high %v23_v44, %v27_v45  ;;  %v1399_v51 = vcombine.low %v23_v44, %v27_v45  ;;  %v31_v56 = vld [vmem:[%s2416_s0 + $0x80] sm:$0xff]  ;;  %v32_v58 = vld [vmem:[%s2416_s0 + $0x88] sm:$0xff]  ;;  %v1900_v12 = vld [vmem:[%s2415_s1 + $0x1d8] sm:$0xff]  }
  0x14   :  { %1607 = vmatpush3.bf16.msra.mxu0 %v1872_v18  ;;  %v35_v57 = vld [vmem:[%s2416_s0 + $0xa0] sm:$0xff]  ;;  %v36_v59 = vld [vmem:[%s2416_s0 + $0xa8] sm:$0xff]  ;;  %v1901_v13 = vld [vmem:[%s2415_s1 + $0x198] sm:$0xff]  }
  0x15   :  { %1671 = vmatpush3.bf16.msra.mxu1 %v1873_v19  ;;  %1608 = vmatprep.subr.bf16.mxu0 %v1874_v20  ;;  %v1408_v60 = vcombine.high %v31_v56, %v35_v57  ;;  %v1410_v61 = vcombine.high %v32_v58, %v36_v59  ;;  %v1407_v2 = vcombine.low %v31_v56, %v35_v57  ;;  %v39_v3 = vld [vmem:[%s2416_s0 + $0xc0] sm:$0xff]  ;;  %v40_v5 = vld [vmem:[%s2416_s0 + $0xc8] sm:$0xff]  ;;  %v1911_v39 = vld [vmem:[%s2415_s1 + $0x130] sm:$0xff]  }
  0x16   :  { %1672 = vmatprep.subr.bf16.mxu1 %v1875_v21  ;;  %v43_v4 = vld [vmem:[%s2416_s0 + $0xe0] sm:$0xff]  ;;  %v1409_v6 = vcombine.low %v32_v58, %v36_v59  ;;  %v44_v8 = vld [vmem:[%s2416_s0 + $0xe8] sm:$0xff]  ;;  %v1915_v48 = vld [vmem:[%s2415_s1 + $0x138] sm:$0xff]  }
  0x17   :  { %v1416_v7 = vcombine.high %v39_v3, %v43_v4  ;;  %v1418_v9 = vcombine.high %v40_v5, %v44_v8  ;;  %v47_v14 = vld [vmem:[%s2416_s0 + $0x100] sm:$0xff]  ;;  %v48_v16 = vld [vmem:[%s2416_s0 + $0x108] sm:$0xff]  ;;  %v1415_v19 = vcombine.low %v39_v3, %v43_v4  ;;  %v1417_v21 = vcombine.low %v40_v5, %v44_v8  ;;  %v26_v8 = vld [vmem:[%s2416_s0 + $0x58] sm:$0xff] }
  0x18   :  { %1609 = vmatpush3.bf16.msra.mxu0 %v1876_v22  ;;  %v51_v15 = vld [vmem:[%s2416_s0 + $0x120] sm:$0xff]  ;;  %v52_v17 = vld [vmem:[%s2416_s0 + $0x128] sm:$0xff] }
  0x19   :  { %1673 = vmatpush3.bf16.msra.mxu1 %v1877_v23  ;;  %1610 = vmatprep.subr.bf16.mxu0 %v1878_v24  ;;  %v1902_v18 = vld [vmem:[%s2415_s1 + $0x160] sm:$0xff]   ;;  %v1424_v22 = vcombine.high %v47_v14, %v51_v15  ;;  %v1426_v24 = vcombine.high %v48_v16, %v52_v17  ;;  %v1908_v32 = vld [vmem:[%s2415_s1 + $0x1e8] sm:$0xff]   ;;  %v1423_v34 = vcombine.low %v47_v14, %v51_v15  ;;  %v33_v14 = vld [vmem:[%s2416_s0 + $0x90] sm:$0xff] }
  0x1a   :  { %1674 = vmatprep.subr.bf16.mxu1 %v1879_v25  ;;  %v1903_v20 = vld [vmem:[%s2415_s1 + $0x120] sm:$0xff]   ;;  %v1909_v33 = vld [vmem:[%s2415_s1 + $0x1a8] sm:$0xff]   ;;  %v37_v15 = vld [vmem:[%s2416_s0 + $0xb0] sm:$0xff] }
  0x1b   :  { %v1904_v23 = vld [vmem:[%s2415_s1 + $0x1e0] sm:$0xff]   ;;  %v64_v44 = vld [vmem:[%s2416_s0 + $0x188] sm:$0xff] }
  0x1c   :  { %1611 = vmatpush3.bf16.msra.mxu0 %v1880_v26  ;;  %v1905_v25 = vld [vmem:[%s2415_s1 + $0x1a0] sm:$0xff]   ;;  %v68_v45 = vld [vmem:[%s2416_s0 + $0x1a8] sm:$0xff] }
  0x1d   :  { %1675 = vmatpush3.bf16.msra.mxu1 %v1881_v27  ;;  %1612 = vmatprep.subr.bf16.mxu0 %v1882_v28  ;;  %v55_v26 = vld [vmem:[%s2416_s0 + $0x140] sm:$0xff]  ;;  %v1906_v28 = vld [vmem:[%s2415_s1 + $0x168] sm:$0xff]   ;;  %v1441_v59 = vcombine.low %v64_v44, %v68_v45 }
  0x1e   :  { %1676 = vmatprep.subr.bf16.mxu1 %v1883_v29  ;;  %v59_v27 = vld [vmem:[%s2416_s0 + $0x160] sm:$0xff]  ;;  %v56_v29 = vld [vmem:[%s2416_s0 + $0x148] sm:$0xff] }
  0x1f   :  { %v1432_v36 = vcombine.high %v55_v26, %v59_v27  ;;  %v1431_v47 = vcombine.low %v55_v26, %v59_v27  ;;  %v72_v56 = vld [vmem:[%s2416_s0 + $0x1c8] sm:$0xff]  ;;  %v1411_v26 = vcombine.low %v33_v14, %v37_v15 }
  0x20   :  { %1613 = vmatpush3.bf16.msra.mxu0 %v1884_v30  ;;  %v60_v30 = vld [vmem:[%s2416_s0 + $0x168] sm:$0xff] }
  0x21   :  { %1677 = vmatpush3.bf16.msra.mxu1 %v1885_v31  ;;  %1726 = vmatprep.subr.bf16.mxu0 %v1886_v40  ;;  %v1907_v31 = vld [vmem:[%s2415_s1 + $0x128] sm:$0xff]   ;;  %v1434_v37 = vcombine.high %v56_v29, %v60_v30  ;;  %v1912_v40 = vld [vmem:[%s2415_s1 + $0x1f0] sm:$0xff]  }
  0x22   :  { %1790 = vmatprep.subr.bf16.mxu1 %v1888_v42  ;;  %v67_v42 = vld [vmem:[%s2416_s0 + $0x1a0] sm:$0xff]  ;;  %v76_v57 = vld [vmem:[%s2416_s0 + $0x1e8] sm:$0xff] }
  0x23   :  { %951 = vmatmul.mubr.bf16.vlgmr.msra.gmra.mrb[0].mxu0 %v1391_v35  ;;  %v1425_v35 = vcombine.low %v48_v16, %v52_v17  ;;  %v1449_v3 = vcombine.low %v72_v56, %v76_v57  ;;  %v34_v16 = vld [vmem:[%s2416_s0 + $0x98] sm:$0xff] }
  0x24   :  { %1048 = vmatmul.mubr.bf16.vlgmr.msra.gmra.mrb[0].mxu1 %v1393_v38  ;;  %1727 = vmatpush3.bf16.msra.mxu0 %v1887_v41  ;;  %v1910_v38 = vld [vmem:[%s2415_s1 + $0x170] sm:$0xff]   ;;  %v63_v41 = vld [vmem:[%s2416_s0 + $0x180] sm:$0xff]  ;;  %v38_v17 = vld [vmem:[%s2416_s0 + $0xb8] sm:$0xff] }
  0x25   :  { %1791 = vmatpush3.bf16.msra.mxu1 %v1889_v43  ;;  %958 = vmatprep.mubr.bf16.mxu0 %v1400_v46  ;;  %v1913_v43 = vld [vmem:[%s2415_s1 + $0x1b0] sm:$0xff]   ;;  %v1914_v46 = vld [vmem:[%s2415_s1 + $0x178] sm:$0xff]   ;;  %v1439_v58 = vcombine.low %v63_v41, %v67_v42  ;;  %v1413_v27 = vcombine.low %v34_v16, %v38_v17 }
  0x26   :  { %1055 = vmatprep.mubr.bf16.mxu1 %v1402_v49  ;;  %1728 = vmatprep.subr.bf16.mxu0 %v1890_v50  ;;  %v1433_v49 = vcombine.low %v56_v29, %v60_v30  ;;  %v1440_v50 = vcombine.high %v63_v41, %v67_v42  ;;  %v49_v30 = vld [vmem:[%s2416_s0 + $0x110] sm:$0xff]  ;;  %v62_v41 = vld [vmem:[%s2416_s0 + $0x178] sm:$0xff] }
  0x27   :  { %1792 = vmatprep.subr.bf16.mxu1 %v1892_v54  ;;  %v71_v54 = vld [vmem:[%s2416_s0 + $0x1c0] sm:$0xff] }
  0x28   :  { %1729 = vmatpush3.bf16.msra.mxu0 %v1891_v52  ;;  %v1442_v52 = vcombine.high %v64_v44, %v68_v45 }
  0x29   :  { %1793 = vmatpush3.bf16.msra.mxu1 %v1893_v55  ;;  %1730 = vmatprep.subr.bf16.mxu0 %v1894_v62  ;;  %v75_v55 = vld [vmem:[%s2416_s0 + $0x1e0] sm:$0xff]  ;;  %v17_v62 = vld [vmem:[%s2416_s0 + $0x10] sm:$0xff] }
  0x2a   :  { %1794 = vmatprep.subr.bf16.mxu1 %v1896_v0  ;;  %v18_v0 = vld [vmem:[%s2416_s0 + $0x18] sm:$0xff] }
  0x2b   :  { %959 = vmatmul.mubr.bf16.gmra.mrb[4].mxu0 %v1399_v51  ;;  %v1916_v51 = vld [vmem:[%s2415_s1 + $0x1f8] sm:$0xff]  }
  0x2c   :  { %1056 = vmatmul.mubr.bf16.gmra.mrb[4].mxu1 %v1401_v53  ;;  %966 = vmatprep.mubr.bf16.mxu0 %v1408_v60  ;;  %v1917_v53 = vld [vmem:[%s2415_s1 + $0x1b8] sm:$0xff]   ;;  %v1448_v60 = vcombine.high %v71_v54, %v75_v55 }
  0x2d   :  { %1063 = vmatprep.mubr.bf16.mxu1 %v1410_v61  ;;  %1731 = vmatpush3.bf16.msra.mxu0 %v1895_v63  ;;  %v1450_v61 = vcombine.high %v72_v56, %v76_v57  ;;  %v21_v63 = vld [vmem:[%s2416_s0 + $0x30] sm:$0xff]  ;;  %v74_v56 = vld [vmem:[%s2416_s0 + $0x1d8] sm:$0xff] }
  0x2e   :  { %1795 = vmatpush3.bf16.msra.mxu1 %v1897_v1  ;;  %1732 = vmatprep.subr.bf16.mxu0 %v1898_v10  ;;  %v22_v1 = vld [vmem:[%s2416_s0 + $0x38] sm:$0xff]  ;;  %v1396_v4 = vcombine.high %v17_v62, %v21_v63  ;;  %v1395_v10 = vcombine.low %v17_v62, %v21_v63 }
  0x2f   :  { %1796 = vmatprep.subr.bf16.mxu1 %v1900_v12  ;;  %v1398_v5 = vcombine.high %v18_v0, %v22_v1  ;;  %v78_v57 = vld [vmem:[%s2416_s0 + $0x1f8] sm:$0xff] }
  0x30   :  { %v1453_v63 = vcombine.low %v74_v56, %v78_v57 }
  0x31   :  { %1733 = vmatpush3.bf16.msra.mxu0 %v1899_v11  ;;  %v1397_v11 = vcombine.low %v18_v0, %v22_v1 }
  0x32   :  { %1797 = vmatpush3.bf16.msra.mxu1 %v1901_v13  ;;  %1734 = vmatprep.subr.bf16.mxu0 %v1902_v18 }
  0x33   :  { %967 = vmatmul.mubr.bf16.gmra.mrb[8].mxu0 %v1407_v2  ;;  %1798 = vmatprep.subr.bf16.mxu1 %v1904_v23  ;;  %v1447_v2 = vcombine.low %v71_v54, %v75_v55  ;;  %v45_v23 = vld [vmem:[%s2416_s0 + $0xf0] sm:$0xff] }
  0x34   :  { %1064 = vmatmul.mubr.bf16.gmra.mrb[8].mxu1 %v1409_v6  ;;  %974 = vmatprep.mubr.bf16.mxu0 %v1416_v7  ;;  %v25_v6 = vld [vmem:[%s2416_s0 + $0x50] sm:$0xff] }
  0x35   :  { %1071 = vmatprep.mubr.bf16.mxu1 %v1418_v9  ;;  %1735 = vmatpush3.bf16.msra.mxu0 %v1903_v20  ;;  %v29_v7 = vld [vmem:[%s2416_s0 + $0x70] sm:$0xff]  ;;  %v30_v9 = vld [vmem:[%s2416_s0 + $0x78] sm:$0xff]  ;;  %v1412_v20 = vcombine.high %v33_v14, %v37_v15 }
  0x36   :  { %1799 = vmatpush3.bf16.msra.mxu1 %v1905_v25  ;;  %1736 = vmatprep.subr.bf16.mxu0 %v1906_v28  ;;  %v1404_v12 = vcombine.high %v25_v6, %v29_v7  ;;  %v1406_v13 = vcombine.high %v26_v8, %v30_v9  ;;  %v1403_v18 = vcombine.low %v25_v6, %v29_v7  ;;  %v46_v25 = vld [vmem:[%s2416_s0 + $0xf8] sm:$0xff]  ;;  %v73_v54 = vld [vmem:[%s2416_s0 + $0x1d0] sm:$0xff] }
  0x37   :  { %1800 = vmatprep.subr.bf16.mxu1 %v1908_v32  ;;  %v50_v32 = vld [vmem:[%s2416_s0 + $0x118] sm:$0xff]  ;;  %v77_v55 = vld [vmem:[%s2416_s0 + $0x1f0] sm:$0xff] }
  0x38   :  { %v1451_v62 = vcombine.low %v73_v54, %v77_v55 }
  0x39   :  { %1737 = vmatpush3.bf16.msra.mxu0 %v1907_v31  ;;  %v53_v31 = vld [vmem:[%s2416_s0 + $0x130] sm:$0xff] }
  0x3a   :  { %1801 = vmatpush3.bf16.msra.mxu1 %v1909_v33  ;;  %1738 = vmatprep.subr.bf16.mxu0 %v1910_v38  ;;  %v54_v33 = vld [vmem:[%s2416_s0 + $0x138] sm:$0xff]  ;;  %v57_v38 = vld [vmem:[%s2416_s0 + $0x150] sm:$0xff]  ;;  %v1427_v42 = vcombine.low %v49_v30, %v53_v31 }
  0x3b   :  { %975 = vmatmul.mubr.bf16.gmra.mrb[12].mxu0 %v1415_v19  ;;  %1802 = vmatprep.subr.bf16.mxu1 %v1912_v40  ;;  %v1405_v19 = vcombine.low %v26_v8, %v30_v9  ;;  %v58_v40 = vld [vmem:[%s2416_s0 + $0x158] sm:$0xff] }
  0x3c   :  { %1072 = vmatmul.mubr.bf16.gmra.mrb[12].mxu1 %v1417_v21  ;;  %982 = vmatprep.mubr.bf16.mxu0 %v1424_v22  ;;  %v1414_v21 = vcombine.high %v34_v16, %v38_v17  ;;  %v41_v22 = vld [vmem:[%s2416_s0 + $0xd0] sm:$0xff]  ;;  %v1438_v45 = vcombine.high %v58_v40, %v62_v41 }
  0x3d   :  { %1079 = vmatprep.mubr.bf16.mxu1 %v1426_v24  ;;  %1739 = vmatpush3.bf16.msra.mxu0 %v1911_v39  ;;  %v42_v24 = vld [vmem:[%s2416_s0 + $0xd8] sm:$0xff]  ;;  %v1420_v28 = vcombine.high %v41_v22, %v45_v23  ;;  %v61_v39 = vld [vmem:[%s2416_s0 + $0x170] sm:$0xff] }
  0x3e   :  { %1803 = vmatpush3.bf16.msra.mxu1 %v1913_v43  ;;  %1740 = vmatprep.subr.bf16.mxu0 %v1914_v46  ;;  %v1422_v29 = vcombine.high %v42_v24, %v46_v25  ;;  %v1429_v43 = vcombine.low %v50_v32, %v54_v33  ;;  %v1436_v44 = vcombine.high %v57_v38, %v61_v39  ;;  %v65_v46 = vld [vmem:[%s2416_s0 + $0x190] sm:$0xff] }
  0x3f   :  { %1804 = vmatprep.subr.bf16.mxu1 %v1916_v51  ;;  %v1437_v51 = vcombine.low %v58_v40, %v62_v41 }
  0x41   :  { %1741 = vmatpush3.bf16.msra.mxu0 %v1915_v48  ;;  %v66_v48 = vld [vmem:[%s2416_s0 + $0x198] sm:$0xff] }
  0x42   :  { %1805 = vmatpush3.bf16.msra.mxu1 %v1917_v53 }
  0x43   :  { %983 = vmatmul.mubr.bf16.gmra.mrb[16].mxu0 %v1423_v34  ;;  %v1419_v34 = vcombine.low %v41_v22, %v45_v23 }
  0x44   :  { %1080 = vmatmul.mubr.bf16.gmra.mrb[16].mxu1 %v1425_v35  ;;  %990 = vmatprep.mubr.bf16.mxu0 %v1432_v36  ;;  %v1421_v35 = vcombine.low %v42_v24, %v46_v25  ;;  %v1428_v36 = vcombine.high %v49_v30, %v53_v31 }
  0x45   :  { %1087 = vmatprep.mubr.bf16.mxu1 %v1434_v37  ;;  %v1430_v37 = vcombine.high %v50_v32, %v54_v33 }
  0x4b   :  { %991 = vmatmul.mubr.bf16.gmra.mrb[20].mxu0 %v1431_v47  ;;  %v69_v47 = vld [vmem:[%s2416_s0 + $0x1b0] sm:$0xff] }
  0x4c   :  { %1088 = vmatmul.mubr.bf16.gmra.mrb[20].mxu1 %v1433_v49  ;;  %998 = vmatprep.mubr.bf16.mxu0 %v1440_v50  ;;  %v70_v49 = vld [vmem:[%s2416_s0 + $0x1b8] sm:$0xff]  ;;  %v1435_v50 = vcombine.low %v57_v38, %v61_v39 }
  0x4d   :  { %1095 = vmatprep.mubr.bf16.mxu1 %v1442_v52  ;;  %v1444_v52 = vcombine.high %v65_v46, %v69_v47  ;;  %v1446_v53 = vcombine.high %v66_v48, %v70_v49 }
  0x53   :  { %999 = vmatmul.mubr.bf16.gmra.mrb[24].mxu0 %v1439_v58  ;;  %v1443_v58 = vcombine.low %v65_v46, %v69_v47 }
  0x54   :  { %1096 = vmatmul.mubr.bf16.gmra.mrb[24].mxu1 %v1441_v59  ;;  %1006 = vmatprep.mubr.bf16.mxu0 %v1448_v60  ;;  %v1445_v59 = vcombine.low %v66_v48, %v70_v49  ;;  %v1452_v60 = vcombine.high %v73_v54, %v77_v55 }
  0x55   :  { %1103 = vmatprep.mubr.bf16.mxu1 %v1450_v61  ;;  %v1454_v61 = vcombine.high %v74_v56, %v78_v57 }
  0x5b   :  { %1007 = vmatmul.mubr.bf16.gmra.mrb[28].mxu0 %v1447_v2  ;;  %v2325_v2 = vld [vmem:[%s2417_s2] ss:$0 sm:$0xff] }
  0x5c   :  { %1104 = vmatmul.mubr.bf16.gmra.mrb[28].mxu1 %v1449_v3  ;;  %1144 = vmatprep.mubr.bf16.mxu0 %v1396_v4 }
  0x5d   :  { %1241 = vmatprep.mubr.bf16.mxu1 %v1398_v5 }
  0x63   :  { %1145 = vmatmul.mubr.bf16.vlgmr.msra.gmra.mrb[32].mxu0 %v1395_v10 }
  0x64   :  { %1242 = vmatmul.mubr.bf16.vlgmr.msra.gmra.mrb[32].mxu1 %v1397_v11  ;;  %1152 = vmatprep.mubr.bf16.mxu0 %v1404_v12 }
  0x65   :  { %1249 = vmatprep.mubr.bf16.mxu1 %v1406_v13 }
  0x6b   :  { %1153 = vmatmul.mubr.bf16.gmra.mrb[36].mxu0 %v1403_v18 }
  0x6c   :  { %1250 = vmatmul.mubr.bf16.gmra.mrb[36].mxu1 %v1405_v19  ;;  %1160 = vmatprep.mubr.bf16.mxu0 %v1412_v20 }
  0x6d   :  { %1257 = vmatprep.mubr.bf16.mxu1 %v1414_v21 }
  0x73   :  { %1161 = vmatmul.mubr.bf16.gmra.mrb[40].mxu0 %v1411_v26 }
  0x74   :  { %1258 = vmatmul.mubr.bf16.gmra.mrb[40].mxu1 %v1413_v27  ;;  %1168 = vmatprep.mubr.bf16.mxu0 %v1420_v28 }
  0x75   :  { %1265 = vmatprep.mubr.bf16.mxu1 %v1422_v29 }
  0x7b   :  { %1169 = vmatmul.mubr.bf16.gmra.mrb[44].mxu0 %v1419_v34 }
  0x7c   :  { %1266 = vmatmul.mubr.bf16.gmra.mrb[44].mxu1 %v1421_v35  ;;  %1176 = vmatprep.mubr.bf16.mxu0 %v1428_v36 }
  0x7d   :  { %1273 = vmatprep.mubr.bf16.mxu1 %v1430_v37 }
  0x83   :  { %1177 = vmatmul.mubr.bf16.gmra.mrb[48].mxu0 %v1427_v42 }
  0x84   :  { %1274 = vmatmul.mubr.bf16.gmra.mrb[48].mxu1 %v1429_v43  ;;  %1184 = vmatprep.mubr.bf16.mxu0 %v1436_v44 }
  0x85   :  { %1281 = vmatprep.mubr.bf16.mxu1 %v1438_v45 }
  0x8b   :  { %1185 = vmatmul.mubr.bf16.gmra.mrb[52].mxu0 %v1435_v50 }
  0x8c   :  { %1282 = vmatmul.mubr.bf16.gmra.mrb[52].mxu1 %v1437_v51  ;;  %1192 = vmatprep.mubr.bf16.mxu0 %v1444_v52 }
  0x8d   :  { %1289 = vmatprep.mubr.bf16.mxu1 %v1446_v53 }
  0x93   :  { %1193 = vmatmul.mubr.bf16.gmra.mrb[56].mxu0 %v1443_v58 }
  0x94   :  { %1290 = vmatmul.mubr.bf16.gmra.mrb[56].mxu1 %v1445_v59  ;;  %1200 = vmatprep.mubr.bf16.mxu0 %v1452_v60 }
  0x95   :  { %1297 = vmatprep.mubr.bf16.mxu1 %v1454_v61 }
  0x9b   :  { %1201 = vmatmul.mubr.bf16.gmra.mrb[60].mxu0 %v1451_v62 }
  0x9c   :  { %1298 = vmatmul.mubr.bf16.gmra.mrb[60].mxu1 %v1453_v63 }
  0xf6   :  { %v1614_v0 = vpop.f32.mrb[0].mxu0 }
  0xf7   :  { %v1678_v1 = vpop.f32.mrb[0].mxu1  ;;  %v1615_v3 = vpop.f32.mrb[1].mxu0 }
  0xf8   :  { %v1616_v4 = vadd.f32 %v1615_v3, %v1614_v0  ;;  %v1679_v5 = vpop.f32.mrb[1].mxu1  ;;  %v1617_v6 = vpop.f32.mrb[2].mxu0 }
  0xf9   :  { %v1680_v7 = vadd.f32 %v1679_v5, %v1678_v1  ;;  %v1681_v8 = vpop.f32.mrb[2].mxu1  ;;  %v1618_v9 = vpop.f32.mrb[3].mxu0 }
  0xfa   :  { %v953_v10 = vadd.f32 %v1616_v4, %v2325_v2  ;;  %v1619_v11 = vadd.f32 %v1618_v9, %v1617_v6  ;;  %v1682_v12 = vpop.f32.mrb[3].mxu1 }
  0xfb   :  { %v1683_v13 = vadd.f32 %v1682_v12, %v1681_v8 }
  0xfc   :  { %v2328_v14 = vadd.f32 %v1680_v7, %v953_v10  ;;  %v956_v15 = vadd.f32 %v1619_v11, %v2325_v2 }
  0xfe   :  { %v2331_v16 = vadd.f32 %v1683_v13, %v956_v15  ;;  %v1620_v17 = vpop.f32.mrb[4].mxu0 }
  0xff   :  { %v1684_v18 = vpop.f32.mrb[4].mxu1  ;;  %v1621_v19 = vpop.f32.mrb[5].mxu0 }
 0x100   :  { %v1622_v20 = vadd.f32 %v1621_v19, %v1620_v17  ;;  %v1685_v21 = vpop.f32.mrb[5].mxu1  ;;  %v1623_v22 = vpop.f32.mrb[6].mxu0 }
 0x101   :  { %v1686_v23 = vadd.f32 %v1685_v21, %v1684_v18  ;;  %v1687_v24 = vpop.f32.mrb[6].mxu1  ;;  %v1624_v25 = vpop.f32.mrb[7].mxu0 }
 0x102   :  { %v961_v26 = vadd.f32 %v1622_v20, %v2325_v2  ;;  %v1625_v27 = vadd.f32 %v1624_v25, %v1623_v22  ;;  %v1688_v28 = vpop.f32.mrb[7].mxu1 }
 0x103   :  { %v1689_v29 = vadd.f32 %v1688_v28, %v1687_v24 }
 0x104   :  { %v2334_v30 = vadd.f32 %v1686_v23, %v961_v26  ;;  %v964_v31 = vadd.f32 %v1625_v27, %v2325_v2 }
 0x106   :  { %v2337_v32 = vadd.f32 %v1689_v29, %v964_v31  ;;  %v1626_v33 = vpop.f32.mrb[8].mxu0 }
 0x107   :  { %v1690_v34 = vpop.f32.mrb[8].mxu1  ;;  %v1627_v35 = vpop.f32.mrb[9].mxu0 }
 0x108   :  { %v1628_v36 = vadd.f32 %v1627_v35, %v1626_v33  ;;  %v1691_v37 = vpop.f32.mrb[9].mxu1  ;;  %v1629_v38 = vpop.f32.mrb[10].mxu0 }
 0x109   :  { %v1692_v39 = vadd.f32 %v1691_v37, %v1690_v34  ;;  %v1693_v40 = vpop.f32.mrb[10].mxu1  ;;  %v1630_v41 = vpop.f32.mrb[11].mxu0 }
 0x10a   :  { %v969_v42 = vadd.f32 %v1628_v36, %v2325_v2  ;;  %v1631_v43 = vadd.f32 %v1630_v41, %v1629_v38  ;;  %v1694_v44 = vpop.f32.mrb[11].mxu1 }
 0x10b   :  { %v1695_v45 = vadd.f32 %v1694_v44, %v1693_v40 }
 0x10c   :  { %v2340_v46 = vadd.f32 %v1692_v39, %v969_v42  ;;  %v972_v47 = vadd.f32 %v1631_v43, %v2325_v2 }
 0x10e   :  { %v2343_v48 = vadd.f32 %v1695_v45, %v972_v47  ;;  %v1632_v49 = vpop.f32.mrb[12].mxu0 }
 0x10f   :  { %v1696_v50 = vpop.f32.mrb[12].mxu1  ;;  %v1633_v51 = vpop.f32.mrb[13].mxu0 }
 0x110   :  { %v1634_v52 = vadd.f32 %v1633_v51, %v1632_v49  ;;  %v1697_v53 = vpop.f32.mrb[13].mxu1  ;;  %v1635_v54 = vpop.f32.mrb[14].mxu0 }
 0x111   :  { %v1698_v55 = vadd.f32 %v1697_v53, %v1696_v50  ;;  %v1699_v56 = vpop.f32.mrb[14].mxu1  ;;  %v1636_v57 = vpop.f32.mrb[15].mxu0 }
 0x112   :  { %v977_v58 = vadd.f32 %v1634_v52, %v2325_v2  ;;  %v1637_v59 = vadd.f32 %v1636_v57, %v1635_v54  ;;  %v1700_v60 = vpop.f32.mrb[15].mxu1 }
 0x113   :  { %v1701_v61 = vadd.f32 %v1700_v60, %v1699_v56 }
 0x114   :  { %v2346_v62 = vadd.f32 %v1698_v55, %v977_v58  ;;  %v980_v63 = vadd.f32 %v1637_v59, %v2325_v2 }
 0x116   :  { %v2349_v0 = vadd.f32 %v1701_v61, %v980_v63  ;;  %v1638_v1 = vpop.f32.mrb[16].mxu0 }
 0x117   :  { %v1702_v3 = vpop.f32.mrb[16].mxu1  ;;  %v1639_v4 = vpop.f32.mrb[17].mxu0 }
 0x118   :  { %v1640_v5 = vadd.f32 %v1639_v4, %v1638_v1  ;;  %v1703_v6 = vpop.f32.mrb[17].mxu1  ;;  %v1641_v7 = vpop.f32.mrb[18].mxu0 }
 0x119   :  { %v1704_v8 = vadd.f32 %v1703_v6, %v1702_v3  ;;  %v1705_v9 = vpop.f32.mrb[18].mxu1  ;;  %v1642_v10 = vpop.f32.mrb[19].mxu0 }
 0x11a   :  { %v985_v11 = vadd.f32 %v1640_v5, %v2325_v2  ;;  %v1643_v12 = vadd.f32 %v1642_v10, %v1641_v7  ;;  %v1706_v13 = vpop.f32.mrb[19].mxu1 }
 0x11b   :  { %v1707_v15 = vadd.f32 %v1706_v13, %v1705_v9 }
 0x11c   :  { %v2352_v17 = vadd.f32 %v1704_v8, %v985_v11  ;;  %v988_v18 = vadd.f32 %v1643_v12, %v2325_v2 }
 0x11e   :  { %v2355_v19 = vadd.f32 %v1707_v15, %v988_v18  ;;  %v1644_v20 = vpop.f32.mrb[20].mxu0 }
 0x11f   :  { %v1708_v21 = vpop.f32.mrb[20].mxu1  ;;  %v1645_v22 = vpop.f32.mrb[21].mxu0 }
 0x120   :  { %v1646_v23 = vadd.f32 %v1645_v22, %v1644_v20  ;;  %v1709_v24 = vpop.f32.mrb[21].mxu1  ;;  %v1647_v25 = vpop.f32.mrb[22].mxu0 }
 0x121   :  { %v1710_v26 = vadd.f32 %v1709_v24, %v1708_v21  ;;  %v1711_v27 = vpop.f32.mrb[22].mxu1  ;;  %v1648_v28 = vpop.f32.mrb[23].mxu0 }
 0x122   :  { %v993_v29 = vadd.f32 %v1646_v23, %v2325_v2  ;;  %v1649_v31 = vadd.f32 %v1648_v28, %v1647_v25  ;;  %v1712_v33 = vpop.f32.mrb[23].mxu1 }
 0x123   :  { %v1713_v34 = vadd.f32 %v1712_v33, %v1711_v27 }
 0x124   :  { %v2358_v35 = vadd.f32 %v1710_v26, %v993_v29  ;;  %v996_v36 = vadd.f32 %v1649_v31, %v2325_v2 }
 0x126   :  { %v2361_v37 = vadd.f32 %v1713_v34, %v996_v36  ;;  %v1650_v38 = vpop.f32.mrb[24].mxu0 }
 0x127   :  { %v1714_v39 = vpop.f32.mrb[24].mxu1  ;;  %v1651_v40 = vpop.f32.mrb[25].mxu0 }
 0x128   :  { %v1652_v41 = vadd.f32 %v1651_v40, %v1650_v38  ;;  %v1715_v42 = vpop.f32.mrb[25].mxu1  ;;  %v1653_v43 = vpop.f32.mrb[26].mxu0 }
 0x129   :  { %v1716_v44 = vadd.f32 %v1715_v42, %v1714_v39  ;;  %v1717_v45 = vpop.f32.mrb[26].mxu1  ;;  %v1654_v47 = vpop.f32.mrb[27].mxu0 }
 0x12a   :  { %v1001_v49 = vadd.f32 %v1652_v41, %v2325_v2  ;;  %v1655_v50 = vadd.f32 %v1654_v47, %v1653_v43  ;;  %v1718_v51 = vpop.f32.mrb[27].mxu1 }
 0x12b   :  { %v1719_v52 = vadd.f32 %v1718_v51, %v1717_v45 }
 0x12c   :  { %v2364_v53 = vadd.f32 %v1716_v44, %v1001_v49  ;;  %v1004_v54 = vadd.f32 %v1655_v50, %v2325_v2 }
 0x12e   :  { %v2367_v55 = vadd.f32 %v1719_v52, %v1004_v54  ;;  %v1656_v56 = vpop.f32.mrb[28].mxu0 }
 0x12f   :  { %v1720_v57 = vpop.f32.mrb[28].mxu1  ;;  %v1657_v58 = vpop.f32.mrb[29].mxu0 }
 0x130   :  { %v1658_v59 = vadd.f32 %v1657_v58, %v1656_v56  ;;  %v1721_v60 = vpop.f32.mrb[29].mxu1  ;;  %v1659_v61 = vpop.f32.mrb[30].mxu0 }
 0x131   :  { %v1722_v63 = vadd.f32 %v1721_v60, %v1720_v57  ;;  %v1723_v1 = vpop.f32.mrb[30].mxu1  ;;  %v1660_v3 = vpop.f32.mrb[31].mxu0 }
 0x132   :  { %v1009_v4 = vadd.f32 %v1658_v59, %v2325_v2  ;;  %v1661_v5 = vadd.f32 %v1660_v3, %v1659_v61  ;;  %v1724_v6 = vpop.f32.mrb[31].mxu1 }
 0x133   :  { %v1725_v7 = vadd.f32 %v1724_v6, %v1723_v1 }
 0x134   :  { %v2370_v8 = vadd.f32 %v1722_v63, %v1009_v4  ;;  %v1012_v9 = vadd.f32 %v1661_v5, %v2325_v2 }
 0x136   :  { %v2373_v10 = vadd.f32 %v1725_v7, %v1012_v9  ;;  %v1742_v11 = vpop.f32.mrb[32].mxu0 }
 0x137   :  { %v1806_v12 = vpop.f32.mrb[32].mxu1  ;;  %v1743_v13 = vpop.f32.mrb[33].mxu0 }
 0x138   :  { %v1744_v15 = vadd.f32 %v1743_v13, %v1742_v11  ;;  %v1807_v18 = vpop.f32.mrb[33].mxu1  ;;  %v1745_v20 = vpop.f32.mrb[34].mxu0 }
 0x139   :  { %v1808_v21 = vadd.f32 %v1807_v18, %v1806_v12  ;;  %v1809_v22 = vpop.f32.mrb[34].mxu1  ;;  %v1746_v23 = vpop.f32.mrb[35].mxu0 }
 0x13a   :  { %v1147_v24 = vadd.f32 %v1744_v15, %v2328_v14  ;;  %v1747_v25 = vadd.f32 %v1746_v23, %v1745_v20  ;;  %v1810_v26 = vpop.f32.mrb[35].mxu1 }
 0x13b   :  { %v1811_v27 = vadd.f32 %v1810_v26, %v1809_v22 }
 0x13c   :  { %v1244_v28 = vadd.f32 %v1808_v21, %v1147_v24  ;;  %v1150_v29 = vadd.f32 %v1747_v25, %v2331_v16 }
 0x13e   :  { %v1247_v2 = vadd.f32 %v1811_v27, %v1150_v29  ;;  %v1748_v31 = vpop.f32.mrb[36].mxu0 }
 0x13f   :  { %v1812_v33 = vpop.f32.mrb[36].mxu1  ;;  %v1749_v34 = vpop.f32.mrb[37].mxu0 }
 0x140   :  { %v1554_v36 = vpack.c.bf16 %v1247_v2, %v1244_v28  ;;  %v1750_v38 = vadd.f32 %v1749_v34, %v1748_v31  ;;  %v1813_v39 = vpop.f32.mrb[37].mxu1  ;;  %v1751_v40 = vpop.f32.mrb[38].mxu0 }
 0x141   :  { %v1814_v41 = vadd.f32 %v1813_v39, %v1812_v33  ;;  %v1815_v42 = vpop.f32.mrb[38].mxu1  ;;  %v1752_v43 = vpop.f32.mrb[39].mxu0 }
 0x142   :  { %1555 = vst [vmem:[%s2418_s3] sm:$0xff] %v1554_v36   ;;  %v1155_v14 = vadd.f32 %v1750_v38, %v2334_v30  ;;  %v1753_v44 = vadd.f32 %v1752_v43, %v1751_v40  ;;  %v1816_v45 = vpop.f32.mrb[39].mxu1 }
 0x143   :  { %v1817_v16 = vadd.f32 %v1816_v45, %v1815_v42 }
 0x144   :  { %v1252_v47 = vadd.f32 %v1814_v41, %v1155_v14  ;;  %v1158_v49 = vadd.f32 %v1753_v44, %v2337_v32 }
 0x146   :  { %v1255_v50 = vadd.f32 %v1817_v16, %v1158_v49  ;;  %v1754_v51 = vpop.f32.mrb[40].mxu0 }
 0x147   :  { %v1818_v52 = vpop.f32.mrb[40].mxu1  ;;  %v1755_v54 = vpop.f32.mrb[41].mxu0 }
 0x148   :  { %v1559_v56 = vpack.c.bf16 %v1255_v50, %v1252_v47  ;;  %v1756_v57 = vadd.f32 %v1755_v54, %v1754_v51  ;;  %v1819_v58 = vpop.f32.mrb[41].mxu1  ;;  %v1757_v59 = vpop.f32.mrb[42].mxu0 }
 0x149   :  { %v1820_v60 = vadd.f32 %v1819_v58, %v1818_v52  ;;  %v1821_v61 = vpop.f32.mrb[42].mxu1  ;;  %v1758_v63 = vpop.f32.mrb[43].mxu0 }
 0x14a   :  { %1591 = vst [vmem:[%s2418_s3 + $0x8] sm:$0xff] %v1559_v56   ;;  %v1163_v30 = vadd.f32 %v1756_v57, %v2340_v46  ;;  %v1759_v1 = vadd.f32 %v1758_v63, %v1757_v59  ;;  %v1822_v3 = vpop.f32.mrb[43].mxu1 }
 0x14b   :  { %v1823_v32 = vadd.f32 %v1822_v3, %v1821_v61 }
 0x14c   :  { %v1260_v4 = vadd.f32 %v1820_v60, %v1163_v30  ;;  %v1166_v5 = vadd.f32 %v1759_v1, %v2343_v48 }
 0x14e   :  { %v1263_v6 = vadd.f32 %v1823_v32, %v1166_v5  ;;  %v1760_v7 = vpop.f32.mrb[44].mxu0 }
 0x14f   :  { %v1824_v9 = vpop.f32.mrb[44].mxu1  ;;  %v1761_v11 = vpop.f32.mrb[45].mxu0 }
 0x150   :  { %v1564_v12 = vpack.c.bf16 %v1263_v6, %v1260_v4  ;;  %v1762_v13 = vadd.f32 %v1761_v11, %v1760_v7  ;;  %v1825_v15 = vpop.f32.mrb[45].mxu1  ;;  %v1763_v18 = vpop.f32.mrb[46].mxu0 }
 0x151   :  { %v1826_v20 = vadd.f32 %v1825_v15, %v1824_v9  ;;  %v1827_v21 = vpop.f32.mrb[46].mxu1  ;;  %v1764_v22 = vpop.f32.mrb[47].mxu0 }
 0x152   :  { %1592 = vst [vmem:[%s2418_s3 + $0x10] sm:$0xff] %v1564_v12   ;;  %v1171_v46 = vadd.f32 %v1762_v13, %v2346_v62  ;;  %v1765_v23 = vadd.f32 %v1764_v22, %v1763_v18  ;;  %v1828_v24 = vpop.f32.mrb[47].mxu1 }
 0x153   :  { %v1829_v48 = vadd.f32 %v1828_v24, %v1827_v21 }
 0x154   :  { %v1268_v25 = vadd.f32 %v1826_v20, %v1171_v46  ;;  %v1174_v26 = vadd.f32 %v1765_v23, %v2349_v0 }
 0x156   :  { %v1271_v27 = vadd.f32 %v1829_v48, %v1174_v26  ;;  %v1766_v28 = vpop.f32.mrb[48].mxu0 }
 0x157   :  { %v1830_v29 = vpop.f32.mrb[48].mxu1  ;;  %v1767_v2 = vpop.f32.mrb[49].mxu0 }
 0x158   :  { %v1569_v31 = vpack.c.bf16 %v1271_v27, %v1268_v25  ;;  %v1768_v33 = vadd.f32 %v1767_v2, %v1766_v28  ;;  %v1831_v34 = vpop.f32.mrb[49].mxu1  ;;  %v1769_v36 = vpop.f32.mrb[50].mxu0 }
 0x159   :  { %v1832_v38 = vadd.f32 %v1831_v34, %v1830_v29  ;;  %v1833_v39 = vpop.f32.mrb[50].mxu1  ;;  %v1770_v40 = vpop.f32.mrb[51].mxu0 }
 0x15a   :  { %1593 = vst [vmem:[%s2418_s3 + $0x18] sm:$0xff] %v1569_v31   ;;  %v1179_v62 = vadd.f32 %v1768_v33, %v2352_v17  ;;  %v1771_v41 = vadd.f32 %v1770_v40, %v1769_v36  ;;  %v1834_v42 = vpop.f32.mrb[51].mxu1 }
 0x15b   :  { %v1835_v0 = vadd.f32 %v1834_v42, %v1833_v39 }
 0x15c   :  { %v1276_v43 = vadd.f32 %v1832_v38, %v1179_v62  ;;  %v1182_v14 = vadd.f32 %v1771_v41, %v2355_v19 }
 0x15e   :  { %v1279_v44 = vadd.f32 %v1835_v0, %v1182_v14  ;;  %v1772_v45 = vpop.f32.mrb[52].mxu0 }
 0x15f   :  { %v1836_v16 = vpop.f32.mrb[52].mxu1  ;;  %v1773_v47 = vpop.f32.mrb[53].mxu0 }
 0x160   :  { %v1574_v49 = vpack.c.bf16 %v1279_v44, %v1276_v43  ;;  %v1774_v50 = vadd.f32 %v1773_v47, %v1772_v45  ;;  %v1837_v51 = vpop.f32.mrb[53].mxu1  ;;  %v1775_v52 = vpop.f32.mrb[54].mxu0 }
 0x161   :  { %v1838_v54 = vadd.f32 %v1837_v51, %v1836_v16  ;;  %v1839_v56 = vpop.f32.mrb[54].mxu1  ;;  %v1776_v57 = vpop.f32.mrb[55].mxu0 }
 0x162   :  { %1594 = vst [vmem:[%s2418_s3 + $0x20] sm:$0xff] %v1574_v49   ;;  %v1187_v17 = vadd.f32 %v1774_v50, %v2358_v35  ;;  %v1777_v58 = vadd.f32 %v1776_v57, %v1775_v52  ;;  %v1840_v59 = vpop.f32.mrb[55].mxu1 }
 0x163   :  { %v1841_v19 = vadd.f32 %v1840_v59, %v1839_v56 }
 0x164   :  { %v1284_v60 = vadd.f32 %v1838_v54, %v1187_v17  ;;  %v1190_v61 = vadd.f32 %v1777_v58, %v2361_v37 }
 0x166   :  { %v1287_v63 = vadd.f32 %v1841_v19, %v1190_v61  ;;  %v1778_v30 = vpop.f32.mrb[56].mxu0 }
 0x167   :  { %v1842_v1 = vpop.f32.mrb[56].mxu1  ;;  %v1779_v3 = vpop.f32.mrb[57].mxu0 }
 0x168   :  { %v1579_v32 = vpack.c.bf16 %v1287_v63, %v1284_v60  ;;  %v1780_v4 = vadd.f32 %v1779_v3, %v1778_v30  ;;  %v1843_v5 = vpop.f32.mrb[57].mxu1  ;;  %v1781_v6 = vpop.f32.mrb[58].mxu0 }
 0x169   :  { %v1844_v7 = vadd.f32 %v1843_v5, %v1842_v1  ;;  %v1845_v9 = vpop.f32.mrb[58].mxu1  ;;  %v1782_v11 = vpop.f32.mrb[59].mxu0 }
 0x16a   :  { %1595 = vst [vmem:[%s2418_s3 + $0x28] sm:$0xff] %v1579_v32   ;;  %v1195_v35 = vadd.f32 %v1780_v4, %v2364_v53  ;;  %v1783_v12 = vadd.f32 %v1782_v11, %v1781_v6  ;;  %v1846_v13 = vpop.f32.mrb[59].mxu1 }
 0x16b   :  { %v1847_v37 = vadd.f32 %v1846_v13, %v1845_v9 }
 0x16c   :  { %v1292_v15 = vadd.f32 %v1844_v7, %v1195_v35  ;;  %v1198_v18 = vadd.f32 %v1783_v12, %v2367_v55 }
 0x16e   :  { %v1295_v20 = vadd.f32 %v1847_v37, %v1198_v18  ;;  %v1784_v21 = vpop.f32.mrb[60].mxu0 }
 0x16f   :  { %v1848_v22 = vpop.f32.mrb[60].mxu1  ;;  %v1785_v46 = vpop.f32.mrb[61].mxu0 }
 0x170   :  { %v1584_v23 = vpack.c.bf16 %v1295_v20, %v1292_v15  ;;  %v1786_v24 = vadd.f32 %v1785_v46, %v1784_v21  ;;  %v1849_v48 = vpop.f32.mrb[61].mxu1  ;;  %v1787_v25 = vpop.f32.mrb[62].mxu0 }
 0x171   :  { %v1850_v26 = vadd.f32 %v1849_v48, %v1848_v22  ;;  %v1851_v27 = vpop.f32.mrb[62].mxu1  ;;  %v1788_v28 = vpop.f32.mrb[63].mxu0 }
 0x172   :  { %1596 = vst [vmem:[%s2418_s3 + $0x30] sm:$0xff] %v1584_v23   ;;  %v1203_v53 = vadd.f32 %v1786_v24, %v2370_v8  ;;  %v1789_v29 = vadd.f32 %v1788_v28, %v1787_v25  ;;  %v1852_v2 = vpop.f32.mrb[63].mxu1 }
 0x173   :  { %v1853_v55 = vadd.f32 %v1852_v2, %v1851_v27 }
 0x174   :  { %v1300_v31 = vadd.f32 %v1850_v26, %v1203_v53  ;;  %v1206_v33 = vadd.f32 %v1789_v29, %v2373_v10 }
 0x176   :  { %v1303_v34 = vadd.f32 %v1853_v55, %v1206_v33 }
 0x178   :  { %v1589_v36 = vpack.c.bf16 %v1303_v34, %v1300_v31 }
 0x17a   :  { %1597 = vst [vmem:[%s2418_s3 + $0x38] sm:$0xff] %v1589_v36  }

// kernel: generator_nchw.74
= control target key start
LH: loop header
LB: loop body
LE: loop exit
PB: predicated region body
PF: predicated region fallthrough
CT: control target
= control target key end

     0   :  { %s916_s21 = smov 0   ;;  %s918_s22 = smov 0   ;;  %s969_s0 = inlined_call_operand.vmem [shape: bf16[2,64,128], index: 0, kind: input, shape index: {}]   ;;  %s970_s1 = inlined_call_operand.vmem [shape: f32[2,1,128], index: 1, kind: input, shape index: {}]   ;;  %s971_s2 = inlined_call_operand.vmem [shape: f32[2,1,128], index: 2, kind: input, shape index: {}]   ;;  %s972_s3 = inlined_call_operand.vmem [shape: f32[1,128], index: 3, kind: input, shape index: {}]   ;;  %s973_s4 = inlined_call_operand.vmem [shape: f32[1,128], index: 4, kind: input, shape index: {}]   ;;  %s974_s5 = inlined_call_operand.vmem [shape: bf16[2,64,128], index: 5, kind: input, shape index: {}]   ;;  %s975_s6 = inlined_call_operand.vmem [shape: bf16[2,64,128], index: 6, kind: output, shape index: {}]  }
   0x1   :  { %s920_s23 = smov 0  }
   0x2 LB: > { %s35_s24 = sadd.s32 1, %s875_s22  ;;  %p742_p0 = scmp.ge.s32.totalorder %s879_s23, 1  ;;  %s879_s23 = sphi %s920_s23, %s16_s23   ;;  %s875_s22 = sphi %s918_s22, %s977_s22   ;;  %s871_s21 = sphi %s916_s21, %s976_s21  }
   0x3   : > { %p37_p1 = scmp.ge.s32.totalorder %s35_s24, 2  ;;  %p311_p2 = scmp.lt.s32.totalorder %s879_s23, 3 }
   0x5   : > { %s979_s24 = smov (%p37_p1, %s35_s24), 0  ;;  %p312_p3 = pnand %p742_p0, %p311_p2 }
   0x6   : > { %p386_p4 = scmp.lt.s32.totalorder (!%p312_p3), %s871_s21, 1  ;;  %v473_v8 = vlaneseq (!%p312_p3)  ;;  %v460_v11 = vld [vmem:[%s972_s3] sm:$0x1] (!%p312_p3) }
   0x7   : > { %315 = sbr.rel (%p312_p3) target bundleno = 54 (0x36), region = 44  ;;  %v461_v22 = vld [vmem:[%s973_s4] sm:$0x1] (!%p312_p3) }
   0x8   : > { %v474_v9 = vshrl.u32 (!%p312_p3), %v473_v8, 7 }
   0xa   : > { %v475_v13 = vsub.s32 (!%p312_p3), 0, %v474_v9 }
   0xe   : > { %s981_s21 = smov (!%p386_p4, %s871_s21), 1 }
   0xf   : > { %s403_s27 = scalar_lea.vmem %s970_s1, %s981_s21  ;;  %s409_s30 = scalar_lea.vmem %s971_s2, %s981_s21 }
  0x10   : > { %v458_v0 = vld [vmem:[%s403_s27] sm:$0x1]  ;;  %s940_s7 = sshll.u32 %s981_s21, 5 }
  0x11   : > { %v459_v1 = vld [vmem:[%s409_s30] sm:$0x1]  ;;  %v462_v2 = vmul.f32 0.015625, %v458_v0  ;;  %s396_s10 = scalar_lea.vmem %s969_s0, %s940_s7  ;;  %s427_s13 = scalar_lea.vmem %s974_s5, %s940_s7 }
  0x12   : > { %v463_v3 = vmul.f32 0.015625, %v459_v1  ;;  %v771_v10 = vld [vmem:[%s396_s10] sm:$0xff]   ;;  %v822_v12 = vld [vmem:[%s396_s10 + $0x8] sm:$0xff]   ;;  %v823_v14 = vld [vmem:[%s396_s10 + $0x10] sm:$0xff]   ;;  %s440_s20 = scalar_lea.vmem %s975_s6, %s940_s7 }
  0x13   : > { %v464_v4 = vmul.f32 %v462_v2, %v462_v2  ;;  %v824_v15 = vld [vmem:[%s396_s10 + $0x18] sm:$0xff]   ;;  %v772_v17 = vunpack.c.l.bf16 %v771_v10  ;;  %v773_v18 = vunpack.c.h.bf16 %v771_v10  ;;  %v787_v20 = vld [vmem:[%s427_s13] sm:$0xff]   ;;  %v776_v21 = vunpack.c.l.bf16 %v822_v12  ;;  %v825_v32 = vld [vmem:[%s427_s13 + $0x8] sm:$0xff]  }
  0x14   : > { %v777_v23 = vunpack.c.h.bf16 %v822_v12  ;;  %v780_v24 = vunpack.c.l.bf16 %v823_v14  ;;  %v781_v25 = vunpack.c.h.bf16 %v823_v14  ;;  %v784_v26 = vunpack.c.l.bf16 %v824_v15  ;;  %v826_v37 = vld [vmem:[%s427_s13 + $0x10] sm:$0xff]   ;;  %v827_v38 = vld [vmem:[%s427_s13 + $0x18] sm:$0xff]  }
  0x15   : > { %v465_v5 = vsub.f32 %v463_v3, %v464_v4  ;;  %v785_v29 = vunpack.c.h.bf16 %v824_v15  ;;  %v788_v30 = vunpack.c.l.bf16 %v787_v20  ;;  %v789_v31 = vunpack.c.h.bf16 %v787_v20 }
  0x16   : > { %v792_v44 = vunpack.c.l.bf16 %v825_v32  ;;  %v793_v45 = vunpack.c.h.bf16 %v825_v32  ;;  %v796_v47 = vunpack.c.l.bf16 %v826_v37  ;;  %v797_v48 = vunpack.c.h.bf16 %v826_v37 }
  0x17   : > { %v466_v6 = vmax.f32 %v465_v5, 0.0  ;;  %v800_v49 = vunpack.c.l.bf16 %v827_v38  ;;  %v801_v50 = vunpack.c.h.bf16 %v827_v38 }
  0x19   : > { %v467_v7 = vadd.f32 1e-05, %v466_v6 }
  0x1b   : > { %855 = vrsqrt.f32 %v467_v7 }
  0x25   : > { %v856_v16 = vpop.eup %855 }
  0x26   : > { %v469_v19 = vmul.f32 %v856_v16, %v460_v11 }
  0x28   : > { %v470_v27 = vmul.f32 %v469_v19, %v462_v2  ;;  %v476_v28 = vrot.slane %v469_v19, %v475_v13 }
  0x2a   : > { %v471_v33 = vsub.f32 %v461_v22, %v470_v27  ;;  %v478_v34 = vmul.f32 %v772_v17, %v476_v28  ;;  %v479_v35 = vmul.f32 %v773_v18, %v476_v28  ;;  %v480_v36 = vmul.f32 %v776_v21, %v476_v28 }
  0x2b   : > { %v481_v39 = vmul.f32 %v777_v23, %v476_v28  ;;  %v482_v40 = vmul.f32 %v780_v24, %v476_v28  ;;  %v483_v41 = vmul.f32 %v781_v25, %v476_v28  ;;  %v484_v42 = vmul.f32 %v784_v26, %v476_v28 }
  0x2c   : > { %v490_v43 = vrot.slane %v471_v33, %v475_v13  ;;  %v485_v46 = vmul.f32 %v785_v29, %v476_v28 }
  0x2e   : > { %v492_v51 = vadd.f32 %v490_v43, %v478_v34  ;;  %v493_v52 = vadd.f32 %v490_v43, %v479_v35  ;;  %v494_v53 = vadd.f32 %v490_v43, %v480_v36  ;;  %v495_v54 = vadd.f32 %v490_v43, %v481_v39 }
  0x2f   : > { %v496_v55 = vadd.f32 %v490_v43, %v482_v40  ;;  %v497_v56 = vadd.f32 %v490_v43, %v483_v41  ;;  %v498_v57 = vadd.f32 %v490_v43, %v484_v42  ;;  %v499_v58 = vadd.f32 %v490_v43, %v485_v46 }
  0x30   : > { %v516_v59 = vadd.f32 %v788_v30, %v492_v51  ;;  %v517_v60 = vadd.f32 %v789_v31, %v493_v52  ;;  %v518_v61 = vadd.f32 %v792_v44, %v494_v53  ;;  %v519_v62 = vadd.f32 %v793_v45, %v495_v54 }
  0x31   : > { %v520_v63 = vadd.f32 %v796_v47, %v496_v55  ;;  %v521_v0 = vadd.f32 %v797_v48, %v497_v56  ;;  %v522_v1 = vadd.f32 %v800_v49, %v498_v57  ;;  %v523_v2 = vadd.f32 %v801_v50, %v499_v58 }
  0x32   : > { %v805_v3 = vpack.c.bf16 %v517_v60, %v516_v59  ;;  %v810_v4 = vpack.c.bf16 %v519_v62, %v518_v61 }
  0x33   : > { %v815_v5 = vpack.c.bf16 %v521_v0, %v520_v63  ;;  %v820_v6 = vpack.c.bf16 %v523_v2, %v522_v1 }
  0x34   : > { %806 = vst [vmem:[%s440_s20] sm:$0xff] %v805_v3   ;;  %828 = vst [vmem:[%s440_s20 + $0x8] sm:$0xff] %v810_v4  }
  0x35   : > { %829 = vst [vmem:[%s440_s20 + $0x10] sm:$0xff] %v815_v5   ;;  %830 = vst [vmem:[%s440_s20 + $0x18] sm:$0xff] %v820_v6  }
  0x36 PF: > { %s16_s23 = sadd.s32 1, %s879_s23   ;;  %s976_s21 = smov %s875_s22 }
  0x37   : > { %p13_p5 = scmp.ge.s32.totalorder %s16_s23, 4   ;;  %s977_s22 = smov %s979_s24 }
  0x39   :  { %15 = sbr.rel (!%p13_p5) target bundleno = 2 (0x2), region = 89 }

// kernel: generator_nchw.69
= control target key start
LH: loop header
LB: loop body
LE: loop exit
PB: predicated region body
PF: predicated region fallthrough
CT: control target
= control target key end

     0   :  { %s2907_s1 = inlined_call_operand.vmem [shape: bf16[1152,128], index: 1, kind: input, shape index: {}]   ;;  %s2908_s0 = inlined_call_operand.vmem [shape: bf16[128,1152], index: 0, kind: input, shape index: {}]   ;;  %s2909_s2 = inlined_call_operand.vmem [shape: f32[1,128], index: 2, kind: input, shape index: {}]   ;;  %s2910_s3 = inlined_call_operand.vmem [shape: bf16[128,128], index: 3, kind: output, shape index: {}]  }
   0x1   :  { %v2159_v0 = vld [vmem:[%s2907_s1 + $0x40] sm:$0xff]   ;;  %v2163_v4 = vld [vmem:[%s2907_s1 + $0x48] sm:$0xff]   ;;  %v2167_v8 = vld [vmem:[%s2907_s1 + $0x50] sm:$0xff]  }
   0x2   :  { %v2160_v1 = vld [vmem:[%s2907_s1 + $0xc0] sm:$0xff]   ;;  %1839 = vmatprep.subr.bf16.mxu0 %v2159_v0  ;;  %v2164_v5 = vld [vmem:[%s2907_s1 + $0xc8] sm:$0xff]   ;;  %v2168_v9 = vld [vmem:[%s2907_s1 + $0xd0] sm:$0xff]  }
   0x3   :  { %v2161_v2 = vld [vmem:[%s2907_s1] sm:$0xff]   ;;  %1903 = vmatprep.subr.bf16.mxu1 %v2160_v1  ;;  %v2165_v6 = vld [vmem:[%s2907_s1 + $0x8] sm:$0xff]   ;;  %v2169_v10 = vld [vmem:[%s2907_s1 + $0x10] sm:$0xff]  }
   0x4   :  { %v2162_v3 = vld [vmem:[%s2907_s1 + $0x80] sm:$0xff]   ;;  %1840 = vmatpush3.bf16.msra.mxu0 %v2161_v2  ;;  %v2166_v7 = vld [vmem:[%s2907_s1 + $0x88] sm:$0xff]   ;;  %v2170_v11 = vld [vmem:[%s2907_s1 + $0x90] sm:$0xff]  }
   0x5   :  { %1904 = vmatpush3.bf16.msra.mxu1 %v2162_v3  ;;  %1841 = vmatprep.subr.bf16.mxu0 %v2163_v4  ;;  %v2171_v12 = vld [vmem:[%s2907_s1 + $0x58] sm:$0xff]   ;;  %v2175_v16 = vld [vmem:[%s2907_s1 + $0x60] sm:$0xff]   ;;  %v2179_v20 = vld [vmem:[%s2907_s1 + $0x68] sm:$0xff]  }
   0x6   :  { %1905 = vmatprep.subr.bf16.mxu1 %v2164_v5  ;;  %v2172_v13 = vld [vmem:[%s2907_s1 + $0xd8] sm:$0xff]   ;;  %v2176_v17 = vld [vmem:[%s2907_s1 + $0xe0] sm:$0xff]   ;;  %v2180_v21 = vld [vmem:[%s2907_s1 + $0xe8] sm:$0xff]  }
   0x7   :  { %v2173_v14 = vld [vmem:[%s2907_s1 + $0x18] sm:$0xff]   ;;  %v2177_v18 = vld [vmem:[%s2907_s1 + $0x20] sm:$0xff]   ;;  %v2181_v22 = vld [vmem:[%s2907_s1 + $0x28] sm:$0xff]  }
   0x8   :  { %1842 = vmatpush3.bf16.msra.mxu0 %v2165_v6  ;;  %v2174_v15 = vld [vmem:[%s2907_s1 + $0x98] sm:$0xff]   ;;  %v2178_v19 = vld [vmem:[%s2907_s1 + $0xa0] sm:$0xff]   ;;  %v2182_v23 = vld [vmem:[%s2907_s1 + $0xa8] sm:$0xff]  }
   0x9   :  { %1906 = vmatpush3.bf16.msra.mxu1 %v2166_v7  ;;  %1843 = vmatprep.subr.bf16.mxu0 %v2167_v8  ;;  %v2183_v24 = vld [vmem:[%s2907_s1 + $0x70] sm:$0xff]   ;;  %v2187_v28 = vld [vmem:[%s2907_s1 + $0x78] sm:$0xff]   ;;  %v2191_v32 = vld [vmem:[%s2908_s0] ss:$36 sps:$4 sm:$0xff]  }
   0xa   :  { %1907 = vmatprep.subr.bf16.mxu1 %v2168_v9  ;;  %v2184_v25 = vld [vmem:[%s2907_s1 + $0xf0] sm:$0xff]   ;;  %v2188_v29 = vld [vmem:[%s2907_s1 + $0xf8] sm:$0xff]   ;;  %v2193_v33 = vld [vmem:[%s2908_s0 + $0x4] ss:$36 sps:$4 sm:$0xff]  }
   0xb   :  { %v2185_v26 = vld [vmem:[%s2907_s1 + $0x30] sm:$0xff]   ;;  %v2189_v30 = vld [vmem:[%s2907_s1 + $0x38] sm:$0xff]   ;;  %v2194_v34 = vld [vmem:[%s2908_s0 + $0x8] ss:$36 sps:$4 sm:$0xff]   ;;  %1078 = vmatprep.mubr.bf16.mxu0 %v2193_v33 }
   0xc   :  { %1844 = vmatpush3.bf16.msra.mxu0 %v2169_v10  ;;  %v2186_v27 = vld [vmem:[%s2907_s1 + $0xb0] sm:$0xff]   ;;  %v2190_v31 = vld [vmem:[%s2907_s1 + $0xb8] sm:$0xff]   ;;  %v2197_v36 = vld [vmem:[%s2907_s1 + $0x140] sm:$0xff]  }
   0xd   :  { %1908 = vmatpush3.bf16.msra.mxu1 %v2170_v11  ;;  %1845 = vmatprep.subr.bf16.mxu0 %v2171_v12  ;;  %v2196_v35 = vld [vmem:[%s2908_s0 + $0xc] ss:$36 sps:$4 sm:$0xff]   ;;  %v2198_v37 = vld [vmem:[%s2907_s1 + $0x1c0] sm:$0xff]   ;;  %v2203_v41 = vld [vmem:[%s2908_s0 + $0x54] ss:$36 sps:$4 sm:$0xff]  }
   0xe   :  { %1909 = vmatprep.subr.bf16.mxu1 %v2172_v13  ;;  %1175 = vmatprep.mubr.bf16.mxu1 %v2196_v35  ;;  %v2199_v38 = vld [vmem:[%s2907_s1 + $0x100] sm:$0xff]   ;;  %v2201_v40 = vld [vmem:[%s2908_s0 + $0x4c] ss:$36 sps:$4 sm:$0xff]   ;;  %v2211_v48 = vld [vmem:[%s2908_s0 + $0x94] ss:$36 sps:$4 sm:$0xff]  }
   0xf   :  { %v2200_v39 = vld [vmem:[%s2907_s1 + $0x180] sm:$0xff]   ;;  %v2205_v42 = vld [vmem:[%s2908_s0 + $0x48] ss:$36 sps:$4 sm:$0xff]   ;;  %v2206_v43 = vld [vmem:[%s2908_s0 + $0x50] ss:$36 sps:$4 sm:$0xff]  }
  0x10   :  { %1846 = vmatpush3.bf16.msra.mxu0 %v2173_v14  ;;  %v2207_v44 = vld [vmem:[%s2907_s1 + $0x148] sm:$0xff]   ;;  %v2213_v49 = vld [vmem:[%s2908_s0 + $0x9c] ss:$36 sps:$4 sm:$0xff]   ;;  %v2215_v50 = vld [vmem:[%s2908_s0 + $0x90] ss:$36 sps:$4 sm:$0xff]  }
  0x11   :  { %1910 = vmatpush3.bf16.msra.mxu1 %v2174_v15  ;;  %1847 = vmatprep.subr.bf16.mxu0 %v2175_v16  ;;  %v2208_v45 = vld [vmem:[%s2907_s1 + $0x1c8] sm:$0xff]   ;;  %v2216_v51 = vld [vmem:[%s2908_s0 + $0x98] ss:$36 sps:$4 sm:$0xff]   ;;  %v2217_v52 = vld [vmem:[%s2907_s1 + $0x150] sm:$0xff]  }
  0x12   :  { %1911 = vmatprep.subr.bf16.mxu1 %v2176_v17  ;;  %v2209_v46 = vld [vmem:[%s2907_s1 + $0x108] sm:$0xff]   ;;  %v2218_v53 = vld [vmem:[%s2907_s1 + $0x1d0] sm:$0xff]   ;;  %v2221_v56 = vld [vmem:[%s2908_s0 + $0xdc] ss:$36 sps:$4 sm:$0xff]  }
  0x13   :  { %v2210_v47 = vld [vmem:[%s2907_s1 + $0x188] sm:$0xff]   ;;  %v2219_v54 = vld [vmem:[%s2907_s1 + $0x110] sm:$0xff]   ;;  %v2225_v58 = vld [vmem:[%s2908_s0 + $0xd8] ss:$36 sps:$4 sm:$0xff]  }
  0x14   :  { %1848 = vmatpush3.bf16.msra.mxu0 %v2177_v18  ;;  %v2220_v55 = vld [vmem:[%s2907_s1 + $0x190] sm:$0xff]   ;;  %v2223_v57 = vld [vmem:[%s2908_s0 + $0xe4] ss:$36 sps:$4 sm:$0xff]   ;;  %v2227_v60 = vld [vmem:[%s2907_s1 + $0x158] sm:$0xff]  }
  0x15   :  { %1912 = vmatpush3.bf16.msra.mxu1 %v2178_v19  ;;  %1849 = vmatprep.subr.bf16.mxu0 %v2179_v20  ;;  %v2226_v59 = vld [vmem:[%s2908_s0 + $0xe0] ss:$36 sps:$4 sm:$0xff]   ;;  %v2228_v61 = vld [vmem:[%s2907_s1 + $0x1d8] sm:$0xff]   ;;  %v2233_v1 = vld [vmem:[%s2908_s0 + $0x12c] ss:$36 sps:$4 sm:$0xff]  }
  0x16   :  { %1913 = vmatprep.subr.bf16.mxu1 %v2180_v21  ;;  %v2229_v62 = vld [vmem:[%s2907_s1 + $0x118] sm:$0xff]   ;;  %v2231_v0 = vld [vmem:[%s2908_s0 + $0x124] ss:$36 sps:$4 sm:$0xff]   ;;  %v2241_v8 = vld [vmem:[%s2908_s0 + $0x16c] ss:$36 sps:$4 sm:$0xff]  }
  0x17   :  { %v2230_v63 = vld [vmem:[%s2907_s1 + $0x198] sm:$0xff]   ;;  %v2235_v2 = vld [vmem:[%s2908_s0 + $0x120] ss:$36 sps:$4 sm:$0xff]   ;;  %v2236_v4 = vld [vmem:[%s2908_s0 + $0x128] ss:$36 sps:$4 sm:$0xff]  }
  0x18   :  { %1850 = vmatpush3.bf16.msra.mxu0 %v2181_v22  ;;  %v2237_v3 = vld [vmem:[%s2907_s1 + $0x160] sm:$0xff]   ;;  %v2243_v9 = vld [vmem:[%s2908_s0 + $0x174] ss:$36 sps:$4 sm:$0xff]   ;;  %v2247_v10 = vld [vmem:[%s2907_s1 + $0x168] sm:$0xff]  }
  0x19   :  { %1914 = vmatpush3.bf16.msra.mxu1 %v2182_v23  ;;  %1851 = vmatprep.subr.bf16.mxu0 %v2183_v24  ;;  %v2238_v5 = vld [vmem:[%s2907_s1 + $0x1e0] sm:$0xff]   ;;  %v2248_v11 = vld [vmem:[%s2907_s1 + $0x1e8] sm:$0xff]   ;;  %v2246_v15 = vld [vmem:[%s2908_s0 + $0x170] ss:$36 sps:$4 sm:$0xff]  }
  0x1a   :  { %1915 = vmatprep.subr.bf16.mxu1 %v2184_v25  ;;  %v2239_v6 = vld [vmem:[%s2907_s1 + $0x120] sm:$0xff]   ;;  %v2245_v12 = vld [vmem:[%s2908_s0 + $0x168] ss:$36 sps:$4 sm:$0xff]   ;;  %v2251_v16 = vld [vmem:[%s2908_s0 + $0x1b4] ss:$36 sps:$4 sm:$0xff]  }
  0x1b   :  { %v2240_v7 = vld [vmem:[%s2907_s1 + $0x1a0] sm:$0xff]   ;;  %v2249_v13 = vld [vmem:[%s2907_s1 + $0x128] sm:$0xff]   ;;  %v2257_v18 = vld [vmem:[%s2907_s1 + $0x170] sm:$0xff]  }
  0x1c   :  { %1852 = vmatpush3.bf16.msra.mxu0 %v2185_v26  ;;  %v2250_v14 = vld [vmem:[%s2907_s1 + $0x1a8] sm:$0xff]   ;;  %v2253_v17 = vld [vmem:[%s2908_s0 + $0x1bc] ss:$36 sps:$4 sm:$0xff]   ;;  %v2258_v19 = vld [vmem:[%s2907_s1 + $0x1f0] sm:$0xff]  }
  0x1d   :  { %1916 = vmatpush3.bf16.msra.mxu1 %v2186_v27  ;;  %1853 = vmatprep.subr.bf16.mxu0 %v2187_v28  ;;  %v2259_v20 = vld [vmem:[%s2907_s1 + $0x130] sm:$0xff]   ;;  %v2256_v23 = vld [vmem:[%s2908_s0 + $0x1b8] ss:$36 sps:$4 sm:$0xff]   ;;  %v2263_v25 = vld [vmem:[%s2908_s0 + $0x204] ss:$36 sps:$4 sm:$0xff]  }
  0x1e   :  { %1917 = vmatprep.subr.bf16.mxu1 %v2188_v29  ;;  %v2260_v21 = vld [vmem:[%s2907_s1 + $0x1b0] sm:$0xff]   ;;  %v2261_v24 = vld [vmem:[%s2908_s0 + $0x1fc] ss:$36 sps:$4 sm:$0xff]  }
  0x1f   :  { %v2255_v22 = vld [vmem:[%s2908_s0 + $0x1b0] ss:$36 sps:$4 sm:$0xff]   ;;  %v2267_v26 = vld [vmem:[%s2907_s1 + $0x178] sm:$0xff]  }
  0x20   :  { %1854 = vmatpush3.bf16.msra.mxu0 %v2189_v30  ;;  %v2268_v27 = vld [vmem:[%s2907_s1 + $0x1f8] sm:$0xff]   ;;  %v2271_v35 = vld [vmem:[%s2908_s0 + $0x10] ss:$36 sps:$4 sm:$0xff]  }
  0x21   :  { %1918 = vmatpush3.bf16.msra.mxu1 %v2190_v31  ;;  %1967 = vmatprep.subr.bf16.mxu0 %v2197_v36  ;;  %v2269_v28 = vld [vmem:[%s2907_s1 + $0x138] sm:$0xff]   ;;  %v2266_v31 = vld [vmem:[%s2908_s0 + $0x200] ss:$36 sps:$4 sm:$0xff]  }
  0x22   :  { %2031 = vmatprep.subr.bf16.mxu1 %v2198_v37  ;;  %v2270_v29 = vld [vmem:[%s2907_s1 + $0x1b8] sm:$0xff]  }
  0x23   :  { %1079 = vmatmul.mubr.bf16.vlgmr.msra.gmra.mrb[0].mxu0 %v2191_v32  ;;  %v2265_v30 = vld [vmem:[%s2908_s0 + $0x1f8] ss:$36 sps:$4 sm:$0xff]   ;;  %v2277_v32 = vld [vmem:[%s2907_s1 + $0x200] sm:$0xff]  }
  0x24   :  { %1176 = vmatmul.mubr.bf16.vlgmr.msra.gmra.mrb[0].mxu1 %v2194_v34  ;;  %1968 = vmatpush3.bf16.msra.mxu0 %v2199_v38  ;;  %v2273_v33 = vld [vmem:[%s2908_s0 + $0x14] ss:$36 sps:$4 sm:$0xff]   ;;  %v2276_v34 = vld [vmem:[%s2908_s0 + $0x1c] ss:$36 sps:$4 sm:$0xff]   ;;  %v2280_v38 = vld [vmem:[%s2908_s0 + $0x64] ss:$36 sps:$4 sm:$0xff]  }
  0x25   :  { %2032 = vmatpush3.bf16.msra.mxu1 %v2200_v39  ;;  %1086 = vmatprep.mubr.bf16.mxu0 %v2201_v40  ;;  %v2274_v36 = vld [vmem:[%s2908_s0 + $0x18] ss:$36 sps:$4 sm:$0xff]   ;;  %v2284_v39 = vld [vmem:[%s2907_s1 + $0x208] sm:$0xff]   ;;  %v2291_v40 = vld [vmem:[%s2907_s1 + $0x210] sm:$0xff]  }
  0x26   :  { %1183 = vmatprep.mubr.bf16.mxu1 %v2203_v41  ;;  %1969 = vmatprep.subr.bf16.mxu0 %v2207_v44  ;;  %v2278_v37 = vld [vmem:[%s2908_s0 + $0x5c] ss:$36 sps:$4 sm:$0xff]   ;;  %v2287_v44 = vld [vmem:[%s2908_s0 + $0xac] ss:$36 sps:$4 sm:$0xff]  }
  0x27   :  { %2033 = vmatprep.subr.bf16.mxu1 %v2208_v45  ;;  %v2282_v41 = vld [vmem:[%s2908_s0 + $0x58] ss:$36 sps:$4 sm:$0xff]  }
  0x28   :  { %1970 = vmatpush3.bf16.msra.mxu0 %v2209_v46  ;;  %v2298_v45 = vld [vmem:[%s2907_s1 + $0x218] sm:$0xff]   ;;  %v2305_v46 = vld [vmem:[%s2907_s1 + $0x220] sm:$0xff]  }
  0x29   :  { %2034 = vmatpush3.bf16.msra.mxu1 %v2210_v47  ;;  %1971 = vmatprep.subr.bf16.mxu0 %v2217_v52  ;;  %v2289_v47 = vld [vmem:[%s2908_s0 + $0xa0] ss:$36 sps:$4 sm:$0xff]   ;;  %v2296_v52 = vld [vmem:[%s2908_s0 + $0xe8] ss:$36 sps:$4 sm:$0xff]  }
  0x2a   :  { %2035 = vmatprep.subr.bf16.mxu1 %v2218_v53  ;;  %v2319_v53 = vld [vmem:[%s2907_s1 + $0x230] sm:$0xff]  }
  0x2b   :  { %1087 = vmatmul.mubr.bf16.gmra.mrb[4].mxu0 %v2205_v42  ;;  %v2283_v42 = vld [vmem:[%s2908_s0 + $0x60] ss:$36 sps:$4 sm:$0xff]  }
  0x2c   :  { %1184 = vmatmul.mubr.bf16.gmra.mrb[4].mxu1 %v2206_v43  ;;  %1094 = vmatprep.mubr.bf16.mxu0 %v2211_v48  ;;  %v2285_v43 = vld [vmem:[%s2908_s0 + $0xa4] ss:$36 sps:$4 sm:$0xff]  }
  0x2d   :  { %1191 = vmatprep.mubr.bf16.mxu1 %v2213_v49  ;;  %1972 = vmatpush3.bf16.msra.mxu0 %v2219_v54  ;;  %v2290_v48 = vld [vmem:[%s2908_s0 + $0xa8] ss:$36 sps:$4 sm:$0xff]   ;;  %v2297_v54 = vld [vmem:[%s2908_s0 + $0xf0] ss:$36 sps:$4 sm:$0xff]  }
  0x2e   :  { %2036 = vmatpush3.bf16.msra.mxu1 %v2220_v55  ;;  %1973 = vmatprep.subr.bf16.mxu0 %v2227_v60  ;;  %v2292_v49 = vld [vmem:[%s2908_s0 + $0xec] ss:$36 sps:$4 sm:$0xff]   ;;  %v2299_v55 = vld [vmem:[%s2908_s0 + $0x134] ss:$36 sps:$4 sm:$0xff]   ;;  %v2306_v60 = vld [vmem:[%s2908_s0 + $0x17c] ss:$36 sps:$4 sm:$0xff]  }
  0x2f   :  { %2037 = vmatprep.subr.bf16.mxu1 %v2228_v61  ;;  %v2308_v61 = vld [vmem:[%s2908_s0 + $0x184] ss:$36 sps:$4 sm:$0xff]  }
  0x31   :  { %1974 = vmatpush3.bf16.msra.mxu0 %v2229_v62  ;;  %v2310_v62 = vld [vmem:[%s2908_s0 + $0x178] ss:$36 sps:$4 sm:$0xff]  }
  0x32   :  { %2038 = vmatpush3.bf16.msra.mxu1 %v2230_v63  ;;  %1975 = vmatprep.subr.bf16.mxu0 %v2237_v3  ;;  %v2311_v63 = vld [vmem:[%s2908_s0 + $0x180] ss:$36 sps:$4 sm:$0xff]   ;;  %v2318_v3 = vld [vmem:[%s2908_s0 + $0x1c8] ss:$36 sps:$4 sm:$0xff]  }
  0x33   :  { %1095 = vmatmul.mubr.bf16.gmra.mrb[8].mxu0 %v2215_v50  ;;  %2039 = vmatprep.subr.bf16.mxu1 %v2238_v5  ;;  %v2294_v50 = vld [vmem:[%s2908_s0 + $0xf4] ss:$36 sps:$4 sm:$0xff]  }
  0x34   :  { %1192 = vmatmul.mubr.bf16.gmra.mrb[8].mxu1 %v2216_v51  ;;  %1102 = vmatprep.mubr.bf16.mxu0 %v2221_v56  ;;  %v2312_v51 = vld [vmem:[%s2907_s1 + $0x228] sm:$0xff]   ;;  %v2301_v56 = vld [vmem:[%s2908_s0 + $0x13c] ss:$36 sps:$4 sm:$0xff]   ;;  %v2322_v5 = vld [vmem:[%s2908_s0 + $0x214] ss:$36 sps:$4 sm:$0xff]  }
  0x35   :  { %1199 = vmatprep.mubr.bf16.mxu1 %v2223_v57  ;;  %1976 = vmatpush3.bf16.msra.mxu0 %v2239_v6  ;;  %v2326_v57 = vld [vmem:[%s2907_s1 + $0x238] sm:$0xff]   ;;  %v2324_v6 = vld [vmem:[%s2908_s0 + $0x208] ss:$36 sps:$4 sm:$0xff]  }
  0x36   :  { %2040 = vmatpush3.bf16.msra.mxu1 %v2240_v7  ;;  %1977 = vmatprep.subr.bf16.mxu0 %v2247_v10  ;;  %v2325_v7 = vld [vmem:[%s2908_s0 + $0x210] ss:$36 sps:$4 sm:$0xff]   ;;  %v2329_v10 = vld [vmem:[%s2908_s0 + $0x68] ss:$36 sps:$4 sm:$0xff]  }
  0x37   :  { %2041 = vmatprep.subr.bf16.mxu1 %v2248_v11  ;;  %v2330_v11 = vld [vmem:[%s2908_s0 + $0x188] ss:$36 sps:$4 sm:$0xff]  }
  0x39   :  { %1978 = vmatpush3.bf16.msra.mxu0 %v2249_v13  ;;  %v2332_v13 = vld [vmem:[%s2908_s0 + $0x1d0] ss:$36 sps:$4 sm:$0xff]  }
  0x3a   :  { %2042 = vmatpush3.bf16.msra.mxu1 %v2250_v14  ;;  %1979 = vmatprep.subr.bf16.mxu0 %v2257_v18  ;;  %v2333_v14 = vld [vmem:[%s2908_s0 + $0xf8] ss:$36 sps:$4 sm:$0xff]   ;;  %v2790_v18 = vld [vmem:[%s2909_s2] ss:$0 sm:$0xff] }
  0x3b   :  { %1103 = vmatmul.mubr.bf16.gmra.mrb[12].mxu0 %v2225_v58  ;;  %2043 = vmatprep.subr.bf16.mxu1 %v2258_v19  ;;  %v2303_v58 = vld [vmem:[%s2908_s0 + $0x130] ss:$36 sps:$4 sm:$0xff]  }
  0x3c   :  { %1200 = vmatmul.mubr.bf16.gmra.mrb[12].mxu1 %v2226_v59  ;;  %1110 = vmatprep.mubr.bf16.mxu0 %v2231_v0  ;;  %v2304_v59 = vld [vmem:[%s2908_s0 + $0x138] ss:$36 sps:$4 sm:$0xff]   ;;  %v2313_v0 = vld [vmem:[%s2908_s0 + $0x1c4] ss:$36 sps:$4 sm:$0xff]  }
  0x3d   :  { %1207 = vmatprep.mubr.bf16.mxu1 %v2233_v1  ;;  %1980 = vmatpush3.bf16.msra.mxu0 %v2259_v20  ;;  %v2315_v1 = vld [vmem:[%s2908_s0 + $0x1cc] ss:$36 sps:$4 sm:$0xff]  }
  0x3e   :  { %2044 = vmatpush3.bf16.msra.mxu1 %v2260_v21  ;;  %1981 = vmatprep.subr.bf16.mxu0 %v2267_v26 }
  0x3f   :  { %2045 = vmatprep.subr.bf16.mxu1 %v2268_v27 }
  0x41   :  { %1982 = vmatpush3.bf16.msra.mxu0 %v2269_v28 }
  0x42   :  { %2046 = vmatpush3.bf16.msra.mxu1 %v2270_v29  ;;  %2111 = vmatprep.subr.bf16.mxu0 %v2277_v32 }
  0x43   :  { %1111 = vmatmul.mubr.bf16.gmra.mrb[16].mxu0 %v2235_v2  ;;  %2143 = vmatprep.subr.bf16.mxu1 %v2277_v32  ;;  %v2317_v2 = vld [vmem:[%s2908_s0 + $0x1c0] ss:$36 sps:$4 sm:$0xff]  }
  0x44   :  { %1208 = vmatmul.mubr.bf16.gmra.mrb[16].mxu1 %v2236_v4  ;;  %1118 = vmatprep.mubr.bf16.mxu0 %v2241_v8  ;;  %v2320_v4 = vld [vmem:[%s2908_s0 + $0x20c] ss:$36 sps:$4 sm:$0xff]   ;;  %v2327_v8 = vld [vmem:[%s2908_s0 + $0x20] ss:$36 sps:$4 sm:$0xff]  }
  0x45   :  { %1215 = vmatprep.mubr.bf16.mxu1 %v2243_v9  ;;  %v2328_v9 = vld [vmem:[%s2908_s0 + $0x140] ss:$36 sps:$4 sm:$0xff]  }
  0x4b   :  { %1119 = vmatmul.mubr.bf16.gmra.mrb[20].mxu0 %v2245_v12  ;;  %v2331_v12 = vld [vmem:[%s2908_s0 + $0xb0] ss:$36 sps:$4 sm:$0xff]  }
  0x4c   :  { %1216 = vmatmul.mubr.bf16.gmra.mrb[20].mxu1 %v2246_v15  ;;  %1126 = vmatprep.mubr.bf16.mxu0 %v2251_v16  ;;  %v2334_v15 = vld [vmem:[%s2908_s0 + $0x218] ss:$36 sps:$4 sm:$0xff]  }
  0x4d   :  { %1223 = vmatprep.mubr.bf16.mxu1 %v2253_v17 }
  0x53   :  { %1127 = vmatmul.mubr.bf16.gmra.mrb[24].mxu0 %v2255_v22 }
  0x54   :  { %1224 = vmatmul.mubr.bf16.gmra.mrb[24].mxu1 %v2256_v23  ;;  %1134 = vmatprep.mubr.bf16.mxu0 %v2261_v24 }
  0x55   :  { %1231 = vmatprep.mubr.bf16.mxu1 %v2263_v25 }
  0x5b   :  { %1135 = vmatmul.mubr.bf16.gmra.mrb[28].mxu0 %v2265_v30 }
  0x5c   :  { %1232 = vmatmul.mubr.bf16.gmra.mrb[28].mxu1 %v2266_v31  ;;  %1272 = vmatprep.mubr.bf16.mxu0 %v2273_v33 }
  0x5d   :  { %1369 = vmatprep.mubr.bf16.mxu1 %v2276_v34 }
  0x63   :  { %1273 = vmatmul.mubr.bf16.vlgmr.msra.gmra.mrb[32].mxu0 %v2271_v35 }
  0x64   :  { %1370 = vmatmul.mubr.bf16.vlgmr.msra.gmra.mrb[32].mxu1 %v2274_v36  ;;  %2112 = vmatpush3.bf16.msra.mxu0 %v2277_v32 }
  0x65   :  { %2151 = vmatpush3.bf16.msra.mxu1 %v2277_v32  ;;  %1280 = vmatprep.mubr.bf16.mxu0 %v2278_v37 }
  0x66   :  { %1377 = vmatprep.mubr.bf16.mxu1 %v2280_v38  ;;  %2113 = vmatprep.subr.bf16.mxu0 %v2284_v39 }
  0x67   :  { %2144 = vmatprep.subr.bf16.mxu1 %v2284_v39 }
  0x68   :  { %2114 = vmatpush3.bf16.msra.mxu0 %v2284_v39 }
  0x69   :  { %2152 = vmatpush3.bf16.msra.mxu1 %v2284_v39  ;;  %2115 = vmatprep.subr.bf16.mxu0 %v2291_v40 }
  0x6a   :  { %2145 = vmatprep.subr.bf16.mxu1 %v2291_v40 }
  0x6b   :  { %1281 = vmatmul.mubr.bf16.gmra.mrb[36].mxu0 %v2282_v41 }
  0x6c   :  { %1378 = vmatmul.mubr.bf16.gmra.mrb[36].mxu1 %v2283_v42  ;;  %1288 = vmatprep.mubr.bf16.mxu0 %v2285_v43 }
  0x6d   :  { %1385 = vmatprep.mubr.bf16.mxu1 %v2287_v44  ;;  %2116 = vmatpush3.bf16.msra.mxu0 %v2291_v40 }
  0x6e   :  { %2153 = vmatpush3.bf16.msra.mxu1 %v2291_v40  ;;  %2117 = vmatprep.subr.bf16.mxu0 %v2298_v45 }
  0x6f   :  { %2146 = vmatprep.subr.bf16.mxu1 %v2298_v45 }
  0x71   :  { %2118 = vmatpush3.bf16.msra.mxu0 %v2298_v45 }
  0x72   :  { %2154 = vmatpush3.bf16.msra.mxu1 %v2298_v45  ;;  %2119 = vmatprep.subr.bf16.mxu0 %v2305_v46 }
  0x73   :  { %1289 = vmatmul.mubr.bf16.gmra.mrb[40].mxu0 %v2289_v47  ;;  %2147 = vmatprep.subr.bf16.mxu1 %v2305_v46 }
  0x74   :  { %1386 = vmatmul.mubr.bf16.gmra.mrb[40].mxu1 %v2290_v48  ;;  %1296 = vmatprep.mubr.bf16.mxu0 %v2292_v49 }
  0x75   :  { %1393 = vmatprep.mubr.bf16.mxu1 %v2294_v50  ;;  %2120 = vmatpush3.bf16.msra.mxu0 %v2305_v46 }
  0x76   :  { %2155 = vmatpush3.bf16.msra.mxu1 %v2305_v46  ;;  %2121 = vmatprep.subr.bf16.mxu0 %v2312_v51 }
  0x77   :  { %2148 = vmatprep.subr.bf16.mxu1 %v2312_v51 }
  0x79   :  { %2122 = vmatpush3.bf16.msra.mxu0 %v2312_v51 }
  0x7a   :  { %2156 = vmatpush3.bf16.msra.mxu1 %v2312_v51  ;;  %2123 = vmatprep.subr.bf16.mxu0 %v2319_v53 }
  0x7b   :  { %1297 = vmatmul.mubr.bf16.gmra.mrb[44].mxu0 %v2296_v52  ;;  %2149 = vmatprep.subr.bf16.mxu1 %v2319_v53 }
  0x7c   :  { %1394 = vmatmul.mubr.bf16.gmra.mrb[44].mxu1 %v2297_v54  ;;  %1304 = vmatprep.mubr.bf16.mxu0 %v2299_v55 }
  0x7d   :  { %1401 = vmatprep.mubr.bf16.mxu1 %v2301_v56  ;;  %2124 = vmatpush3.bf16.msra.mxu0 %v2319_v53 }
  0x7e   :  { %2157 = vmatpush3.bf16.msra.mxu1 %v2319_v53  ;;  %2125 = vmatprep.subr.bf16.mxu0 %v2326_v57 }
  0x7f   :  { %2150 = vmatprep.subr.bf16.mxu1 %v2326_v57 }
  0x81   :  { %2126 = vmatpush3.bf16.msra.mxu0 %v2326_v57 }
  0x82   :  { %2158 = vmatpush3.bf16.msra.mxu1 %v2326_v57 }
  0x83   :  { %1305 = vmatmul.mubr.bf16.gmra.mrb[48].mxu0 %v2303_v58 }
  0x84   :  { %1402 = vmatmul.mubr.bf16.gmra.mrb[48].mxu1 %v2304_v59  ;;  %1312 = vmatprep.mubr.bf16.mxu0 %v2306_v60 }
  0x85   :  { %1409 = vmatprep.mubr.bf16.mxu1 %v2308_v61 }
  0x8b   :  { %1313 = vmatmul.mubr.bf16.gmra.mrb[52].mxu0 %v2310_v62 }
  0x8c   :  { %1410 = vmatmul.mubr.bf16.gmra.mrb[52].mxu1 %v2311_v63  ;;  %1320 = vmatprep.mubr.bf16.mxu0 %v2313_v0 }
  0x8d   :  { %1417 = vmatprep.mubr.bf16.mxu1 %v2315_v1 }
  0x93   :  { %1321 = vmatmul.mubr.bf16.gmra.mrb[56].mxu0 %v2317_v2 }
  0x94   :  { %1418 = vmatmul.mubr.bf16.gmra.mrb[56].mxu1 %v2318_v3  ;;  %1328 = vmatprep.mubr.bf16.mxu0 %v2320_v4 }
  0x95   :  { %1425 = vmatprep.mubr.bf16.mxu1 %v2322_v5 }
  0x9b   :  { %1329 = vmatmul.mubr.bf16.gmra.mrb[60].mxu0 %v2324_v6 }
  0x9c   :  { %1426 = vmatmul.mubr.bf16.gmra.mrb[60].mxu1 %v2325_v7  ;;  %2127 = vmatprep.mubr.bf16.mxu0 %v2327_v8 }
  0x9d   :  { %2135 = vmatprep.mubr.bf16.mxu1 %v2328_v9 }
  0xa3   :  { %2128 = vmatmul.mubr.bf16.vlgmr.msra.gmra.mrb[64].mxu0 %v2329_v10 }
  0xa4   :  { %2136 = vmatmul.mubr.bf16.vlgmr.msra.gmra.mrb[64].mxu1 %v2330_v11  ;;  %2131 = vmatprep.mubr.bf16.mxu0 %v2331_v12 }
  0xa5   :  { %2139 = vmatprep.mubr.bf16.mxu1 %v2332_v13 }
  0xab   :  { %2132 = vmatmul.mubr.bf16.gmra.mrb[68].mxu0 %v2333_v14 }
  0xac   :  { %2140 = vmatmul.mubr.bf16.gmra.mrb[68].mxu1 %v2334_v15 }
  0xf6   :  { %v1855_v16 = vpop.f32.mrb[0].mxu0 }
  0xf7   :  { %v1919_v17 = vpop.f32.mrb[0].mxu1  ;;  %v1856_v19 = vpop.f32.mrb[1].mxu0 }
  0xf8   :  { %v1857_v20 = vadd.f32 %v1856_v19, %v1855_v16  ;;  %v1920_v21 = vpop.f32.mrb[1].mxu1  ;;  %v1858_v22 = vpop.f32.mrb[2].mxu0 }
  0xf9   :  { %v1921_v23 = vadd.f32 %v1920_v21, %v1919_v17  ;;  %v1922_v24 = vpop.f32.mrb[2].mxu1  ;;  %v1859_v25 = vpop.f32.mrb[3].mxu0 }
  0xfa   :  { %v1081_v26 = vadd.f32 %v1857_v20, %v2790_v18  ;;  %v1860_v27 = vadd.f32 %v1859_v25, %v1858_v22  ;;  %v1923_v28 = vpop.f32.mrb[3].mxu1 }
  0xfb   :  { %v1924_v29 = vadd.f32 %v1923_v28, %v1922_v24 }
  0xfc   :  { %v2793_v30 = vadd.f32 %v1921_v23, %v1081_v26  ;;  %v1084_v31 = vadd.f32 %v1860_v27, %v2790_v18 }
  0xfe   :  { %v2796_v32 = vadd.f32 %v1924_v29, %v1084_v31  ;;  %v1861_v33 = vpop.f32.mrb[4].mxu0 }
  0xff   :  { %v1925_v34 = vpop.f32.mrb[4].mxu1  ;;  %v1862_v35 = vpop.f32.mrb[5].mxu0 }
 0x100   :  { %v1863_v36 = vadd.f32 %v1862_v35, %v1861_v33  ;;  %v1926_v37 = vpop.f32.mrb[5].mxu1  ;;  %v1864_v38 = vpop.f32.mrb[6].mxu0 }
 0x101   :  { %v1927_v39 = vadd.f32 %v1926_v37, %v1925_v34  ;;  %v1928_v40 = vpop.f32.mrb[6].mxu1  ;;  %v1865_v41 = vpop.f32.mrb[7].mxu0 }
 0x102   :  { %v1089_v42 = vadd.f32 %v1863_v36, %v2790_v18  ;;  %v1866_v43 = vadd.f32 %v1865_v41, %v1864_v38  ;;  %v1929_v44 = vpop.f32.mrb[7].mxu1 }
 0x103   :  { %v1930_v45 = vadd.f32 %v1929_v44, %v1928_v40 }
 0x104   :  { %v2799_v46 = vadd.f32 %v1927_v39, %v1089_v42  ;;  %v1092_v47 = vadd.f32 %v1866_v43, %v2790_v18 }
 0x106   :  { %v2802_v48 = vadd.f32 %v1930_v45, %v1092_v47  ;;  %v1867_v49 = vpop.f32.mrb[8].mxu0 }
 0x107   :  { %v1931_v50 = vpop.f32.mrb[8].mxu1  ;;  %v1868_v51 = vpop.f32.mrb[9].mxu0 }
 0x108   :  { %v1869_v52 = vadd.f32 %v1868_v51, %v1867_v49  ;;  %v1932_v53 = vpop.f32.mrb[9].mxu1  ;;  %v1870_v54 = vpop.f32.mrb[10].mxu0 }
 0x109   :  { %v1933_v55 = vadd.f32 %v1932_v53, %v1931_v50  ;;  %v1934_v56 = vpop.f32.mrb[10].mxu1  ;;  %v1871_v57 = vpop.f32.mrb[11].mxu0 }
 0x10a   :  { %v1097_v58 = vadd.f32 %v1869_v52, %v2790_v18  ;;  %v1872_v59 = vadd.f32 %v1871_v57, %v1870_v54  ;;  %v1935_v60 = vpop.f32.mrb[11].mxu1 }
 0x10b   :  { %v1936_v61 = vadd.f32 %v1935_v60, %v1934_v56 }
 0x10c   :  { %v2805_v62 = vadd.f32 %v1933_v55, %v1097_v58  ;;  %v1100_v63 = vadd.f32 %v1872_v59, %v2790_v18 }
 0x10e   :  { %v2808_v0 = vadd.f32 %v1936_v61, %v1100_v63  ;;  %v1873_v1 = vpop.f32.mrb[12].mxu0 }
 0x10f   :  { %v1937_v2 = vpop.f32.mrb[12].mxu1  ;;  %v1874_v3 = vpop.f32.mrb[13].mxu0 }
 0x110   :  { %v1875_v4 = vadd.f32 %v1874_v3, %v1873_v1  ;;  %v1938_v5 = vpop.f32.mrb[13].mxu1  ;;  %v1876_v6 = vpop.f32.mrb[14].mxu0 }
 0x111   :  { %v1939_v7 = vadd.f32 %v1938_v5, %v1937_v2  ;;  %v1940_v8 = vpop.f32.mrb[14].mxu1  ;;  %v1877_v9 = vpop.f32.mrb[15].mxu0 }
 0x112   :  { %v1105_v10 = vadd.f32 %v1875_v4, %v2790_v18  ;;  %v1878_v11 = vadd.f32 %v1877_v9, %v1876_v6  ;;  %v1941_v12 = vpop.f32.mrb[15].mxu1 }
 0x113   :  { %v1942_v13 = vadd.f32 %v1941_v12, %v1940_v8 }
 0x114   :  { %v2811_v14 = vadd.f32 %v1939_v7, %v1105_v10  ;;  %v1108_v15 = vadd.f32 %v1878_v11, %v2790_v18 }
 0x116   :  { %v2814_v16 = vadd.f32 %v1942_v13, %v1108_v15  ;;  %v1879_v17 = vpop.f32.mrb[16].mxu0 }
 0x117   :  { %v1943_v19 = vpop.f32.mrb[16].mxu1  ;;  %v1880_v20 = vpop.f32.mrb[17].mxu0 }
 0x118   :  { %v1881_v21 = vadd.f32 %v1880_v20, %v1879_v17  ;;  %v1944_v22 = vpop.f32.mrb[17].mxu1  ;;  %v1882_v23 = vpop.f32.mrb[18].mxu0 }
 0x119   :  { %v1945_v24 = vadd.f32 %v1944_v22, %v1943_v19  ;;  %v1946_v25 = vpop.f32.mrb[18].mxu1  ;;  %v1883_v26 = vpop.f32.mrb[19].mxu0 }
 0x11a   :  { %v1113_v27 = vadd.f32 %v1881_v21, %v2790_v18  ;;  %v1884_v28 = vadd.f32 %v1883_v26, %v1882_v23  ;;  %v1947_v29 = vpop.f32.mrb[19].mxu1 }
 0x11b   :  { %v1948_v31 = vadd.f32 %v1947_v29, %v1946_v25 }
 0x11c   :  { %v2817_v33 = vadd.f32 %v1945_v24, %v1113_v27  ;;  %v1116_v34 = vadd.f32 %v1884_v28, %v2790_v18 }
 0x11e   :  { %v2820_v35 = vadd.f32 %v1948_v31, %v1116_v34  ;;  %v1885_v36 = vpop.f32.mrb[20].mxu0 }
 0x11f   :  { %v1949_v37 = vpop.f32.mrb[20].mxu1  ;;  %v1886_v38 = vpop.f32.mrb[21].mxu0 }
 0x120   :  { %v1887_v39 = vadd.f32 %v1886_v38, %v1885_v36  ;;  %v1950_v40 = vpop.f32.mrb[21].mxu1  ;;  %v1888_v41 = vpop.f32.mrb[22].mxu0 }
 0x121   :  { %v1951_v42 = vadd.f32 %v1950_v40, %v1949_v37  ;;  %v1952_v43 = vpop.f32.mrb[22].mxu1  ;;  %v1889_v44 = vpop.f32.mrb[23].mxu0 }
 0x122   :  { %v1121_v45 = vadd.f32 %v1887_v39, %v2790_v18  ;;  %v1890_v47 = vadd.f32 %v1889_v44, %v1888_v41  ;;  %v1953_v49 = vpop.f32.mrb[23].mxu1 }
 0x123   :  { %v1954_v50 = vadd.f32 %v1953_v49, %v1952_v43 }
 0x124   :  { %v2823_v51 = vadd.f32 %v1951_v42, %v1121_v45  ;;  %v1124_v52 = vadd.f32 %v1890_v47, %v2790_v18 }
 0x126   :  { %v2826_v53 = vadd.f32 %v1954_v50, %v1124_v52  ;;  %v1891_v54 = vpop.f32.mrb[24].mxu0 }
 0x127   :  { %v1955_v55 = vpop.f32.mrb[24].mxu1  ;;  %v1892_v56 = vpop.f32.mrb[25].mxu0 }
 0x128   :  { %v1893_v57 = vadd.f32 %v1892_v56, %v1891_v54  ;;  %v1956_v58 = vpop.f32.mrb[25].mxu1  ;;  %v1894_v59 = vpop.f32.mrb[26].mxu0 }
 0x129   :  { %v1957_v60 = vadd.f32 %v1956_v58, %v1955_v55  ;;  %v1958_v61 = vpop.f32.mrb[26].mxu1  ;;  %v1895_v63 = vpop.f32.mrb[27].mxu0 }
 0x12a   :  { %v1129_v1 = vadd.f32 %v1893_v57, %v2790_v18  ;;  %v1896_v2 = vadd.f32 %v1895_v63, %v1894_v59  ;;  %v1959_v3 = vpop.f32.mrb[27].mxu1 }
 0x12b   :  { %v1960_v4 = vadd.f32 %v1959_v3, %v1958_v61 }
 0x12c   :  { %v2829_v5 = vadd.f32 %v1957_v60, %v1129_v1  ;;  %v1132_v6 = vadd.f32 %v1896_v2, %v2790_v18 }
 0x12e   :  { %v2832_v7 = vadd.f32 %v1960_v4, %v1132_v6  ;;  %v1897_v8 = vpop.f32.mrb[28].mxu0 }
 0x12f   :  { %v1961_v9 = vpop.f32.mrb[28].mxu1  ;;  %v1898_v10 = vpop.f32.mrb[29].mxu0 }
 0x130   :  { %v1899_v11 = vadd.f32 %v1898_v10, %v1897_v8  ;;  %v1962_v12 = vpop.f32.mrb[29].mxu1  ;;  %v1900_v13 = vpop.f32.mrb[30].mxu0 }
 0x131   :  { %v1963_v15 = vadd.f32 %v1962_v12, %v1961_v9  ;;  %v1964_v17 = vpop.f32.mrb[30].mxu1  ;;  %v1901_v19 = vpop.f32.mrb[31].mxu0 }
 0x132   :  { %v1137_v20 = vadd.f32 %v1899_v11, %v2790_v18  ;;  %v1902_v21 = vadd.f32 %v1901_v19, %v1900_v13  ;;  %v1965_v22 = vpop.f32.mrb[31].mxu1 }
 0x133   :  { %v1966_v23 = vadd.f32 %v1965_v22, %v1964_v17 }
 0x134   :  { %v2835_v24 = vadd.f32 %v1963_v15, %v1137_v20  ;;  %v1140_v25 = vadd.f32 %v1902_v21, %v2790_v18 }
 0x136   :  { %v2838_v26 = vadd.f32 %v1966_v23, %v1140_v25  ;;  %v1983_v27 = vpop.f32.mrb[32].mxu0 }
 0x137   :  { %v2047_v28 = vpop.f32.mrb[32].mxu1  ;;  %v1984_v29 = vpop.f32.mrb[33].mxu0 }
 0x138   :  { %v1985_v31 = vadd.f32 %v1984_v29, %v1983_v27  ;;  %v2048_v34 = vpop.f32.mrb[33].mxu1  ;;  %v1986_v36 = vpop.f32.mrb[34].mxu0 }
 0x139   :  { %v2049_v37 = vadd.f32 %v2048_v34, %v2047_v28  ;;  %v2050_v38 = vpop.f32.mrb[34].mxu1  ;;  %v1987_v39 = vpop.f32.mrb[35].mxu0 }
 0x13a   :  { %v1275_v40 = vadd.f32 %v1985_v31, %v2793_v30  ;;  %v1988_v41 = vadd.f32 %v1987_v39, %v1986_v36  ;;  %v2051_v42 = vpop.f32.mrb[35].mxu1 }
 0x13b   :  { %v2052_v43 = vadd.f32 %v2051_v42, %v2050_v38 }
 0x13c   :  { %v1278_v44 = vadd.f32 %v1988_v41, %v2796_v32  ;;  %v2842_v45 = vadd.f32 %v2049_v37, %v1275_v40 }
 0x13e   :  { %v1989_v18 = vpop.f32.mrb[36].mxu0  ;;  %v2844_v47 = vadd.f32 %v2052_v43, %v1278_v44 }
 0x13f   :  { %v2053_v49 = vpop.f32.mrb[36].mxu1  ;;  %v1990_v50 = vpop.f32.mrb[37].mxu0 }
 0x140   :  { %v1991_v52 = vadd.f32 %v1990_v50, %v1989_v18  ;;  %v2054_v54 = vpop.f32.mrb[37].mxu1  ;;  %v1992_v55 = vpop.f32.mrb[38].mxu0 }
 0x141   :  { %v2055_v56 = vadd.f32 %v2054_v54, %v2053_v49  ;;  %v2056_v57 = vpop.f32.mrb[38].mxu1  ;;  %v1993_v58 = vpop.f32.mrb[39].mxu0 }
 0x142   :  { %v1283_v30 = vadd.f32 %v1991_v52, %v2799_v46  ;;  %v1994_v59 = vadd.f32 %v1993_v58, %v1992_v55  ;;  %v2057_v60 = vpop.f32.mrb[39].mxu1 }
 0x143   :  { %v2058_v61 = vadd.f32 %v2057_v60, %v2056_v57 }
 0x144   :  { %v1286_v32 = vadd.f32 %v1994_v59, %v2802_v48  ;;  %v2848_v63 = vadd.f32 %v2055_v56, %v1283_v30 }
 0x146   :  { %v1995_v1 = vpop.f32.mrb[40].mxu0  ;;  %v2850_v2 = vadd.f32 %v2058_v61, %v1286_v32 }
 0x147   :  { %v2059_v3 = vpop.f32.mrb[40].mxu1  ;;  %v1996_v4 = vpop.f32.mrb[41].mxu0 }
 0x148   :  { %v1997_v6 = vadd.f32 %v1996_v4, %v1995_v1  ;;  %v2060_v8 = vpop.f32.mrb[41].mxu1  ;;  %v1998_v9 = vpop.f32.mrb[42].mxu0 }
 0x149   :  { %v2061_v10 = vadd.f32 %v2060_v8, %v2059_v3  ;;  %v2062_v11 = vpop.f32.mrb[42].mxu1  ;;  %v1999_v12 = vpop.f32.mrb[43].mxu0 }
 0x14a   :  { %v1291_v46 = vadd.f32 %v1997_v6, %v2805_v62  ;;  %v2000_v13 = vadd.f32 %v1999_v12, %v1998_v9  ;;  %v2063_v15 = vpop.f32.mrb[43].mxu1 }
 0x14b   :  { %v2064_v17 = vadd.f32 %v2063_v15, %v2062_v11 }
 0x14c   :  { %v1294_v48 = vadd.f32 %v2000_v13, %v2808_v0  ;;  %v2854_v19 = vadd.f32 %v2061_v10, %v1291_v46 }
 0x14e   :  { %v2001_v20 = vpop.f32.mrb[44].mxu0  ;;  %v2856_v21 = vadd.f32 %v2064_v17, %v1294_v48 }
 0x14f   :  { %v2065_v22 = vpop.f32.mrb[44].mxu1  ;;  %v2002_v23 = vpop.f32.mrb[45].mxu0 }
 0x150   :  { %v2003_v25 = vadd.f32 %v2002_v23, %v2001_v20  ;;  %v2066_v27 = vpop.f32.mrb[45].mxu1  ;;  %v2004_v28 = vpop.f32.mrb[46].mxu0 }
 0x151   :  { %v2067_v29 = vadd.f32 %v2066_v27, %v2065_v22  ;;  %v2068_v31 = vpop.f32.mrb[46].mxu1  ;;  %v2005_v34 = vpop.f32.mrb[47].mxu0 }
 0x152   :  { %v1299_v62 = vadd.f32 %v2003_v25, %v2811_v14  ;;  %v2006_v36 = vadd.f32 %v2005_v34, %v2004_v28  ;;  %v2069_v37 = vpop.f32.mrb[47].mxu1 }
 0x153   :  { %v2070_v38 = vadd.f32 %v2069_v37, %v2068_v31 }
 0x154   :  { %v1302_v0 = vadd.f32 %v2006_v36, %v2814_v16  ;;  %v2860_v39 = vadd.f32 %v2067_v29, %v1299_v62 }
 0x156   :  { %v2007_v40 = vpop.f32.mrb[48].mxu0  ;;  %v2862_v41 = vadd.f32 %v2070_v38, %v1302_v0 }
 0x157   :  { %v2071_v42 = vpop.f32.mrb[48].mxu1  ;;  %v2008_v43 = vpop.f32.mrb[49].mxu0 }
 0x158   :  { %v2009_v44 = vadd.f32 %v2008_v43, %v2007_v40  ;;  %v2072_v18 = vpop.f32.mrb[49].mxu1  ;;  %v2010_v49 = vpop.f32.mrb[50].mxu0 }
 0x159   :  { %v2073_v50 = vadd.f32 %v2072_v18, %v2071_v42  ;;  %v2074_v52 = vpop.f32.mrb[50].mxu1  ;;  %v2011_v54 = vpop.f32.mrb[51].mxu0 }
 0x15a   :  { %v1307_v14 = vadd.f32 %v2009_v44, %v2817_v33  ;;  %v2012_v55 = vadd.f32 %v2011_v54, %v2010_v49  ;;  %v2075_v56 = vpop.f32.mrb[51].mxu1 }
 0x15b   :  { %v2076_v57 = vadd.f32 %v2075_v56, %v2074_v52 }
 0x15c   :  { %v1310_v16 = vadd.f32 %v2012_v55, %v2820_v35  ;;  %v1404_v58 = vadd.f32 %v2073_v50, %v1307_v14 }
 0x15e   :  { %v2013_v30 = vpop.f32.mrb[52].mxu0  ;;  %v2866_v59 = vadd.f32 %v2076_v57, %v1310_v16 }
 0x15f   :  { %v2077_v60 = vpop.f32.mrb[52].mxu1  ;;  %v2014_v61 = vpop.f32.mrb[53].mxu0 }
 0x160   :  { %v2015_v32 = vadd.f32 %v2014_v61, %v2013_v30  ;;  %v2078_v1 = vpop.f32.mrb[53].mxu1  ;;  %v2016_v3 = vpop.f32.mrb[54].mxu0 }
 0x161   :  { %v2079_v4 = vadd.f32 %v2078_v1, %v2077_v60  ;;  %v2080_v6 = vpop.f32.mrb[54].mxu1  ;;  %v2017_v8 = vpop.f32.mrb[55].mxu0 }
 0x162   :  { %v1315_v9 = vadd.f32 %v2015_v32, %v2823_v51  ;;  %v2018_v33 = vadd.f32 %v2017_v8, %v2016_v3  ;;  %v2081_v10 = vpop.f32.mrb[55].mxu1 }
 0x163   :  { %v2082_v11 = vadd.f32 %v2081_v10, %v2080_v6 }
 0x164   :  { %v1318_v12 = vadd.f32 %v2018_v33, %v2826_v53  ;;  %v1412_v35 = vadd.f32 %v2079_v4, %v1315_v9 }
 0x166   :  { %v2019_v46 = vpop.f32.mrb[56].mxu0  ;;  %v1415_v13 = vadd.f32 %v2082_v11, %v1318_v12 }
 0x167   :  { %v2083_v15 = vpop.f32.mrb[56].mxu1  ;;  %v2020_v17 = vpop.f32.mrb[57].mxu0 }
 0x168   :  { %v2021_v48 = vadd.f32 %v2020_v17, %v2019_v46  ;;  %v2084_v20 = vpop.f32.mrb[57].mxu1  ;;  %v2022_v22 = vpop.f32.mrb[58].mxu0 }
 0x169   :  { %v2085_v23 = vadd.f32 %v2084_v20, %v2083_v15  ;;  %v2086_v25 = vpop.f32.mrb[58].mxu1  ;;  %v2023_v27 = vpop.f32.mrb[59].mxu0 }
 0x16a   :  { %v1323_v28 = vadd.f32 %v2021_v48, %v2829_v5  ;;  %v2024_v29 = vadd.f32 %v2023_v27, %v2022_v22  ;;  %v2087_v51 = vpop.f32.mrb[59].mxu1 }
 0x16b   :  { %v2088_v31 = vadd.f32 %v2087_v51, %v2086_v25 }
 0x16c   :  { %v1326_v34 = vadd.f32 %v2024_v29, %v2832_v7  ;;  %v1420_v62 = vadd.f32 %v2085_v23, %v1323_v28 }
 0x16e   :  { %v2025_v53 = vpop.f32.mrb[60].mxu0  ;;  %v1423_v36 = vadd.f32 %v2088_v31, %v1326_v34 }
 0x16f   :  { %v2089_v37 = vpop.f32.mrb[60].mxu1  ;;  %v2026_v38 = vpop.f32.mrb[61].mxu0 }
 0x170   :  { %v2027_v0 = vadd.f32 %v2026_v38, %v2025_v53  ;;  %v2090_v40 = vpop.f32.mrb[61].mxu1  ;;  %v2028_v42 = vpop.f32.mrb[62].mxu0 }
 0x171   :  { %v2091_v43 = vadd.f32 %v2090_v40, %v2089_v37  ;;  %v2092_v44 = vpop.f32.mrb[62].mxu1  ;;  %v2029_v18 = vpop.f32.mrb[63].mxu0 }
 0x172   :  { %v1331_v49 = vadd.f32 %v2027_v0, %v2835_v24  ;;  %v2030_v50 = vadd.f32 %v2029_v18, %v2028_v42  ;;  %v2093_v5 = vpop.f32.mrb[63].mxu1 }
 0x173   :  { %v2094_v52 = vadd.f32 %v2093_v5, %v2092_v44 }
 0x174   :  { %v1334_v54 = vadd.f32 %v2030_v50, %v2838_v26  ;;  %v1428_v14 = vadd.f32 %v2091_v43, %v1331_v49 }
 0x176   :  { %v2129_v7 = vpop.f32.mrb[64].mxu0  ;;  %v1431_v55 = vadd.f32 %v2094_v52, %v1334_v54 }
 0x177   :  { %v1477_v56 = vadd.f32 %v2129_v7, %v2848_v63  ;;  %v2137_v57 = vpop.f32.mrb[64].mxu1  ;;  %v1468_v16 = vpop.f32.mrb[65].mxu0 }
 0x178   :  { %v1509_v30 = vadd.f32 %v2137_v57, %v1412_v35  ;;  %v1469_v60 = vadd.f32 %v1468_v16, %v2842_v45  ;;  %v1500_v61 = vpop.f32.mrb[65].mxu1  ;;  %v2130_v32 = vpop.f32.mrb[66].mxu0 }
 0x179   :  { %v1501_v1 = vadd.f32 %v1500_v61, %v1404_v58  ;;  %v1480_v24 = vadd.f32 %v2130_v32, %v2850_v2  ;;  %v2138_v3 = vpop.f32.mrb[66].mxu1  ;;  %v1471_v4 = vpop.f32.mrb[67].mxu0 }
 0x17a   :  { %v1512_v6 = vadd.f32 %v2138_v3, %v1415_v13  ;;  %v1472_v26 = vadd.f32 %v1471_v4, %v2844_v47  ;;  %v1503_v8 = vpop.f32.mrb[67].mxu1 }
 0x17b   :  { %v1800_v9 = vpack.c.bf16 %v1480_v24, %v1477_v56  ;;  %v1504_v33 = vadd.f32 %v1503_v8, %v2866_v59 }
 0x17c   :  { %v1820_v63 = vpack.c.bf16 %v1512_v6, %v1509_v30  ;;  %v1795_v10 = vpack.c.bf16 %v1472_v26, %v1469_v60 }
 0x17d   :  { %1832 = vst [vmem:[%s2910_s3 + $0x8] sm:$0xff] %v1800_v9   ;;  %v1815_v45 = vpack.c.bf16 %v1504_v33, %v1501_v1 }
 0x17e   :  { %1836 = vst [vmem:[%s2910_s3 + $0x28] sm:$0xff] %v1820_v63   ;;  %1796 = vst [vmem:[%s2910_s3] sm:$0xff] %v1795_v10   ;;  %v2133_v47 = vpop.f32.mrb[68].mxu0 }
 0x17f   :  { %1835 = vst [vmem:[%s2910_s3 + $0x20] sm:$0xff] %v1815_v45   ;;  %v1493_v2 = vadd.f32 %v2133_v47, %v2860_v39  ;;  %v2141_v58 = vpop.f32.mrb[68].mxu1  ;;  %v1484_v59 = vpop.f32.mrb[69].mxu0 }
 0x180   :  { %v1525_v11 = vadd.f32 %v2141_v58, %v1428_v14  ;;  %v1485_v12 = vadd.f32 %v1484_v59, %v2854_v19  ;;  %v1516_v35 = vpop.f32.mrb[69].mxu1  ;;  %v2134_v46 = vpop.f32.mrb[70].mxu0 }
 0x181   :  { %v1517_v13 = vadd.f32 %v1516_v35, %v1420_v62  ;;  %v1496_v15 = vadd.f32 %v2134_v46, %v2862_v41  ;;  %v2142_v17 = vpop.f32.mrb[70].mxu1  ;;  %v1487_v48 = vpop.f32.mrb[71].mxu0 }
 0x182   :  { %v1528_v20 = vadd.f32 %v2142_v17, %v1431_v55  ;;  %v1488_v22 = vadd.f32 %v1487_v48, %v2856_v21  ;;  %v1519_v23 = vpop.f32.mrb[71].mxu1 }
 0x183   :  { %v1810_v25 = vpack.c.bf16 %v1496_v15, %v1493_v2  ;;  %v1520_v27 = vadd.f32 %v1519_v23, %v1423_v36 }
 0x184   :  { %v1830_v28 = vpack.c.bf16 %v1528_v20, %v1525_v11  ;;  %v1805_v39 = vpack.c.bf16 %v1488_v22, %v1485_v12 }
 0x185   :  { %1834 = vst [vmem:[%s2910_s3 + $0x18] sm:$0xff] %v1810_v25   ;;  %v1825_v19 = vpack.c.bf16 %v1520_v27, %v1517_v13 }
 0x186   :  { %1838 = vst [vmem:[%s2910_s3 + $0x38] sm:$0xff] %v1830_v28   ;;  %1833 = vst [vmem:[%s2910_s3 + $0x10] sm:$0xff] %v1805_v39  }
 0x187   :  { %1837 = vst [vmem:[%s2910_s3 + $0x30] sm:$0xff] %v1825_v19  }

// kernel: generator_nchw.76
= control target key start
LH: loop header
LB: loop body
LE: loop exit
PB: predicated region body
PF: predicated region fallthrough
CT: control target
= control target key end

     0   :  { %s549_s9 = smov 0   ;;  %s551_s10 = smov 0   ;;  %s643_s0 = inlined_call_operand.vmem [shape: bf16[2,16,256], index: 0, kind: input, shape index: {}]   ;;  %s644_s1 = inlined_call_operand.vmem [shape: f32[2,1,256], index: 1, kind: output, shape index: {0}]   ;;  %s645_s2 = inlined_call_operand.vmem [shape: f32[2,1,256], index: 2, kind: output, shape index: {1}]  }
   0x1   :  { %s553_s11 = smov 0   ;;  %s555_s12 = smov 0  }
   0x2   :  { %s557_s13 = smov 0   ;;  %s559_s14 = smov 0  }
   0x3   :  { %s561_s15 = smov 0  }
   0x4 LB: > { %s28_s16 = sadd.s32 1, %s523_s13  ;;  %s32_s17 = sadd.s32 1, %s527_s14  ;;  %s531_s15 = sphi %s561_s15, %s13_s15   ;;  %s527_s14 = sphi %s559_s14, %s651_s14   ;;  %s523_s13 = sphi %s557_s13, %s650_s13   ;;  %s519_s12 = sphi %s555_s12, %s649_s12   ;;  %s515_s11 = sphi %s553_s11, %s648_s11   ;;  %s511_s10 = sphi %s551_s10, %s647_s10   ;;  %s507_s9 = sphi %s549_s9, %s646_s9  }
   0x5   : > { %p30_p0 = scmp.ge.s32.totalorder %s28_s16, 2  ;;  %p50_p1 = scmp.ne.s32.totalorder %s511_s10, %s507_s9 }
   0x6   : > { %p51_p2 = scmp.eq.s32.totalorder %s531_s15, 0  ;;  %s43_s21 = sadd.s32 1, %s511_s10 }
   0x7   : > { %s653_s16 = smov (%p30_p0, %s28_s16), 0  ;;  %s655_s17 = smov (!%p30_p0, %s32_s17), %s527_s14 }
   0x8   : > { %p52_p3 = por %p51_p2, %p50_p1  ;;  %p34_p4 = scmp.ge.s32.totalorder %s655_s17, 2 }
   0x9   : > { %s39_s18 = ssub.s32 %s523_s13, %s653_s16  ;;  %p406_p6 = scmp.ge.s32.totalorder %s531_s15, 4 }
   0xa   : > { %s657_s17 = smov (%p34_p4, %s655_s17), 0 }
   0xb   : > { %s36_s19 = ssub.s32 %s527_s14, %s657_s17  ;;  %132 = sbr.rel (%p406_p6) target bundleno = 25 (0x19), region = 16 }
   0xc   : > { %s40_s20 = sor.u32 %s39_s18, %s36_s19 }
   0xd   : > { %p41_p5 = scmp.eq.s32.totalorder %s40_s20, 0 }
   0xf   : > { %s600_s22 = scalar_select %p41_p5, %s511_s10, %s43_s21  }
  0x12   : > { %135 = sbr.rel (!%p52_p3) target bundleno = 25 (0x19), region = 20  ;;  %s137_s23 = sand.u32 (%p52_p3), 1, %s511_s10  }
  0x13   : > { %s408_s24 = sshll.u32 (%p52_p3), %s527_s14, 2  ;;  %s407_s25 = sshll.u32 (%p52_p3), %s137_s23, 3 }
  0x14   : > { %s144_s26 = sadd.s32 (%p52_p3), %s523_s13, %s408_s24  ;;  %s139_s3 = scalar_lea.vmem (%p52_p3), [#allocation2], %s407_s25 }
  0x15   : > { %s409_s27 = sshll.u32 (%p52_p3), %s144_s26, 2 }
  0x16   : > { %s146_s30 = scalar_lea.vmem (%p52_p3), %s643_s0, %s409_s27 }
  0x17   : > { %v162_v0 = vld [vmem:[%s146_s30] sm:$0xf] (%p52_p3)  ;;  %v164_v1 = vld [vmem:[%s146_s30 + $0x8] sm:$0xf] (%p52_p3) }
  0x18   : > { %163 = vst [vmem:[%s139_s3] sm:$0xf] (%p52_p3), %v162_v0  ;;  %165 = vst [vmem:[%s139_s3 + $0x4] sm:$0xf] (%p52_p3), %v164_v1 }
  0x19 PF: > { %p410_p7 = scmp.ge.s32.totalorder %s531_s15, 1  ;;  %p191_p8 = scmp.lt.s32.totalorder %s531_s15, 5 }
  0x1b   : > { %p192_p9 = pnand %p410_p7, %p191_p8 }
  0x1c   : > { %p229_p10 = scmp.lt.s32.totalorder (!%p192_p9), %s519_s12, 1  ;;  %p231_p11 = scmp.lt.s32.totalorder (!%p192_p9), %s515_s11, 1  ;;  %v533_v3 = vmov (!%p192_p9), 0.0  }
  0x1d   : > { %195 = sbr.rel (%p192_p9) target bundleno = 54 (0x36), region = 61  ;;  %s198_s4 = sand.u32 (!%p192_p9), 1, %s507_s9  }
  0x1e   : > { %s411_s6 = sshll.u32 (!%p192_p9), %s198_s4, 3 }
  0x1f   : > { %s200_s24 = scalar_lea.vmem (!%p192_p9), [#allocation2], %s411_s6 }
  0x20   : > { %v417_v2 = vld [vmem:[%s200_s24] sm:$0xff] (!%p192_p9)  }
  0x21   : > { %v418_v4 = vunpack.c.l.bf16 (!%p192_p9), %v417_v2  ;;  %v419_v5 = vunpack.c.h.bf16 (!%p192_p9), %v417_v2 }
  0x23   : > { %v254_v6 = vadd.f32 (!%p192_p9), %v419_v5, %v418_v4  ;;  %v264_v7 = vmul.f32 (!%p192_p9), %v418_v4, %v418_v4  ;;  %v265_v8 = vmul.f32 (!%p192_p9), %v419_v5, %v419_v5 }
  0x24   : > { %s659_s12 = smov (!%p229_p10, %s519_s12), 1  ;;  %s661_s11 = smov (!%p231_p11, %s515_s11), 1 }
  0x25   : > { %s412_s5 = sshll.u32 %s659_s12, 1  ;;  %v255_v9 = vrot.slane %v254_v6, 4  ;;  %v266_v10 = vadd.f32 %v265_v8, %v264_v7 }
  0x26   : > { %s234_s7 = sadd.s32 %s412_s5, %s661_s11 }
  0x27   : > { %s235_s19 = scalar_lea.vmem %s644_s1, %s234_s7  ;;  %s242_s23 = scalar_lea.vmem %s645_s2, %s234_s7  ;;  %v256_v11 = vadd.f32 %v255_v9, %v254_v6  ;;  %v267_v12 = vrot.slane %v266_v10, 4 }
  0x28   : > { %247 = vst [vmem:[%s235_s19] sm:$0x1] %v533_v3  ;;  %248 = vst [vmem:[%s242_s23] sm:$0x1] %v533_v3 }
  0x29   : > { %v257_v13 = vrot.slane %v256_v11, 2  ;;  %v268_v14 = vadd.f32 %v267_v12, %v266_v10 }
  0x2b   : > { %v258_v15 = vadd.f32 %v257_v13, %v256_v11  ;;  %v269_v16 = vrot.slane %v268_v14, 2 }
  0x2d   : > { %v259_v17 = vrot.slane %v258_v15, 1  ;;  %v270_v18 = vadd.f32 %v269_v16, %v268_v14 }
  0x2f   : > { %v253_v19 = vld [vmem:[%s235_s19] sm:$0x1]  ;;  %v260_v20 = vadd.f32 %v259_v17, %v258_v15  ;;  %v271_v21 = vrot.slane %v270_v18, 1 }
  0x30   : > { %v263_v22 = vld [vmem:[%s242_s23] sm:$0x1] }
  0x31   : > { %v261_v23 = vadd.f32 %v260_v20, %v253_v19  ;;  %v272_v24 = vadd.f32 %v271_v21, %v270_v18 }
  0x33   : > { %262 = vst [vmem:[%s235_s19] sm:$0x1] %v261_v23  ;;  %v273_v25 = vadd.f32 %v272_v24, %v263_v22 }
  0x35   : > { %274 = vst [vmem:[%s242_s23] sm:$0x1] %v273_v25 }
  0x36 PF: > { %s13_s15 = sadd.s32 1, %s531_s15   ;;  %s646_s9 = smov %s511_s10 }
  0x37   : > { %p10_p12 = scmp.ge.s32.totalorder %s13_s15, 6   ;;  %s647_s10 = smov %s600_s22 }
  0x38   : > { %s648_s11 = smov %s523_s13  ;;  %s649_s12 = smov %s527_s14 }
  0x39   : > { %s650_s13 = smov %s653_s16  ;;  %s651_s14 = smov %s657_s17 }
  0x3a   :  { %12 = sbr.rel (!%p10_p12) target bundleno = 4 (0x4), region = 116 }

// kernel: generator_nchw.77
= control target key start
LH: loop header
LB: loop body
LE: loop exit
PB: predicated region body
PF: predicated region fallthrough
CT: control target
= control target key end

     0   :  { %s786_s18 = smov 0   ;;  %s788_s19 = smov 0   ;;  %s898_s0 = inlined_call_operand.vmem [shape: bf16[2,16,256], index: 0, kind: input, shape index: {}]   ;;  %s899_s1 = inlined_call_operand.vmem [shape: f32[2,1,256], index: 1, kind: input, shape index: {}]   ;;  %s900_s2 = inlined_call_operand.vmem [shape: f32[2,1,256], index: 2, kind: input, shape index: {}]   ;;  %s901_s3 = inlined_call_operand.vmem [shape: f32[1,256], index: 3, kind: input, shape index: {}]   ;;  %s902_s4 = inlined_call_operand.vmem [shape: f32[1,256], index: 4, kind: input, shape index: {}]   ;;  %s903_s5 = inlined_call_operand.vmem [shape: bf16[2,16,256], index: 5, kind: output, shape index: {}]  }
   0x1   :  { %s790_s20 = smov 0   ;;  %s792_s21 = smov 0  }
   0x2   :  { %s794_s22 = smov 0   ;;  %s796_s23 = smov 0  }
   0x3   :  { %s798_s24 = smov 0  }
   0x4 LB: > { %s30_s25 = sadd.s32 1, %s746_s22  ;;  %s34_s26 = sadd.s32 1, %s750_s23  ;;  %s754_s24 = sphi %s798_s24, %s15_s24   ;;  %s750_s23 = sphi %s796_s23, %s910_s23   ;;  %s746_s22 = sphi %s794_s22, %s909_s22   ;;  %s742_s21 = sphi %s792_s21, %s908_s21   ;;  %s738_s20 = sphi %s790_s20, %s907_s20   ;;  %s734_s19 = sphi %s788_s19, %s906_s19   ;;  %s730_s18 = sphi %s786_s18, %s905_s18  }
   0x5   : > { %p32_p0 = scmp.ge.s32.totalorder %s30_s25, 2  ;;  %s612_s27 = sadd.s32 4294967295, %s754_s24  }
   0x6   : > { %p52_p1 = scmp.ne.s32.totalorder %s734_s19, %s730_s18  ;;  %p53_p2 = scmp.eq.s32.totalorder %s754_s24, 0 }
   0x7   : > { %s912_s25 = smov (%p32_p0, %s30_s25), 0  ;;  %s914_s26 = smov (!%p32_p0, %s34_s26), %s750_s23 }
   0x8   : > { %p36_p3 = scmp.ge.s32.totalorder %s914_s26, 2  ;;  %p194_p4 = scmp.eq.s32.totalorder %s612_s27, 3 }
   0x9   : > { %s41_s28 = ssub.s32 %s746_s22, %s912_s25  ;;  %p54_p5 = por %p53_p2, %p52_p1 }
   0xa   : > { %s916_s26 = smov (%p36_p3, %s914_s26), 0  ;;  %p834_p6 = por %p194_p4, %p52_p1 }
   0xb   : > { %s38_s30 = ssub.s32 %s750_s23, %s916_s26  ;;  %s45_s7 = sadd.s32 1, %s734_s19 }
   0xc   : > { %s42_s6 = sor.u32 %s41_s28, %s38_s30  ;;  %p615_p8 = scmp.ge.s32.totalorder %s754_s24, 4 }
   0xd   : > { %p43_p7 = scmp.eq.s32.totalorder %s42_s6, 0 }
   0xe   : > { %216 = sbr.rel (%p615_p8) target bundleno = 28 (0x1c), region = 16 }
   0xf   : > { %s842_s8 = scalar_select %p43_p7, %s734_s19, %s45_s7  }
  0x15   : > { %219 = sbr.rel (!%p54_p5) target bundleno = 28 (0x1c), region = 20  ;;  %s221_s9 = sand.u32 (%p54_p5), 1, %s734_s19  }
  0x16   : > { %s617_s10 = sshll.u32 (%p54_p5), %s750_s23, 2  ;;  %s616_s11 = sshll.u32 (%p54_p5), %s221_s9, 3 }
  0x17   : > { %s228_s12 = sadd.s32 (%p54_p5), %s746_s22, %s617_s10  ;;  %s223_s17 = scalar_lea.vmem (%p54_p5), [#allocation2], %s616_s11 }
  0x18   : > { %s618_s13 = sshll.u32 (%p54_p5), %s228_s12, 2 }
  0x19   : > { %s230_s16 = scalar_lea.vmem (%p54_p5), %s898_s0, %s618_s13 }
  0x1a   : > { %v246_v0 = vld [vmem:[%s230_s16] sm:$0xf] (%p54_p5)  ;;  %v248_v1 = vld [vmem:[%s230_s16 + $0x8] sm:$0xf] (%p54_p5) }
  0x1b   : > { %247 = vst [vmem:[%s223_s17] sm:$0xf] (%p54_p5), %v246_v0  ;;  %249 = vst [vmem:[%s223_s17 + $0x4] sm:$0xf] (%p54_p5), %v248_v1 }
  0x1c PF: > { %p619_p9 = scmp.ge.s32.totalorder %s754_s24, 1  ;;  %p307_p10 = scmp.lt.s32.totalorder %s754_s24, 5 }
  0x1e   : > { %p308_p11 = pnand %p619_p9, %p307_p10 }
  0x1f   : > { %p361_p12 = scmp.lt.s32.totalorder (!%p308_p11), %s742_s21, 1  ;;  %p363_p13 = scmp.lt.s32.totalorder (!%p308_p11), %s738_s20, 1  ;;  %v401_v10 = vlaneseq (!%p308_p11) }
  0x20   : > { %311 = sbr.rel (%p308_p11) target bundleno = 89 (0x59), region = 77  ;;  %s314_s14 = sand.u32 (!%p308_p11), 1, %s730_s18  }
  0x21   : > { %s620_s15 = sshll.u32 (!%p308_p11), %s314_s14, 3  ;;  %v402_v11 = vshrl.u32 (!%p308_p11), %v401_v10, 7 }
  0x22   : > { %s359_s18 = scalar_lea.vmem (!%p308_p11), [#allocation3], %s620_s15 }
  0x23   : > { %v403_v14 = vsub.s32 (!%p308_p11), 0, %v402_v11 }
  0x27   : > { %s362_s27 = scalar_select %p361_p12, %s742_s21, 1 }
  0x28   : > { %s364_s28 = scalar_select %p363_p13, %s738_s20, 1 }
  0x29   : > { %s622_s30 = sshll.u32 %s362_s27, 1 }
  0x2a   : > { %s366_s6 = sadd.s32 %s622_s30, %s364_s28  ;;  %s377_s27 = scalar_lea.vmem %s901_s3, %s364_s28 }
  0x2b   : > { %s367_s10 = scalar_lea.vmem %s899_s1, %s366_s6  ;;  %s374_s13 = scalar_lea.vmem %s900_s2, %s366_s6  ;;  %v388_v13 = vld [vmem:[%s377_s27] sm:$0x1] }
  0x2c   : > { %v386_v2 = vld [vmem:[%s367_s10] sm:$0x1]  ;;  %s316_s30 = scalar_lea.vmem [#allocation2], %s620_s15  ;;  %s380_s9 = scalar_lea.vmem %s902_s4, %s364_s28 }
  0x2d   : > { %v387_v3 = vld [vmem:[%s374_s13] sm:$0x1]  ;;  %v390_v4 = vmul.f32 0.0625, %v386_v2  ;;  %s627_s28 = sshll.u32 (%p834_p6), %s742_s21, 2 }
  0x2e   : > { %v391_v5 = vmul.f32 0.0625, %v387_v3  ;;  %v634_v12 = vld [vmem:[%s316_s30] sm:$0xff]   ;;  %s439_s10 = sadd.s32 (%p834_p6), %s738_s20, %s627_s28 }
  0x2f   : > { %v392_v6 = vmul.f32 %v390_v4, %v390_v4  ;;  %v635_v16 = vunpack.c.l.bf16 %v634_v12  ;;  %v636_v17 = vunpack.c.h.bf16 %v634_v12  ;;  %v389_v19 = vld [vmem:[%s380_s9] sm:$0x1]  ;;  %s628_s11 = sshll.u32 (%p834_p6), %s439_s10, 2 }
  0x30   : > { %s441_s14 = scalar_lea.vmem (%p834_p6), %s903_s5, %s628_s11 }
  0x31   : > { %v393_v7 = vsub.f32 %v391_v5, %v392_v6 }
  0x33   : > { %v394_v8 = vmax.f32 %v393_v7, 0.0 }
  0x35   : > { %v395_v9 = vadd.f32 1e-05, %v394_v8 }
  0x37   : > { %698 = vrsqrt.f32 %v395_v9 }
  0x41   : > { %v699_v15 = vpop.eup %698 }
  0x42   : > { %v397_v18 = vmul.f32 %v699_v15, %v388_v13 }
  0x44   : > { %v398_v20 = vmul.f32 %v397_v18, %v390_v4  ;;  %v404_v21 = vrot.slane %v397_v18, %v403_v14 }
  0x46   : > { %v399_v22 = vsub.f32 %v389_v19, %v398_v20  ;;  %v406_v23 = vmul.f32 %v635_v16, %v404_v21  ;;  %v407_v24 = vmul.f32 %v636_v17, %v404_v21 }
  0x48   : > { %v412_v25 = vrot.slane %v399_v22, %v403_v14 }
  0x4a   : > { %v414_v26 = vadd.f32 %v412_v25, %v406_v23  ;;  %v415_v27 = vadd.f32 %v412_v25, %v407_v24  ;;  %434 = sbr.rel (!%p834_p6) target bundleno = 89 (0x59), region = 85 }
  0x4c   : > { %v416_v28 = vmax.f32 %v414_v26, 0.0  ;;  %v417_v29 = vmax.f32 %v415_v27, 0.0 }
  0x4e   : > { %v640_v30 = vpack.c.bf16 %v417_v29, %v416_v28 }
  0x50   : > { %641 = vst [vmem:[%s359_s18] sm:$0xff] %v640_v30  }
  0x57   : > { %v457_v31 = vld [vmem:[%s359_s18] sm:$0xf]  ;;  %v459_v32 = vld [vmem:[%s359_s18 + $0x4] sm:$0xf] }
  0x58   : > { %458 = vst [vmem:[%s441_s14] sm:$0xf] %v457_v31  ;;  %460 = vst [vmem:[%s441_s14 + $0x8] sm:$0xf] %v459_v32 }
  0x59 PF: > { %s15_s24 = sadd.s32 1, %s754_s24   ;;  %s905_s18 = smov %s734_s19 }
  0x5a   : > { %p12_p0 = scmp.ge.s32.totalorder %s15_s24, 6   ;;  %s906_s19 = smov %s842_s8 }
  0x5b   : > { %s907_s20 = smov %s746_s22  ;;  %s908_s21 = smov %s750_s23 }
  0x5c   : > { %s909_s22 = smov %s912_s25  ;;  %s910_s23 = smov %s916_s26 }
  0x5d   :  { %14 = sbr.rel (!%p12_p0) target bundleno = 4 (0x4), region = 169 }

// kernel: generator_nchw.83
= control target key start
LH: loop header
LB: loop body
LE: loop exit
PB: predicated region body
PF: predicated region fallthrough
CT: control target
= control target key end

     0   :  { %s927_s21 = smov 0   ;;  %s929_s22 = smov 0   ;;  %s1053_s0 = inlined_call_operand.vmem [shape: bf16[2,16,256], index: 0, kind: input, shape index: {}]   ;;  %s1054_s1 = inlined_call_operand.vmem [shape: f32[2,1,256], index: 1, kind: input, shape index: {}]   ;;  %s1055_s2 = inlined_call_operand.vmem [shape: f32[2,1,256], index: 2, kind: input, shape index: {}]   ;;  %s1056_s3 = inlined_call_operand.vmem [shape: f32[1,256], index: 3, kind: input, shape index: {}]   ;;  %s1057_s4 = inlined_call_operand.vmem [shape: f32[1,256], index: 4, kind: input, shape index: {}]   ;;  %s1058_s5 = inlined_call_operand.vmem [shape: bf16[2,16,256], index: 5, kind: input, shape index: {}]   ;;  %s1059_s6 = inlined_call_operand.vmem [shape: bf16[2,16,256], index: 6, kind: output, shape index: {}]  }
   0x1   :  { %s931_s23 = smov 0   ;;  %s933_s24 = smov 0  }
   0x2   :  { %s935_s25 = smov 0   ;;  %s937_s26 = smov 0  }
   0x3   :  { %s939_s27 = smov 0  }
   0x4 LB: > { %s31_s28 = sadd.s32 1, %s882_s25  ;;  %s35_s29 = sadd.s32 1, %s886_s26  ;;  %s890_s27 = sphi %s939_s27, %s16_s27   ;;  %s886_s26 = sphi %s937_s26, %s1067_s26   ;;  %s882_s25 = sphi %s935_s25, %s1066_s25   ;;  %s878_s24 = sphi %s933_s24, %s1065_s24   ;;  %s874_s23 = sphi %s931_s23, %s1064_s23   ;;  %s870_s22 = sphi %s929_s22, %s1063_s22   ;;  %s866_s21 = sphi %s927_s21, %s1062_s21  }
   0x5   : > { %p33_p0 = scmp.ge.s32.totalorder %s31_s28, 2  ;;  %s740_s30 = sadd.s32 4294967295, %s890_s27  }
   0x6   : > { %p53_p1 = scmp.ne.s32.totalorder %s870_s22, %s866_s21  ;;  %p54_p2 = scmp.eq.s32.totalorder %s890_s27, 0 }
   0x7   : > { %s1069_s28 = smov (%p33_p0, %s31_s28), 0  ;;  %s1071_s29 = smov (!%p33_p0, %s35_s29), %s886_s26 }
   0x8   : > { %p37_p3 = scmp.ge.s32.totalorder %s1071_s29, 2  ;;  %p225_p4 = scmp.eq.s32.totalorder %s740_s30, 3 }
   0x9   : > { %s42_s7 = ssub.s32 %s882_s25, %s1069_s28  ;;  %p973_p5 = por %p54_p2, %p53_p1 }
   0xa   : > { %s1073_s29 = smov (%p37_p3, %s1071_s29), 0  ;;  %p979_p6 = por %p225_p4, %p53_p1 }
   0xb   : > { %s39_s10 = ssub.s32 %s886_s26, %s1073_s29  ;;  %s46_s12 = sadd.s32 1, %s870_s22 }
   0xc   : > { %s43_s11 = sor.u32 %s42_s7, %s39_s10  ;;  %p743_p8 = scmp.ge.s32.totalorder %s890_s27, 4 }
   0xd   : > { %p44_p7 = scmp.eq.s32.totalorder %s43_s11, 0 }
   0xe   : > { %247 = sbr.rel (%p743_p8) target bundleno = 35 (0x23), region = 16 }
   0xf   : > { %s987_s13 = scalar_select %p44_p7, %s870_s22, %s46_s12  }
  0x15   : > { %250 = sbr.rel (!%p973_p5) target bundleno = 28 (0x1c), region = 20  ;;  %s252_s14 = sand.u32 (%p973_p5), 1, %s870_s22  }
  0x16   : > { %s745_s15 = sshll.u32 (%p973_p5), %s886_s26, 2  ;;  %s744_s16 = sshll.u32 (%p973_p5), %s252_s14, 3 }
  0x17   : > { %s259_s17 = sadd.s32 (%p973_p5), %s882_s25, %s745_s15  ;;  %s254_s7 = scalar_lea.vmem (%p973_p5), [#allocation2], %s744_s16 }
  0x18   : > { %s746_s18 = sshll.u32 (%p973_p5), %s259_s17, 2 }
  0x19   : > { %s261_s30 = scalar_lea.vmem (%p973_p5), %s1053_s0, %s746_s18 }
  0x1a   : > { %v277_v0 = vld [vmem:[%s261_s30] sm:$0xf] (%p973_p5)  ;;  %v279_v1 = vld [vmem:[%s261_s30 + $0x8] sm:$0xf] (%p973_p5) }
  0x1b   : > { %278 = vst [vmem:[%s254_s7] sm:$0xf] (%p973_p5), %v277_v0  ;;  %280 = vst [vmem:[%s254_s7 + $0x4] sm:$0xf] (%p973_p5), %v279_v1 }
  0x1c PF: > { %339 = sbr.rel (!%p973_p5) target bundleno = 35 (0x23), region = 77  ;;  %s341_s10 = sand.u32 (%p973_p5), 1, %s870_s22  }
  0x1d   : > { %s748_s11 = sshll.u32 (%p973_p5), %s886_s26, 2  ;;  %s747_s12 = sshll.u32 (%p973_p5), %s341_s10, 3 }
  0x1e   : > { %s348_s14 = sadd.s32 (%p973_p5), %s882_s25, %s748_s11  ;;  %s343_s16 = scalar_lea.vmem (%p973_p5), [#allocation3], %s747_s12 }
  0x1f   : > { %s749_s15 = sshll.u32 (%p973_p5), %s348_s14, 2 }
  0x20   : > { %s350_s18 = scalar_lea.vmem (%p973_p5), %s1058_s5, %s749_s15 }
  0x21   : > { %v366_v2 = vld [vmem:[%s350_s18] sm:$0xf] (%p973_p5)  ;;  %v368_v3 = vld [vmem:[%s350_s18 + $0x8] sm:$0xf] (%p973_p5) }
  0x22   : > { %367 = vst [vmem:[%s343_s16] sm:$0xf] (%p973_p5), %v366_v2  ;;  %369 = vst [vmem:[%s343_s16 + $0x4] sm:$0xf] (%p973_p5), %v368_v3 }
  0x23 PF: > { %p750_p9 = scmp.ge.s32.totalorder %s890_s27, 1  ;;  %p395_p10 = scmp.lt.s32.totalorder %s890_s27, 5 }
  0x25   : > { %p396_p11 = pnand %p750_p9, %p395_p10 }
  0x26   : > { %p462_p12 = scmp.lt.s32.totalorder (!%p396_p11), %s878_s24, 1  ;;  %p464_p13 = scmp.lt.s32.totalorder (!%p396_p11), %s874_s23, 1  ;;  %v503_v12 = vlaneseq (!%p396_p11) }
  0x27   : > { %399 = sbr.rel (%p396_p11) target bundleno = 96 (0x60), region = 118  ;;  %s402_s19 = sand.u32 (!%p396_p11), 1, %s866_s21  }
  0x28   : > { %s751_s18 = sshll.u32 (!%p396_p11), %s402_s19, 3  ;;  %v504_v13 = vshrl.u32 (!%p396_p11), %v503_v12, 7 }
  0x29   : > { %s404_s10 = scalar_lea.vmem (!%p396_p11), [#allocation2], %s751_s18  ;;  %s411_s21 = scalar_lea.vmem (!%p396_p11), [#allocation3], %s751_s18 }
  0x2a   : > { %v766_v14 = vld [vmem:[%s404_s10] sm:$0xff] (!%p396_p11)   ;;  %v505_v16 = vsub.s32 (!%p396_p11), 0, %v504_v13  ;;  %v770_v24 = vld [vmem:[%s411_s21] sm:$0xff] (!%p396_p11)  }
  0x2b   : > { %v767_v18 = vunpack.c.l.bf16 (!%p396_p11), %v766_v14  ;;  %v768_v19 = vunpack.c.h.bf16 (!%p396_p11), %v766_v14  ;;  %v771_v29 = vunpack.c.l.bf16 (!%p396_p11), %v770_v24  ;;  %v772_v30 = vunpack.c.h.bf16 (!%p396_p11), %v770_v24 }
  0x2e   : > { %s463_s8 = scalar_select %p462_p12, %s878_s24, 1 }
  0x2f   : > { %s465_s20 = scalar_select %p464_p13, %s874_s23, 1 }
  0x30   : > { %s754_s30 = sshll.u32 %s463_s8, 1  ;;  %s759_s14 = sshll.u32 (%p979_p6), %s878_s24, 2 }
  0x31   : > { %s467_s7 = sadd.s32 %s754_s30, %s465_s20  ;;  %s478_s30 = scalar_lea.vmem %s1056_s3, %s465_s20 }
  0x32   : > { %s468_s12 = scalar_lea.vmem %s1054_s1, %s467_s7  ;;  %s475_s17 = scalar_lea.vmem %s1055_s2, %s467_s7  ;;  %v490_v15 = vld [vmem:[%s478_s30] sm:$0x1] }
  0x33   : > { %v488_v4 = vld [vmem:[%s468_s12] sm:$0x1]  ;;  %s481_s12 = scalar_lea.vmem %s1057_s4, %s465_s20  ;;  %s460_s20 = scalar_lea.vmem [#allocation4], %s751_s18 }
  0x34   : > { %v489_v5 = vld [vmem:[%s475_s17] sm:$0x1]  ;;  %v492_v6 = vmul.f32 0.0625, %v488_v4  ;;  %s545_s15 = sadd.s32 (%p979_p6), %s874_s23, %s759_s14 }
  0x35   : > { %v493_v7 = vmul.f32 0.0625, %v489_v5  ;;  %v491_v21 = vld [vmem:[%s481_s12] sm:$0x1]  ;;  %s760_s17 = sshll.u32 (%p979_p6), %s545_s15, 2 }
  0x36   : > { %v494_v8 = vmul.f32 %v492_v6, %v492_v6  ;;  %s547_s8 = scalar_lea.vmem (%p979_p6), %s1059_s6, %s760_s17 }
  0x38   : > { %v495_v9 = vsub.f32 %v493_v7, %v494_v8 }
  0x3a   : > { %v496_v10 = vmax.f32 %v495_v9, 0.0 }
  0x3c   : > { %v497_v11 = vadd.f32 1e-05, %v496_v10 }
  0x3e   : > { %834 = vrsqrt.f32 %v497_v11 }
  0x48   : > { %v835_v17 = vpop.eup %834 }
  0x49   : > { %v499_v20 = vmul.f32 %v835_v17, %v490_v15 }
  0x4b   : > { %v500_v22 = vmul.f32 %v499_v20, %v492_v6  ;;  %v506_v23 = vrot.slane %v499_v20, %v505_v16 }
  0x4d   : > { %v501_v25 = vsub.f32 %v491_v21, %v500_v22  ;;  %v508_v26 = vmul.f32 %v767_v18, %v506_v23  ;;  %v509_v27 = vmul.f32 %v768_v19, %v506_v23 }
  0x4f   : > { %v514_v28 = vrot.slane %v501_v25, %v505_v16 }
  0x51   : > { %v516_v31 = vadd.f32 %v514_v28, %v508_v26  ;;  %v517_v32 = vadd.f32 %v514_v28, %v509_v27  ;;  %540 = sbr.rel (!%p979_p6) target bundleno = 96 (0x60), region = 130 }
  0x53   : > { %v522_v33 = vadd.f32 %v771_v29, %v516_v31  ;;  %v523_v34 = vadd.f32 %v772_v30, %v517_v32 }
  0x55   : > { %v776_v35 = vpack.c.bf16 %v523_v34, %v522_v33 }
  0x57   : > { %777 = vst [vmem:[%s460_s20] sm:$0xff] %v776_v35  }
  0x5e   : > { %v563_v36 = vld [vmem:[%s460_s20] sm:$0xf]  ;;  %v565_v37 = vld [vmem:[%s460_s20 + $0x4] sm:$0xf] }
  0x5f   : > { %564 = vst [vmem:[%s547_s8] sm:$0xf] %v563_v36  ;;  %566 = vst [vmem:[%s547_s8 + $0x8] sm:$0xf] %v565_v37 }
  0x60 PF: > { %s16_s27 = sadd.s32 1, %s890_s27   ;;  %s1062_s21 = smov %s870_s22 }
  0x61   : > { %p13_p0 = scmp.ge.s32.totalorder %s16_s27, 6   ;;  %s1063_s22 = smov %s987_s13 }
  0x62   : > { %s1064_s23 = smov %s882_s25  ;;  %s1065_s24 = smov %s886_s26 }
  0x63   : > { %s1066_s25 = smov %s1069_s28  ;;  %s1067_s26 = smov %s1073_s29 }
  0x64   :  { %15 = sbr.rel (!%p13_p0) target bundleno = 4 (0x4), region = 222 }

// kernel: generator_nchw.75
= control target key start
LH: loop header
LB: loop body
LE: loop exit
PB: predicated region body
PF: predicated region fallthrough
CT: control target
= control target key end

     0   :  { %s3901_s1 = inlined_call_operand.vmem [shape: bf16[2048,256], index: 1, kind: input, shape index: {}]   ;;  %s3902_s0 = inlined_call_operand.vmem [shape: bf16[32,2048], index: 0, kind: input, shape index: {}]   ;;  %s3903_s2 = inlined_call_operand.vmem [shape: f32[1,256], index: 2, kind: input, shape index: {}]   ;;  %s3904_s3 = inlined_call_operand.vmem [shape: bf16[32,256], index: 3, kind: output, shape index: {}]  }
   0x1   :  { %v2570_v0 = vld [vmem:[%s3901_s1 + $0x4] ss:$8 sps:$4 sm:$0xff]   ;;  %v2574_v2 = vld [vmem:[%s3901_s1] ss:$8 sps:$4 sm:$0xff]   ;;  %v2576_v4 = vld [vmem:[%s3901_s1 + $0x14] ss:$8 sps:$4 sm:$0xff]  }
   0x2   :  { %v2572_v1 = vld [vmem:[%s3901_s1 + $0x404] ss:$8 sps:$4 sm:$0xff]   ;;  %1754 = vmatprep.subr.bf16.mxu1 %v2570_v0  ;;  %v2575_v3 = vld [vmem:[%s3901_s1 + $0x400] ss:$8 sps:$4 sm:$0xff]   ;;  %v2578_v5 = vld [vmem:[%s3901_s1 + $0x414] ss:$8 sps:$4 sm:$0xff]  }
   0x3   :  { %1966 = vmatprep.subr.bf16.mxu0 %v2572_v1  ;;  %1755 = vmatpush1.bf16.msra.mxu1 %v2574_v2  ;;  %v2580_v6 = vld [vmem:[%s3901_s1 + $0x10] ss:$8 sps:$4 sm:$0xff]   ;;  %v2582_v8 = vld [vmem:[%s3901_s1 + $0x24] ss:$8 sps:$4 sm:$0xff]   ;;  %v2586_v10 = vld [vmem:[%s3901_s1 + $0x20] ss:$8 sps:$4 sm:$0xff]  }
   0x4   :  { %1967 = vmatpush1.bf16.msra.mxu0 %v2575_v3  ;;  %1756 = vmatprep.subr.bf16.mxu1 %v2576_v4  ;;  %v2581_v7 = vld [vmem:[%s3901_s1 + $0x410] ss:$8 sps:$4 sm:$0xff]   ;;  %v2584_v9 = vld [vmem:[%s3901_s1 + $0x424] ss:$8 sps:$4 sm:$0xff]   ;;  %v2587_v11 = vld [vmem:[%s3901_s1 + $0x420] ss:$8 sps:$4 sm:$0xff]  }
   0x5   :  { %1968 = vmatprep.subr.bf16.mxu0 %v2578_v5  ;;  %v2588_v12 = vld [vmem:[%s3901_s1 + $0x34] ss:$8 sps:$4 sm:$0xff]   ;;  %v2592_v14 = vld [vmem:[%s3901_s1 + $0x30] ss:$8 sps:$4 sm:$0xff]   ;;  %v2594_v16 = vld [vmem:[%s3901_s1 + $0x44] ss:$8 sps:$4 sm:$0xff]  }
   0x6   :  { %v2590_v13 = vld [vmem:[%s3901_s1 + $0x434] ss:$8 sps:$4 sm:$0xff]   ;;  %v2593_v15 = vld [vmem:[%s3901_s1 + $0x430] ss:$8 sps:$4 sm:$0xff]   ;;  %v2596_v17 = vld [vmem:[%s3901_s1 + $0x444] ss:$8 sps:$4 sm:$0xff]  }
   0x7   :  { %1757 = vmatpush1.bf16.msra.mxu1 %v2580_v6  ;;  %v2598_v18 = vld [vmem:[%s3901_s1 + $0x40] ss:$8 sps:$4 sm:$0xff]   ;;  %v2600_v20 = vld [vmem:[%s3901_s1 + $0x54] ss:$8 sps:$4 sm:$0xff]   ;;  %v2604_v22 = vld [vmem:[%s3901_s1 + $0x50] ss:$8 sps:$4 sm:$0xff]  }
   0x8   :  { %1969 = vmatpush1.bf16.msra.mxu0 %v2581_v7  ;;  %1758 = vmatprep.subr.bf16.mxu1 %v2582_v8  ;;  %v2599_v19 = vld [vmem:[%s3901_s1 + $0x440] ss:$8 sps:$4 sm:$0xff]   ;;  %v2602_v21 = vld [vmem:[%s3901_s1 + $0x454] ss:$8 sps:$4 sm:$0xff]   ;;  %v2605_v23 = vld [vmem:[%s3901_s1 + $0x450] ss:$8 sps:$4 sm:$0xff]  }
   0x9   :  { %1970 = vmatprep.subr.bf16.mxu0 %v2584_v9  ;;  %v2606_v24 = vld [vmem:[%s3901_s1 + $0x64] ss:$8 sps:$4 sm:$0xff]   ;;  %v2610_v26 = vld [vmem:[%s3901_s1 + $0x60] ss:$8 sps:$4 sm:$0xff]   ;;  %v2612_v28 = vld [vmem:[%s3901_s1 + $0x74] ss:$8 sps:$4 sm:$0xff]  }
   0xa   :  { %v2608_v25 = vld [vmem:[%s3901_s1 + $0x464] ss:$8 sps:$4 sm:$0xff]   ;;  %v2611_v27 = vld [vmem:[%s3901_s1 + $0x460] ss:$8 sps:$4 sm:$0xff]   ;;  %v2614_v29 = vld [vmem:[%s3901_s1 + $0x474] ss:$8 sps:$4 sm:$0xff]  }
   0xb   :  { %1759 = vmatpush1.bf16.msra.mxu1 %v2586_v10  ;;  %v2616_v30 = vld [vmem:[%s3901_s1 + $0x70] ss:$8 sps:$4 sm:$0xff]   ;;  %v2618_v32 = vld [vmem:[%s3901_s1 + $0x84] ss:$8 sps:$4 sm:$0xff]   ;;  %v2622_v34 = vld [vmem:[%s3901_s1 + $0x80] ss:$8 sps:$4 sm:$0xff]  }
   0xc   :  { %1971 = vmatpush1.bf16.msra.mxu0 %v2587_v11  ;;  %1760 = vmatprep.subr.bf16.mxu1 %v2588_v12  ;;  %v2617_v31 = vld [vmem:[%s3901_s1 + $0x470] ss:$8 sps:$4 sm:$0xff]   ;;  %v2620_v33 = vld [vmem:[%s3901_s1 + $0x484] ss:$8 sps:$4 sm:$0xff]   ;;  %v2623_v35 = vld [vmem:[%s3901_s1 + $0x480] ss:$8 sps:$4 sm:$0xff]  }
   0xd   :  { %1972 = vmatprep.subr.bf16.mxu0 %v2590_v13  ;;  %v2624_v36 = vld [vmem:[%s3901_s1 + $0x94] ss:$8 sps:$4 sm:$0xff]   ;;  %v2628_v38 = vld [vmem:[%s3901_s1 + $0x90] ss:$8 sps:$4 sm:$0xff]   ;;  %v2630_v40 = vld [vmem:[%s3901_s1 + $0xa4] ss:$8 sps:$4 sm:$0xff]  }
   0xe   :  { %v2626_v37 = vld [vmem:[%s3901_s1 + $0x494] ss:$8 sps:$4 sm:$0xff]   ;;  %v2629_v39 = vld [vmem:[%s3901_s1 + $0x490] ss:$8 sps:$4 sm:$0xff]   ;;  %v2632_v41 = vld [vmem:[%s3901_s1 + $0x4a4] ss:$8 sps:$4 sm:$0xff]  }
   0xf   :  { %1761 = vmatpush1.bf16.msra.mxu1 %v2592_v14  ;;  %v2634_v42 = vld [vmem:[%s3901_s1 + $0xa0] ss:$8 sps:$4 sm:$0xff]   ;;  %v2636_v44 = vld [vmem:[%s3901_s1 + $0xb4] ss:$8 sps:$4 sm:$0xff]   ;;  %v2640_v46 = vld [vmem:[%s3901_s1 + $0xb0] ss:$8 sps:$4 sm:$0xff]  }
  0x10   :  { %1973 = vmatpush1.bf16.msra.mxu0 %v2593_v15  ;;  %1762 = vmatprep.subr.bf16.mxu1 %v2594_v16  ;;  %v2635_v43 = vld [vmem:[%s3901_s1 + $0x4a0] ss:$8 sps:$4 sm:$0xff]   ;;  %v2638_v45 = vld [vmem:[%s3901_s1 + $0x4b4] ss:$8 sps:$4 sm:$0xff]   ;;  %v2641_v47 = vld [vmem:[%s3901_s1 + $0x4b0] ss:$8 sps:$4 sm:$0xff]  }
  0x11   :  { %1974 = vmatprep.subr.bf16.mxu0 %v2596_v17  ;;  %v14_v48 = vld [vmem:[%s3902_s0] sm:$0xff]  ;;  %v2648_v58 = vld [vmem:[%s3901_s1 + $0xd4] ss:$8 sps:$4 sm:$0xff]   ;;  %v2652_v60 = vld [vmem:[%s3901_s1 + $0xd0] ss:$8 sps:$4 sm:$0xff]  }
  0x12   :  { %v22_v49 = vld [vmem:[%s3902_s0 + $0x40] sm:$0xff]  ;;  %v2650_v59 = vld [vmem:[%s3901_s1 + $0x4d4] ss:$8 sps:$4 sm:$0xff]   ;;  %v2653_v61 = vld [vmem:[%s3901_s1 + $0x4d0] ss:$8 sps:$4 sm:$0xff]  }
  0x13   :  { %1763 = vmatpush1.bf16.msra.mxu1 %v2598_v18  ;;  %v2642_v50 = vld [vmem:[%s3901_s1 + $0xc4] ss:$8 sps:$4 sm:$0xff]   ;;  %v2211_v52 = vcombine.high %v14_v48, %v22_v49  ;;  %v2646_v56 = vld [vmem:[%s3901_s1 + $0xc0] ss:$8 sps:$4 sm:$0xff]   ;;  %v2660_v2 = vld [vmem:[%s3901_s1 + $0xf4] ss:$8 sps:$4 sm:$0xff]   ;;  %v2210_v8 = vcombine.low %v14_v48, %v22_v49 }
  0x14   :  { %1975 = vmatpush1.bf16.msra.mxu0 %v2599_v19  ;;  %1764 = vmatprep.subr.bf16.mxu1 %v2600_v20  ;;  %v2644_v51 = vld [vmem:[%s3901_s1 + $0x4c4] ss:$8 sps:$4 sm:$0xff]   ;;  %v2647_v57 = vld [vmem:[%s3901_s1 + $0x4c0] ss:$8 sps:$4 sm:$0xff]   ;;  %v2662_v3 = vld [vmem:[%s3901_s1 + $0x4f4] ss:$8 sps:$4 sm:$0xff]  }
  0x15   :  { %1976 = vmatprep.subr.bf16.mxu0 %v2602_v21  ;;  %v18_v53 = vld [vmem:[%s3902_s0 + $0x20] sm:$0xff]  ;;  %1786 = vmatprep.mubr.bf16.mxu1 %v2211_v52  ;;  %v2664_v4 = vld [vmem:[%s3901_s1 + $0xf0] ss:$8 sps:$4 sm:$0xff]   ;;  %v2674_v12 = vld [vmem:[%s3901_s1 + $0x114] ss:$8 sps:$4 sm:$0xff]  }
  0x16   :  { %v26_v54 = vld [vmem:[%s3902_s0 + $0x60] sm:$0xff]  ;;  %v2665_v5 = vld [vmem:[%s3901_s1 + $0x4f0] ss:$8 sps:$4 sm:$0xff]   ;;  %v2677_v13 = vld [vmem:[%s3901_s1 + $0x514] ss:$8 sps:$4 sm:$0xff]  }
  0x17   :  { %1765 = vmatpush1.bf16.msra.mxu1 %v2604_v22  ;;  %v2219_v55 = vcombine.high %v18_v53, %v26_v54  ;;  %v2654_v62 = vld [vmem:[%s3901_s1 + $0xe4] ss:$8 sps:$4 sm:$0xff]   ;;  %v2658_v0 = vld [vmem:[%s3901_s1 + $0xe0] ss:$8 sps:$4 sm:$0xff]   ;;  %v2218_v10 = vcombine.low %v18_v53, %v26_v54  ;;  %v2672_v14 = vld [vmem:[%s3901_s1 + $0x110] ss:$8 sps:$4 sm:$0xff]  }
  0x18   :  { %1977 = vmatpush1.bf16.msra.mxu0 %v2605_v23  ;;  %1766 = vmatprep.subr.bf16.mxu1 %v2606_v24  ;;  %v2656_v63 = vld [vmem:[%s3901_s1 + $0x4e4] ss:$8 sps:$4 sm:$0xff]   ;;  %v2659_v1 = vld [vmem:[%s3901_s1 + $0x4e0] ss:$8 sps:$4 sm:$0xff]   ;;  %v2675_v15 = vld [vmem:[%s3901_s1 + $0x510] ss:$8 sps:$4 sm:$0xff]  }
  0x19   :  { %1978 = vmatprep.subr.bf16.mxu0 %v2608_v25  ;;  %1998 = vmatprep.mubr.bf16.mxu0 %v2219_v55  ;;  %v2668_v6 = vld [vmem:[%s3901_s1 + $0x104] ss:$8 sps:$4 sm:$0xff]   ;;  %v2666_v9 = vld [vmem:[%s3901_s1 + $0x100] ss:$8 sps:$4 sm:$0xff]   ;;  %v2686_v20 = vld [vmem:[%s3901_s1 + $0x134] ss:$8 sps:$4 sm:$0xff]  }
  0x1a   :  { %v2671_v7 = vld [vmem:[%s3901_s1 + $0x504] ss:$8 sps:$4 sm:$0xff]   ;;  %v2669_v11 = vld [vmem:[%s3901_s1 + $0x500] ss:$8 sps:$4 sm:$0xff]   ;;  %v2689_v21 = vld [vmem:[%s3901_s1 + $0x534] ss:$8 sps:$4 sm:$0xff]  }
  0x1b   :  { %1767 = vmatpush1.bf16.msra.mxu1 %v2610_v26  ;;  %v2680_v16 = vld [vmem:[%s3901_s1 + $0x124] ss:$8 sps:$4 sm:$0xff]   ;;  %v2678_v18 = vld [vmem:[%s3901_s1 + $0x120] ss:$8 sps:$4 sm:$0xff]   ;;  %v2684_v22 = vld [vmem:[%s3901_s1 + $0x130] ss:$8 sps:$4 sm:$0xff]  }
  0x1c   :  { %1979 = vmatpush1.bf16.msra.mxu0 %v2611_v27  ;;  %1768 = vmatprep.subr.bf16.mxu1 %v2612_v28  ;;  %v2683_v17 = vld [vmem:[%s3901_s1 + $0x524] ss:$8 sps:$4 sm:$0xff]   ;;  %v2681_v19 = vld [vmem:[%s3901_s1 + $0x520] ss:$8 sps:$4 sm:$0xff]   ;;  %v2687_v23 = vld [vmem:[%s3901_s1 + $0x530] ss:$8 sps:$4 sm:$0xff]  }
  0x1d   :  { %1980 = vmatprep.subr.bf16.mxu0 %v2614_v29  ;;  %v2692_v24 = vld [vmem:[%s3901_s1 + $0x144] ss:$8 sps:$4 sm:$0xff]   ;;  %v2690_v26 = vld [vmem:[%s3901_s1 + $0x140] ss:$8 sps:$4 sm:$0xff]   ;;  %v2698_v28 = vld [vmem:[%s3901_s1 + $0x154] ss:$8 sps:$4 sm:$0xff]  }
  0x1e   :  { %v2695_v25 = vld [vmem:[%s3901_s1 + $0x544] ss:$8 sps:$4 sm:$0xff]   ;;  %v2693_v27 = vld [vmem:[%s3901_s1 + $0x540] ss:$8 sps:$4 sm:$0xff]   ;;  %v2701_v29 = vld [vmem:[%s3901_s1 + $0x554] ss:$8 sps:$4 sm:$0xff]  }
  0x1f   :  { %1769 = vmatpush1.bf16.msra.mxu1 %v2616_v30  ;;  %v30_v30 = vld [vmem:[%s3902_s0 + $0x80] sm:$0xff]  ;;  %v3295_v49 = vld [vmem:[%s3902_s0 + $0x28] sm:$0xff]  ;;  %v2711_v52 = vld [vmem:[%s3901_s1 + $0x570] ss:$8 sps:$4 sm:$0xff]  }
  0x20   :  { %1981 = vmatpush1.bf16.msra.mxu0 %v2617_v31  ;;  %1770 = vmatprep.subr.bf16.mxu1 %v2618_v32  ;;  %v38_v31 = vld [vmem:[%s3902_s0 + $0xc0] sm:$0xff]  ;;  %v2696_v32 = vld [vmem:[%s3901_s1 + $0x150] ss:$8 sps:$4 sm:$0xff]  }
  0x21   :  { %1982 = vmatprep.subr.bf16.mxu0 %v2620_v33  ;;  %v2227_v33 = vcombine.high %v30_v30, %v38_v31  ;;  %v2716_v54 = vld [vmem:[%s3901_s1 + $0x184] ss:$8 sps:$4 sm:$0xff]  }
  0x22   :  { %v2719_v55 = vld [vmem:[%s3901_s1 + $0x584] ss:$8 sps:$4 sm:$0xff]  }
  0x23   :  { %1771 = vmatpush1.bf16.msra.mxu1 %v2622_v34  ;;  %v2699_v34 = vld [vmem:[%s3901_s1 + $0x550] ss:$8 sps:$4 sm:$0xff]  }
  0x24   :  { %1983 = vmatpush1.bf16.msra.mxu0 %v2623_v35  ;;  %1772 = vmatprep.subr.bf16.mxu1 %v2624_v36  ;;  %v34_v35 = vld [vmem:[%s3902_s0 + $0xa0] sm:$0xff] }
  0x25   :  { %1984 = vmatprep.subr.bf16.mxu0 %v2626_v37  ;;  %v42_v36 = vld [vmem:[%s3902_s0 + $0xe0] sm:$0xff]  ;;  %v2226_v37 = vcombine.low %v30_v30, %v38_v31  ;;  %v2770_v30 = vld [vmem:[%s3901_s1 + $0x214] ss:$8 sps:$4 sm:$0xff]  }
  0x26   :  { %v2773_v31 = vld [vmem:[%s3901_s1 + $0x614] ss:$8 sps:$4 sm:$0xff]  }
  0x27   :  { %1773 = vmatpush1.bf16.msra.mxu1 %v2628_v38  ;;  %v2704_v38 = vld [vmem:[%s3901_s1 + $0x164] ss:$8 sps:$4 sm:$0xff]  }
  0x28   :  { %1985 = vmatpush1.bf16.msra.mxu0 %v2629_v39  ;;  %1774 = vmatprep.subr.bf16.mxu1 %v2630_v40  ;;  %v2235_v39 = vcombine.high %v34_v35, %v42_v36  ;;  %v2234_v40 = vcombine.low %v34_v35, %v42_v36  ;;  %v2768_v36 = vld [vmem:[%s3901_s1 + $0x210] ss:$8 sps:$4 sm:$0xff]  }
  0x29   :  { %1986 = vmatprep.subr.bf16.mxu0 %v2632_v41  ;;  %v2707_v41 = vld [vmem:[%s3901_s1 + $0x564] ss:$8 sps:$4 sm:$0xff]  }
  0x2b   :  { %1775 = vmatpush1.bf16.msra.mxu1 %v2634_v42  ;;  %v2702_v42 = vld [vmem:[%s3901_s1 + $0x160] ss:$8 sps:$4 sm:$0xff]  }
  0x2c   :  { %1987 = vmatpush1.bf16.msra.mxu0 %v2635_v43  ;;  %1776 = vmatprep.subr.bf16.mxu1 %v2636_v44  ;;  %v2705_v43 = vld [vmem:[%s3901_s1 + $0x560] ss:$8 sps:$4 sm:$0xff]  }
  0x2d   :  { %1988 = vmatprep.subr.bf16.mxu0 %v2638_v45  ;;  %v3277_v44 = vld [vmem:[%s3902_s0 + $0x8] sm:$0xff] }
  0x2e   :  { %v3282_v45 = vld [vmem:[%s3902_s0 + $0x48] sm:$0xff] }
  0x2f   :  { %1777 = vmatpush1.bf16.msra.mxu1 %v2640_v46  ;;  %v2710_v46 = vld [vmem:[%s3901_s1 + $0x174] ss:$8 sps:$4 sm:$0xff]   ;;  %v2213_v48 = vcombine.high %v3277_v44, %v3282_v45 }
  0x30   :  { %1989 = vmatpush1.bf16.msra.mxu0 %v2641_v47  ;;  %1778 = vmatprep.subr.bf16.mxu1 %v2642_v50  ;;  %v2713_v47 = vld [vmem:[%s3901_s1 + $0x574] ss:$8 sps:$4 sm:$0xff]   ;;  %v3300_v50 = vld [vmem:[%s3902_s0 + $0x68] sm:$0xff] }
  0x31   :  { %1990 = vmatprep.subr.bf16.mxu0 %v2644_v51  ;;  %v2708_v51 = vld [vmem:[%s3901_s1 + $0x170] ss:$8 sps:$4 sm:$0xff]   ;;  %v2221_v53 = vcombine.high %v3295_v49, %v3300_v50 }
  0x33   :  { %1779 = vmatpush1.bf16.msra.mxu1 %v2646_v56  ;;  %v2714_v56 = vld [vmem:[%s3901_s1 + $0x180] ss:$8 sps:$4 sm:$0xff]  }
  0x34   :  { %1991 = vmatpush1.bf16.msra.mxu0 %v2647_v57  ;;  %1780 = vmatprep.subr.bf16.mxu1 %v2648_v58  ;;  %v2717_v57 = vld [vmem:[%s3901_s1 + $0x580] ss:$8 sps:$4 sm:$0xff]   ;;  %v2722_v58 = vld [vmem:[%s3901_s1 + $0x194] ss:$8 sps:$4 sm:$0xff]  }
  0x35   :  { %1992 = vmatprep.subr.bf16.mxu0 %v2650_v59  ;;  %v2725_v59 = vld [vmem:[%s3901_s1 + $0x594] ss:$8 sps:$4 sm:$0xff]  }
  0x37   :  { %1781 = vmatpush1.bf16.msra.mxu1 %v2652_v60  ;;  %v2720_v60 = vld [vmem:[%s3901_s1 + $0x190] ss:$8 sps:$4 sm:$0xff]  }
  0x38   :  { %1993 = vmatpush1.bf16.msra.mxu0 %v2653_v61  ;;  %1782 = vmatprep.subr.bf16.mxu1 %v2654_v62  ;;  %v2723_v61 = vld [vmem:[%s3901_s1 + $0x590] ss:$8 sps:$4 sm:$0xff]   ;;  %v2728_v62 = vld [vmem:[%s3901_s1 + $0x1a4] ss:$8 sps:$4 sm:$0xff]  }
  0x39   :  { %1994 = vmatprep.subr.bf16.mxu0 %v2656_v63  ;;  %v2731_v63 = vld [vmem:[%s3901_s1 + $0x5a4] ss:$8 sps:$4 sm:$0xff]  }
  0x3b   :  { %1783 = vmatpush1.bf16.msra.mxu1 %v2658_v0  ;;  %v2726_v0 = vld [vmem:[%s3901_s1 + $0x1a0] ss:$8 sps:$4 sm:$0xff]  }
  0x3c   :  { %1995 = vmatpush1.bf16.msra.mxu0 %v2659_v1  ;;  %1784 = vmatprep.subr.bf16.mxu1 %v2660_v2  ;;  %v2729_v1 = vld [vmem:[%s3901_s1 + $0x5a0] ss:$8 sps:$4 sm:$0xff]   ;;  %v2734_v2 = vld [vmem:[%s3901_s1 + $0x1b4] ss:$8 sps:$4 sm:$0xff]  }
  0x3d   :  { %1996 = vmatprep.subr.bf16.mxu0 %v2662_v3  ;;  %v2737_v3 = vld [vmem:[%s3901_s1 + $0x5b4] ss:$8 sps:$4 sm:$0xff]  }
  0x3f   :  { %1785 = vmatpush1.bf16.msra.mxu1 %v2664_v4  ;;  %v2732_v4 = vld [vmem:[%s3901_s1 + $0x1b0] ss:$8 sps:$4 sm:$0xff]  }
  0x40   :  { %1997 = vmatpush1.bf16.msra.mxu0 %v2665_v5  ;;  %1807 = vmatprep.subr.bf16.mxu1 %v2668_v6  ;;  %v2735_v5 = vld [vmem:[%s3901_s1 + $0x5b0] ss:$8 sps:$4 sm:$0xff]   ;;  %v2740_v6 = vld [vmem:[%s3901_s1 + $0x1c4] ss:$8 sps:$4 sm:$0xff]  }
  0x41   :  { %2019 = vmatprep.subr.bf16.mxu0 %v2671_v7  ;;  %v2743_v7 = vld [vmem:[%s3901_s1 + $0x5c4] ss:$8 sps:$4 sm:$0xff]  }
  0x42   :  { %1787 = vmatmul.mubr.bf16.vlgmr.msra.gmra.mrb[0].mxu1 %v2210_v8  ;;  %v2738_v8 = vld [vmem:[%s3901_s1 + $0x1c0] ss:$8 sps:$4 sm:$0xff]  }
  0x43   :  { %1999 = vmatmul.mubr.bf16.vlgmr.msra.gmra.mrb[0].mxu0 %v2218_v10  ;;  %1808 = vmatpush1.bf16.msra.mxu1 %v2666_v9  ;;  %v2741_v9 = vld [vmem:[%s3901_s1 + $0x5c0] ss:$8 sps:$4 sm:$0xff]   ;;  %v2746_v10 = vld [vmem:[%s3901_s1 + $0x1d4] ss:$8 sps:$4 sm:$0xff]  }
  0x44   :  { %2020 = vmatpush1.bf16.msra.mxu0 %v2669_v11  ;;  %1809 = vmatprep.subr.bf16.mxu1 %v2674_v12  ;;  %v2749_v11 = vld [vmem:[%s3901_s1 + $0x5d4] ss:$8 sps:$4 sm:$0xff]   ;;  %v2744_v12 = vld [vmem:[%s3901_s1 + $0x1d0] ss:$8 sps:$4 sm:$0xff]  }
  0x45   :  { %2021 = vmatprep.subr.bf16.mxu0 %v2677_v13  ;;  %1796 = vmatprep.mubr.bf16.mxu1 %v2227_v33  ;;  %v2747_v13 = vld [vmem:[%s3901_s1 + $0x5d0] ss:$8 sps:$4 sm:$0xff]   ;;  %v43_v33 = vld [vmem:[%s3902_s0 + $0xe8] sm:$0xff] }
  0x46   :  { %2008 = vmatprep.mubr.bf16.mxu0 %v2235_v39  ;;  %v2779_v39 = vld [vmem:[%s3901_s1 + $0x624] ss:$8 sps:$4 sm:$0xff]  }
  0x47   :  { %1810 = vmatpush1.bf16.msra.mxu1 %v2672_v14  ;;  %v2752_v14 = vld [vmem:[%s3901_s1 + $0x1e4] ss:$8 sps:$4 sm:$0xff]  }
  0x48   :  { %2022 = vmatpush1.bf16.msra.mxu0 %v2675_v15  ;;  %1811 = vmatprep.subr.bf16.mxu1 %v2680_v16  ;;  %v2755_v15 = vld [vmem:[%s3901_s1 + $0x5e4] ss:$8 sps:$4 sm:$0xff]   ;;  %v2750_v16 = vld [vmem:[%s3901_s1 + $0x1e0] ss:$8 sps:$4 sm:$0xff]  }
  0x49   :  { %2023 = vmatprep.subr.bf16.mxu0 %v2683_v17  ;;  %v2753_v17 = vld [vmem:[%s3901_s1 + $0x5e0] ss:$8 sps:$4 sm:$0xff]  }
  0x4a   :  { %1797 = vmatmul.mubr.bf16.gmra.mrb[4].mxu1 %v2226_v37  ;;  %v2771_v37 = vld [vmem:[%s3901_s1 + $0x610] ss:$8 sps:$4 sm:$0xff]  }
  0x4b   :  { %1812 = vmatpush1.bf16.msra.mxu1 %v2678_v18  ;;  %2009 = vmatmul.mubr.bf16.gmra.mrb[4].mxu0 %v2234_v40  ;;  %v2758_v18 = vld [vmem:[%s3901_s1 + $0x1f4] ss:$8 sps:$4 sm:$0xff]   ;;  %v2774_v40 = vld [vmem:[%s3901_s1 + $0x220] ss:$8 sps:$4 sm:$0xff]  }
  0x4c   :  { %2024 = vmatpush1.bf16.msra.mxu0 %v2681_v19  ;;  %1813 = vmatprep.subr.bf16.mxu1 %v2686_v20  ;;  %v2761_v19 = vld [vmem:[%s3901_s1 + $0x5f4] ss:$8 sps:$4 sm:$0xff]   ;;  %v2756_v20 = vld [vmem:[%s3901_s1 + $0x1f0] ss:$8 sps:$4 sm:$0xff]  }
  0x4d   :  { %2025 = vmatprep.subr.bf16.mxu0 %v2689_v21  ;;  %1839 = vmatprep.mubr.bf16.mxu1 %v2213_v48  ;;  %v2759_v21 = vld [vmem:[%s3901_s1 + $0x5f0] ss:$8 sps:$4 sm:$0xff]   ;;  %v2782_v48 = vld [vmem:[%s3901_s1 + $0x234] ss:$8 sps:$4 sm:$0xff]  }
  0x4e   :  { %2051 = vmatprep.mubr.bf16.mxu0 %v2221_v53  ;;  %v2783_v53 = vld [vmem:[%s3901_s1 + $0x630] ss:$8 sps:$4 sm:$0xff]  }
  0x4f   :  { %1814 = vmatpush1.bf16.msra.mxu1 %v2684_v22  ;;  %v2764_v22 = vld [vmem:[%s3901_s1 + $0x204] ss:$8 sps:$4 sm:$0xff]  }
  0x50   :  { %2026 = vmatpush1.bf16.msra.mxu0 %v2687_v23  ;;  %1815 = vmatprep.subr.bf16.mxu1 %v2692_v24  ;;  %v2767_v23 = vld [vmem:[%s3901_s1 + $0x604] ss:$8 sps:$4 sm:$0xff]   ;;  %v2762_v24 = vld [vmem:[%s3901_s1 + $0x200] ss:$8 sps:$4 sm:$0xff]  }
  0x51   :  { %2027 = vmatprep.subr.bf16.mxu0 %v2695_v25  ;;  %v2765_v25 = vld [vmem:[%s3901_s1 + $0x600] ss:$8 sps:$4 sm:$0xff]  }
  0x53   :  { %1816 = vmatpush1.bf16.msra.mxu1 %v2690_v26  ;;  %v31_v26 = vld [vmem:[%s3902_s0 + $0x88] sm:$0xff] }
  0x54   :  { %2028 = vmatpush1.bf16.msra.mxu0 %v2693_v27  ;;  %1817 = vmatprep.subr.bf16.mxu1 %v2698_v28  ;;  %v2212_v27 = vcombine.low %v3277_v44, %v3282_v45  ;;  %v2220_v28 = vcombine.low %v3295_v49, %v3300_v50  ;;  %v3466_v45 = vld [vmem:[%s3902_s0 + $0x50] sm:$0xff] }
  0x55   :  { %2029 = vmatprep.subr.bf16.mxu0 %v2701_v29  ;;  %v39_v29 = vld [vmem:[%s3902_s0 + $0xc8] sm:$0xff]  ;;  %v2785_v49 = vld [vmem:[%s3901_s1 + $0x634] ss:$8 sps:$4 sm:$0xff]  }
  0x57   :  { %1818 = vmatpush1.bf16.msra.mxu1 %v2696_v32  ;;  %v35_v32 = vld [vmem:[%s3902_s0 + $0xa8] sm:$0xff] }
  0x58   :  { %2030 = vmatpush1.bf16.msra.mxu0 %v2699_v34  ;;  %1819 = vmatprep.subr.bf16.mxu1 %v2704_v38  ;;  %v2229_v34 = vcombine.high %v31_v26, %v39_v29  ;;  %v2237_v35 = vcombine.high %v35_v32, %v43_v33  ;;  %v2776_v38 = vld [vmem:[%s3901_s1 + $0x224] ss:$8 sps:$4 sm:$0xff]   ;;  %v2236_v44 = vcombine.low %v35_v32, %v43_v33  ;;  %v2846_v32 = vld [vmem:[%s3901_s1 + $0x2e0] ss:$8 sps:$4 sm:$0xff]  }
  0x59   :  { %2031 = vmatprep.subr.bf16.mxu0 %v2707_v41  ;;  %v2777_v41 = vld [vmem:[%s3901_s1 + $0x620] ss:$8 sps:$4 sm:$0xff]  }
  0x5a   :  { %v2849_v33 = vld [vmem:[%s3901_s1 + $0x6e0] ss:$8 sps:$4 sm:$0xff]  }
  0x5b   :  { %1820 = vmatpush1.bf16.msra.mxu1 %v2702_v42  ;;  %v3461_v42 = vld [vmem:[%s3902_s0 + $0x10] sm:$0xff] }
  0x5c   :  { %2032 = vmatpush1.bf16.msra.mxu0 %v2705_v43  ;;  %1821 = vmatprep.subr.bf16.mxu1 %v2710_v46  ;;  %v2228_v43 = vcombine.low %v31_v26, %v39_v29  ;;  %v3471_v46 = vld [vmem:[%s3902_s0 + $0x30] sm:$0xff]  ;;  %v2215_v50 = vcombine.high %v3461_v42, %v3466_v45 }
  0x5d   :  { %2033 = vmatprep.subr.bf16.mxu0 %v2713_v47  ;;  %v3476_v47 = vld [vmem:[%s3902_s0 + $0x70] sm:$0xff] }
  0x5e   :  { %v2842_v26 = vld [vmem:[%s3901_s1 + $0x2d4] ss:$8 sps:$4 sm:$0xff]   ;;  %v2843_v29 = vld [vmem:[%s3901_s1 + $0x6d0] ss:$8 sps:$4 sm:$0xff]  }
  0x5f   :  { %1822 = vmatpush1.bf16.msra.mxu1 %v2708_v51  ;;  %v2223_v51 = vcombine.high %v3471_v46, %v3476_v47 }
  0x60   :  { %2034 = vmatpush1.bf16.msra.mxu0 %v2711_v52  ;;  %1823 = vmatprep.subr.bf16.mxu1 %v2716_v54  ;;  %v2780_v52 = vld [vmem:[%s3901_s1 + $0x230] ss:$8 sps:$4 sm:$0xff]   ;;  %v2788_v54 = vld [vmem:[%s3901_s1 + $0x244] ss:$8 sps:$4 sm:$0xff]  }
  0x61   :  { %2035 = vmatprep.subr.bf16.mxu0 %v2719_v55  ;;  %v2791_v55 = vld [vmem:[%s3901_s1 + $0x644] ss:$8 sps:$4 sm:$0xff]  }
  0x63   :  { %1824 = vmatpush1.bf16.msra.mxu1 %v2714_v56  ;;  %v2786_v56 = vld [vmem:[%s3901_s1 + $0x240] ss:$8 sps:$4 sm:$0xff]  }
  0x64   :  { %2036 = vmatpush1.bf16.msra.mxu0 %v2717_v57  ;;  %1825 = vmatprep.subr.bf16.mxu1 %v2722_v58  ;;  %v2789_v57 = vld [vmem:[%s3901_s1 + $0x640] ss:$8 sps:$4 sm:$0xff]   ;;  %v2794_v58 = vld [vmem:[%s3901_s1 + $0x254] ss:$8 sps:$4 sm:$0xff]  }
  0x65   :  { %2037 = vmatprep.subr.bf16.mxu0 %v2725_v59  ;;  %v2797_v59 = vld [vmem:[%s3901_s1 + $0x654] ss:$8 sps:$4 sm:$0xff]  }
  0x67   :  { %1826 = vmatpush1.bf16.msra.mxu1 %v2720_v60  ;;  %v2792_v60 = vld [vmem:[%s3901_s1 + $0x250] ss:$8 sps:$4 sm:$0xff]  }
  0x68   :  { %2038 = vmatpush1.bf16.msra.mxu0 %v2723_v61  ;;  %1827 = vmatprep.subr.bf16.mxu1 %v2728_v62  ;;  %v2795_v61 = vld [vmem:[%s3901_s1 + $0x650] ss:$8 sps:$4 sm:$0xff]   ;;  %v2800_v62 = vld [vmem:[%s3901_s1 + $0x264] ss:$8 sps:$4 sm:$0xff]  }
  0x69   :  { %2039 = vmatprep.subr.bf16.mxu0 %v2731_v63  ;;  %v2803_v63 = vld [vmem:[%s3901_s1 + $0x664] ss:$8 sps:$4 sm:$0xff]  }
  0x6b   :  { %1828 = vmatpush1.bf16.msra.mxu1 %v2726_v0  ;;  %v2798_v0 = vld [vmem:[%s3901_s1 + $0x260] ss:$8 sps:$4 sm:$0xff]  }
  0x6c   :  { %2040 = vmatpush1.bf16.msra.mxu0 %v2729_v1  ;;  %1829 = vmatprep.subr.bf16.mxu1 %v2734_v2  ;;  %v2801_v1 = vld [vmem:[%s3901_s1 + $0x660] ss:$8 sps:$4 sm:$0xff]   ;;  %v2806_v2 = vld [vmem:[%s3901_s1 + $0x274] ss:$8 sps:$4 sm:$0xff]  }
  0x6d   :  { %2041 = vmatprep.subr.bf16.mxu0 %v2737_v3  ;;  %v2809_v3 = vld [vmem:[%s3901_s1 + $0x674] ss:$8 sps:$4 sm:$0xff]  }
  0x6f   :  { %1830 = vmatpush1.bf16.msra.mxu1 %v2732_v4  ;;  %v2804_v4 = vld [vmem:[%s3901_s1 + $0x270] ss:$8 sps:$4 sm:$0xff]  }
  0x70   :  { %2042 = vmatpush1.bf16.msra.mxu0 %v2735_v5  ;;  %1831 = vmatprep.subr.bf16.mxu1 %v2740_v6  ;;  %v2807_v5 = vld [vmem:[%s3901_s1 + $0x670] ss:$8 sps:$4 sm:$0xff]   ;;  %v2812_v6 = vld [vmem:[%s3901_s1 + $0x284] ss:$8 sps:$4 sm:$0xff]  }
  0x71   :  { %2043 = vmatprep.subr.bf16.mxu0 %v2743_v7  ;;  %v2815_v7 = vld [vmem:[%s3901_s1 + $0x684] ss:$8 sps:$4 sm:$0xff]  }
  0x73   :  { %1832 = vmatpush1.bf16.msra.mxu1 %v2738_v8  ;;  %v2810_v8 = vld [vmem:[%s3901_s1 + $0x280] ss:$8 sps:$4 sm:$0xff]  }
  0x74   :  { %2044 = vmatpush1.bf16.msra.mxu0 %v2741_v9  ;;  %1833 = vmatprep.subr.bf16.mxu1 %v2746_v10  ;;  %v2813_v9 = vld [vmem:[%s3901_s1 + $0x680] ss:$8 sps:$4 sm:$0xff]   ;;  %v2818_v10 = vld [vmem:[%s3901_s1 + $0x294] ss:$8 sps:$4 sm:$0xff]  }
  0x75   :  { %2045 = vmatprep.subr.bf16.mxu0 %v2749_v11  ;;  %v2821_v11 = vld [vmem:[%s3901_s1 + $0x694] ss:$8 sps:$4 sm:$0xff]  }
  0x77   :  { %1834 = vmatpush1.bf16.msra.mxu1 %v2744_v12  ;;  %v2816_v12 = vld [vmem:[%s3901_s1 + $0x290] ss:$8 sps:$4 sm:$0xff]  }
  0x78   :  { %2046 = vmatpush1.bf16.msra.mxu0 %v2747_v13  ;;  %1835 = vmatprep.subr.bf16.mxu1 %v2752_v14  ;;  %v2819_v13 = vld [vmem:[%s3901_s1 + $0x690] ss:$8 sps:$4 sm:$0xff]   ;;  %v2824_v14 = vld [vmem:[%s3901_s1 + $0x2a4] ss:$8 sps:$4 sm:$0xff]  }
  0x79   :  { %2047 = vmatprep.subr.bf16.mxu0 %v2755_v15  ;;  %v2827_v15 = vld [vmem:[%s3901_s1 + $0x6a4] ss:$8 sps:$4 sm:$0xff]  }
  0x7b   :  { %1836 = vmatpush1.bf16.msra.mxu1 %v2750_v16  ;;  %v2822_v16 = vld [vmem:[%s3901_s1 + $0x2a0] ss:$8 sps:$4 sm:$0xff]  }
  0x7c   :  { %2048 = vmatpush1.bf16.msra.mxu0 %v2753_v17  ;;  %1837 = vmatprep.subr.bf16.mxu1 %v2758_v18  ;;  %v2825_v17 = vld [vmem:[%s3901_s1 + $0x6a0] ss:$8 sps:$4 sm:$0xff]   ;;  %v2830_v18 = vld [vmem:[%s3901_s1 + $0x2b4] ss:$8 sps:$4 sm:$0xff]  }
  0x7d   :  { %2049 = vmatprep.subr.bf16.mxu0 %v2761_v19  ;;  %v2833_v19 = vld [vmem:[%s3901_s1 + $0x6b4] ss:$8 sps:$4 sm:$0xff]  }
  0x7f   :  { %1838 = vmatpush1.bf16.msra.mxu1 %v2756_v20  ;;  %v2828_v20 = vld [vmem:[%s3901_s1 + $0x2b0] ss:$8 sps:$4 sm:$0xff]  }
  0x80   :  { %2050 = vmatpush1.bf16.msra.mxu0 %v2759_v21  ;;  %1860 = vmatprep.subr.bf16.mxu1 %v2764_v22  ;;  %v2831_v21 = vld [vmem:[%s3901_s1 + $0x6b0] ss:$8 sps:$4 sm:$0xff]   ;;  %v2836_v22 = vld [vmem:[%s3901_s1 + $0x2c4] ss:$8 sps:$4 sm:$0xff]  }
  0x81   :  { %2072 = vmatprep.subr.bf16.mxu0 %v2767_v23  ;;  %v2839_v23 = vld [vmem:[%s3901_s1 + $0x6c4] ss:$8 sps:$4 sm:$0xff]  }
  0x82   :  { %1840 = vmatmul.mubr.bf16.vlgmr.msra.gmra.mrb[0].mxu1 %v2212_v27  ;;  %v2845_v27 = vld [vmem:[%s3901_s1 + $0x6d4] ss:$8 sps:$4 sm:$0xff]  }
  0x83   :  { %2052 = vmatmul.mubr.bf16.vlgmr.msra.gmra.mrb[0].mxu0 %v2220_v28  ;;  %1861 = vmatpush1.bf16.msra.mxu1 %v2762_v24  ;;  %v2834_v24 = vld [vmem:[%s3901_s1 + $0x2c0] ss:$8 sps:$4 sm:$0xff]   ;;  %v2840_v28 = vld [vmem:[%s3901_s1 + $0x2d0] ss:$8 sps:$4 sm:$0xff]  }
  0x84   :  { %2073 = vmatpush1.bf16.msra.mxu0 %v2765_v25  ;;  %1862 = vmatprep.subr.bf16.mxu1 %v2770_v30  ;;  %v2837_v25 = vld [vmem:[%s3901_s1 + $0x6c0] ss:$8 sps:$4 sm:$0xff]   ;;  %v2848_v30 = vld [vmem:[%s3901_s1 + $0x2e4] ss:$8 sps:$4 sm:$0xff]  }
  0x85   :  { %2074 = vmatprep.subr.bf16.mxu0 %v2773_v31  ;;  %1849 = vmatprep.mubr.bf16.mxu1 %v2229_v34  ;;  %v2851_v31 = vld [vmem:[%s3901_s1 + $0x6e4] ss:$8 sps:$4 sm:$0xff]   ;;  %v2854_v34 = vld [vmem:[%s3901_s1 + $0x2f4] ss:$8 sps:$4 sm:$0xff]  }
  0x86   :  { %2061 = vmatprep.mubr.bf16.mxu0 %v2237_v35  ;;  %v2857_v35 = vld [vmem:[%s3901_s1 + $0x6f4] ss:$8 sps:$4 sm:$0xff]  }
  0x87   :  { %1863 = vmatpush1.bf16.msra.mxu1 %v2768_v36  ;;  %v2852_v36 = vld [vmem:[%s3901_s1 + $0x2f0] ss:$8 sps:$4 sm:$0xff]  }
  0x88   :  { %2075 = vmatpush1.bf16.msra.mxu0 %v2771_v37  ;;  %1864 = vmatprep.subr.bf16.mxu1 %v2776_v38  ;;  %v2855_v37 = vld [vmem:[%s3901_s1 + $0x6f0] ss:$8 sps:$4 sm:$0xff]   ;;  %v2860_v38 = vld [vmem:[%s3901_s1 + $0x304] ss:$8 sps:$4 sm:$0xff]  }
  0x89   :  { %2076 = vmatprep.subr.bf16.mxu0 %v2779_v39  ;;  %v2863_v39 = vld [vmem:[%s3901_s1 + $0x704] ss:$8 sps:$4 sm:$0xff]  }
  0x8a   :  { %1850 = vmatmul.mubr.bf16.gmra.mrb[4].mxu1 %v2228_v43  ;;  %v2222_v43 = vcombine.low %v3471_v46, %v3476_v47  ;;  %v2866_v46 = vld [vmem:[%s3901_s1 + $0x314] ss:$8 sps:$4 sm:$0xff]  }
  0x8b   :  { %2062 = vmatmul.mubr.bf16.gmra.mrb[4].mxu0 %v2236_v44  ;;  %1865 = vmatpush1.bf16.msra.mxu1 %v2774_v40  ;;  %v32_v40 = vld [vmem:[%s3902_s0 + $0x90] sm:$0xff] }
  0x8c   :  { %2077 = vmatpush1.bf16.msra.mxu0 %v2777_v41  ;;  %1866 = vmatprep.subr.bf16.mxu1 %v2782_v48  ;;  %v2214_v41 = vcombine.low %v3461_v42, %v3466_v45  ;;  %v40_v44 = vld [vmem:[%s3902_s0 + $0xd0] sm:$0xff]  ;;  %v2858_v42 = vld [vmem:[%s3901_s1 + $0x300] ss:$8 sps:$4 sm:$0xff]  }
  0x8d   :  { %2078 = vmatprep.subr.bf16.mxu0 %v2785_v49  ;;  %1892 = vmatprep.mubr.bf16.mxu1 %v2215_v50  ;;  %v36_v48 = vld [vmem:[%s3902_s0 + $0xb0] sm:$0xff]  ;;  %v2861_v45 = vld [vmem:[%s3901_s1 + $0x700] ss:$8 sps:$4 sm:$0xff]   ;;  %v2231_v50 = vcombine.high %v32_v40, %v40_v44 }
  0x8e   :  { %2104 = vmatprep.mubr.bf16.mxu0 %v2223_v51  ;;  %v44_v49 = vld [vmem:[%s3902_s0 + $0xf0] sm:$0xff] }
  0x8f   :  { %1867 = vmatpush1.bf16.msra.mxu1 %v2780_v52  ;;  %v2869_v47 = vld [vmem:[%s3901_s1 + $0x714] ss:$8 sps:$4 sm:$0xff]   ;;  %v2239_v51 = vcombine.high %v36_v48, %v44_v49  ;;  %v2864_v52 = vld [vmem:[%s3901_s1 + $0x310] ss:$8 sps:$4 sm:$0xff]  }
  0x90   :  { %2079 = vmatpush1.bf16.msra.mxu0 %v2783_v53  ;;  %1868 = vmatprep.subr.bf16.mxu1 %v2788_v54  ;;  %v2867_v53 = vld [vmem:[%s3901_s1 + $0x710] ss:$8 sps:$4 sm:$0xff]   ;;  %v2872_v54 = vld [vmem:[%s3901_s1 + $0x324] ss:$8 sps:$4 sm:$0xff]  }
  0x91   :  { %2080 = vmatprep.subr.bf16.mxu0 %v2791_v55  ;;  %v2875_v55 = vld [vmem:[%s3901_s1 + $0x724] ss:$8 sps:$4 sm:$0xff]  }
  0x93   :  { %1869 = vmatpush1.bf16.msra.mxu1 %v2786_v56  ;;  %v3687_v56 = vld [vmem:[%s3902_s0 + $0x18] sm:$0xff] }
  0x94   :  { %2081 = vmatpush1.bf16.msra.mxu0 %v2789_v57  ;;  %1870 = vmatprep.subr.bf16.mxu1 %v2794_v58  ;;  %v2230_v57 = vcombine.low %v32_v40, %v40_v44  ;;  %v2238_v58 = vcombine.low %v36_v48, %v44_v49  ;;  %v2930_v40 = vld [vmem:[%s3901_s1 + $0x3c0] ss:$8 sps:$4 sm:$0xff]   ;;  %v2941_v44 = vld [vmem:[%s3901_s1 + $0x7d4] ss:$8 sps:$4 sm:$0xff]   ;;  %v2936_v48 = vld [vmem:[%s3901_s1 + $0x3d0] ss:$8 sps:$4 sm:$0xff]  }
  0x95   :  { %2082 = vmatprep.subr.bf16.mxu0 %v2797_v59  ;;  %v3692_v59 = vld [vmem:[%s3902_s0 + $0x58] sm:$0xff] }
  0x96   :  { %v2939_v49 = vld [vmem:[%s3901_s1 + $0x7d0] ss:$8 sps:$4 sm:$0xff]  }
  0x97   :  { %1871 = vmatpush1.bf16.msra.mxu1 %v2792_v60  ;;  %v3697_v60 = vld [vmem:[%s3902_s0 + $0x38] sm:$0xff] }
  0x98   :  { %2083 = vmatpush1.bf16.msra.mxu0 %v2795_v61  ;;  %1872 = vmatprep.subr.bf16.mxu1 %v2800_v62  ;;  %v3702_v61 = vld [vmem:[%s3902_s0 + $0x78] sm:$0xff]  ;;  %v2870_v62 = vld [vmem:[%s3901_s1 + $0x320] ss:$8 sps:$4 sm:$0xff]  }
  0x99   :  { %2084 = vmatprep.subr.bf16.mxu0 %v2803_v63  ;;  %v2873_v63 = vld [vmem:[%s3901_s1 + $0x720] ss:$8 sps:$4 sm:$0xff]  }
  0x9b   :  { %1873 = vmatpush1.bf16.msra.mxu1 %v2798_v0  ;;  %v2878_v0 = vld [vmem:[%s3901_s1 + $0x334] ss:$8 sps:$4 sm:$0xff]  }
  0x9c   :  { %2085 = vmatpush1.bf16.msra.mxu0 %v2801_v1  ;;  %1874 = vmatprep.subr.bf16.mxu1 %v2806_v2  ;;  %v2881_v1 = vld [vmem:[%s3901_s1 + $0x734] ss:$8 sps:$4 sm:$0xff]   ;;  %v2217_v2 = vcombine.high %v3687_v56, %v3692_v59 }
  0x9d   :  { %2086 = vmatprep.subr.bf16.mxu0 %v2809_v3  ;;  %v2225_v3 = vcombine.high %v3697_v60, %v3702_v61 }
  0x9f   :  { %1875 = vmatpush1.bf16.msra.mxu1 %v2804_v4  ;;  %v2876_v4 = vld [vmem:[%s3901_s1 + $0x330] ss:$8 sps:$4 sm:$0xff]  }
  0xa0   :  { %2087 = vmatpush1.bf16.msra.mxu0 %v2807_v5  ;;  %1876 = vmatprep.subr.bf16.mxu1 %v2812_v6  ;;  %v2879_v5 = vld [vmem:[%s3901_s1 + $0x730] ss:$8 sps:$4 sm:$0xff]   ;;  %v2884_v6 = vld [vmem:[%s3901_s1 + $0x344] ss:$8 sps:$4 sm:$0xff]  }
  0xa1   :  { %2088 = vmatprep.subr.bf16.mxu0 %v2815_v7  ;;  %v2887_v7 = vld [vmem:[%s3901_s1 + $0x744] ss:$8 sps:$4 sm:$0xff]  }
  0xa3   :  { %1877 = vmatpush1.bf16.msra.mxu1 %v2810_v8  ;;  %v2882_v8 = vld [vmem:[%s3901_s1 + $0x340] ss:$8 sps:$4 sm:$0xff]  }
  0xa4   :  { %2089 = vmatpush1.bf16.msra.mxu0 %v2813_v9  ;;  %1878 = vmatprep.subr.bf16.mxu1 %v2818_v10  ;;  %v2885_v9 = vld [vmem:[%s3901_s1 + $0x740] ss:$8 sps:$4 sm:$0xff]   ;;  %v2890_v10 = vld [vmem:[%s3901_s1 + $0x354] ss:$8 sps:$4 sm:$0xff]  }
  0xa5   :  { %2090 = vmatprep.subr.bf16.mxu0 %v2821_v11  ;;  %v2893_v11 = vld [vmem:[%s3901_s1 + $0x754] ss:$8 sps:$4 sm:$0xff]  }
  0xa7   :  { %1879 = vmatpush1.bf16.msra.mxu1 %v2816_v12  ;;  %v2888_v12 = vld [vmem:[%s3901_s1 + $0x350] ss:$8 sps:$4 sm:$0xff]  }
  0xa8   :  { %2091 = vmatpush1.bf16.msra.mxu0 %v2819_v13  ;;  %1880 = vmatprep.subr.bf16.mxu1 %v2824_v14  ;;  %v2891_v13 = vld [vmem:[%s3901_s1 + $0x750] ss:$8 sps:$4 sm:$0xff]   ;;  %v2896_v14 = vld [vmem:[%s3901_s1 + $0x364] ss:$8 sps:$4 sm:$0xff]  }
  0xa9   :  { %2092 = vmatprep.subr.bf16.mxu0 %v2827_v15  ;;  %v2899_v15 = vld [vmem:[%s3901_s1 + $0x764] ss:$8 sps:$4 sm:$0xff]  }
  0xab   :  { %1881 = vmatpush1.bf16.msra.mxu1 %v2822_v16  ;;  %v2894_v16 = vld [vmem:[%s3901_s1 + $0x360] ss:$8 sps:$4 sm:$0xff]  }
  0xac   :  { %2093 = vmatpush1.bf16.msra.mxu0 %v2825_v17  ;;  %1882 = vmatprep.subr.bf16.mxu1 %v2830_v18  ;;  %v2897_v17 = vld [vmem:[%s3901_s1 + $0x760] ss:$8 sps:$4 sm:$0xff]   ;;  %v2902_v18 = vld [vmem:[%s3901_s1 + $0x374] ss:$8 sps:$4 sm:$0xff]  }
  0xad   :  { %2094 = vmatprep.subr.bf16.mxu0 %v2833_v19  ;;  %v2905_v19 = vld [vmem:[%s3901_s1 + $0x774] ss:$8 sps:$4 sm:$0xff]  }
  0xaf   :  { %1883 = vmatpush1.bf16.msra.mxu1 %v2828_v20  ;;  %v2900_v20 = vld [vmem:[%s3901_s1 + $0x370] ss:$8 sps:$4 sm:$0xff]  }
  0xb0   :  { %2095 = vmatpush1.bf16.msra.mxu0 %v2831_v21  ;;  %1884 = vmatprep.subr.bf16.mxu1 %v2836_v22  ;;  %v2903_v21 = vld [vmem:[%s3901_s1 + $0x770] ss:$8 sps:$4 sm:$0xff]   ;;  %v2908_v22 = vld [vmem:[%s3901_s1 + $0x384] ss:$8 sps:$4 sm:$0xff]  }
  0xb1   :  { %2096 = vmatprep.subr.bf16.mxu0 %v2839_v23  ;;  %v2911_v23 = vld [vmem:[%s3901_s1 + $0x784] ss:$8 sps:$4 sm:$0xff]  }
  0xb3   :  { %1885 = vmatpush1.bf16.msra.mxu1 %v2834_v24  ;;  %v2906_v24 = vld [vmem:[%s3901_s1 + $0x380] ss:$8 sps:$4 sm:$0xff]  }
  0xb4   :  { %2097 = vmatpush1.bf16.msra.mxu0 %v2837_v25  ;;  %1886 = vmatprep.subr.bf16.mxu1 %v2842_v26  ;;  %v2909_v25 = vld [vmem:[%s3901_s1 + $0x780] ss:$8 sps:$4 sm:$0xff]   ;;  %v2914_v26 = vld [vmem:[%s3901_s1 + $0x394] ss:$8 sps:$4 sm:$0xff]  }
  0xb5   :  { %2098 = vmatprep.subr.bf16.mxu0 %v2845_v27  ;;  %v2917_v27 = vld [vmem:[%s3901_s1 + $0x794] ss:$8 sps:$4 sm:$0xff]  }
  0xb7   :  { %1887 = vmatpush1.bf16.msra.mxu1 %v2840_v28  ;;  %v2912_v28 = vld [vmem:[%s3901_s1 + $0x390] ss:$8 sps:$4 sm:$0xff]  }
  0xb8   :  { %2099 = vmatpush1.bf16.msra.mxu0 %v2843_v29  ;;  %1888 = vmatprep.subr.bf16.mxu1 %v2848_v30  ;;  %v2915_v29 = vld [vmem:[%s3901_s1 + $0x790] ss:$8 sps:$4 sm:$0xff]   ;;  %v2920_v30 = vld [vmem:[%s3901_s1 + $0x3a4] ss:$8 sps:$4 sm:$0xff]  }
  0xb9   :  { %2100 = vmatprep.subr.bf16.mxu0 %v2851_v31  ;;  %v2923_v31 = vld [vmem:[%s3901_s1 + $0x7a4] ss:$8 sps:$4 sm:$0xff]  }
  0xbb   :  { %1889 = vmatpush1.bf16.msra.mxu1 %v2846_v32  ;;  %v2918_v32 = vld [vmem:[%s3901_s1 + $0x3a0] ss:$8 sps:$4 sm:$0xff]  }
  0xbc   :  { %2101 = vmatpush1.bf16.msra.mxu0 %v2849_v33  ;;  %1890 = vmatprep.subr.bf16.mxu1 %v2854_v34  ;;  %v2921_v33 = vld [vmem:[%s3901_s1 + $0x7a0] ss:$8 sps:$4 sm:$0xff]   ;;  %v2926_v34 = vld [vmem:[%s3901_s1 + $0x3b4] ss:$8 sps:$4 sm:$0xff]  }
  0xbd   :  { %2102 = vmatprep.subr.bf16.mxu0 %v2857_v35  ;;  %v2929_v35 = vld [vmem:[%s3901_s1 + $0x7b4] ss:$8 sps:$4 sm:$0xff]  }
  0xbf   :  { %1891 = vmatpush1.bf16.msra.mxu1 %v2852_v36  ;;  %v2924_v36 = vld [vmem:[%s3901_s1 + $0x3b0] ss:$8 sps:$4 sm:$0xff]  }
  0xc0   :  { %2103 = vmatpush1.bf16.msra.mxu0 %v2855_v37  ;;  %1913 = vmatprep.subr.bf16.mxu1 %v2860_v38  ;;  %v2927_v37 = vld [vmem:[%s3901_s1 + $0x7b0] ss:$8 sps:$4 sm:$0xff]   ;;  %v2932_v38 = vld [vmem:[%s3901_s1 + $0x3c4] ss:$8 sps:$4 sm:$0xff]  }
  0xc1   :  { %2125 = vmatprep.subr.bf16.mxu0 %v2863_v39  ;;  %v2935_v39 = vld [vmem:[%s3901_s1 + $0x7c4] ss:$8 sps:$4 sm:$0xff]  }
  0xc2   :  { %1893 = vmatmul.mubr.bf16.vlgmr.msra.gmra.mrb[0].mxu1 %v2214_v41  ;;  %v2933_v41 = vld [vmem:[%s3901_s1 + $0x7c0] ss:$8 sps:$4 sm:$0xff]  }
  0xc3   :  { %2105 = vmatmul.mubr.bf16.vlgmr.msra.gmra.mrb[0].mxu0 %v2222_v43  ;;  %1914 = vmatpush1.bf16.msra.mxu1 %v2858_v42  ;;  %v2938_v43 = vld [vmem:[%s3901_s1 + $0x3d4] ss:$8 sps:$4 sm:$0xff]   ;;  %v2944_v42 = vld [vmem:[%s3901_s1 + $0x3e4] ss:$8 sps:$4 sm:$0xff]  }
  0xc4   :  { %2126 = vmatpush1.bf16.msra.mxu0 %v2861_v45  ;;  %1915 = vmatprep.subr.bf16.mxu1 %v2866_v46  ;;  %v2947_v45 = vld [vmem:[%s3901_s1 + $0x7e4] ss:$8 sps:$4 sm:$0xff]   ;;  %v2942_v46 = vld [vmem:[%s3901_s1 + $0x3e0] ss:$8 sps:$4 sm:$0xff]  }
  0xc5   :  { %2127 = vmatprep.subr.bf16.mxu0 %v2869_v47  ;;  %1902 = vmatprep.mubr.bf16.mxu1 %v2231_v50  ;;  %v2945_v47 = vld [vmem:[%s3901_s1 + $0x7e0] ss:$8 sps:$4 sm:$0xff]   ;;  %v2950_v50 = vld [vmem:[%s3901_s1 + $0x3f4] ss:$8 sps:$4 sm:$0xff]  }
  0xc6   :  { %2114 = vmatprep.mubr.bf16.mxu0 %v2239_v51  ;;  %v2953_v51 = vld [vmem:[%s3901_s1 + $0x7f4] ss:$8 sps:$4 sm:$0xff]  }
  0xc7   :  { %1916 = vmatpush1.bf16.msra.mxu1 %v2864_v52  ;;  %v2948_v52 = vld [vmem:[%s3901_s1 + $0x3f0] ss:$8 sps:$4 sm:$0xff]  }
  0xc8   :  { %2128 = vmatpush1.bf16.msra.mxu0 %v2867_v53  ;;  %1917 = vmatprep.subr.bf16.mxu1 %v2872_v54  ;;  %v2951_v53 = vld [vmem:[%s3901_s1 + $0x7f0] ss:$8 sps:$4 sm:$0xff]  }
  0xc9   :  { %2129 = vmatprep.subr.bf16.mxu0 %v2875_v55  ;;  %v33_v54 = vld [vmem:[%s3902_s0 + $0x98] sm:$0xff] }
  0xca   :  { %1903 = vmatmul.mubr.bf16.gmra.mrb[4].mxu1 %v2230_v57  ;;  %v41_v55 = vld [vmem:[%s3902_s0 + $0xd8] sm:$0xff] }
  0xcb   :  { %2115 = vmatmul.mubr.bf16.gmra.mrb[4].mxu0 %v2238_v58  ;;  %1918 = vmatpush1.bf16.msra.mxu1 %v2870_v62  ;;  %v37_v57 = vld [vmem:[%s3902_s0 + $0xb8] sm:$0xff]  ;;  %v2216_v62 = vcombine.low %v3687_v56, %v3692_v59  ;;  %v302_v56 = vld [vmem:[%s3903_s2] sm:$0x3] }
  0xcc   :  { %2130 = vmatpush1.bf16.msra.mxu0 %v2873_v63  ;;  %1919 = vmatprep.subr.bf16.mxu1 %v2878_v0  ;;  %v45_v58 = vld [vmem:[%s3902_s0 + $0xf8] sm:$0xff]  ;;  %v2224_v63 = vcombine.low %v3697_v60, %v3702_v61  ;;  %v2233_v0 = vcombine.high %v33_v54, %v41_v55 }
  0xcd   :  { %2131 = vmatprep.subr.bf16.mxu0 %v2881_v1  ;;  %1945 = vmatprep.mubr.bf16.mxu1 %v2217_v2  ;;  %v2241_v1 = vcombine.high %v37_v57, %v45_v58  ;;  %v2232_v2 = vcombine.low %v33_v54, %v41_v55 }
  0xce   :  { %2157 = vmatprep.mubr.bf16.mxu0 %v2225_v3  ;;  %v2240_v3 = vcombine.low %v37_v57, %v45_v58 }
  0xcf   :  { %1920 = vmatpush1.bf16.msra.mxu1 %v2876_v4  ;;  %v304_v4 = vlaneseq }
  0xd0   :  { %2132 = vmatpush1.bf16.msra.mxu0 %v2879_v5  ;;  %1921 = vmatprep.subr.bf16.mxu1 %v2884_v6 }
  0xd1   :  { %2133 = vmatprep.subr.bf16.mxu0 %v2887_v7  ;;  %v305_v5 = vshrl.u32 %v304_v4, 7 }
  0xd3   :  { %1922 = vmatpush1.bf16.msra.mxu1 %v2882_v8  ;;  %v306_v6 = vsub.s32 0, %v305_v5  ;;  %v310_v59 = vsub.s32 1, %v305_v5 }
  0xd4   :  { %2134 = vmatpush1.bf16.msra.mxu0 %v2885_v9  ;;  %1923 = vmatprep.subr.bf16.mxu1 %v2890_v10 }
  0xd5   :  { %2135 = vmatprep.subr.bf16.mxu0 %v2893_v11  ;;  %v307_v60 = vrot.slane %v302_v56, %v306_v6  ;;  %v311_v61 = vrot.slane %v302_v56, %v310_v59 }
  0xd7   :  { %1924 = vmatpush1.bf16.msra.mxu1 %v2888_v12 }
  0xd8   :  { %2136 = vmatpush1.bf16.msra.mxu0 %v2891_v13  ;;  %1925 = vmatprep.subr.bf16.mxu1 %v2896_v14 }
  0xd9   :  { %2137 = vmatprep.subr.bf16.mxu0 %v2899_v15 }
  0xdb   :  { %1926 = vmatpush1.bf16.msra.mxu1 %v2894_v16 }
  0xdc   :  { %2138 = vmatpush1.bf16.msra.mxu0 %v2897_v17  ;;  %1927 = vmatprep.subr.bf16.mxu1 %v2902_v18 }
  0xdd   :  { %2139 = vmatprep.subr.bf16.mxu0 %v2905_v19 }
  0xdf   :  { %1928 = vmatpush1.bf16.msra.mxu1 %v2900_v20 }
  0xe0   :  { %2140 = vmatpush1.bf16.msra.mxu0 %v2903_v21  ;;  %1929 = vmatprep.subr.bf16.mxu1 %v2908_v22 }
  0xe1   :  { %2141 = vmatprep.subr.bf16.mxu0 %v2911_v23 }
  0xe3   :  { %1930 = vmatpush1.bf16.msra.mxu1 %v2906_v24 }
  0xe4   :  { %2142 = vmatpush1.bf16.msra.mxu0 %v2909_v25  ;;  %1931 = vmatprep.subr.bf16.mxu1 %v2914_v26 }
  0xe5   :  { %2143 = vmatprep.subr.bf16.mxu0 %v2917_v27 }
  0xe7   :  { %1932 = vmatpush1.bf16.msra.mxu1 %v2912_v28 }
  0xe8   :  { %2144 = vmatpush1.bf16.msra.mxu0 %v2915_v29  ;;  %1933 = vmatprep.subr.bf16.mxu1 %v2920_v30 }
  0xe9   :  { %2145 = vmatprep.subr.bf16.mxu0 %v2923_v31 }
  0xeb   :  { %1934 = vmatpush1.bf16.msra.mxu1 %v2918_v32 }
  0xec   :  { %2146 = vmatpush1.bf16.msra.mxu0 %v2921_v33  ;;  %1935 = vmatprep.subr.bf16.mxu1 %v2926_v34 }
  0xed   :  { %2147 = vmatprep.subr.bf16.mxu0 %v2929_v35 }
  0xef   :  { %1936 = vmatpush1.bf16.msra.mxu1 %v2924_v36 }
  0xf0   :  { %2148 = vmatpush1.bf16.msra.mxu0 %v2927_v37  ;;  %1937 = vmatprep.subr.bf16.mxu1 %v2932_v38 }
  0xf1   :  { %2149 = vmatprep.subr.bf16.mxu0 %v2935_v39 }
  0xf3   :  { %1938 = vmatpush1.bf16.msra.mxu1 %v2930_v40 }
  0xf4   :  { %2150 = vmatpush1.bf16.msra.mxu0 %v2933_v41  ;;  %1939 = vmatprep.subr.bf16.mxu1 %v2938_v43 }
  0xf5   :  { %2151 = vmatprep.subr.bf16.mxu0 %v2941_v44 }
  0xf7   :  { %1940 = vmatpush1.bf16.msra.mxu1 %v2936_v48 }
  0xf8   :  { %2152 = vmatpush1.bf16.msra.mxu0 %v2939_v49  ;;  %1941 = vmatprep.subr.bf16.mxu1 %v2944_v42 }
  0xf9   :  { %2153 = vmatprep.subr.bf16.mxu0 %v2947_v45 }
  0xfb   :  { %1942 = vmatpush1.bf16.msra.mxu1 %v2942_v46 }
  0xfc   :  { %2154 = vmatpush1.bf16.msra.mxu0 %v2945_v47  ;;  %1943 = vmatprep.subr.bf16.mxu1 %v2950_v50 }
  0xfd   :  { %2155 = vmatprep.subr.bf16.mxu0 %v2953_v51 }
  0xff   :  { %1944 = vmatpush1.bf16.msra.mxu1 %v2948_v52 }
 0x100   :  { %2156 = vmatpush1.bf16.msra.mxu0 %v2951_v53 }
 0x102   :  { %1946 = vmatmul.mubr.bf16.vlgmr.msra.gmra.mrb[0].mxu1 %v2216_v62 }
 0x103   :  { %2158 = vmatmul.mubr.bf16.vlgmr.msra.gmra.mrb[0].mxu0 %v2224_v63  ;;  %1955 = vmatprep.mubr.bf16.mxu1 %v2233_v0 }
 0x104   :  { %2167 = vmatprep.mubr.bf16.mxu0 %v2241_v1 }
 0x10a   :  { %1956 = vmatmul.mubr.bf16.gmra.mrb[4].mxu1 %v2232_v2 }
 0x10b   :  { %2168 = vmatmul.mubr.bf16.gmra.mrb[4].mxu0 %v2240_v3 }
 0x1d5   :  { %v1947_v7 = vpop.f32.mrb[0].mxu1 }
 0x1d6   :  { %v2159_v8 = vpop.f32.mrb[0].mxu0  ;;  %v2506_v9 = vadd.f32 %v1947_v7, %v307_v60  ;;  %v1949_v10 = vpop.f32.mrb[1].mxu1 }
 0x1d7   :  { %v2161_v11 = vpop.f32.mrb[1].mxu0  ;;  %v2508_v12 = vadd.f32 %v1949_v10, %v311_v61  ;;  %v1951_v13 = vpop.f32.mrb[2].mxu1 }
 0x1d8   :  { %v2163_v14 = vpop.f32.mrb[2].mxu0  ;;  %v2507_v15 = vadd.f32 %v2506_v9, %v2159_v8  ;;  %v2510_v16 = vadd.f32 %v1951_v13, %v307_v60  ;;  %v1953_v17 = vpop.f32.mrb[3].mxu1 }
 0x1d9   :  { %v2165_v18 = vpop.f32.mrb[3].mxu0  ;;  %v2509_v19 = vadd.f32 %v2508_v12, %v2161_v11  ;;  %v2512_v20 = vadd.f32 %v1953_v17, %v311_v61 }
 0x1da   :  { %v2511_v21 = vadd.f32 %v2510_v16, %v2163_v14 }
 0x1db   :  { %v2502_v22 = vpack.c.bf16 %v2509_v19, %v2507_v15  ;;  %v2513_v23 = vadd.f32 %v2512_v20, %v2165_v18 }
 0x1dd   :  { %2202 = vst [vmem:[%s3904_s3] sm:$0xff] %v2502_v22  ;;  %v2503_v24 = vpack.c.bf16 %v2513_v23, %v2511_v21  ;;  %v1957_v25 = vpop.f32.mrb[4].mxu1 }
 0x1de   :  { %v2169_v26 = vpop.f32.mrb[4].mxu0  ;;  %v2514_v27 = vadd.f32 %v1957_v25, %v307_v60  ;;  %v1959_v28 = vpop.f32.mrb[5].mxu1 }
 0x1df   :  { %v2171_v29 = vpop.f32.mrb[5].mxu0  ;;  %2203 = vst [vmem:[%s3904_s3 + $0x8] sm:$0xff] %v2503_v24  ;;  %v2516_v30 = vadd.f32 %v1959_v28, %v311_v61  ;;  %v1961_v31 = vpop.f32.mrb[6].mxu1 }
 0x1e0   :  { %v2173_v32 = vpop.f32.mrb[6].mxu0  ;;  %v2515_v33 = vadd.f32 %v2514_v27, %v2169_v26  ;;  %v2518_v34 = vadd.f32 %v1961_v31, %v307_v60  ;;  %v1963_v35 = vpop.f32.mrb[7].mxu1 }
 0x1e1   :  { %v2175_v36 = vpop.f32.mrb[7].mxu0  ;;  %v2517_v37 = vadd.f32 %v2516_v30, %v2171_v29  ;;  %v2520_v38 = vadd.f32 %v1963_v35, %v311_v61 }
 0x1e2   :  { %v2519_v39 = vadd.f32 %v2518_v34, %v2173_v32 }
 0x1e3   :  { %v2504_v40 = vpack.c.bf16 %v2517_v37, %v2515_v33  ;;  %v2521_v41 = vadd.f32 %v2520_v38, %v2175_v36 }
 0x1e5   :  { %2204 = vst [vmem:[%s3904_s3 + $0x10] sm:$0xff] %v2504_v40  ;;  %v2505_v43 = vpack.c.bf16 %v2521_v41, %v2519_v39 }
 0x1e7   :  { %2205 = vst [vmem:[%s3904_s3 + $0x18] sm:$0xff] %v2505_v43 }

// kernel: generator_nchw.90
= control target key start
LH: loop header
LB: loop body
LE: loop exit
PB: predicated region body
PF: predicated region fallthrough
CT: control target
= control target key end

     0   :  { %s1395_s1 = inlined_call_operand.vmem [shape: bf16[1024,128], index: 1, kind: input, shape index: {}]   ;;  %s1396_s0 = inlined_call_operand.vmem [shape: bf16[32,1024], index: 0, kind: input, shape index: {}]   ;;  %s1397_s2 = inlined_call_operand.vmem [shape: f32[1,128], index: 2, kind: input, shape index: {}]   ;;  %s1398_s3 = inlined_call_operand.vmem [shape: bf16[32,128], index: 3, kind: output, shape index: {}]  }
   0x1   :  { %v1062_v0 = vld [vmem:[%s1395_s1 + $0x40] sm:$0xff]   ;;  %v1066_v4 = vld [vmem:[%s1395_s1 + $0x48] sm:$0xff]   ;;  %v1070_v8 = vld [vmem:[%s1395_s1 + $0x50] sm:$0xff]  }
   0x2   :  { %v1063_v1 = vld [vmem:[%s1395_s1 + $0xc0] sm:$0xff]   ;;  %950 = vmatprep.subr.bf16.mxu0 %v1062_v0  ;;  %v1067_v5 = vld [vmem:[%s1395_s1 + $0xc8] sm:$0xff]   ;;  %v1071_v9 = vld [vmem:[%s1395_s1 + $0xd0] sm:$0xff]  }
   0x3   :  { %v1064_v2 = vld [vmem:[%s1395_s1] sm:$0xff]   ;;  %978 = vmatprep.subr.bf16.mxu1 %v1063_v1  ;;  %v1068_v6 = vld [vmem:[%s1395_s1 + $0x8] sm:$0xff]   ;;  %v1072_v10 = vld [vmem:[%s1395_s1 + $0x10] sm:$0xff]  }
   0x4   :  { %v1065_v3 = vld [vmem:[%s1395_s1 + $0x80] sm:$0xff]   ;;  %951 = vmatpush3.bf16.msra.mxu0 %v1064_v2  ;;  %v1069_v7 = vld [vmem:[%s1395_s1 + $0x88] sm:$0xff]   ;;  %v1073_v11 = vld [vmem:[%s1395_s1 + $0x90] sm:$0xff]  }
   0x5   :  { %979 = vmatpush3.bf16.msra.mxu1 %v1065_v3  ;;  %952 = vmatprep.subr.bf16.mxu0 %v1066_v4  ;;  %v1074_v12 = vld [vmem:[%s1395_s1 + $0x58] sm:$0xff]   ;;  %v1078_v16 = vld [vmem:[%s1395_s1 + $0x60] sm:$0xff]   ;;  %v1082_v20 = vld [vmem:[%s1395_s1 + $0x68] sm:$0xff]  }
   0x6   :  { %980 = vmatprep.subr.bf16.mxu1 %v1067_v5  ;;  %v1075_v13 = vld [vmem:[%s1395_s1 + $0xd8] sm:$0xff]   ;;  %v1079_v17 = vld [vmem:[%s1395_s1 + $0xe0] sm:$0xff]   ;;  %v1083_v21 = vld [vmem:[%s1395_s1 + $0xe8] sm:$0xff]  }
   0x7   :  { %v1076_v14 = vld [vmem:[%s1395_s1 + $0x18] sm:$0xff]   ;;  %v1080_v18 = vld [vmem:[%s1395_s1 + $0x20] sm:$0xff]   ;;  %v1084_v22 = vld [vmem:[%s1395_s1 + $0x28] sm:$0xff]  }
   0x8   :  { %953 = vmatpush3.bf16.msra.mxu0 %v1068_v6  ;;  %v1077_v15 = vld [vmem:[%s1395_s1 + $0x98] sm:$0xff]   ;;  %v1081_v19 = vld [vmem:[%s1395_s1 + $0xa0] sm:$0xff]   ;;  %v1085_v23 = vld [vmem:[%s1395_s1 + $0xa8] sm:$0xff]  }
   0x9   :  { %981 = vmatpush3.bf16.msra.mxu1 %v1069_v7  ;;  %954 = vmatprep.subr.bf16.mxu0 %v1070_v8  ;;  %v1086_v24 = vld [vmem:[%s1395_s1 + $0x70] sm:$0xff]   ;;  %v1090_v28 = vld [vmem:[%s1395_s1 + $0x78] sm:$0xff]   ;;  %v15_v32 = vld [vmem:[%s1396_s0] sm:$0xff] }
   0xa   :  { %982 = vmatprep.subr.bf16.mxu1 %v1071_v9  ;;  %v1087_v25 = vld [vmem:[%s1395_s1 + $0xf0] sm:$0xff]   ;;  %v1091_v29 = vld [vmem:[%s1395_s1 + $0xf8] sm:$0xff]   ;;  %v19_v33 = vld [vmem:[%s1396_s0 + $0x20] sm:$0xff] }
   0xb   :  { %v1088_v26 = vld [vmem:[%s1395_s1 + $0x30] sm:$0xff]   ;;  %v1092_v30 = vld [vmem:[%s1395_s1 + $0x38] sm:$0xff]   ;;  %v16_v34 = vld [vmem:[%s1396_s0 + $0x8] sm:$0xff]  ;;  %v851_v35 = vcombine.low %v15_v32, %v19_v33  ;;  %v852_v36 = vcombine.high %v15_v32, %v19_v33 }
   0xc   :  { %955 = vmatpush3.bf16.msra.mxu0 %v1072_v10  ;;  %v1089_v27 = vld [vmem:[%s1395_s1 + $0xb0] sm:$0xff]   ;;  %v1093_v31 = vld [vmem:[%s1395_s1 + $0xb8] sm:$0xff]   ;;  %v20_v37 = vld [vmem:[%s1396_s0 + $0x28] sm:$0xff] }
   0xd   :  { %983 = vmatpush3.bf16.msra.mxu1 %v1073_v11  ;;  %956 = vmatprep.subr.bf16.mxu0 %v1074_v12  ;;  %v853_v38 = vcombine.low %v16_v34, %v20_v37  ;;  %v854_v39 = vcombine.high %v16_v34, %v20_v37  ;;  %v1094_v40 = vld [vmem:[%s1395_s1 + $0x140] sm:$0xff]   ;;  %v1098_v44 = vld [vmem:[%s1395_s1 + $0x148] sm:$0xff]   ;;  %v1102_v48 = vld [vmem:[%s1395_s1 + $0x150] sm:$0xff]  }
   0xe   :  { %984 = vmatprep.subr.bf16.mxu1 %v1075_v13  ;;  %662 = vmatprep.mubr.bf16.mxu0 %v852_v36  ;;  %v1095_v41 = vld [vmem:[%s1395_s1 + $0x1c0] sm:$0xff]   ;;  %v1099_v45 = vld [vmem:[%s1395_s1 + $0x1c8] sm:$0xff]   ;;  %v1103_v49 = vld [vmem:[%s1395_s1 + $0x1d0] sm:$0xff]  }
   0xf   :  { %711 = vmatprep.mubr.bf16.mxu1 %v854_v39  ;;  %v1096_v42 = vld [vmem:[%s1395_s1 + $0x100] sm:$0xff]   ;;  %v1100_v46 = vld [vmem:[%s1395_s1 + $0x108] sm:$0xff]   ;;  %v1104_v50 = vld [vmem:[%s1395_s1 + $0x110] sm:$0xff]  }
  0x10   :  { %957 = vmatpush3.bf16.msra.mxu0 %v1076_v14  ;;  %v1097_v43 = vld [vmem:[%s1395_s1 + $0x180] sm:$0xff]   ;;  %v1101_v47 = vld [vmem:[%s1395_s1 + $0x188] sm:$0xff]   ;;  %v1105_v51 = vld [vmem:[%s1395_s1 + $0x190] sm:$0xff]  }
  0x11   :  { %985 = vmatpush3.bf16.msra.mxu1 %v1077_v15  ;;  %958 = vmatprep.subr.bf16.mxu0 %v1078_v16  ;;  %v1106_v52 = vld [vmem:[%s1395_s1 + $0x158] sm:$0xff]   ;;  %v1110_v56 = vld [vmem:[%s1395_s1 + $0x160] sm:$0xff]   ;;  %v1114_v63 = vld [vmem:[%s1395_s1 + $0x168] sm:$0xff]  }
  0x12   :  { %986 = vmatprep.subr.bf16.mxu1 %v1079_v17  ;;  %v1107_v53 = vld [vmem:[%s1395_s1 + $0x1d8] sm:$0xff]   ;;  %v1111_v57 = vld [vmem:[%s1395_s1 + $0x1e0] sm:$0xff]   ;;  %v1115_v1 = vld [vmem:[%s1395_s1 + $0x1e8] sm:$0xff]  }
  0x13   :  { %v1108_v54 = vld [vmem:[%s1395_s1 + $0x118] sm:$0xff]   ;;  %v1112_v58 = vld [vmem:[%s1395_s1 + $0x120] sm:$0xff]   ;;  %v1116_v2 = vld [vmem:[%s1395_s1 + $0x128] sm:$0xff]  }
  0x14   :  { %959 = vmatpush3.bf16.msra.mxu0 %v1080_v18  ;;  %v1109_v55 = vld [vmem:[%s1395_s1 + $0x198] sm:$0xff]   ;;  %v1113_v59 = vld [vmem:[%s1395_s1 + $0x1a0] sm:$0xff]   ;;  %v1117_v3 = vld [vmem:[%s1395_s1 + $0x1a8] sm:$0xff]  }
  0x15   :  { %987 = vmatpush3.bf16.msra.mxu1 %v1081_v19  ;;  %960 = vmatprep.subr.bf16.mxu0 %v1082_v20  ;;  %v23_v60 = vld [vmem:[%s1396_s0 + $0x40] sm:$0xff]  ;;  %v24_v4 = vld [vmem:[%s1396_s0 + $0x48] sm:$0xff]  ;;  %v1118_v8 = vld [vmem:[%s1395_s1 + $0x170] sm:$0xff]  }
  0x16   :  { %988 = vmatprep.subr.bf16.mxu1 %v1083_v21  ;;  %v27_v61 = vld [vmem:[%s1396_s0 + $0x60] sm:$0xff]  ;;  %v28_v5 = vld [vmem:[%s1396_s0 + $0x68] sm:$0xff]  ;;  %v1119_v9 = vld [vmem:[%s1395_s1 + $0x1f0] sm:$0xff]  }
  0x17   :  { %v860_v62 = vcombine.high %v23_v60, %v27_v61  ;;  %v859_v0 = vcombine.low %v23_v60, %v27_v61  ;;  %v862_v6 = vcombine.high %v24_v4, %v28_v5  ;;  %v861_v7 = vcombine.low %v24_v4, %v28_v5  ;;  %v1120_v10 = vld [vmem:[%s1395_s1 + $0x130] sm:$0xff]   ;;  %v1122_v12 = vld [vmem:[%s1395_s1 + $0x178] sm:$0xff]   ;;  %v850_v34 = vld [vmem:[%s1397_s2] ss:$0 sm:$0xff] }
  0x18   :  { %961 = vmatpush3.bf16.msra.mxu0 %v1084_v22  ;;  %v1121_v11 = vld [vmem:[%s1395_s1 + $0x1b0] sm:$0xff]   ;;  %v1123_v13 = vld [vmem:[%s1395_s1 + $0x1f8] sm:$0xff]  }
  0x19   :  { %989 = vmatpush3.bf16.msra.mxu1 %v1085_v23  ;;  %962 = vmatprep.subr.bf16.mxu0 %v1086_v24  ;;  %v1124_v14 = vld [vmem:[%s1395_s1 + $0x138] sm:$0xff]   ;;  %v17_v16 = vld [vmem:[%s1396_s0 + $0x10] sm:$0xff] }
  0x1a   :  { %990 = vmatprep.subr.bf16.mxu1 %v1087_v25  ;;  %v1125_v15 = vld [vmem:[%s1395_s1 + $0x1b8] sm:$0xff]   ;;  %v21_v17 = vld [vmem:[%s1396_s0 + $0x30] sm:$0xff] }
  0x1b   :  { %v18_v18 = vld [vmem:[%s1396_s0 + $0x18] sm:$0xff]  ;;  %v855_v20 = vcombine.low %v17_v16, %v21_v17  ;;  %v856_v21 = vcombine.high %v17_v16, %v21_v17  ;;  %v25_v24 = vld [vmem:[%s1396_s0 + $0x50] sm:$0xff] }
  0x1c   :  { %963 = vmatpush3.bf16.msra.mxu0 %v1088_v26  ;;  %v22_v19 = vld [vmem:[%s1396_s0 + $0x38] sm:$0xff]  ;;  %v29_v25 = vld [vmem:[%s1396_s0 + $0x70] sm:$0xff] }
  0x1d   :  { %991 = vmatpush3.bf16.msra.mxu1 %v1089_v27  ;;  %964 = vmatprep.subr.bf16.mxu0 %v1090_v28  ;;  %v857_v22 = vcombine.low %v18_v18, %v22_v19  ;;  %v858_v23 = vcombine.high %v18_v18, %v22_v19  ;;  %v26_v26 = vld [vmem:[%s1396_s0 + $0x58] sm:$0xff]  ;;  %v864_v27 = vcombine.high %v25_v24, %v29_v25 }
  0x1e   :  { %992 = vmatprep.subr.bf16.mxu1 %v1091_v29  ;;  %v30_v28 = vld [vmem:[%s1396_s0 + $0x78] sm:$0xff] }
  0x1f   :  { %v866_v29 = vcombine.high %v26_v26, %v30_v28 }
  0x20   :  { %965 = vmatpush3.bf16.msra.mxu0 %v1092_v30  ;;  %v863_v30 = vcombine.low %v25_v24, %v29_v25 }
  0x21   :  { %993 = vmatpush3.bf16.msra.mxu1 %v1093_v31  ;;  %1006 = vmatprep.subr.bf16.mxu0 %v1094_v40  ;;  %v865_v31 = vcombine.low %v26_v26, %v30_v28 }
  0x22   :  { %1034 = vmatprep.subr.bf16.mxu1 %v1095_v41 }
  0x23   :  { %663 = vmatmul.mubr.bf16.vlgmr.msra.gmra.mrb[0].mxu0 %v851_v35 }
  0x24   :  { %712 = vmatmul.mubr.bf16.vlgmr.msra.gmra.mrb[0].mxu1 %v853_v38  ;;  %1007 = vmatpush3.bf16.msra.mxu0 %v1096_v42 }
  0x25   :  { %1035 = vmatpush3.bf16.msra.mxu1 %v1097_v43  ;;  %1008 = vmatprep.subr.bf16.mxu0 %v1098_v44 }
  0x26   :  { %1036 = vmatprep.subr.bf16.mxu1 %v1099_v45  ;;  %670 = vmatprep.mubr.bf16.mxu0 %v860_v62 }
  0x27   :  { %719 = vmatprep.mubr.bf16.mxu1 %v862_v6 }
  0x28   :  { %1009 = vmatpush3.bf16.msra.mxu0 %v1100_v46 }
  0x29   :  { %1037 = vmatpush3.bf16.msra.mxu1 %v1101_v47  ;;  %1010 = vmatprep.subr.bf16.mxu0 %v1102_v48 }
  0x2a   :  { %1038 = vmatprep.subr.bf16.mxu1 %v1103_v49 }
  0x2b   :  { %671 = vmatmul.mubr.bf16.gmra.mrb[4].mxu0 %v859_v0 }
  0x2c   :  { %1011 = vmatpush3.bf16.msra.mxu0 %v1104_v50  ;;  %720 = vmatmul.mubr.bf16.gmra.mrb[4].mxu1 %v861_v7 }
  0x2d   :  { %1039 = vmatpush3.bf16.msra.mxu1 %v1105_v51  ;;  %1012 = vmatprep.subr.bf16.mxu0 %v1106_v52 }
  0x2e   :  { %1040 = vmatprep.subr.bf16.mxu1 %v1107_v53  ;;  %760 = vmatprep.mubr.bf16.mxu0 %v856_v21 }
  0x2f   :  { %809 = vmatprep.mubr.bf16.mxu1 %v858_v23 }
  0x30   :  { %1013 = vmatpush3.bf16.msra.mxu0 %v1108_v54 }
  0x31   :  { %1041 = vmatpush3.bf16.msra.mxu1 %v1109_v55  ;;  %1014 = vmatprep.subr.bf16.mxu0 %v1110_v56 }
  0x32   :  { %1042 = vmatprep.subr.bf16.mxu1 %v1111_v57 }
  0x34   :  { %1015 = vmatpush3.bf16.msra.mxu0 %v1112_v58 }
  0x35   :  { %1043 = vmatpush3.bf16.msra.mxu1 %v1113_v59  ;;  %1016 = vmatprep.subr.bf16.mxu0 %v1114_v63 }
  0x36   :  { %1044 = vmatprep.subr.bf16.mxu1 %v1115_v1 }
  0x38   :  { %1017 = vmatpush3.bf16.msra.mxu0 %v1116_v2 }
  0x39   :  { %1045 = vmatpush3.bf16.msra.mxu1 %v1117_v3  ;;  %1018 = vmatprep.subr.bf16.mxu0 %v1118_v8 }
  0x3a   :  { %1046 = vmatprep.subr.bf16.mxu1 %v1119_v9 }
  0x3c   :  { %1019 = vmatpush3.bf16.msra.mxu0 %v1120_v10 }
  0x3d   :  { %1047 = vmatpush3.bf16.msra.mxu1 %v1121_v11  ;;  %1020 = vmatprep.subr.bf16.mxu0 %v1122_v12 }
  0x3e   :  { %1048 = vmatprep.subr.bf16.mxu1 %v1123_v13 }
  0x40   :  { %1021 = vmatpush3.bf16.msra.mxu0 %v1124_v14 }
  0x41   :  { %1049 = vmatpush3.bf16.msra.mxu1 %v1125_v15 }
  0x43   :  { %761 = vmatmul.mubr.bf16.vlgmr.msra.gmra.mrb[8].mxu0 %v855_v20 }
  0x44   :  { %810 = vmatmul.mubr.bf16.vlgmr.msra.gmra.mrb[8].mxu1 %v857_v22  ;;  %768 = vmatprep.mubr.bf16.mxu0 %v864_v27 }
  0x45   :  { %817 = vmatprep.mubr.bf16.mxu1 %v866_v29 }
  0x4b   :  { %769 = vmatmul.mubr.bf16.gmra.mrb[12].mxu0 %v863_v30 }
  0x4c   :  { %818 = vmatmul.mubr.bf16.gmra.mrb[12].mxu1 %v865_v31 }
  0xf6   :  { %v966_v32 = vpop.f32.mrb[0].mxu0 }
  0xf7   :  { %v994_v33 = vpop.f32.mrb[0].mxu1  ;;  %v967_v35 = vpop.f32.mrb[1].mxu0 }
  0xf8   :  { %v968_v36 = vadd.f32 %v967_v35, %v966_v32  ;;  %v995_v37 = vpop.f32.mrb[1].mxu1  ;;  %v969_v38 = vpop.f32.mrb[2].mxu0 }
  0xf9   :  { %v996_v39 = vadd.f32 %v995_v37, %v994_v33  ;;  %v997_v40 = vpop.f32.mrb[2].mxu1  ;;  %v970_v41 = vpop.f32.mrb[3].mxu0 }
  0xfa   :  { %v665_v42 = vadd.f32 %v968_v36, %v850_v34  ;;  %v971_v43 = vadd.f32 %v970_v41, %v969_v38  ;;  %v998_v44 = vpop.f32.mrb[3].mxu1 }
  0xfb   :  { %v999_v45 = vadd.f32 %v998_v44, %v997_v40 }
  0xfc   :  { %v714_v46 = vadd.f32 %v996_v39, %v665_v42  ;;  %v668_v47 = vadd.f32 %v971_v43, %v850_v34 }
  0xfe   :  { %v717_v48 = vadd.f32 %v999_v45, %v668_v47  ;;  %v972_v49 = vpop.f32.mrb[4].mxu0 }
  0xff   :  { %v973_v50 = vpop.f32.mrb[5].mxu0  ;;  %v1000_v56 = vpop.f32.mrb[4].mxu1 }
 0x100   :  { %v974_v51 = vadd.f32 %v973_v50, %v972_v49  ;;  %v975_v52 = vpop.f32.mrb[6].mxu0  ;;  %v1001_v57 = vpop.f32.mrb[5].mxu1 }
 0x101   :  { %v976_v53 = vpop.f32.mrb[7].mxu0  ;;  %v1002_v59 = vadd.f32 %v1001_v57, %v1000_v56  ;;  %v1003_v60 = vpop.f32.mrb[6].mxu1 }
 0x102   :  { %v977_v54 = vadd.f32 %v976_v53, %v975_v52  ;;  %v673_v55 = vadd.f32 %v974_v51, %v850_v34  ;;  %v1004_v61 = vpop.f32.mrb[7].mxu1 }
 0x103   :  { %v1005_v63 = vadd.f32 %v1004_v61, %v1003_v60 }
 0x104   :  { %v676_v58 = vadd.f32 %v977_v54, %v850_v34  ;;  %v722_v62 = vadd.f32 %v1002_v59, %v673_v55 }
 0x106   :  { %v725_v0 = vadd.f32 %v1005_v63, %v676_v58 }
 0x116   :  { %v1022_v1 = vpop.f32.mrb[8].mxu0 }
 0x117   :  { %v1050_v2 = vpop.f32.mrb[8].mxu1  ;;  %v1023_v3 = vpop.f32.mrb[9].mxu0 }
 0x118   :  { %v1051_v4 = vpop.f32.mrb[9].mxu1  ;;  %v1024_v5 = vadd.f32 %v1023_v3, %v1022_v1  ;;  %v1025_v7 = vpop.f32.mrb[10].mxu0 }
 0x119   :  { %v1052_v6 = vadd.f32 %v1051_v4, %v1050_v2  ;;  %v1053_v8 = vpop.f32.mrb[10].mxu1  ;;  %v1026_v9 = vpop.f32.mrb[11].mxu0 }
 0x11a   :  { %v1054_v10 = vpop.f32.mrb[11].mxu1  ;;  %v763_v11 = vadd.f32 %v1024_v5, %v714_v46  ;;  %v1027_v12 = vadd.f32 %v1026_v9, %v1025_v7 }
 0x11b   :  { %v1055_v13 = vadd.f32 %v1054_v10, %v1053_v8 }
 0x11c   :  { %v812_v14 = vadd.f32 %v1052_v6, %v763_v11  ;;  %v766_v15 = vadd.f32 %v1027_v12, %v717_v48 }
 0x11e   :  { %v815_v16 = vadd.f32 %v1055_v13, %v766_v15  ;;  %v1028_v17 = vpop.f32.mrb[12].mxu0 }
 0x11f   :  { %v1056_v18 = vpop.f32.mrb[12].mxu1  ;;  %v1029_v19 = vpop.f32.mrb[13].mxu0 }
 0x120   :  { %v1057_v20 = vpop.f32.mrb[13].mxu1  ;;  %v942_v21 = vpack.c.bf16 %v815_v16, %v812_v14  ;;  %v1030_v22 = vadd.f32 %v1029_v19, %v1028_v17  ;;  %v1031_v24 = vpop.f32.mrb[14].mxu0 }
 0x121   :  { %v1058_v23 = vadd.f32 %v1057_v20, %v1056_v18  ;;  %v1059_v25 = vpop.f32.mrb[14].mxu1  ;;  %v1032_v26 = vpop.f32.mrb[15].mxu0 }
 0x122   :  { %v1060_v27 = vpop.f32.mrb[15].mxu1  ;;  %943 = vst [vmem:[%s1398_s3] sm:$0xff] %v942_v21   ;;  %v771_v28 = vadd.f32 %v1030_v22, %v722_v62  ;;  %v1033_v29 = vadd.f32 %v1032_v26, %v1031_v24 }
 0x123   :  { %v1061_v30 = vadd.f32 %v1060_v27, %v1059_v25 }
 0x124   :  { %v820_v31 = vadd.f32 %v1058_v23, %v771_v28  ;;  %v774_v32 = vadd.f32 %v1033_v29, %v725_v0 }
 0x126   :  { %v823_v33 = vadd.f32 %v1061_v30, %v774_v32 }
 0x128   :  { %v947_v34 = vpack.c.bf16 %v823_v33, %v820_v31 }
 0x12a   :  { %949 = vst [vmem:[%s1398_s3 + $0x8] sm:$0xff] %v947_v34  }

// kernel: generator_nchw.78
= control target key start
LH: loop header
LB: loop body
LE: loop exit
PB: predicated region body
PF: predicated region fallthrough
CT: control target
= control target key end

     0   :  { %s4408_s1 = inlined_call_operand.vmem [shape: bf16[2304,256], index: 1, kind: input, shape index: {}]   ;;  %s4409_s0 = inlined_call_operand.vmem [shape: bf16[32,2304], index: 0, kind: input, shape index: {}]   ;;  %s4410_s2 = inlined_call_operand.vmem [shape: f32[1,256], index: 2, kind: input, shape index: {}]   ;;  %s4411_s3 = inlined_call_operand.vmem [shape: bf16[32,256], index: 3, kind: output, shape index: {}]  }
   0x1   :  { %v2915_v0 = vld [vmem:[%s4408_s1 + $0x4] ss:$8 sps:$4 sm:$0xff]   ;;  %v2919_v2 = vld [vmem:[%s4408_s1] ss:$8 sps:$4 sm:$0xff]   ;;  %v2921_v4 = vld [vmem:[%s4408_s1 + $0x14] ss:$8 sps:$4 sm:$0xff]  }
   0x2   :  { %v2917_v1 = vld [vmem:[%s4408_s1 + $0x404] ss:$8 sps:$4 sm:$0xff]   ;;  %1970 = vmatprep.subr.bf16.mxu1 %v2915_v0  ;;  %v2920_v3 = vld [vmem:[%s4408_s1 + $0x400] ss:$8 sps:$4 sm:$0xff]   ;;  %v2923_v5 = vld [vmem:[%s4408_s1 + $0x414] ss:$8 sps:$4 sm:$0xff]  }
   0x3   :  { %2182 = vmatprep.subr.bf16.mxu0 %v2917_v1  ;;  %1971 = vmatpush1.bf16.msra.mxu1 %v2919_v2  ;;  %v2925_v6 = vld [vmem:[%s4408_s1 + $0x10] ss:$8 sps:$4 sm:$0xff]   ;;  %v2927_v8 = vld [vmem:[%s4408_s1 + $0x24] ss:$8 sps:$4 sm:$0xff]   ;;  %v2931_v10 = vld [vmem:[%s4408_s1 + $0x20] ss:$8 sps:$4 sm:$0xff]  }
   0x4   :  { %2183 = vmatpush1.bf16.msra.mxu0 %v2920_v3  ;;  %1972 = vmatprep.subr.bf16.mxu1 %v2921_v4  ;;  %v2926_v7 = vld [vmem:[%s4408_s1 + $0x410] ss:$8 sps:$4 sm:$0xff]   ;;  %v2929_v9 = vld [vmem:[%s4408_s1 + $0x424] ss:$8 sps:$4 sm:$0xff]   ;;  %v2932_v11 = vld [vmem:[%s4408_s1 + $0x420] ss:$8 sps:$4 sm:$0xff]  }
   0x5   :  { %2184 = vmatprep.subr.bf16.mxu0 %v2923_v5  ;;  %v2933_v12 = vld [vmem:[%s4408_s1 + $0x34] ss:$8 sps:$4 sm:$0xff]   ;;  %v2937_v14 = vld [vmem:[%s4408_s1 + $0x30] ss:$8 sps:$4 sm:$0xff]   ;;  %v2939_v16 = vld [vmem:[%s4408_s1 + $0x44] ss:$8 sps:$4 sm:$0xff]  }
   0x6   :  { %v2935_v13 = vld [vmem:[%s4408_s1 + $0x434] ss:$8 sps:$4 sm:$0xff]   ;;  %v2938_v15 = vld [vmem:[%s4408_s1 + $0x430] ss:$8 sps:$4 sm:$0xff]   ;;  %v2941_v17 = vld [vmem:[%s4408_s1 + $0x444] ss:$8 sps:$4 sm:$0xff]  }
   0x7   :  { %1973 = vmatpush1.bf16.msra.mxu1 %v2925_v6  ;;  %v2943_v18 = vld [vmem:[%s4408_s1 + $0x40] ss:$8 sps:$4 sm:$0xff]   ;;  %v2945_v20 = vld [vmem:[%s4408_s1 + $0x54] ss:$8 sps:$4 sm:$0xff]   ;;  %v2949_v22 = vld [vmem:[%s4408_s1 + $0x50] ss:$8 sps:$4 sm:$0xff]  }
   0x8   :  { %2185 = vmatpush1.bf16.msra.mxu0 %v2926_v7  ;;  %1974 = vmatprep.subr.bf16.mxu1 %v2927_v8  ;;  %v2944_v19 = vld [vmem:[%s4408_s1 + $0x440] ss:$8 sps:$4 sm:$0xff]   ;;  %v2947_v21 = vld [vmem:[%s4408_s1 + $0x454] ss:$8 sps:$4 sm:$0xff]   ;;  %v2950_v23 = vld [vmem:[%s4408_s1 + $0x450] ss:$8 sps:$4 sm:$0xff]  }
   0x9   :  { %2186 = vmatprep.subr.bf16.mxu0 %v2929_v9  ;;  %v2951_v24 = vld [vmem:[%s4408_s1 + $0x64] ss:$8 sps:$4 sm:$0xff]   ;;  %v2955_v26 = vld [vmem:[%s4408_s1 + $0x60] ss:$8 sps:$4 sm:$0xff]   ;;  %v2957_v28 = vld [vmem:[%s4408_s1 + $0x74] ss:$8 sps:$4 sm:$0xff]  }
   0xa   :  { %v2953_v25 = vld [vmem:[%s4408_s1 + $0x464] ss:$8 sps:$4 sm:$0xff]   ;;  %v2956_v27 = vld [vmem:[%s4408_s1 + $0x460] ss:$8 sps:$4 sm:$0xff]   ;;  %v2959_v29 = vld [vmem:[%s4408_s1 + $0x474] ss:$8 sps:$4 sm:$0xff]  }
   0xb   :  { %1975 = vmatpush1.bf16.msra.mxu1 %v2931_v10  ;;  %v2961_v30 = vld [vmem:[%s4408_s1 + $0x70] ss:$8 sps:$4 sm:$0xff]   ;;  %v2963_v32 = vld [vmem:[%s4408_s1 + $0x84] ss:$8 sps:$4 sm:$0xff]   ;;  %v2967_v34 = vld [vmem:[%s4408_s1 + $0x80] ss:$8 sps:$4 sm:$0xff]  }
   0xc   :  { %2187 = vmatpush1.bf16.msra.mxu0 %v2932_v11  ;;  %1976 = vmatprep.subr.bf16.mxu1 %v2933_v12  ;;  %v2962_v31 = vld [vmem:[%s4408_s1 + $0x470] ss:$8 sps:$4 sm:$0xff]   ;;  %v2965_v33 = vld [vmem:[%s4408_s1 + $0x484] ss:$8 sps:$4 sm:$0xff]   ;;  %v2968_v35 = vld [vmem:[%s4408_s1 + $0x480] ss:$8 sps:$4 sm:$0xff]  }
   0xd   :  { %2188 = vmatprep.subr.bf16.mxu0 %v2935_v13  ;;  %v2969_v36 = vld [vmem:[%s4408_s1 + $0x94] ss:$8 sps:$4 sm:$0xff]   ;;  %v2973_v38 = vld [vmem:[%s4408_s1 + $0x90] ss:$8 sps:$4 sm:$0xff]   ;;  %v2975_v40 = vld [vmem:[%s4408_s1 + $0xa4] ss:$8 sps:$4 sm:$0xff]  }
   0xe   :  { %v2971_v37 = vld [vmem:[%s4408_s1 + $0x494] ss:$8 sps:$4 sm:$0xff]   ;;  %v2974_v39 = vld [vmem:[%s4408_s1 + $0x490] ss:$8 sps:$4 sm:$0xff]   ;;  %v2977_v41 = vld [vmem:[%s4408_s1 + $0x4a4] ss:$8 sps:$4 sm:$0xff]  }
   0xf   :  { %1977 = vmatpush1.bf16.msra.mxu1 %v2937_v14  ;;  %v2979_v42 = vld [vmem:[%s4408_s1 + $0xa0] ss:$8 sps:$4 sm:$0xff]   ;;  %v2981_v44 = vld [vmem:[%s4408_s1 + $0xb4] ss:$8 sps:$4 sm:$0xff]   ;;  %v2985_v46 = vld [vmem:[%s4408_s1 + $0xb0] ss:$8 sps:$4 sm:$0xff]  }
  0x10   :  { %2189 = vmatpush1.bf16.msra.mxu0 %v2938_v15  ;;  %1978 = vmatprep.subr.bf16.mxu1 %v2939_v16  ;;  %v2980_v43 = vld [vmem:[%s4408_s1 + $0x4a0] ss:$8 sps:$4 sm:$0xff]   ;;  %v2983_v45 = vld [vmem:[%s4408_s1 + $0x4b4] ss:$8 sps:$4 sm:$0xff]   ;;  %v2986_v47 = vld [vmem:[%s4408_s1 + $0x4b0] ss:$8 sps:$4 sm:$0xff]  }
  0x11   :  { %2190 = vmatprep.subr.bf16.mxu0 %v2941_v17  ;;  %v3013_v48 = vld [vmem:[%s4409_s0 + $0x4] ss:$72 sps:$4 sm:$0xff]   ;;  %v2991_v52 = vld [vmem:[%s4408_s1 + $0xc0] ss:$8 sps:$4 sm:$0xff]   ;;  %v2993_v54 = vld [vmem:[%s4408_s1 + $0xd4] ss:$8 sps:$4 sm:$0xff]  }
  0x12   :  { %v2987_v49 = vld [vmem:[%s4408_s1 + $0xc4] ss:$8 sps:$4 sm:$0xff]   ;;  %2002 = vmatprep.mubr.bf16.mxu1 %v3013_v48  ;;  %v2992_v53 = vld [vmem:[%s4408_s1 + $0x4c0] ss:$8 sps:$4 sm:$0xff]   ;;  %v2995_v55 = vld [vmem:[%s4408_s1 + $0x4d4] ss:$8 sps:$4 sm:$0xff]  }
  0x13   :  { %1979 = vmatpush1.bf16.msra.mxu1 %v2943_v18  ;;  %v2989_v50 = vld [vmem:[%s4408_s1 + $0x4c4] ss:$8 sps:$4 sm:$0xff]   ;;  %v2997_v56 = vld [vmem:[%s4408_s1 + $0xd0] ss:$8 sps:$4 sm:$0xff]   ;;  %v3003_v60 = vld [vmem:[%s4408_s1 + $0xe0] ss:$8 sps:$4 sm:$0xff]  }
  0x14   :  { %2191 = vmatpush1.bf16.msra.mxu0 %v2944_v19  ;;  %1980 = vmatprep.subr.bf16.mxu1 %v2945_v20  ;;  %v3019_v51 = vld [vmem:[%s4409_s0 + $0x24] ss:$72 sps:$4 sm:$0xff]   ;;  %v2998_v57 = vld [vmem:[%s4408_s1 + $0x4d0] ss:$8 sps:$4 sm:$0xff]   ;;  %v3004_v61 = vld [vmem:[%s4408_s1 + $0x4e0] ss:$8 sps:$4 sm:$0xff]  }
  0x15   :  { %2192 = vmatprep.subr.bf16.mxu0 %v2947_v21  ;;  %2214 = vmatprep.mubr.bf16.mxu0 %v3019_v51  ;;  %v2999_v58 = vld [vmem:[%s4408_s1 + $0xe4] ss:$8 sps:$4 sm:$0xff]   ;;  %v3005_v62 = vld [vmem:[%s4408_s1 + $0xf4] ss:$8 sps:$4 sm:$0xff]   ;;  %v3009_v0 = vld [vmem:[%s4408_s1 + $0xf0] ss:$8 sps:$4 sm:$0xff]  }
  0x16   :  { %v3001_v59 = vld [vmem:[%s4408_s1 + $0x4e4] ss:$8 sps:$4 sm:$0xff]   ;;  %v3007_v63 = vld [vmem:[%s4408_s1 + $0x4f4] ss:$8 sps:$4 sm:$0xff]   ;;  %v3010_v1 = vld [vmem:[%s4408_s1 + $0x4f0] ss:$8 sps:$4 sm:$0xff]  }
  0x17   :  { %1981 = vmatpush1.bf16.msra.mxu1 %v2949_v22  ;;  %v3016_v2 = vld [vmem:[%s4408_s1 + $0x104] ss:$8 sps:$4 sm:$0xff]   ;;  %v3011_v4 = vld [vmem:[%s4409_s0] ss:$72 sps:$4 sm:$0xff]   ;;  %v3025_v8 = vld [vmem:[%s4408_s1 + $0x114] ss:$8 sps:$4 sm:$0xff]  }
  0x18   :  { %2193 = vmatpush1.bf16.msra.mxu0 %v2950_v23  ;;  %1982 = vmatprep.subr.bf16.mxu1 %v2951_v24  ;;  %v3022_v3 = vld [vmem:[%s4408_s1 + $0x504] ss:$8 sps:$4 sm:$0xff]   ;;  %v3014_v5 = vld [vmem:[%s4408_s1 + $0x100] ss:$8 sps:$4 sm:$0xff]   ;;  %v3028_v9 = vld [vmem:[%s4408_s1 + $0x514] ss:$8 sps:$4 sm:$0xff]  }
  0x19   :  { %2194 = vmatprep.subr.bf16.mxu0 %v2953_v25  ;;  %v3017_v6 = vld [vmem:[%s4409_s0 + $0x20] ss:$72 sps:$4 sm:$0xff]   ;;  %v3023_v10 = vld [vmem:[%s4408_s1 + $0x110] ss:$8 sps:$4 sm:$0xff]   ;;  %v3031_v12 = vld [vmem:[%s4408_s1 + $0x124] ss:$8 sps:$4 sm:$0xff]  }
  0x1a   :  { %v3020_v7 = vld [vmem:[%s4408_s1 + $0x500] ss:$8 sps:$4 sm:$0xff]   ;;  %v3026_v11 = vld [vmem:[%s4408_s1 + $0x510] ss:$8 sps:$4 sm:$0xff]   ;;  %v3034_v13 = vld [vmem:[%s4408_s1 + $0x524] ss:$8 sps:$4 sm:$0xff]  }
  0x1b   :  { %1983 = vmatpush1.bf16.msra.mxu1 %v2955_v26  ;;  %v3029_v14 = vld [vmem:[%s4408_s1 + $0x120] ss:$8 sps:$4 sm:$0xff]   ;;  %v3037_v16 = vld [vmem:[%s4408_s1 + $0x134] ss:$8 sps:$4 sm:$0xff]   ;;  %v3035_v18 = vld [vmem:[%s4408_s1 + $0x130] ss:$8 sps:$4 sm:$0xff]  }
  0x1c   :  { %2195 = vmatpush1.bf16.msra.mxu0 %v2956_v27  ;;  %1984 = vmatprep.subr.bf16.mxu1 %v2957_v28  ;;  %v3032_v15 = vld [vmem:[%s4408_s1 + $0x520] ss:$8 sps:$4 sm:$0xff]   ;;  %v3040_v17 = vld [vmem:[%s4408_s1 + $0x534] ss:$8 sps:$4 sm:$0xff]   ;;  %v3038_v19 = vld [vmem:[%s4408_s1 + $0x530] ss:$8 sps:$4 sm:$0xff]  }
  0x1d   :  { %2196 = vmatprep.subr.bf16.mxu0 %v2959_v29  ;;  %v3043_v20 = vld [vmem:[%s4408_s1 + $0x144] ss:$8 sps:$4 sm:$0xff]   ;;  %v3041_v22 = vld [vmem:[%s4408_s1 + $0x140] ss:$8 sps:$4 sm:$0xff]   ;;  %v3049_v24 = vld [vmem:[%s4408_s1 + $0x154] ss:$8 sps:$4 sm:$0xff]  }
  0x1e   :  { %v3046_v21 = vld [vmem:[%s4408_s1 + $0x544] ss:$8 sps:$4 sm:$0xff]   ;;  %v3044_v23 = vld [vmem:[%s4408_s1 + $0x540] ss:$8 sps:$4 sm:$0xff]   ;;  %v3052_v25 = vld [vmem:[%s4408_s1 + $0x554] ss:$8 sps:$4 sm:$0xff]  }
  0x1f   :  { %1985 = vmatpush1.bf16.msra.mxu1 %v2961_v30  ;;  %v3047_v26 = vld [vmem:[%s4408_s1 + $0x150] ss:$8 sps:$4 sm:$0xff]   ;;  %v3101_v28 = vld [vmem:[%s4409_s0 + $0x94] ss:$72 sps:$4 sm:$0xff]   ;;  %v3055_v29 = vld [vmem:[%s4408_s1 + $0x164] ss:$8 sps:$4 sm:$0xff]  }
  0x20   :  { %2197 = vmatpush1.bf16.msra.mxu0 %v2962_v31  ;;  %1986 = vmatprep.subr.bf16.mxu1 %v2963_v32  ;;  %v3050_v27 = vld [vmem:[%s4408_s1 + $0x550] ss:$8 sps:$4 sm:$0xff]   ;;  %v3058_v30 = vld [vmem:[%s4408_s1 + $0x564] ss:$8 sps:$4 sm:$0xff]   ;;  %v3106_v31 = vld [vmem:[%s4409_s0 + $0xb4] ss:$72 sps:$4 sm:$0xff]  }
  0x21   :  { %2198 = vmatprep.subr.bf16.mxu0 %v2965_v33  ;;  %v3053_v32 = vld [vmem:[%s4408_s1 + $0x160] ss:$8 sps:$4 sm:$0xff]   ;;  %v3071_v48 = vld [vmem:[%s4408_s1 + $0x190] ss:$8 sps:$4 sm:$0xff]   ;;  %v3082_v51 = vld [vmem:[%s4408_s1 + $0x5a4] ss:$8 sps:$4 sm:$0xff]  }
  0x22   :  { %v3056_v33 = vld [vmem:[%s4408_s1 + $0x560] ss:$8 sps:$4 sm:$0xff]  }
  0x23   :  { %1987 = vmatpush1.bf16.msra.mxu1 %v2967_v34  ;;  %v3111_v34 = vld [vmem:[%s4409_s0 + $0x90] ss:$72 sps:$4 sm:$0xff]  }
  0x24   :  { %2199 = vmatpush1.bf16.msra.mxu0 %v2968_v35  ;;  %1988 = vmatprep.subr.bf16.mxu1 %v2969_v36  ;;  %v3112_v35 = vld [vmem:[%s4409_s0 + $0xb0] ss:$72 sps:$4 sm:$0xff]   ;;  %v3061_v36 = vld [vmem:[%s4408_s1 + $0x174] ss:$8 sps:$4 sm:$0xff]  }
  0x25   :  { %2200 = vmatprep.subr.bf16.mxu0 %v2971_v37  ;;  %v3064_v37 = vld [vmem:[%s4408_s1 + $0x574] ss:$8 sps:$4 sm:$0xff]  }
  0x27   :  { %1989 = vmatpush1.bf16.msra.mxu1 %v2973_v38  ;;  %v3059_v38 = vld [vmem:[%s4408_s1 + $0x170] ss:$8 sps:$4 sm:$0xff]  }
  0x28   :  { %2201 = vmatpush1.bf16.msra.mxu0 %v2974_v39  ;;  %1990 = vmatprep.subr.bf16.mxu1 %v2975_v40  ;;  %v3062_v39 = vld [vmem:[%s4408_s1 + $0x570] ss:$8 sps:$4 sm:$0xff]   ;;  %v3121_v40 = vld [vmem:[%s4409_s0 + $0xc] ss:$72 sps:$4 sm:$0xff]  }
  0x29   :  { %2202 = vmatprep.subr.bf16.mxu0 %v2977_v41  ;;  %v3067_v41 = vld [vmem:[%s4408_s1 + $0x184] ss:$8 sps:$4 sm:$0xff]  }
  0x2b   :  { %1991 = vmatpush1.bf16.msra.mxu1 %v2979_v42  ;;  %v3070_v42 = vld [vmem:[%s4408_s1 + $0x584] ss:$8 sps:$4 sm:$0xff]  }
  0x2c   :  { %2203 = vmatpush1.bf16.msra.mxu0 %v2980_v43  ;;  %1992 = vmatprep.subr.bf16.mxu1 %v2981_v44  ;;  %v3127_v43 = vld [vmem:[%s4409_s0 + $0x2c] ss:$72 sps:$4 sm:$0xff]   ;;  %v3065_v44 = vld [vmem:[%s4408_s1 + $0x180] ss:$8 sps:$4 sm:$0xff]  }
  0x2d   :  { %2204 = vmatprep.subr.bf16.mxu0 %v2983_v45  ;;  %v3068_v45 = vld [vmem:[%s4408_s1 + $0x580] ss:$8 sps:$4 sm:$0xff]  }
  0x2f   :  { %1993 = vmatpush1.bf16.msra.mxu1 %v2985_v46  ;;  %v3073_v46 = vld [vmem:[%s4408_s1 + $0x194] ss:$8 sps:$4 sm:$0xff]  }
  0x30   :  { %2205 = vmatpush1.bf16.msra.mxu0 %v2986_v47  ;;  %1994 = vmatprep.subr.bf16.mxu1 %v2987_v49  ;;  %v3076_v47 = vld [vmem:[%s4408_s1 + $0x594] ss:$8 sps:$4 sm:$0xff]   ;;  %v3074_v49 = vld [vmem:[%s4408_s1 + $0x590] ss:$8 sps:$4 sm:$0xff]  }
  0x31   :  { %2206 = vmatprep.subr.bf16.mxu0 %v2989_v50  ;;  %v3079_v50 = vld [vmem:[%s4408_s1 + $0x1a4] ss:$8 sps:$4 sm:$0xff]  }
  0x33   :  { %1995 = vmatpush1.bf16.msra.mxu1 %v2991_v52  ;;  %v3077_v52 = vld [vmem:[%s4408_s1 + $0x1a0] ss:$8 sps:$4 sm:$0xff]  }
  0x34   :  { %2207 = vmatpush1.bf16.msra.mxu0 %v2992_v53  ;;  %1996 = vmatprep.subr.bf16.mxu1 %v2993_v54  ;;  %v3080_v53 = vld [vmem:[%s4408_s1 + $0x5a0] ss:$8 sps:$4 sm:$0xff]   ;;  %v3085_v54 = vld [vmem:[%s4408_s1 + $0x1b4] ss:$8 sps:$4 sm:$0xff]  }
  0x35   :  { %2208 = vmatprep.subr.bf16.mxu0 %v2995_v55  ;;  %v3088_v55 = vld [vmem:[%s4408_s1 + $0x5b4] ss:$8 sps:$4 sm:$0xff]  }
  0x37   :  { %1997 = vmatpush1.bf16.msra.mxu1 %v2997_v56  ;;  %v3083_v56 = vld [vmem:[%s4408_s1 + $0x1b0] ss:$8 sps:$4 sm:$0xff]  }
  0x38   :  { %2209 = vmatpush1.bf16.msra.mxu0 %v2998_v57  ;;  %1998 = vmatprep.subr.bf16.mxu1 %v2999_v58  ;;  %v3086_v57 = vld [vmem:[%s4408_s1 + $0x5b0] ss:$8 sps:$4 sm:$0xff]   ;;  %v3091_v58 = vld [vmem:[%s4408_s1 + $0x1c4] ss:$8 sps:$4 sm:$0xff]  }
  0x39   :  { %2210 = vmatprep.subr.bf16.mxu0 %v3001_v59  ;;  %v3094_v59 = vld [vmem:[%s4408_s1 + $0x5c4] ss:$8 sps:$4 sm:$0xff]  }
  0x3b   :  { %1999 = vmatpush1.bf16.msra.mxu1 %v3003_v60  ;;  %v3089_v60 = vld [vmem:[%s4408_s1 + $0x1c0] ss:$8 sps:$4 sm:$0xff]  }
  0x3c   :  { %2211 = vmatpush1.bf16.msra.mxu0 %v3004_v61  ;;  %2000 = vmatprep.subr.bf16.mxu1 %v3005_v62  ;;  %v3092_v61 = vld [vmem:[%s4408_s1 + $0x5c0] ss:$8 sps:$4 sm:$0xff]   ;;  %v3097_v62 = vld [vmem:[%s4408_s1 + $0x1d4] ss:$8 sps:$4 sm:$0xff]  }
  0x3d   :  { %2212 = vmatprep.subr.bf16.mxu0 %v3007_v63  ;;  %v3100_v63 = vld [vmem:[%s4408_s1 + $0x5d4] ss:$8 sps:$4 sm:$0xff]  }
  0x3f   :  { %2001 = vmatpush1.bf16.msra.mxu1 %v3009_v0  ;;  %v3095_v0 = vld [vmem:[%s4408_s1 + $0x1d0] ss:$8 sps:$4 sm:$0xff]  }
  0x40   :  { %2213 = vmatpush1.bf16.msra.mxu0 %v3010_v1  ;;  %2023 = vmatprep.subr.bf16.mxu1 %v3016_v2  ;;  %v3098_v1 = vld [vmem:[%s4408_s1 + $0x5d0] ss:$8 sps:$4 sm:$0xff]   ;;  %v3105_v2 = vld [vmem:[%s4408_s1 + $0x1e4] ss:$8 sps:$4 sm:$0xff]  }
  0x41   :  { %2235 = vmatprep.subr.bf16.mxu0 %v3022_v3  ;;  %v3110_v3 = vld [vmem:[%s4408_s1 + $0x5e4] ss:$8 sps:$4 sm:$0xff]  }
  0x42   :  { %2003 = vmatmul.mubr.bf16.vlgmr.msra.gmra.mrb[0].mxu1 %v3011_v4  ;;  %v3103_v4 = vld [vmem:[%s4408_s1 + $0x1e0] ss:$8 sps:$4 sm:$0xff]  }
  0x43   :  { %2215 = vmatmul.mubr.bf16.vlgmr.msra.gmra.mrb[0].mxu0 %v3017_v6  ;;  %2024 = vmatpush1.bf16.msra.mxu1 %v3014_v5  ;;  %v3108_v5 = vld [vmem:[%s4408_s1 + $0x5e0] ss:$8 sps:$4 sm:$0xff]   ;;  %v3115_v6 = vld [vmem:[%s4408_s1 + $0x1f4] ss:$8 sps:$4 sm:$0xff]  }
  0x44   :  { %2236 = vmatpush1.bf16.msra.mxu0 %v3020_v7  ;;  %2025 = vmatprep.subr.bf16.mxu1 %v3025_v8  ;;  %v3118_v7 = vld [vmem:[%s4408_s1 + $0x5f4] ss:$8 sps:$4 sm:$0xff]   ;;  %v3113_v8 = vld [vmem:[%s4408_s1 + $0x1f0] ss:$8 sps:$4 sm:$0xff]  }
  0x45   :  { %2237 = vmatprep.subr.bf16.mxu0 %v3028_v9  ;;  %2012 = vmatprep.mubr.bf16.mxu1 %v3101_v28  ;;  %v3116_v9 = vld [vmem:[%s4408_s1 + $0x5f0] ss:$8 sps:$4 sm:$0xff]   ;;  %v3145_v28 = vld [vmem:[%s4408_s1 + $0x234] ss:$8 sps:$4 sm:$0xff]  }
  0x46   :  { %2224 = vmatprep.mubr.bf16.mxu0 %v3106_v31  ;;  %v3146_v31 = vld [vmem:[%s4408_s1 + $0x630] ss:$8 sps:$4 sm:$0xff]  }
  0x47   :  { %2026 = vmatpush1.bf16.msra.mxu1 %v3023_v10  ;;  %v3124_v10 = vld [vmem:[%s4408_s1 + $0x204] ss:$8 sps:$4 sm:$0xff]  }
  0x48   :  { %2238 = vmatpush1.bf16.msra.mxu0 %v3026_v11  ;;  %2027 = vmatprep.subr.bf16.mxu1 %v3031_v12  ;;  %v3130_v11 = vld [vmem:[%s4408_s1 + $0x604] ss:$8 sps:$4 sm:$0xff]   ;;  %v3119_v12 = vld [vmem:[%s4409_s0 + $0x8] ss:$72 sps:$4 sm:$0xff]  }
  0x49   :  { %2239 = vmatprep.subr.bf16.mxu0 %v3034_v13  ;;  %v3122_v13 = vld [vmem:[%s4408_s1 + $0x200] ss:$8 sps:$4 sm:$0xff]  }
  0x4a   :  { %2013 = vmatmul.mubr.bf16.gmra.mrb[4].mxu1 %v3111_v34  ;;  %v3154_v34 = vld [vmem:[%s4408_s1 + $0x644] ss:$8 sps:$4 sm:$0xff]  }
  0x4b   :  { %2028 = vmatpush1.bf16.msra.mxu1 %v3029_v14  ;;  %2225 = vmatmul.mubr.bf16.gmra.mrb[4].mxu0 %v3112_v35  ;;  %v3125_v14 = vld [vmem:[%s4409_s0 + $0x28] ss:$72 sps:$4 sm:$0xff]   ;;  %v3235_v35 = vld [vmem:[%s4409_s0 + $0x34] ss:$72 sps:$4 sm:$0xff]  }
  0x4c   :  { %2240 = vmatpush1.bf16.msra.mxu0 %v3032_v15  ;;  %2029 = vmatprep.subr.bf16.mxu1 %v3037_v16  ;;  %v3128_v15 = vld [vmem:[%s4408_s1 + $0x600] ss:$8 sps:$4 sm:$0xff]   ;;  %v3133_v16 = vld [vmem:[%s4408_s1 + $0x214] ss:$8 sps:$4 sm:$0xff]  }
  0x4d   :  { %2241 = vmatprep.subr.bf16.mxu0 %v3040_v17  ;;  %2055 = vmatprep.mubr.bf16.mxu1 %v3121_v40  ;;  %v3136_v17 = vld [vmem:[%s4408_s1 + $0x614] ss:$8 sps:$4 sm:$0xff]   ;;  %v3155_v40 = vld [vmem:[%s4408_s1 + $0x250] ss:$8 sps:$4 sm:$0xff]  }
  0x4e   :  { %2267 = vmatprep.mubr.bf16.mxu0 %v3127_v43  ;;  %v3166_v43 = vld [vmem:[%s4408_s1 + $0x664] ss:$8 sps:$4 sm:$0xff]  }
  0x4f   :  { %2030 = vmatpush1.bf16.msra.mxu1 %v3035_v18  ;;  %v3131_v18 = vld [vmem:[%s4408_s1 + $0x210] ss:$8 sps:$4 sm:$0xff]  }
  0x50   :  { %2242 = vmatpush1.bf16.msra.mxu0 %v3038_v19  ;;  %2031 = vmatprep.subr.bf16.mxu1 %v3043_v20  ;;  %v3134_v19 = vld [vmem:[%s4408_s1 + $0x610] ss:$8 sps:$4 sm:$0xff]   ;;  %v3209_v20 = vld [vmem:[%s4409_s0 + $0x9c] ss:$72 sps:$4 sm:$0xff]  }
  0x51   :  { %2243 = vmatprep.subr.bf16.mxu0 %v3046_v21  ;;  %v3139_v21 = vld [vmem:[%s4408_s1 + $0x224] ss:$8 sps:$4 sm:$0xff]  }
  0x53   :  { %2032 = vmatpush1.bf16.msra.mxu1 %v3041_v22  ;;  %v3142_v22 = vld [vmem:[%s4408_s1 + $0x624] ss:$8 sps:$4 sm:$0xff]  }
  0x54   :  { %2244 = vmatpush1.bf16.msra.mxu0 %v3044_v23  ;;  %2033 = vmatprep.subr.bf16.mxu1 %v3049_v24  ;;  %v3214_v23 = vld [vmem:[%s4409_s0 + $0xbc] ss:$72 sps:$4 sm:$0xff]   ;;  %v3137_v24 = vld [vmem:[%s4408_s1 + $0x220] ss:$8 sps:$4 sm:$0xff]  }
  0x55   :  { %2245 = vmatprep.subr.bf16.mxu0 %v3052_v25  ;;  %v3140_v25 = vld [vmem:[%s4408_s1 + $0x620] ss:$8 sps:$4 sm:$0xff]  }
  0x57   :  { %2034 = vmatpush1.bf16.msra.mxu1 %v3047_v26  ;;  %v3219_v26 = vld [vmem:[%s4409_s0 + $0x98] ss:$72 sps:$4 sm:$0xff]  }
  0x58   :  { %2246 = vmatpush1.bf16.msra.mxu0 %v3050_v27  ;;  %2035 = vmatprep.subr.bf16.mxu1 %v3055_v29  ;;  %v3220_v27 = vld [vmem:[%s4409_s0 + $0xb8] ss:$72 sps:$4 sm:$0xff]   ;;  %v3148_v29 = vld [vmem:[%s4408_s1 + $0x634] ss:$8 sps:$4 sm:$0xff]  }
  0x59   :  { %2247 = vmatprep.subr.bf16.mxu0 %v3058_v30  ;;  %v3143_v30 = vld [vmem:[%s4408_s1 + $0x230] ss:$8 sps:$4 sm:$0xff]  }
  0x5b   :  { %2036 = vmatpush1.bf16.msra.mxu1 %v3053_v32  ;;  %v3229_v32 = vld [vmem:[%s4409_s0 + $0x14] ss:$72 sps:$4 sm:$0xff]  }
  0x5c   :  { %2248 = vmatpush1.bf16.msra.mxu0 %v3056_v33  ;;  %2037 = vmatprep.subr.bf16.mxu1 %v3061_v36  ;;  %v3151_v33 = vld [vmem:[%s4408_s1 + $0x244] ss:$8 sps:$4 sm:$0xff]   ;;  %v3149_v36 = vld [vmem:[%s4408_s1 + $0x240] ss:$8 sps:$4 sm:$0xff]  }
  0x5d   :  { %2249 = vmatprep.subr.bf16.mxu0 %v3064_v37  ;;  %v3152_v37 = vld [vmem:[%s4408_s1 + $0x640] ss:$8 sps:$4 sm:$0xff]  }
  0x5f   :  { %2038 = vmatpush1.bf16.msra.mxu1 %v3059_v38  ;;  %v3157_v38 = vld [vmem:[%s4408_s1 + $0x254] ss:$8 sps:$4 sm:$0xff]  }
  0x60   :  { %2250 = vmatpush1.bf16.msra.mxu0 %v3062_v39  ;;  %2039 = vmatprep.subr.bf16.mxu1 %v3067_v41  ;;  %v3160_v39 = vld [vmem:[%s4408_s1 + $0x654] ss:$8 sps:$4 sm:$0xff]   ;;  %v3158_v41 = vld [vmem:[%s4408_s1 + $0x650] ss:$8 sps:$4 sm:$0xff]  }
  0x61   :  { %2251 = vmatprep.subr.bf16.mxu0 %v3070_v42  ;;  %v3163_v42 = vld [vmem:[%s4408_s1 + $0x264] ss:$8 sps:$4 sm:$0xff]  }
  0x63   :  { %2040 = vmatpush1.bf16.msra.mxu1 %v3065_v44  ;;  %v3161_v44 = vld [vmem:[%s4408_s1 + $0x260] ss:$8 sps:$4 sm:$0xff]  }
  0x64   :  { %2252 = vmatpush1.bf16.msra.mxu0 %v3068_v45  ;;  %2041 = vmatprep.subr.bf16.mxu1 %v3073_v46  ;;  %v3164_v45 = vld [vmem:[%s4408_s1 + $0x660] ss:$8 sps:$4 sm:$0xff]   ;;  %v3169_v46 = vld [vmem:[%s4408_s1 + $0x274] ss:$8 sps:$4 sm:$0xff]  }
  0x65   :  { %2253 = vmatprep.subr.bf16.mxu0 %v3076_v47  ;;  %v3172_v47 = vld [vmem:[%s4408_s1 + $0x674] ss:$8 sps:$4 sm:$0xff]  }
  0x67   :  { %2042 = vmatpush1.bf16.msra.mxu1 %v3071_v48  ;;  %v3167_v48 = vld [vmem:[%s4408_s1 + $0x270] ss:$8 sps:$4 sm:$0xff]  }
  0x68   :  { %2254 = vmatpush1.bf16.msra.mxu0 %v3074_v49  ;;  %2043 = vmatprep.subr.bf16.mxu1 %v3079_v50  ;;  %v3170_v49 = vld [vmem:[%s4408_s1 + $0x670] ss:$8 sps:$4 sm:$0xff]   ;;  %v3175_v50 = vld [vmem:[%s4408_s1 + $0x284] ss:$8 sps:$4 sm:$0xff]  }
  0x69   :  { %2255 = vmatprep.subr.bf16.mxu0 %v3082_v51  ;;  %v3178_v51 = vld [vmem:[%s4408_s1 + $0x684] ss:$8 sps:$4 sm:$0xff]  }
  0x6b   :  { %2044 = vmatpush1.bf16.msra.mxu1 %v3077_v52  ;;  %v3173_v52 = vld [vmem:[%s4408_s1 + $0x280] ss:$8 sps:$4 sm:$0xff]  }
  0x6c   :  { %2256 = vmatpush1.bf16.msra.mxu0 %v3080_v53  ;;  %2045 = vmatprep.subr.bf16.mxu1 %v3085_v54  ;;  %v3176_v53 = vld [vmem:[%s4408_s1 + $0x680] ss:$8 sps:$4 sm:$0xff]   ;;  %v3181_v54 = vld [vmem:[%s4408_s1 + $0x294] ss:$8 sps:$4 sm:$0xff]  }
  0x6d   :  { %2257 = vmatprep.subr.bf16.mxu0 %v3088_v55  ;;  %v3184_v55 = vld [vmem:[%s4408_s1 + $0x694] ss:$8 sps:$4 sm:$0xff]  }
  0x6f   :  { %2046 = vmatpush1.bf16.msra.mxu1 %v3083_v56  ;;  %v3179_v56 = vld [vmem:[%s4408_s1 + $0x290] ss:$8 sps:$4 sm:$0xff]  }
  0x70   :  { %2258 = vmatpush1.bf16.msra.mxu0 %v3086_v57  ;;  %2047 = vmatprep.subr.bf16.mxu1 %v3091_v58  ;;  %v3182_v57 = vld [vmem:[%s4408_s1 + $0x690] ss:$8 sps:$4 sm:$0xff]   ;;  %v3187_v58 = vld [vmem:[%s4408_s1 + $0x2a4] ss:$8 sps:$4 sm:$0xff]  }
  0x71   :  { %2259 = vmatprep.subr.bf16.mxu0 %v3094_v59  ;;  %v3190_v59 = vld [vmem:[%s4408_s1 + $0x6a4] ss:$8 sps:$4 sm:$0xff]  }
  0x73   :  { %2048 = vmatpush1.bf16.msra.mxu1 %v3089_v60  ;;  %v3185_v60 = vld [vmem:[%s4408_s1 + $0x2a0] ss:$8 sps:$4 sm:$0xff]  }
  0x74   :  { %2260 = vmatpush1.bf16.msra.mxu0 %v3092_v61  ;;  %2049 = vmatprep.subr.bf16.mxu1 %v3097_v62  ;;  %v3188_v61 = vld [vmem:[%s4408_s1 + $0x6a0] ss:$8 sps:$4 sm:$0xff]   ;;  %v3193_v62 = vld [vmem:[%s4408_s1 + $0x2b4] ss:$8 sps:$4 sm:$0xff]  }
  0x75   :  { %2261 = vmatprep.subr.bf16.mxu0 %v3100_v63  ;;  %v3196_v63 = vld [vmem:[%s4408_s1 + $0x6b4] ss:$8 sps:$4 sm:$0xff]  }
  0x77   :  { %2050 = vmatpush1.bf16.msra.mxu1 %v3095_v0  ;;  %v3191_v0 = vld [vmem:[%s4408_s1 + $0x2b0] ss:$8 sps:$4 sm:$0xff]  }
  0x78   :  { %2262 = vmatpush1.bf16.msra.mxu0 %v3098_v1  ;;  %2051 = vmatprep.subr.bf16.mxu1 %v3105_v2  ;;  %v3194_v1 = vld [vmem:[%s4408_s1 + $0x6b0] ss:$8 sps:$4 sm:$0xff]   ;;  %v3199_v2 = vld [vmem:[%s4408_s1 + $0x2c4] ss:$8 sps:$4 sm:$0xff]  }
  0x79   :  { %2263 = vmatprep.subr.bf16.mxu0 %v3110_v3  ;;  %v3202_v3 = vld [vmem:[%s4408_s1 + $0x6c4] ss:$8 sps:$4 sm:$0xff]  }
  0x7b   :  { %2052 = vmatpush1.bf16.msra.mxu1 %v3103_v4  ;;  %v3197_v4 = vld [vmem:[%s4408_s1 + $0x2c0] ss:$8 sps:$4 sm:$0xff]  }
  0x7c   :  { %2264 = vmatpush1.bf16.msra.mxu0 %v3108_v5  ;;  %2053 = vmatprep.subr.bf16.mxu1 %v3115_v6  ;;  %v3200_v5 = vld [vmem:[%s4408_s1 + $0x6c0] ss:$8 sps:$4 sm:$0xff]   ;;  %v3205_v6 = vld [vmem:[%s4408_s1 + $0x2d4] ss:$8 sps:$4 sm:$0xff]  }
  0x7d   :  { %2265 = vmatprep.subr.bf16.mxu0 %v3118_v7  ;;  %v3208_v7 = vld [vmem:[%s4408_s1 + $0x6d4] ss:$8 sps:$4 sm:$0xff]  }
  0x7f   :  { %2054 = vmatpush1.bf16.msra.mxu1 %v3113_v8  ;;  %v3203_v8 = vld [vmem:[%s4408_s1 + $0x2d0] ss:$8 sps:$4 sm:$0xff]  }
  0x80   :  { %2266 = vmatpush1.bf16.msra.mxu0 %v3116_v9  ;;  %2076 = vmatprep.subr.bf16.mxu1 %v3124_v10  ;;  %v3206_v9 = vld [vmem:[%s4408_s1 + $0x6d0] ss:$8 sps:$4 sm:$0xff]   ;;  %v3213_v10 = vld [vmem:[%s4408_s1 + $0x2e4] ss:$8 sps:$4 sm:$0xff]  }
  0x81   :  { %2288 = vmatprep.subr.bf16.mxu0 %v3130_v11  ;;  %v3218_v11 = vld [vmem:[%s4408_s1 + $0x6e4] ss:$8 sps:$4 sm:$0xff]  }
  0x82   :  { %2056 = vmatmul.mubr.bf16.vlgmr.msra.gmra.mrb[0].mxu1 %v3119_v12  ;;  %v3211_v12 = vld [vmem:[%s4408_s1 + $0x2e0] ss:$8 sps:$4 sm:$0xff]  }
  0x83   :  { %2268 = vmatmul.mubr.bf16.vlgmr.msra.gmra.mrb[0].mxu0 %v3125_v14  ;;  %2077 = vmatpush1.bf16.msra.mxu1 %v3122_v13  ;;  %v3216_v13 = vld [vmem:[%s4408_s1 + $0x6e0] ss:$8 sps:$4 sm:$0xff]   ;;  %v3223_v14 = vld [vmem:[%s4408_s1 + $0x2f4] ss:$8 sps:$4 sm:$0xff]  }
  0x84   :  { %2289 = vmatpush1.bf16.msra.mxu0 %v3128_v15  ;;  %2078 = vmatprep.subr.bf16.mxu1 %v3133_v16  ;;  %v3226_v15 = vld [vmem:[%s4408_s1 + $0x6f4] ss:$8 sps:$4 sm:$0xff]   ;;  %v3221_v16 = vld [vmem:[%s4408_s1 + $0x2f0] ss:$8 sps:$4 sm:$0xff]  }
  0x85   :  { %2290 = vmatprep.subr.bf16.mxu0 %v3136_v17  ;;  %2065 = vmatprep.mubr.bf16.mxu1 %v3209_v20  ;;  %v3224_v17 = vld [vmem:[%s4408_s1 + $0x6f0] ss:$8 sps:$4 sm:$0xff]  }
  0x86   :  { %2277 = vmatprep.mubr.bf16.mxu0 %v3214_v23  ;;  %v3227_v20 = vld [vmem:[%s4409_s0 + $0x10] ss:$72 sps:$4 sm:$0xff]   ;;  %v3236_v23 = vld [vmem:[%s4408_s1 + $0x700] ss:$8 sps:$4 sm:$0xff]  }
  0x87   :  { %2079 = vmatpush1.bf16.msra.mxu1 %v3131_v18  ;;  %v3232_v18 = vld [vmem:[%s4408_s1 + $0x304] ss:$8 sps:$4 sm:$0xff]  }
  0x88   :  { %2291 = vmatpush1.bf16.msra.mxu0 %v3134_v19  ;;  %2080 = vmatprep.subr.bf16.mxu1 %v3139_v21  ;;  %v3238_v19 = vld [vmem:[%s4408_s1 + $0x704] ss:$8 sps:$4 sm:$0xff]   ;;  %v3230_v21 = vld [vmem:[%s4408_s1 + $0x300] ss:$8 sps:$4 sm:$0xff]  }
  0x89   :  { %2292 = vmatprep.subr.bf16.mxu0 %v3142_v22  ;;  %v3233_v22 = vld [vmem:[%s4409_s0 + $0x30] ss:$72 sps:$4 sm:$0xff]  }
  0x8a   :  { %2066 = vmatmul.mubr.bf16.gmra.mrb[4].mxu1 %v3219_v26  ;;  %v3317_v26 = vld [vmem:[%s4409_s0 + $0xa4] ss:$72 sps:$4 sm:$0xff]  }
  0x8b   :  { %2278 = vmatmul.mubr.bf16.gmra.mrb[4].mxu0 %v3220_v27  ;;  %2081 = vmatpush1.bf16.msra.mxu1 %v3137_v24  ;;  %v3241_v24 = vld [vmem:[%s4408_s1 + $0x314] ss:$8 sps:$4 sm:$0xff]   ;;  %v3319_v27 = vld [vmem:[%s4409_s0 + $0xc4] ss:$72 sps:$4 sm:$0xff]  }
  0x8c   :  { %2293 = vmatpush1.bf16.msra.mxu0 %v3140_v25  ;;  %2082 = vmatprep.subr.bf16.mxu1 %v3145_v28  ;;  %v3244_v25 = vld [vmem:[%s4408_s1 + $0x714] ss:$8 sps:$4 sm:$0xff]   ;;  %v3239_v28 = vld [vmem:[%s4408_s1 + $0x310] ss:$8 sps:$4 sm:$0xff]  }
  0x8d   :  { %2294 = vmatprep.subr.bf16.mxu0 %v3148_v29  ;;  %2108 = vmatprep.mubr.bf16.mxu1 %v3229_v32  ;;  %v3242_v29 = vld [vmem:[%s4408_s1 + $0x710] ss:$8 sps:$4 sm:$0xff]   ;;  %v3245_v32 = vld [vmem:[%s4408_s1 + $0x320] ss:$8 sps:$4 sm:$0xff]  }
  0x8e   :  { %2320 = vmatprep.mubr.bf16.mxu0 %v3235_v35  ;;  %v3325_v35 = vld [vmem:[%s4409_s0 + $0xc0] ss:$72 sps:$4 sm:$0xff]  }
  0x8f   :  { %2083 = vmatpush1.bf16.msra.mxu1 %v3143_v30  ;;  %v3247_v30 = vld [vmem:[%s4408_s1 + $0x324] ss:$8 sps:$4 sm:$0xff]  }
  0x90   :  { %2295 = vmatpush1.bf16.msra.mxu0 %v3146_v31  ;;  %2084 = vmatprep.subr.bf16.mxu1 %v3151_v33  ;;  %v3250_v31 = vld [vmem:[%s4408_s1 + $0x724] ss:$8 sps:$4 sm:$0xff]   ;;  %v3248_v33 = vld [vmem:[%s4408_s1 + $0x720] ss:$8 sps:$4 sm:$0xff]  }
  0x91   :  { %2296 = vmatprep.subr.bf16.mxu0 %v3154_v34  ;;  %v3321_v34 = vld [vmem:[%s4409_s0 + $0xa0] ss:$72 sps:$4 sm:$0xff]  }
  0x93   :  { %2085 = vmatpush1.bf16.msra.mxu1 %v3149_v36  ;;  %v3253_v36 = vld [vmem:[%s4408_s1 + $0x334] ss:$8 sps:$4 sm:$0xff]  }
  0x94   :  { %2297 = vmatpush1.bf16.msra.mxu0 %v3152_v37  ;;  %2086 = vmatprep.subr.bf16.mxu1 %v3157_v38  ;;  %v3256_v37 = vld [vmem:[%s4408_s1 + $0x734] ss:$8 sps:$4 sm:$0xff]  }
  0x95   :  { %2298 = vmatprep.subr.bf16.mxu0 %v3160_v39  ;;  %v3337_v38 = vld [vmem:[%s4409_s0 + $0x1c] ss:$72 sps:$4 sm:$0xff]  }
  0x96   :  { %v3340_v39 = vld [vmem:[%s4409_s0 + $0x3c] ss:$72 sps:$4 sm:$0xff]  }
  0x97   :  { %2087 = vmatpush1.bf16.msra.mxu1 %v3155_v40  ;;  %v3251_v40 = vld [vmem:[%s4408_s1 + $0x330] ss:$8 sps:$4 sm:$0xff]  }
  0x98   :  { %2299 = vmatpush1.bf16.msra.mxu0 %v3158_v41  ;;  %2088 = vmatprep.subr.bf16.mxu1 %v3163_v42  ;;  %v3254_v41 = vld [vmem:[%s4408_s1 + $0x730] ss:$8 sps:$4 sm:$0xff]   ;;  %v3259_v42 = vld [vmem:[%s4408_s1 + $0x344] ss:$8 sps:$4 sm:$0xff]  }
  0x99   :  { %2300 = vmatprep.subr.bf16.mxu0 %v3166_v43  ;;  %v3262_v43 = vld [vmem:[%s4408_s1 + $0x744] ss:$8 sps:$4 sm:$0xff]  }
  0x9b   :  { %2089 = vmatpush1.bf16.msra.mxu1 %v3161_v44  ;;  %v3257_v44 = vld [vmem:[%s4408_s1 + $0x340] ss:$8 sps:$4 sm:$0xff]  }
  0x9c   :  { %2301 = vmatpush1.bf16.msra.mxu0 %v3164_v45  ;;  %2090 = vmatprep.subr.bf16.mxu1 %v3169_v46  ;;  %v3260_v45 = vld [vmem:[%s4408_s1 + $0x740] ss:$8 sps:$4 sm:$0xff]   ;;  %v3265_v46 = vld [vmem:[%s4408_s1 + $0x354] ss:$8 sps:$4 sm:$0xff]  }
  0x9d   :  { %2302 = vmatprep.subr.bf16.mxu0 %v3172_v47  ;;  %v3268_v47 = vld [vmem:[%s4408_s1 + $0x754] ss:$8 sps:$4 sm:$0xff]  }
  0x9f   :  { %2091 = vmatpush1.bf16.msra.mxu1 %v3167_v48  ;;  %v3263_v48 = vld [vmem:[%s4408_s1 + $0x350] ss:$8 sps:$4 sm:$0xff]  }
  0xa0   :  { %2303 = vmatpush1.bf16.msra.mxu0 %v3170_v49  ;;  %2092 = vmatprep.subr.bf16.mxu1 %v3175_v50  ;;  %v3266_v49 = vld [vmem:[%s4408_s1 + $0x750] ss:$8 sps:$4 sm:$0xff]   ;;  %v3271_v50 = vld [vmem:[%s4408_s1 + $0x364] ss:$8 sps:$4 sm:$0xff]  }
  0xa1   :  { %2304 = vmatprep.subr.bf16.mxu0 %v3178_v51  ;;  %v3274_v51 = vld [vmem:[%s4408_s1 + $0x764] ss:$8 sps:$4 sm:$0xff]  }
  0xa3   :  { %2093 = vmatpush1.bf16.msra.mxu1 %v3173_v52  ;;  %v3269_v52 = vld [vmem:[%s4408_s1 + $0x360] ss:$8 sps:$4 sm:$0xff]  }
  0xa4   :  { %2305 = vmatpush1.bf16.msra.mxu0 %v3176_v53  ;;  %2094 = vmatprep.subr.bf16.mxu1 %v3181_v54  ;;  %v3272_v53 = vld [vmem:[%s4408_s1 + $0x760] ss:$8 sps:$4 sm:$0xff]   ;;  %v3277_v54 = vld [vmem:[%s4408_s1 + $0x374] ss:$8 sps:$4 sm:$0xff]  }
  0xa5   :  { %2306 = vmatprep.subr.bf16.mxu0 %v3184_v55  ;;  %v3280_v55 = vld [vmem:[%s4408_s1 + $0x774] ss:$8 sps:$4 sm:$0xff]  }
  0xa7   :  { %2095 = vmatpush1.bf16.msra.mxu1 %v3179_v56  ;;  %v3275_v56 = vld [vmem:[%s4408_s1 + $0x370] ss:$8 sps:$4 sm:$0xff]  }
  0xa8   :  { %2307 = vmatpush1.bf16.msra.mxu0 %v3182_v57  ;;  %2096 = vmatprep.subr.bf16.mxu1 %v3187_v58  ;;  %v3278_v57 = vld [vmem:[%s4408_s1 + $0x770] ss:$8 sps:$4 sm:$0xff]   ;;  %v3283_v58 = vld [vmem:[%s4408_s1 + $0x384] ss:$8 sps:$4 sm:$0xff]  }
  0xa9   :  { %2308 = vmatprep.subr.bf16.mxu0 %v3190_v59  ;;  %v3286_v59 = vld [vmem:[%s4408_s1 + $0x784] ss:$8 sps:$4 sm:$0xff]  }
  0xab   :  { %2097 = vmatpush1.bf16.msra.mxu1 %v3185_v60  ;;  %v3281_v60 = vld [vmem:[%s4408_s1 + $0x380] ss:$8 sps:$4 sm:$0xff]  }
  0xac   :  { %2309 = vmatpush1.bf16.msra.mxu0 %v3188_v61  ;;  %2098 = vmatprep.subr.bf16.mxu1 %v3193_v62  ;;  %v3284_v61 = vld [vmem:[%s4408_s1 + $0x780] ss:$8 sps:$4 sm:$0xff]   ;;  %v3289_v62 = vld [vmem:[%s4408_s1 + $0x394] ss:$8 sps:$4 sm:$0xff]  }
  0xad   :  { %2310 = vmatprep.subr.bf16.mxu0 %v3196_v63  ;;  %v3292_v63 = vld [vmem:[%s4408_s1 + $0x794] ss:$8 sps:$4 sm:$0xff]  }
  0xaf   :  { %2099 = vmatpush1.bf16.msra.mxu1 %v3191_v0  ;;  %v3287_v0 = vld [vmem:[%s4408_s1 + $0x390] ss:$8 sps:$4 sm:$0xff]  }
  0xb0   :  { %2311 = vmatpush1.bf16.msra.mxu0 %v3194_v1  ;;  %2100 = vmatprep.subr.bf16.mxu1 %v3199_v2  ;;  %v3290_v1 = vld [vmem:[%s4408_s1 + $0x790] ss:$8 sps:$4 sm:$0xff]   ;;  %v3295_v2 = vld [vmem:[%s4408_s1 + $0x3a4] ss:$8 sps:$4 sm:$0xff]  }
  0xb1   :  { %2312 = vmatprep.subr.bf16.mxu0 %v3202_v3  ;;  %v3298_v3 = vld [vmem:[%s4408_s1 + $0x7a4] ss:$8 sps:$4 sm:$0xff]  }
  0xb3   :  { %2101 = vmatpush1.bf16.msra.mxu1 %v3197_v4  ;;  %v3293_v4 = vld [vmem:[%s4408_s1 + $0x3a0] ss:$8 sps:$4 sm:$0xff]  }
  0xb4   :  { %2313 = vmatpush1.bf16.msra.mxu0 %v3200_v5  ;;  %2102 = vmatprep.subr.bf16.mxu1 %v3205_v6  ;;  %v3296_v5 = vld [vmem:[%s4408_s1 + $0x7a0] ss:$8 sps:$4 sm:$0xff]   ;;  %v3301_v6 = vld [vmem:[%s4408_s1 + $0x3b4] ss:$8 sps:$4 sm:$0xff]  }
  0xb5   :  { %2314 = vmatprep.subr.bf16.mxu0 %v3208_v7  ;;  %v3304_v7 = vld [vmem:[%s4408_s1 + $0x7b4] ss:$8 sps:$4 sm:$0xff]  }
  0xb7   :  { %2103 = vmatpush1.bf16.msra.mxu1 %v3203_v8  ;;  %v3299_v8 = vld [vmem:[%s4408_s1 + $0x3b0] ss:$8 sps:$4 sm:$0xff]  }
  0xb8   :  { %2315 = vmatpush1.bf16.msra.mxu0 %v3206_v9  ;;  %2104 = vmatprep.subr.bf16.mxu1 %v3213_v10  ;;  %v3302_v9 = vld [vmem:[%s4408_s1 + $0x7b0] ss:$8 sps:$4 sm:$0xff]   ;;  %v3307_v10 = vld [vmem:[%s4408_s1 + $0x3c4] ss:$8 sps:$4 sm:$0xff]  }
  0xb9   :  { %2316 = vmatprep.subr.bf16.mxu0 %v3218_v11  ;;  %v3310_v11 = vld [vmem:[%s4408_s1 + $0x7c4] ss:$8 sps:$4 sm:$0xff]  }
  0xbb   :  { %2105 = vmatpush1.bf16.msra.mxu1 %v3211_v12  ;;  %v3305_v12 = vld [vmem:[%s4408_s1 + $0x3c0] ss:$8 sps:$4 sm:$0xff]  }
  0xbc   :  { %2317 = vmatpush1.bf16.msra.mxu0 %v3216_v13  ;;  %2106 = vmatprep.subr.bf16.mxu1 %v3223_v14  ;;  %v3308_v13 = vld [vmem:[%s4408_s1 + $0x7c0] ss:$8 sps:$4 sm:$0xff]   ;;  %v3313_v14 = vld [vmem:[%s4408_s1 + $0x3d4] ss:$8 sps:$4 sm:$0xff]  }
  0xbd   :  { %2318 = vmatprep.subr.bf16.mxu0 %v3226_v15  ;;  %v3316_v15 = vld [vmem:[%s4408_s1 + $0x7d4] ss:$8 sps:$4 sm:$0xff]  }
  0xbf   :  { %2107 = vmatpush1.bf16.msra.mxu1 %v3221_v16  ;;  %v3311_v16 = vld [vmem:[%s4408_s1 + $0x3d0] ss:$8 sps:$4 sm:$0xff]  }
  0xc0   :  { %2319 = vmatpush1.bf16.msra.mxu0 %v3224_v17  ;;  %2129 = vmatprep.subr.bf16.mxu1 %v3232_v18  ;;  %v3314_v17 = vld [vmem:[%s4408_s1 + $0x7d0] ss:$8 sps:$4 sm:$0xff]   ;;  %v3324_v18 = vld [vmem:[%s4408_s1 + $0x3e4] ss:$8 sps:$4 sm:$0xff]  }
  0xc1   :  { %2341 = vmatprep.subr.bf16.mxu0 %v3238_v19  ;;  %v3328_v19 = vld [vmem:[%s4408_s1 + $0x7e4] ss:$8 sps:$4 sm:$0xff]  }
  0xc2   :  { %2109 = vmatmul.mubr.bf16.vlgmr.msra.gmra.mrb[0].mxu1 %v3227_v20  ;;  %v3322_v20 = vld [vmem:[%s4408_s1 + $0x3e0] ss:$8 sps:$4 sm:$0xff]  }
  0xc3   :  { %2321 = vmatmul.mubr.bf16.vlgmr.msra.gmra.mrb[0].mxu0 %v3233_v22  ;;  %2130 = vmatpush1.bf16.msra.mxu1 %v3230_v21  ;;  %v3326_v21 = vld [vmem:[%s4408_s1 + $0x7e0] ss:$8 sps:$4 sm:$0xff]   ;;  %v3331_v22 = vld [vmem:[%s4408_s1 + $0x3f4] ss:$8 sps:$4 sm:$0xff]  }
  0xc4   :  { %2342 = vmatpush1.bf16.msra.mxu0 %v3236_v23  ;;  %2131 = vmatprep.subr.bf16.mxu1 %v3241_v24  ;;  %v3334_v23 = vld [vmem:[%s4408_s1 + $0x7f4] ss:$8 sps:$4 sm:$0xff]   ;;  %v3329_v24 = vld [vmem:[%s4408_s1 + $0x3f0] ss:$8 sps:$4 sm:$0xff]  }
  0xc5   :  { %2343 = vmatprep.subr.bf16.mxu0 %v3244_v25  ;;  %2118 = vmatprep.mubr.bf16.mxu1 %v3317_v26  ;;  %v3332_v25 = vld [vmem:[%s4408_s1 + $0x7f0] ss:$8 sps:$4 sm:$0xff]   ;;  %v3343_v26 = vld [vmem:[%s4408_s1 + $0x804] ss:$8 sps:$4 sm:$0xff]  }
  0xc6   :  { %2330 = vmatprep.mubr.bf16.mxu0 %v3319_v27  ;;  %v3335_v27 = vld [vmem:[%s4409_s0 + $0x18] ss:$72 sps:$4 sm:$0xff]  }
  0xc7   :  { %2132 = vmatpush1.bf16.msra.mxu1 %v3239_v28  ;;  %v3338_v28 = vld [vmem:[%s4409_s0 + $0x38] ss:$72 sps:$4 sm:$0xff]  }
  0xc8   :  { %2344 = vmatpush1.bf16.msra.mxu0 %v3242_v29  ;;  %2133 = vmatprep.subr.bf16.mxu1 %v3247_v30  ;;  %v3341_v29 = vld [vmem:[%s4408_s1 + $0x800] ss:$8 sps:$4 sm:$0xff]   ;;  %v3346_v30 = vld [vmem:[%s4408_s1 + $0x814] ss:$8 sps:$4 sm:$0xff]  }
  0xc9   :  { %2345 = vmatprep.subr.bf16.mxu0 %v3250_v31  ;;  %v3347_v31 = vld [vmem:[%s4409_s0 + $0xac] ss:$72 sps:$4 sm:$0xff]  }
  0xca   :  { %2119 = vmatmul.mubr.bf16.gmra.mrb[4].mxu1 %v3321_v34  ;;  %v3355_v34 = vld [vmem:[%s4408_s1 + $0x824] ss:$8 sps:$4 sm:$0xff]  }
  0xcb   :  { %2331 = vmatmul.mubr.bf16.gmra.mrb[4].mxu0 %v3325_v35  ;;  %2134 = vmatpush1.bf16.msra.mxu1 %v3245_v32  ;;  %v3349_v32 = vld [vmem:[%s4409_s0 + $0xcc] ss:$72 sps:$4 sm:$0xff]   ;;  %v3351_v35 = vld [vmem:[%s4409_s0 + $0xa8] ss:$72 sps:$4 sm:$0xff]  }
  0xcc   :  { %2346 = vmatpush1.bf16.msra.mxu0 %v3248_v33  ;;  %2135 = vmatprep.subr.bf16.mxu1 %v3253_v36  ;;  %v3344_v33 = vld [vmem:[%s4408_s1 + $0x810] ss:$8 sps:$4 sm:$0xff]  }
  0xcd   :  { %2347 = vmatprep.subr.bf16.mxu0 %v3256_v37  ;;  %2161 = vmatprep.mubr.bf16.mxu1 %v3337_v38  ;;  %v3352_v36 = vld [vmem:[%s4409_s0 + $0xc8] ss:$72 sps:$4 sm:$0xff]   ;;  %v3358_v38 = vld [vmem:[%s4408_s1 + $0x834] ss:$8 sps:$4 sm:$0xff]  }
  0xce   :  { %2373 = vmatprep.mubr.bf16.mxu0 %v3340_v39  ;;  %v3353_v37 = vld [vmem:[%s4408_s1 + $0x820] ss:$8 sps:$4 sm:$0xff]   ;;  %v3397_v39 = vld [vmem:[%s4409_s0 + $0x44] ss:$72 sps:$4 sm:$0xff]  }
  0xcf   :  { %2136 = vmatpush1.bf16.msra.mxu1 %v3251_v40  ;;  %v3400_v40 = vld [vmem:[%s4409_s0 + $0xd4] ss:$72 sps:$4 sm:$0xff]  }
  0xd0   :  { %2348 = vmatpush1.bf16.msra.mxu0 %v3254_v41  ;;  %2137 = vmatprep.subr.bf16.mxu1 %v3259_v42  ;;  %v3356_v41 = vld [vmem:[%s4408_s1 + $0x830] ss:$8 sps:$4 sm:$0xff]   ;;  %v3361_v42 = vld [vmem:[%s4408_s1 + $0x844] ss:$8 sps:$4 sm:$0xff]  }
  0xd1   :  { %2349 = vmatprep.subr.bf16.mxu0 %v3262_v43  ;;  %v3359_v43 = vld [vmem:[%s4408_s1 + $0x840] ss:$8 sps:$4 sm:$0xff]  }
  0xd3   :  { %2138 = vmatpush1.bf16.msra.mxu1 %v3257_v44  ;;  %v3364_v44 = vld [vmem:[%s4408_s1 + $0x854] ss:$8 sps:$4 sm:$0xff]  }
  0xd4   :  { %2350 = vmatpush1.bf16.msra.mxu0 %v3260_v45  ;;  %2139 = vmatprep.subr.bf16.mxu1 %v3265_v46  ;;  %v3362_v45 = vld [vmem:[%s4408_s1 + $0x850] ss:$8 sps:$4 sm:$0xff]   ;;  %v3367_v46 = vld [vmem:[%s4408_s1 + $0x864] ss:$8 sps:$4 sm:$0xff]  }
  0xd5   :  { %2351 = vmatprep.subr.bf16.mxu0 %v3268_v47  ;;  %v3365_v47 = vld [vmem:[%s4408_s1 + $0x860] ss:$8 sps:$4 sm:$0xff]  }
  0xd7   :  { %2140 = vmatpush1.bf16.msra.mxu1 %v3263_v48  ;;  %v3370_v48 = vld [vmem:[%s4408_s1 + $0x874] ss:$8 sps:$4 sm:$0xff]  }
  0xd8   :  { %2352 = vmatpush1.bf16.msra.mxu0 %v3266_v49  ;;  %2141 = vmatprep.subr.bf16.mxu1 %v3271_v50  ;;  %v3368_v49 = vld [vmem:[%s4408_s1 + $0x870] ss:$8 sps:$4 sm:$0xff]   ;;  %v3373_v50 = vld [vmem:[%s4408_s1 + $0x884] ss:$8 sps:$4 sm:$0xff]  }
  0xd9   :  { %2353 = vmatprep.subr.bf16.mxu0 %v3274_v51  ;;  %v3371_v51 = vld [vmem:[%s4408_s1 + $0x880] ss:$8 sps:$4 sm:$0xff]  }
  0xdb   :  { %2142 = vmatpush1.bf16.msra.mxu1 %v3269_v52  ;;  %v3376_v52 = vld [vmem:[%s4408_s1 + $0x894] ss:$8 sps:$4 sm:$0xff]  }
  0xdc   :  { %2354 = vmatpush1.bf16.msra.mxu0 %v3272_v53  ;;  %2143 = vmatprep.subr.bf16.mxu1 %v3277_v54  ;;  %v3374_v53 = vld [vmem:[%s4408_s1 + $0x890] ss:$8 sps:$4 sm:$0xff]   ;;  %v3379_v54 = vld [vmem:[%s4408_s1 + $0x8a4] ss:$8 sps:$4 sm:$0xff]  }
  0xdd   :  { %2355 = vmatprep.subr.bf16.mxu0 %v3280_v55  ;;  %v3377_v55 = vld [vmem:[%s4408_s1 + $0x8a0] ss:$8 sps:$4 sm:$0xff]  }
  0xdf   :  { %2144 = vmatpush1.bf16.msra.mxu1 %v3275_v56  ;;  %v3382_v56 = vld [vmem:[%s4408_s1 + $0x8b4] ss:$8 sps:$4 sm:$0xff]  }
  0xe0   :  { %2356 = vmatpush1.bf16.msra.mxu0 %v3278_v57  ;;  %2145 = vmatprep.subr.bf16.mxu1 %v3283_v58  ;;  %v3380_v57 = vld [vmem:[%s4408_s1 + $0x8b0] ss:$8 sps:$4 sm:$0xff]   ;;  %v3385_v58 = vld [vmem:[%s4408_s1 + $0x8c4] ss:$8 sps:$4 sm:$0xff]  }
  0xe1   :  { %2357 = vmatprep.subr.bf16.mxu0 %v3286_v59  ;;  %v3383_v59 = vld [vmem:[%s4408_s1 + $0x8c0] ss:$8 sps:$4 sm:$0xff]  }
  0xe3   :  { %2146 = vmatpush1.bf16.msra.mxu1 %v3281_v60  ;;  %v3388_v60 = vld [vmem:[%s4408_s1 + $0x8d4] ss:$8 sps:$4 sm:$0xff]  }
  0xe4   :  { %2358 = vmatpush1.bf16.msra.mxu0 %v3284_v61  ;;  %2147 = vmatprep.subr.bf16.mxu1 %v3289_v62  ;;  %v3386_v61 = vld [vmem:[%s4408_s1 + $0x8d0] ss:$8 sps:$4 sm:$0xff]   ;;  %v3391_v62 = vld [vmem:[%s4408_s1 + $0x8e4] ss:$8 sps:$4 sm:$0xff]  }
  0xe5   :  { %2359 = vmatprep.subr.bf16.mxu0 %v3292_v63  ;;  %v3389_v63 = vld [vmem:[%s4408_s1 + $0x8e0] ss:$8 sps:$4 sm:$0xff]  }
  0xe7   :  { %2148 = vmatpush1.bf16.msra.mxu1 %v3287_v0  ;;  %v3394_v0 = vld [vmem:[%s4408_s1 + $0x8f4] ss:$8 sps:$4 sm:$0xff]  }
  0xe8   :  { %2360 = vmatpush1.bf16.msra.mxu0 %v3290_v1  ;;  %2149 = vmatprep.subr.bf16.mxu1 %v3295_v2  ;;  %v3392_v1 = vld [vmem:[%s4408_s1 + $0x8f0] ss:$8 sps:$4 sm:$0xff]   ;;  %v3395_v2 = vld [vmem:[%s4409_s0 + $0x40] ss:$72 sps:$4 sm:$0xff]  }
  0xe9   :  { %2361 = vmatprep.subr.bf16.mxu0 %v3298_v3  ;;  %v3398_v3 = vld [vmem:[%s4409_s0 + $0xd0] ss:$72 sps:$4 sm:$0xff]  }
  0xeb   :  { %2150 = vmatpush1.bf16.msra.mxu1 %v3293_v4  ;;  %v340_v4 = vlaneseq }
  0xec   :  { %2362 = vmatpush1.bf16.msra.mxu0 %v3296_v5  ;;  %2151 = vmatprep.subr.bf16.mxu1 %v3301_v6 }
  0xed   :  { %2363 = vmatprep.subr.bf16.mxu0 %v3304_v7  ;;  %v341_v5 = vshrl.u32 %v340_v4, 7 }
  0xef   :  { %2152 = vmatpush1.bf16.msra.mxu1 %v3299_v8 }
  0xf0   :  { %2364 = vmatpush1.bf16.msra.mxu0 %v3302_v9  ;;  %2153 = vmatprep.subr.bf16.mxu1 %v3307_v10  ;;  %v342_v9 = vsub.s32 0, %v341_v5 }
  0xf1   :  { %2365 = vmatprep.subr.bf16.mxu0 %v3310_v11  ;;  %v338_v11 = vld [vmem:[%s4410_s2] sm:$0x3] }
  0xf3   :  { %2154 = vmatpush1.bf16.msra.mxu1 %v3305_v12  ;;  %v346_v12 = vsub.s32 1, %v341_v5 }
  0xf4   :  { %2366 = vmatpush1.bf16.msra.mxu0 %v3308_v13  ;;  %2155 = vmatprep.subr.bf16.mxu1 %v3313_v14  ;;  %v343_v13 = vrot.slane %v338_v11, %v342_v9 }
  0xf5   :  { %2367 = vmatprep.subr.bf16.mxu0 %v3316_v15  ;;  %v347_v14 = vrot.slane %v338_v11, %v346_v12 }
  0xf7   :  { %2156 = vmatpush1.bf16.msra.mxu1 %v3311_v16 }
  0xf8   :  { %2368 = vmatpush1.bf16.msra.mxu0 %v3314_v17  ;;  %2157 = vmatprep.subr.bf16.mxu1 %v3324_v18 }
  0xf9   :  { %2369 = vmatprep.subr.bf16.mxu0 %v3328_v19 }
  0xfb   :  { %2158 = vmatpush1.bf16.msra.mxu1 %v3322_v20 }
  0xfc   :  { %2370 = vmatpush1.bf16.msra.mxu0 %v3326_v21  ;;  %2159 = vmatprep.subr.bf16.mxu1 %v3331_v22 }
  0xfd   :  { %2371 = vmatprep.subr.bf16.mxu0 %v3334_v23 }
  0xff   :  { %2160 = vmatpush1.bf16.msra.mxu1 %v3329_v24 }
 0x100   :  { %2372 = vmatpush1.bf16.msra.mxu0 %v3332_v25  ;;  %2811 = vmatprep.subr.bf16.mxu1 %v3343_v26 }
 0x101   :  { %2394 = vmatprep.subr.bf16.mxu0 %v3343_v26 }
 0x102   :  { %2162 = vmatmul.mubr.bf16.vlgmr.msra.gmra.mrb[0].mxu1 %v3335_v27 }
 0x103   :  { %2374 = vmatmul.mubr.bf16.vlgmr.msra.gmra.mrb[0].mxu0 %v3338_v28  ;;  %2827 = vmatpush1.bf16.msra.mxu1 %v3341_v29 }
 0x104   :  { %2395 = vmatpush1.bf16.msra.mxu0 %v3341_v29  ;;  %2812 = vmatprep.subr.bf16.mxu1 %v3346_v30 }
 0x105   :  { %2396 = vmatprep.subr.bf16.mxu0 %v3346_v30  ;;  %2171 = vmatprep.mubr.bf16.mxu1 %v3347_v31 }
 0x106   :  { %2383 = vmatprep.mubr.bf16.mxu0 %v3349_v32 }
 0x107   :  { %2828 = vmatpush1.bf16.msra.mxu1 %v3344_v33 }
 0x108   :  { %2397 = vmatpush1.bf16.msra.mxu0 %v3344_v33  ;;  %2813 = vmatprep.subr.bf16.mxu1 %v3355_v34 }
 0x109   :  { %2398 = vmatprep.subr.bf16.mxu0 %v3355_v34 }
 0x10a   :  { %2172 = vmatmul.mubr.bf16.gmra.mrb[4].mxu1 %v3351_v35 }
 0x10b   :  { %2384 = vmatmul.mubr.bf16.gmra.mrb[4].mxu0 %v3352_v36  ;;  %2829 = vmatpush1.bf16.msra.mxu1 %v3353_v37 }
 0x10c   :  { %2399 = vmatpush1.bf16.msra.mxu0 %v3353_v37  ;;  %2814 = vmatprep.subr.bf16.mxu1 %v3358_v38 }
 0x10d   :  { %2400 = vmatprep.subr.bf16.mxu0 %v3358_v38  ;;  %2426 = vmatprep.mubr.bf16.mxu0 %v3397_v39 }
 0x10e   :  { %2436 = vmatprep.mubr.bf16.mxu1 %v3400_v40 }
 0x10f   :  { %2830 = vmatpush1.bf16.msra.mxu1 %v3356_v41 }
 0x110   :  { %2401 = vmatpush1.bf16.msra.mxu0 %v3356_v41  ;;  %2815 = vmatprep.subr.bf16.mxu1 %v3361_v42 }
 0x111   :  { %2402 = vmatprep.subr.bf16.mxu0 %v3361_v42 }
 0x113   :  { %2831 = vmatpush1.bf16.msra.mxu1 %v3359_v43 }
 0x114   :  { %2403 = vmatpush1.bf16.msra.mxu0 %v3359_v43  ;;  %2816 = vmatprep.subr.bf16.mxu1 %v3364_v44 }
 0x115   :  { %2404 = vmatprep.subr.bf16.mxu0 %v3364_v44 }
 0x117   :  { %2832 = vmatpush1.bf16.msra.mxu1 %v3362_v45 }
 0x118   :  { %2405 = vmatpush1.bf16.msra.mxu0 %v3362_v45  ;;  %2817 = vmatprep.subr.bf16.mxu1 %v3367_v46 }
 0x119   :  { %2406 = vmatprep.subr.bf16.mxu0 %v3367_v46 }
 0x11b   :  { %2833 = vmatpush1.bf16.msra.mxu1 %v3365_v47 }
 0x11c   :  { %2407 = vmatpush1.bf16.msra.mxu0 %v3365_v47  ;;  %2818 = vmatprep.subr.bf16.mxu1 %v3370_v48 }
 0x11d   :  { %2408 = vmatprep.subr.bf16.mxu0 %v3370_v48 }
 0x11f   :  { %2834 = vmatpush1.bf16.msra.mxu1 %v3368_v49 }
 0x120   :  { %2409 = vmatpush1.bf16.msra.mxu0 %v3368_v49  ;;  %2819 = vmatprep.subr.bf16.mxu1 %v3373_v50 }
 0x121   :  { %2410 = vmatprep.subr.bf16.mxu0 %v3373_v50 }
 0x123   :  { %2835 = vmatpush1.bf16.msra.mxu1 %v3371_v51 }
 0x124   :  { %2411 = vmatpush1.bf16.msra.mxu0 %v3371_v51  ;;  %2820 = vmatprep.subr.bf16.mxu1 %v3376_v52 }
 0x125   :  { %2412 = vmatprep.subr.bf16.mxu0 %v3376_v52 }
 0x127   :  { %2836 = vmatpush1.bf16.msra.mxu1 %v3374_v53 }
 0x128   :  { %2413 = vmatpush1.bf16.msra.mxu0 %v3374_v53  ;;  %2821 = vmatprep.subr.bf16.mxu1 %v3379_v54 }
 0x129   :  { %2414 = vmatprep.subr.bf16.mxu0 %v3379_v54 }
 0x12b   :  { %2837 = vmatpush1.bf16.msra.mxu1 %v3377_v55 }
 0x12c   :  { %2415 = vmatpush1.bf16.msra.mxu0 %v3377_v55  ;;  %2822 = vmatprep.subr.bf16.mxu1 %v3382_v56 }
 0x12d   :  { %2416 = vmatprep.subr.bf16.mxu0 %v3382_v56 }
 0x12f   :  { %2838 = vmatpush1.bf16.msra.mxu1 %v3380_v57 }
 0x130   :  { %2417 = vmatpush1.bf16.msra.mxu0 %v3380_v57  ;;  %2823 = vmatprep.subr.bf16.mxu1 %v3385_v58 }
 0x131   :  { %2418 = vmatprep.subr.bf16.mxu0 %v3385_v58 }
 0x133   :  { %2839 = vmatpush1.bf16.msra.mxu1 %v3383_v59 }
 0x134   :  { %2419 = vmatpush1.bf16.msra.mxu0 %v3383_v59  ;;  %2824 = vmatprep.subr.bf16.mxu1 %v3388_v60 }
 0x135   :  { %2420 = vmatprep.subr.bf16.mxu0 %v3388_v60 }
 0x137   :  { %2840 = vmatpush1.bf16.msra.mxu1 %v3386_v61 }
 0x138   :  { %2421 = vmatpush1.bf16.msra.mxu0 %v3386_v61  ;;  %2825 = vmatprep.subr.bf16.mxu1 %v3391_v62 }
 0x139   :  { %2422 = vmatprep.subr.bf16.mxu0 %v3391_v62 }
 0x13b   :  { %2841 = vmatpush1.bf16.msra.mxu1 %v3389_v63 }
 0x13c   :  { %2423 = vmatpush1.bf16.msra.mxu0 %v3389_v63  ;;  %2826 = vmatprep.subr.bf16.mxu1 %v3394_v0 }
 0x13d   :  { %2424 = vmatprep.subr.bf16.mxu0 %v3394_v0 }
 0x13f   :  { %2842 = vmatpush1.bf16.msra.mxu1 %v3392_v1 }
 0x140   :  { %2425 = vmatpush1.bf16.msra.mxu0 %v3392_v1 }
 0x142   :  { %2437 = vmatmul.mubr.bf16.vlgmr.msra.gmra.mrb[8].mxu1 %v3398_v3 }
 0x143   :  { %2427 = vmatmul.mubr.bf16.vlgmr.msra.gmra.mrb[0].mxu0 %v3395_v2 }
 0x1d5   :  { %v2163_v6 = vpop.f32.mrb[0].mxu1 }
 0x1d6   :  { %v2165_v7 = vpop.f32.mrb[1].mxu1  ;;  %v2843_v31 = vadd.f32 %v2163_v6, %v343_v13 }
 0x1d7   :  { %v2167_v8 = vpop.f32.mrb[2].mxu1  ;;  %v2845_v32 = vadd.f32 %v2165_v7, %v347_v14 }
 0x1d8   :  { %v2169_v10 = vpop.f32.mrb[3].mxu1  ;;  %v2847_v35 = vadd.f32 %v2167_v8, %v343_v13 }
 0x1d9   :  { %v2849_v40 = vadd.f32 %v2169_v10, %v347_v14 }
 0x1dd   :  { %v2173_v15 = vpop.f32.mrb[4].mxu1 }
 0x1de   :  { %v2385_v16 = vpop.f32.mrb[4].mxu0  ;;  %v2851_v17 = vadd.f32 %v2173_v15, %v343_v13  ;;  %v2175_v18 = vpop.f32.mrb[5].mxu1 }
 0x1df   :  { %v2387_v19 = vpop.f32.mrb[5].mxu0  ;;  %v2854_v20 = vadd.f32 %v2175_v18, %v347_v14  ;;  %v2177_v21 = vpop.f32.mrb[6].mxu1 }
 0x1e0   :  { %v2389_v22 = vpop.f32.mrb[6].mxu0  ;;  %v2852_v23 = vadd.f32 %v2851_v17, %v2385_v16  ;;  %v2857_v24 = vadd.f32 %v2177_v21, %v343_v13  ;;  %v2179_v25 = vpop.f32.mrb[7].mxu1 }
 0x1e1   :  { %v2391_v26 = vpop.f32.mrb[7].mxu0  ;;  %v2855_v27 = vadd.f32 %v2854_v20, %v2387_v19  ;;  %v2860_v28 = vadd.f32 %v2179_v25, %v347_v14 }
 0x1e2   :  { %v2858_v29 = vadd.f32 %v2857_v24, %v2389_v22 }
 0x1e3   :  { %v2861_v30 = vadd.f32 %v2860_v28, %v2391_v26 }
 0x215   :  { %v2438_v34 = vpop.f32.mrb[8].mxu1 }
 0x216   :  { %v2428_v33 = vpop.f32.mrb[0].mxu0  ;;  %v2853_v37 = vadd.f32 %v2852_v23, %v2438_v34  ;;  %v2440_v39 = vpop.f32.mrb[9].mxu1 }
 0x217   :  { %v2844_v36 = vadd.f32 %v2843_v31, %v2428_v33  ;;  %v2430_v38 = vpop.f32.mrb[1].mxu0  ;;  %v2856_v42 = vadd.f32 %v2855_v27, %v2440_v39  ;;  %v2442_v44 = vpop.f32.mrb[10].mxu1 }
 0x218   :  { %v2846_v41 = vadd.f32 %v2845_v32, %v2430_v38  ;;  %v2432_v43 = vpop.f32.mrb[2].mxu0  ;;  %v2859_v46 = vadd.f32 %v2858_v29, %v2442_v44  ;;  %v2444_v48 = vpop.f32.mrb[11].mxu1 }
 0x219   :  { %v2848_v45 = vadd.f32 %v2847_v35, %v2432_v43  ;;  %v2434_v47 = vpop.f32.mrb[3].mxu0  ;;  %v2809_v50 = vpack.c.bf16 %v2856_v42, %v2853_v37  ;;  %v2862_v52 = vadd.f32 %v2861_v30, %v2444_v48 }
 0x21a   :  { %v2807_v49 = vpack.c.bf16 %v2846_v41, %v2844_v36  ;;  %v2850_v51 = vadd.f32 %v2849_v40, %v2434_v47 }
 0x21b   :  { %2473 = vst [vmem:[%s4411_s3 + $0x10] sm:$0xff] %v2809_v50  ;;  %v2810_v54 = vpack.c.bf16 %v2862_v52, %v2859_v46 }
 0x21c   :  { %2471 = vst [vmem:[%s4411_s3] sm:$0xff] %v2807_v49  ;;  %v2808_v53 = vpack.c.bf16 %v2850_v51, %v2848_v45 }
 0x21d   :  { %2474 = vst [vmem:[%s4411_s3 + $0x18] sm:$0xff] %v2810_v54 }
 0x21e   :  { %2472 = vst [vmem:[%s4411_s3 + $0x8] sm:$0xff] %v2808_v53 }

// kernel: generator_nchw.102
= control target key start
LH: loop header
LB: loop body
LE: loop exit
PB: predicated region body
PF: predicated region fallthrough
CT: control target
= control target key end

     0   :  { %s1357_s1 = inlined_call_operand.vmem [shape: bf16[512,128], index: 1, kind: input, shape index: {}]   ;;  %s1358_s0 = inlined_call_operand.vmem [shape: bf16[128,512], index: 0, kind: input, shape index: {}]   ;;  %s1359_s2 = inlined_call_operand.vmem [shape: f32[1,128], index: 2, kind: input, shape index: {}]   ;;  %s1360_s3 = inlined_call_operand.vmem [shape: bf16[128,128], index: 3, kind: output, shape index: {}]  }
   0x1   :  { %v1020_v0 = vld [vmem:[%s1357_s1 + $0x40] sm:$0xff]   ;;  %v1024_v4 = vld [vmem:[%s1357_s1 + $0x48] sm:$0xff]   ;;  %v1028_v8 = vld [vmem:[%s1357_s1 + $0x50] sm:$0xff]  }
   0x2   :  { %v1021_v1 = vld [vmem:[%s1357_s1 + $0xc0] sm:$0xff]   ;;  %892 = vmatprep.subr.bf16.mxu0 %v1020_v0  ;;  %v1025_v5 = vld [vmem:[%s1357_s1 + $0xc8] sm:$0xff]   ;;  %v1029_v9 = vld [vmem:[%s1357_s1 + $0xd0] sm:$0xff]  }
   0x3   :  { %v1022_v2 = vld [vmem:[%s1357_s1] sm:$0xff]   ;;  %956 = vmatprep.subr.bf16.mxu1 %v1021_v1  ;;  %v1026_v6 = vld [vmem:[%s1357_s1 + $0x8] sm:$0xff]   ;;  %v1030_v10 = vld [vmem:[%s1357_s1 + $0x10] sm:$0xff]  }
   0x4   :  { %v1023_v3 = vld [vmem:[%s1357_s1 + $0x80] sm:$0xff]   ;;  %893 = vmatpush3.bf16.msra.mxu0 %v1022_v2  ;;  %v1027_v7 = vld [vmem:[%s1357_s1 + $0x88] sm:$0xff]   ;;  %v1031_v11 = vld [vmem:[%s1357_s1 + $0x90] sm:$0xff]  }
   0x5   :  { %957 = vmatpush3.bf16.msra.mxu1 %v1023_v3  ;;  %894 = vmatprep.subr.bf16.mxu0 %v1024_v4  ;;  %v1032_v12 = vld [vmem:[%s1357_s1 + $0x58] sm:$0xff]   ;;  %v1036_v16 = vld [vmem:[%s1357_s1 + $0x60] sm:$0xff]   ;;  %v1040_v20 = vld [vmem:[%s1357_s1 + $0x68] sm:$0xff]  }
   0x6   :  { %958 = vmatprep.subr.bf16.mxu1 %v1025_v5  ;;  %v1033_v13 = vld [vmem:[%s1357_s1 + $0xd8] sm:$0xff]   ;;  %v1037_v17 = vld [vmem:[%s1357_s1 + $0xe0] sm:$0xff]   ;;  %v1041_v21 = vld [vmem:[%s1357_s1 + $0xe8] sm:$0xff]  }
   0x7   :  { %v1034_v14 = vld [vmem:[%s1357_s1 + $0x18] sm:$0xff]   ;;  %v1038_v18 = vld [vmem:[%s1357_s1 + $0x20] sm:$0xff]   ;;  %v1042_v22 = vld [vmem:[%s1357_s1 + $0x28] sm:$0xff]  }
   0x8   :  { %895 = vmatpush3.bf16.msra.mxu0 %v1026_v6  ;;  %v1035_v15 = vld [vmem:[%s1357_s1 + $0x98] sm:$0xff]   ;;  %v1039_v19 = vld [vmem:[%s1357_s1 + $0xa0] sm:$0xff]   ;;  %v1043_v23 = vld [vmem:[%s1357_s1 + $0xa8] sm:$0xff]  }
   0x9   :  { %959 = vmatpush3.bf16.msra.mxu1 %v1027_v7  ;;  %896 = vmatprep.subr.bf16.mxu0 %v1028_v8  ;;  %v1044_v24 = vld [vmem:[%s1357_s1 + $0x70] sm:$0xff]   ;;  %v1048_v28 = vld [vmem:[%s1357_s1 + $0x78] sm:$0xff]   ;;  %v1315_v2 = vld [vmem:[%s1359_s2] ss:$0 sm:$0xff] }
   0xa   :  { %960 = vmatprep.subr.bf16.mxu1 %v1029_v9  ;;  %v1045_v25 = vld [vmem:[%s1357_s1 + $0xf0] sm:$0xff]   ;;  %v1049_v29 = vld [vmem:[%s1357_s1 + $0xf8] sm:$0xff]  }
   0xb   :  { %v1046_v26 = vld [vmem:[%s1357_s1 + $0x30] sm:$0xff]   ;;  %v1050_v30 = vld [vmem:[%s1357_s1 + $0x38] sm:$0xff]  }
   0xc   :  { %897 = vmatpush3.bf16.msra.mxu0 %v1030_v10  ;;  %v1047_v27 = vld [vmem:[%s1357_s1 + $0xb0] sm:$0xff]   ;;  %v1051_v31 = vld [vmem:[%s1357_s1 + $0xb8] sm:$0xff]  }
   0xd   :  { %961 = vmatpush3.bf16.msra.mxu1 %v1031_v11  ;;  %898 = vmatprep.subr.bf16.mxu0 %v1032_v12  ;;  %v1052_v32 = vld [vmem:[%s1358_s0] ss:$16 sps:$4 sm:$0xff]   ;;  %v1054_v33 = vld [vmem:[%s1358_s0 + $0x4] ss:$16 sps:$4 sm:$0xff]   ;;  %v1055_v34 = vld [vmem:[%s1358_s0 + $0x8] ss:$16 sps:$4 sm:$0xff]  }
   0xe   :  { %962 = vmatprep.subr.bf16.mxu1 %v1033_v13  ;;  %v1057_v35 = vld [vmem:[%s1358_s0 + $0xc] ss:$16 sps:$4 sm:$0xff]   ;;  %502 = vmatprep.mubr.bf16.mxu0 %v1054_v33  ;;  %v1058_v36 = vld [vmem:[%s1358_s0 + $0x24] ss:$16 sps:$4 sm:$0xff]   ;;  %v1062_v38 = vld [vmem:[%s1358_s0 + $0x20] ss:$16 sps:$4 sm:$0xff]  }
   0xf   :  { %599 = vmatprep.mubr.bf16.mxu1 %v1057_v35  ;;  %v1060_v37 = vld [vmem:[%s1358_s0 + $0x2c] ss:$16 sps:$4 sm:$0xff]   ;;  %v1063_v39 = vld [vmem:[%s1358_s0 + $0x28] ss:$16 sps:$4 sm:$0xff]   ;;  %v1064_v40 = vld [vmem:[%s1358_s0 + $0x44] ss:$16 sps:$4 sm:$0xff]  }
  0x10   :  { %899 = vmatpush3.bf16.msra.mxu0 %v1034_v14  ;;  %v1066_v41 = vld [vmem:[%s1358_s0 + $0x4c] ss:$16 sps:$4 sm:$0xff]   ;;  %v1068_v42 = vld [vmem:[%s1358_s0 + $0x40] ss:$16 sps:$4 sm:$0xff]   ;;  %v1069_v43 = vld [vmem:[%s1358_s0 + $0x48] ss:$16 sps:$4 sm:$0xff]  }
  0x11   :  { %963 = vmatpush3.bf16.msra.mxu1 %v1035_v15  ;;  %900 = vmatprep.subr.bf16.mxu0 %v1036_v16  ;;  %v1070_v44 = vld [vmem:[%s1358_s0 + $0x64] ss:$16 sps:$4 sm:$0xff]   ;;  %v1072_v45 = vld [vmem:[%s1358_s0 + $0x6c] ss:$16 sps:$4 sm:$0xff]   ;;  %v1074_v46 = vld [vmem:[%s1358_s0 + $0x60] ss:$16 sps:$4 sm:$0xff]  }
  0x12   :  { %964 = vmatprep.subr.bf16.mxu1 %v1037_v17  ;;  %v1075_v47 = vld [vmem:[%s1358_s0 + $0x68] ss:$16 sps:$4 sm:$0xff]   ;;  %v1076_v48 = vld [vmem:[%s1358_s0 + $0x84] ss:$16 sps:$4 sm:$0xff]   ;;  %v1078_v49 = vld [vmem:[%s1358_s0 + $0x8c] ss:$16 sps:$4 sm:$0xff]  }
  0x13   :  { %v1080_v50 = vld [vmem:[%s1358_s0 + $0x80] ss:$16 sps:$4 sm:$0xff]   ;;  %v1081_v51 = vld [vmem:[%s1358_s0 + $0x88] ss:$16 sps:$4 sm:$0xff]   ;;  %v1082_v52 = vld [vmem:[%s1358_s0 + $0xa4] ss:$16 sps:$4 sm:$0xff]  }
  0x14   :  { %901 = vmatpush3.bf16.msra.mxu0 %v1038_v18  ;;  %v1084_v53 = vld [vmem:[%s1358_s0 + $0xac] ss:$16 sps:$4 sm:$0xff]   ;;  %v1086_v54 = vld [vmem:[%s1358_s0 + $0xa0] ss:$16 sps:$4 sm:$0xff]   ;;  %v1087_v55 = vld [vmem:[%s1358_s0 + $0xa8] ss:$16 sps:$4 sm:$0xff]  }
  0x15   :  { %965 = vmatpush3.bf16.msra.mxu1 %v1039_v19  ;;  %902 = vmatprep.subr.bf16.mxu0 %v1040_v20  ;;  %v1088_v56 = vld [vmem:[%s1358_s0 + $0xc4] ss:$16 sps:$4 sm:$0xff]   ;;  %v1090_v57 = vld [vmem:[%s1358_s0 + $0xcc] ss:$16 sps:$4 sm:$0xff]   ;;  %v1092_v58 = vld [vmem:[%s1358_s0 + $0xc0] ss:$16 sps:$4 sm:$0xff]  }
  0x16   :  { %966 = vmatprep.subr.bf16.mxu1 %v1041_v21  ;;  %v1093_v59 = vld [vmem:[%s1358_s0 + $0xc8] ss:$16 sps:$4 sm:$0xff]   ;;  %v1094_v60 = vld [vmem:[%s1358_s0 + $0xe4] ss:$16 sps:$4 sm:$0xff]   ;;  %v1096_v61 = vld [vmem:[%s1358_s0 + $0xec] ss:$16 sps:$4 sm:$0xff]  }
  0x17   :  { %v1098_v62 = vld [vmem:[%s1358_s0 + $0xe0] ss:$16 sps:$4 sm:$0xff]   ;;  %v1099_v63 = vld [vmem:[%s1358_s0 + $0xe8] ss:$16 sps:$4 sm:$0xff]  }
  0x18   :  { %903 = vmatpush3.bf16.msra.mxu0 %v1042_v22 }
  0x19   :  { %967 = vmatpush3.bf16.msra.mxu1 %v1043_v23  ;;  %904 = vmatprep.subr.bf16.mxu0 %v1044_v24 }
  0x1a   :  { %968 = vmatprep.subr.bf16.mxu1 %v1045_v25 }
  0x1c   :  { %905 = vmatpush3.bf16.msra.mxu0 %v1046_v26 }
  0x1d   :  { %969 = vmatpush3.bf16.msra.mxu1 %v1047_v27  ;;  %906 = vmatprep.subr.bf16.mxu0 %v1048_v28 }
  0x1e   :  { %970 = vmatprep.subr.bf16.mxu1 %v1049_v29 }
  0x20   :  { %907 = vmatpush3.bf16.msra.mxu0 %v1050_v30 }
  0x21   :  { %971 = vmatpush3.bf16.msra.mxu1 %v1051_v31 }
  0x23   :  { %503 = vmatmul.mubr.bf16.vlgmr.msra.gmra.mrb[0].mxu0 %v1052_v32 }
  0x24   :  { %600 = vmatmul.mubr.bf16.vlgmr.msra.gmra.mrb[0].mxu1 %v1055_v34  ;;  %510 = vmatprep.mubr.bf16.mxu0 %v1058_v36 }
  0x25   :  { %607 = vmatprep.mubr.bf16.mxu1 %v1060_v37 }
  0x2b   :  { %511 = vmatmul.mubr.bf16.gmra.mrb[4].mxu0 %v1062_v38 }
  0x2c   :  { %608 = vmatmul.mubr.bf16.gmra.mrb[4].mxu1 %v1063_v39  ;;  %518 = vmatprep.mubr.bf16.mxu0 %v1064_v40 }
  0x2d   :  { %615 = vmatprep.mubr.bf16.mxu1 %v1066_v41 }
  0x33   :  { %519 = vmatmul.mubr.bf16.gmra.mrb[8].mxu0 %v1068_v42 }
  0x34   :  { %616 = vmatmul.mubr.bf16.gmra.mrb[8].mxu1 %v1069_v43  ;;  %526 = vmatprep.mubr.bf16.mxu0 %v1070_v44 }
  0x35   :  { %623 = vmatprep.mubr.bf16.mxu1 %v1072_v45 }
  0x3b   :  { %527 = vmatmul.mubr.bf16.gmra.mrb[12].mxu0 %v1074_v46 }
  0x3c   :  { %624 = vmatmul.mubr.bf16.gmra.mrb[12].mxu1 %v1075_v47  ;;  %534 = vmatprep.mubr.bf16.mxu0 %v1076_v48 }
  0x3d   :  { %631 = vmatprep.mubr.bf16.mxu1 %v1078_v49 }
  0x43   :  { %535 = vmatmul.mubr.bf16.gmra.mrb[16].mxu0 %v1080_v50 }
  0x44   :  { %632 = vmatmul.mubr.bf16.gmra.mrb[16].mxu1 %v1081_v51  ;;  %542 = vmatprep.mubr.bf16.mxu0 %v1082_v52 }
  0x45   :  { %639 = vmatprep.mubr.bf16.mxu1 %v1084_v53 }
  0x4b   :  { %543 = vmatmul.mubr.bf16.gmra.mrb[20].mxu0 %v1086_v54 }
  0x4c   :  { %640 = vmatmul.mubr.bf16.gmra.mrb[20].mxu1 %v1087_v55  ;;  %550 = vmatprep.mubr.bf16.mxu0 %v1088_v56 }
  0x4d   :  { %647 = vmatprep.mubr.bf16.mxu1 %v1090_v57 }
  0x53   :  { %551 = vmatmul.mubr.bf16.gmra.mrb[24].mxu0 %v1092_v58 }
  0x54   :  { %648 = vmatmul.mubr.bf16.gmra.mrb[24].mxu1 %v1093_v59  ;;  %558 = vmatprep.mubr.bf16.mxu0 %v1094_v60 }
  0x55   :  { %655 = vmatprep.mubr.bf16.mxu1 %v1096_v61 }
  0x5b   :  { %559 = vmatmul.mubr.bf16.gmra.mrb[28].mxu0 %v1098_v62 }
  0x5c   :  { %656 = vmatmul.mubr.bf16.gmra.mrb[28].mxu1 %v1099_v63 }
  0xf6   :  { %v908_v0 = vpop.f32.mrb[0].mxu0 }
  0xf7   :  { %v972_v1 = vpop.f32.mrb[0].mxu1  ;;  %v909_v3 = vpop.f32.mrb[1].mxu0 }
  0xf8   :  { %v910_v4 = vadd.f32 %v909_v3, %v908_v0  ;;  %v973_v5 = vpop.f32.mrb[1].mxu1  ;;  %v911_v6 = vpop.f32.mrb[2].mxu0 }
  0xf9   :  { %v974_v7 = vadd.f32 %v973_v5, %v972_v1  ;;  %v975_v8 = vpop.f32.mrb[2].mxu1  ;;  %v912_v9 = vpop.f32.mrb[3].mxu0 }
  0xfa   :  { %v505_v10 = vadd.f32 %v910_v4, %v1315_v2  ;;  %v913_v11 = vadd.f32 %v912_v9, %v911_v6  ;;  %v976_v12 = vpop.f32.mrb[3].mxu1 }
  0xfb   :  { %v977_v13 = vadd.f32 %v976_v12, %v975_v8 }
  0xfc   :  { %v602_v14 = vadd.f32 %v974_v7, %v505_v10  ;;  %v508_v15 = vadd.f32 %v913_v11, %v1315_v2 }
  0xfe   :  { %v605_v16 = vadd.f32 %v977_v13, %v508_v15  ;;  %v914_v17 = vpop.f32.mrb[4].mxu0 }
  0xff   :  { %v978_v18 = vpop.f32.mrb[4].mxu1  ;;  %v915_v19 = vpop.f32.mrb[5].mxu0 }
 0x100   :  { %v848_v20 = vpack.c.bf16 %v605_v16, %v602_v14  ;;  %v916_v21 = vadd.f32 %v915_v19, %v914_v17  ;;  %v979_v22 = vpop.f32.mrb[5].mxu1  ;;  %v917_v23 = vpop.f32.mrb[6].mxu0 }
 0x101   :  { %v980_v24 = vadd.f32 %v979_v22, %v978_v18  ;;  %v981_v25 = vpop.f32.mrb[6].mxu1  ;;  %v918_v26 = vpop.f32.mrb[7].mxu0 }
 0x102   :  { %849 = vst [vmem:[%s1360_s3] sm:$0xff] %v848_v20   ;;  %v513_v27 = vadd.f32 %v916_v21, %v1315_v2  ;;  %v919_v28 = vadd.f32 %v918_v26, %v917_v23  ;;  %v982_v29 = vpop.f32.mrb[7].mxu1 }
 0x103   :  { %v983_v30 = vadd.f32 %v982_v29, %v981_v25 }
 0x104   :  { %v610_v31 = vadd.f32 %v980_v24, %v513_v27  ;;  %v516_v32 = vadd.f32 %v919_v28, %v1315_v2 }
 0x106   :  { %v613_v33 = vadd.f32 %v983_v30, %v516_v32  ;;  %v920_v34 = vpop.f32.mrb[8].mxu0 }
 0x107   :  { %v984_v35 = vpop.f32.mrb[8].mxu1  ;;  %v921_v36 = vpop.f32.mrb[9].mxu0 }
 0x108   :  { %v853_v37 = vpack.c.bf16 %v613_v33, %v610_v31  ;;  %v922_v38 = vadd.f32 %v921_v36, %v920_v34  ;;  %v985_v39 = vpop.f32.mrb[9].mxu1  ;;  %v923_v40 = vpop.f32.mrb[10].mxu0 }
 0x109   :  { %v986_v41 = vadd.f32 %v985_v39, %v984_v35  ;;  %v987_v42 = vpop.f32.mrb[10].mxu1  ;;  %v924_v43 = vpop.f32.mrb[11].mxu0 }
 0x10a   :  { %885 = vst [vmem:[%s1360_s3 + $0x8] sm:$0xff] %v853_v37   ;;  %v521_v44 = vadd.f32 %v922_v38, %v1315_v2  ;;  %v925_v45 = vadd.f32 %v924_v43, %v923_v40  ;;  %v988_v46 = vpop.f32.mrb[11].mxu1 }
 0x10b   :  { %v989_v47 = vadd.f32 %v988_v46, %v987_v42 }
 0x10c   :  { %v618_v48 = vadd.f32 %v986_v41, %v521_v44  ;;  %v524_v49 = vadd.f32 %v925_v45, %v1315_v2 }
 0x10e   :  { %v621_v50 = vadd.f32 %v989_v47, %v524_v49  ;;  %v926_v51 = vpop.f32.mrb[12].mxu0 }
 0x10f   :  { %v990_v52 = vpop.f32.mrb[12].mxu1  ;;  %v927_v53 = vpop.f32.mrb[13].mxu0 }
 0x110   :  { %v858_v54 = vpack.c.bf16 %v621_v50, %v618_v48  ;;  %v928_v55 = vadd.f32 %v927_v53, %v926_v51  ;;  %v991_v56 = vpop.f32.mrb[13].mxu1  ;;  %v929_v57 = vpop.f32.mrb[14].mxu0 }
 0x111   :  { %v992_v58 = vadd.f32 %v991_v56, %v990_v52  ;;  %v993_v59 = vpop.f32.mrb[14].mxu1  ;;  %v930_v60 = vpop.f32.mrb[15].mxu0 }
 0x112   :  { %886 = vst [vmem:[%s1360_s3 + $0x10] sm:$0xff] %v858_v54   ;;  %v529_v61 = vadd.f32 %v928_v55, %v1315_v2  ;;  %v931_v62 = vadd.f32 %v930_v60, %v929_v57  ;;  %v994_v63 = vpop.f32.mrb[15].mxu1 }
 0x113   :  { %v995_v0 = vadd.f32 %v994_v63, %v993_v59 }
 0x114   :  { %v626_v1 = vadd.f32 %v992_v58, %v529_v61  ;;  %v532_v3 = vadd.f32 %v931_v62, %v1315_v2 }
 0x116   :  { %v629_v4 = vadd.f32 %v995_v0, %v532_v3  ;;  %v932_v5 = vpop.f32.mrb[16].mxu0 }
 0x117   :  { %v996_v6 = vpop.f32.mrb[16].mxu1  ;;  %v933_v7 = vpop.f32.mrb[17].mxu0 }
 0x118   :  { %v863_v8 = vpack.c.bf16 %v629_v4, %v626_v1  ;;  %v934_v9 = vadd.f32 %v933_v7, %v932_v5  ;;  %v997_v10 = vpop.f32.mrb[17].mxu1  ;;  %v935_v11 = vpop.f32.mrb[18].mxu0 }
 0x119   :  { %v998_v12 = vadd.f32 %v997_v10, %v996_v6  ;;  %v999_v13 = vpop.f32.mrb[18].mxu1  ;;  %v936_v14 = vpop.f32.mrb[19].mxu0 }
 0x11a   :  { %887 = vst [vmem:[%s1360_s3 + $0x18] sm:$0xff] %v863_v8   ;;  %v537_v15 = vadd.f32 %v934_v9, %v1315_v2  ;;  %v937_v16 = vadd.f32 %v936_v14, %v935_v11  ;;  %v1000_v17 = vpop.f32.mrb[19].mxu1 }
 0x11b   :  { %v1001_v18 = vadd.f32 %v1000_v17, %v999_v13 }
 0x11c   :  { %v634_v19 = vadd.f32 %v998_v12, %v537_v15  ;;  %v540_v20 = vadd.f32 %v937_v16, %v1315_v2 }
 0x11e   :  { %v637_v21 = vadd.f32 %v1001_v18, %v540_v20  ;;  %v938_v22 = vpop.f32.mrb[20].mxu0 }
 0x11f   :  { %v1002_v23 = vpop.f32.mrb[20].mxu1  ;;  %v939_v24 = vpop.f32.mrb[21].mxu0 }
 0x120   :  { %v868_v25 = vpack.c.bf16 %v637_v21, %v634_v19  ;;  %v940_v26 = vadd.f32 %v939_v24, %v938_v22  ;;  %v1003_v27 = vpop.f32.mrb[21].mxu1  ;;  %v941_v28 = vpop.f32.mrb[22].mxu0 }
 0x121   :  { %v1004_v29 = vadd.f32 %v1003_v27, %v1002_v23  ;;  %v1005_v30 = vpop.f32.mrb[22].mxu1  ;;  %v942_v31 = vpop.f32.mrb[23].mxu0 }
 0x122   :  { %888 = vst [vmem:[%s1360_s3 + $0x20] sm:$0xff] %v868_v25   ;;  %v545_v32 = vadd.f32 %v940_v26, %v1315_v2  ;;  %v943_v33 = vadd.f32 %v942_v31, %v941_v28  ;;  %v1006_v34 = vpop.f32.mrb[23].mxu1 }
 0x123   :  { %v1007_v35 = vadd.f32 %v1006_v34, %v1005_v30 }
 0x124   :  { %v642_v36 = vadd.f32 %v1004_v29, %v545_v32  ;;  %v548_v37 = vadd.f32 %v943_v33, %v1315_v2 }
 0x126   :  { %v645_v38 = vadd.f32 %v1007_v35, %v548_v37  ;;  %v944_v39 = vpop.f32.mrb[24].mxu0 }
 0x127   :  { %v1008_v40 = vpop.f32.mrb[24].mxu1  ;;  %v945_v41 = vpop.f32.mrb[25].mxu0 }
 0x128   :  { %v873_v42 = vpack.c.bf16 %v645_v38, %v642_v36  ;;  %v946_v43 = vadd.f32 %v945_v41, %v944_v39  ;;  %v1009_v44 = vpop.f32.mrb[25].mxu1  ;;  %v947_v45 = vpop.f32.mrb[26].mxu0 }
 0x129   :  { %v1010_v46 = vadd.f32 %v1009_v44, %v1008_v40  ;;  %v1011_v47 = vpop.f32.mrb[26].mxu1  ;;  %v948_v48 = vpop.f32.mrb[27].mxu0 }
 0x12a   :  { %889 = vst [vmem:[%s1360_s3 + $0x28] sm:$0xff] %v873_v42   ;;  %v553_v49 = vadd.f32 %v946_v43, %v1315_v2  ;;  %v949_v50 = vadd.f32 %v948_v48, %v947_v45  ;;  %v1012_v51 = vpop.f32.mrb[27].mxu1 }
 0x12b   :  { %v1013_v52 = vadd.f32 %v1012_v51, %v1011_v47 }
 0x12c   :  { %v650_v53 = vadd.f32 %v1010_v46, %v553_v49  ;;  %v556_v54 = vadd.f32 %v949_v50, %v1315_v2 }
 0x12e   :  { %v653_v55 = vadd.f32 %v1013_v52, %v556_v54  ;;  %v950_v56 = vpop.f32.mrb[28].mxu0 }
 0x12f   :  { %v1014_v57 = vpop.f32.mrb[28].mxu1  ;;  %v951_v58 = vpop.f32.mrb[29].mxu0 }
 0x130   :  { %v878_v59 = vpack.c.bf16 %v653_v55, %v650_v53  ;;  %v952_v60 = vadd.f32 %v951_v58, %v950_v56  ;;  %v1015_v61 = vpop.f32.mrb[29].mxu1  ;;  %v953_v62 = vpop.f32.mrb[30].mxu0 }
 0x131   :  { %v1016_v63 = vadd.f32 %v1015_v61, %v1014_v57  ;;  %v1017_v0 = vpop.f32.mrb[30].mxu1  ;;  %v954_v1 = vpop.f32.mrb[31].mxu0 }
 0x132   :  { %890 = vst [vmem:[%s1360_s3 + $0x30] sm:$0xff] %v878_v59   ;;  %v561_v3 = vadd.f32 %v952_v60, %v1315_v2  ;;  %v955_v4 = vadd.f32 %v954_v1, %v953_v62  ;;  %v1018_v5 = vpop.f32.mrb[31].mxu1 }
 0x133   :  { %v1019_v6 = vadd.f32 %v1018_v5, %v1017_v0 }
 0x134   :  { %v658_v7 = vadd.f32 %v1016_v63, %v561_v3  ;;  %v564_v8 = vadd.f32 %v955_v4, %v1315_v2 }
 0x136   :  { %v661_v9 = vadd.f32 %v1019_v6, %v564_v8 }
 0x138   :  { %v883_v10 = vpack.c.bf16 %v661_v9, %v658_v7 }
 0x13a   :  { %891 = vst [vmem:[%s1360_s3 + $0x38] sm:$0xff] %v883_v10  }

// kernel: generator_nchw.114
= control target key start
LH: loop header
LB: loop body
LE: loop exit
PB: predicated region body
PF: predicated region fallthrough
CT: control target
= control target key end

     0   :  { %s1140_s12 = smov 0   ;;  %s1317_s0 = inlined_call_operand.vmem [shape: bf16[512,256], index: 0, kind: input, shape index: {}]   ;;  %s1318_s1 = inlined_call_operand.vmem [shape: bf16[256,128], index: 1, kind: input, shape index: {}]   ;;  %s1319_s2 = inlined_call_operand.vmem [shape: f32[1,128], index: 2, kind: input, shape index: {}]   ;;  %s1320_s3 = inlined_call_operand.vmem [shape: f32[512,128], index: 3, kind: output, shape index: {}]  }
   0x1 LB: > { %s786_s13 = sadd.s32 4294967295, %s1118_s12   ;;  %p790_p0 = scmp.ge.s32.totalorder %s1118_s12, 1  ;;  %s1118_s12 = sphi %s1140_s12, %s13_s12  }
   0x2   : > { %p139_p1 = scmp.lt.s32.totalorder %s1118_s12, 3 }
   0x4   : > { %p140_p2 = pnand %p790_p0, %p139_p1 }
   0x5   : > { %v984_v0 = vld [vmem:[%s1318_s1 + $0x40] sm:$0xff] (!%p140_p2)   ;;  %s791_s16 = sshll.u32 (!%p140_p2), %s786_s13, 5  ;;  %v986_v2 = vld [vmem:[%s1318_s1 + $0x48] sm:$0xff] (!%p140_p2)   ;;  %v988_v4 = vld [vmem:[%s1318_s1 + $0x50] sm:$0xff] (!%p140_p2)  }
   0x6   : > { %143 = sbr.rel (%p140_p2) target bundleno = 328 (0x148), region = 32  ;;  %v985_v1 = vld [vmem:[%s1318_s1] sm:$0xff] (!%p140_p2)   ;;  %848 = vmatprep.subr.bf16.mxu0 (!%p140_p2), %v984_v0  ;;  %960 = vmatprep.subr.bf16.mxu1 (!%p140_p2), %v984_v0  ;;  %v987_v3 = vld [vmem:[%s1318_s1 + $0x8] sm:$0xff] (!%p140_p2)   ;;  %p165_p3 = scmp.lt.s32.totalorder (!%p140_p2), %s791_s16, 63  ;;  %v989_v5 = vld [vmem:[%s1318_s1 + $0x10] sm:$0xff] (!%p140_p2)  }
   0x7   : > { %849 = vmatpush3.bf16.msra.mxu0 (!%p140_p2), %v985_v1  ;;  %968 = vmatpush3.bf16.msra.mxu1 (!%p140_p2), %v985_v1  ;;  %v990_v6 = vld [vmem:[%s1318_s1 + $0x58] sm:$0xff] (!%p140_p2)   ;;  %v992_v8 = vld [vmem:[%s1318_s1 + $0x60] sm:$0xff] (!%p140_p2)   ;;  %v994_v10 = vld [vmem:[%s1318_s1 + $0x68] sm:$0xff] (!%p140_p2)  }
   0x8   : > { %850 = vmatprep.subr.bf16.mxu0 (!%p140_p2), %v986_v2  ;;  %961 = vmatprep.subr.bf16.mxu1 (!%p140_p2), %v986_v2  ;;  %v991_v7 = vld [vmem:[%s1318_s1 + $0x18] sm:$0xff] (!%p140_p2)   ;;  %v993_v9 = vld [vmem:[%s1318_s1 + $0x20] sm:$0xff] (!%p140_p2)   ;;  %v995_v13 = vld [vmem:[%s1318_s1 + $0x28] sm:$0xff] (!%p140_p2)  }
   0x9   : > { %v996_v14 = vld [vmem:[%s1318_s1 + $0x70] sm:$0xff] (!%p140_p2)   ;;  %v998_v16 = vld [vmem:[%s1318_s1 + $0x78] sm:$0xff] (!%p140_p2)   ;;  %v1241_v50 = vld [vmem:[%s1319_s2] ss:$0 sm:$0xff] (!%p140_p2) }
   0xa   : > { %v997_v15 = vld [vmem:[%s1318_s1 + $0x30] sm:$0xff] (!%p140_p2)   ;;  %v999_v17 = vld [vmem:[%s1318_s1 + $0x38] sm:$0xff] (!%p140_p2)  }
   0xb   : > { %851 = vmatpush3.bf16.msra.mxu0 (!%p140_p2), %v987_v3  ;;  %969 = vmatpush3.bf16.msra.mxu1 (!%p140_p2), %v987_v3 }
   0xc   : > { %852 = vmatprep.subr.bf16.mxu0 (!%p140_p2), %v988_v4  ;;  %962 = vmatprep.subr.bf16.mxu1 (!%p140_p2), %v988_v4 }
   0xd   : > { %s1322_s16 = smov (!%p165_p3, %s791_s16), 63 }
   0xe   : > { %s847_s4 = sshll.u32 %s1322_s16, 3 }
   0xf   : > { %853 = vmatpush3.bf16.msra.mxu0 %v989_v5  ;;  %970 = vmatpush3.bf16.msra.mxu1 %v989_v5  ;;  %s1183_s9 = scalar_lea.vmem %s1317_s0, %s847_s4  ;;  %s1254_s30 = scalar_lea.vmem %s1320_s3, %s847_s4 }
  0x10   : > { %854 = vmatprep.subr.bf16.mxu0 %v990_v6  ;;  %963 = vmatprep.subr.bf16.mxu1 %v990_v6  ;;  %v1002_v11 = vld [vmem:[%s1183_s9 + $0x4] ss:$8 sps:$4 sm:$0xff]   ;;  %v1000_v18 = vld [vmem:[%s1183_s9] ss:$8 sps:$4 sm:$0xff]   ;;  %v1006_v20 = vld [vmem:[%s1183_s9 + $0x14] ss:$8 sps:$4 sm:$0xff]  }
  0x11   : > { %v1005_v12 = vld [vmem:[%s1183_s9 + $0x84] ss:$8 sps:$4 sm:$0xff]   ;;  %537 = vmatprep.mubr.bf16.mxu0 %v1002_v11  ;;  %v1003_v19 = vld [vmem:[%s1183_s9 + $0x80] ss:$8 sps:$4 sm:$0xff]   ;;  %v1008_v21 = vld [vmem:[%s1183_s9 + $0x94] ss:$8 sps:$4 sm:$0xff]  }
  0x12   : > { %601 = vmatprep.mubr.bf16.mxu1 %v1005_v12  ;;  %v1010_v22 = vld [vmem:[%s1183_s9 + $0x10] ss:$8 sps:$4 sm:$0xff]   ;;  %v1012_v24 = vld [vmem:[%s1183_s9 + $0x24] ss:$8 sps:$4 sm:$0xff]   ;;  %v1016_v26 = vld [vmem:[%s1183_s9 + $0x20] ss:$8 sps:$4 sm:$0xff]  }
  0x13   : > { %855 = vmatpush3.bf16.msra.mxu0 %v991_v7  ;;  %971 = vmatpush3.bf16.msra.mxu1 %v991_v7  ;;  %v1011_v23 = vld [vmem:[%s1183_s9 + $0x90] ss:$8 sps:$4 sm:$0xff]   ;;  %v1014_v25 = vld [vmem:[%s1183_s9 + $0xa4] ss:$8 sps:$4 sm:$0xff]   ;;  %v1017_v27 = vld [vmem:[%s1183_s9 + $0xa0] ss:$8 sps:$4 sm:$0xff]  }
  0x14   : > { %856 = vmatprep.subr.bf16.mxu0 %v992_v8  ;;  %964 = vmatprep.subr.bf16.mxu1 %v992_v8  ;;  %v1018_v28 = vld [vmem:[%s1183_s9 + $0x34] ss:$8 sps:$4 sm:$0xff]   ;;  %v1022_v30 = vld [vmem:[%s1183_s9 + $0x30] ss:$8 sps:$4 sm:$0xff]   ;;  %v1024_v32 = vld [vmem:[%s1183_s9 + $0x44] ss:$8 sps:$4 sm:$0xff]  }
  0x15   : > { %v1020_v29 = vld [vmem:[%s1183_s9 + $0xb4] ss:$8 sps:$4 sm:$0xff]   ;;  %v1023_v31 = vld [vmem:[%s1183_s9 + $0xb0] ss:$8 sps:$4 sm:$0xff]   ;;  %v1026_v33 = vld [vmem:[%s1183_s9 + $0xc4] ss:$8 sps:$4 sm:$0xff]  }
  0x16   : > { %v1028_v34 = vld [vmem:[%s1183_s9 + $0x40] ss:$8 sps:$4 sm:$0xff]   ;;  %v1030_v36 = vld [vmem:[%s1183_s9 + $0x54] ss:$8 sps:$4 sm:$0xff]   ;;  %v1034_v38 = vld [vmem:[%s1183_s9 + $0x50] ss:$8 sps:$4 sm:$0xff]  }
  0x17   : > { %857 = vmatpush3.bf16.msra.mxu0 %v993_v9  ;;  %972 = vmatpush3.bf16.msra.mxu1 %v993_v9  ;;  %v1029_v35 = vld [vmem:[%s1183_s9 + $0xc0] ss:$8 sps:$4 sm:$0xff]   ;;  %v1032_v37 = vld [vmem:[%s1183_s9 + $0xd4] ss:$8 sps:$4 sm:$0xff]   ;;  %v1035_v39 = vld [vmem:[%s1183_s9 + $0xd0] ss:$8 sps:$4 sm:$0xff]  }
  0x18   : > { %858 = vmatprep.subr.bf16.mxu0 %v994_v10  ;;  %965 = vmatprep.subr.bf16.mxu1 %v994_v10  ;;  %v1036_v40 = vld [vmem:[%s1183_s9 + $0x64] ss:$8 sps:$4 sm:$0xff]   ;;  %v1040_v42 = vld [vmem:[%s1183_s9 + $0x60] ss:$8 sps:$4 sm:$0xff]   ;;  %v1042_v44 = vld [vmem:[%s1183_s9 + $0x74] ss:$8 sps:$4 sm:$0xff]  }
  0x19   : > { %v1038_v41 = vld [vmem:[%s1183_s9 + $0xe4] ss:$8 sps:$4 sm:$0xff]   ;;  %v1041_v43 = vld [vmem:[%s1183_s9 + $0xe0] ss:$8 sps:$4 sm:$0xff]   ;;  %v1044_v45 = vld [vmem:[%s1183_s9 + $0xf4] ss:$8 sps:$4 sm:$0xff]  }
  0x1a   : > { %v1046_v46 = vld [vmem:[%s1183_s9 + $0x70] ss:$8 sps:$4 sm:$0xff]  }
  0x1b   : > { %859 = vmatpush3.bf16.msra.mxu0 %v995_v13  ;;  %973 = vmatpush3.bf16.msra.mxu1 %v995_v13  ;;  %v1047_v47 = vld [vmem:[%s1183_s9 + $0xf0] ss:$8 sps:$4 sm:$0xff]  }
  0x1c   : > { %860 = vmatprep.subr.bf16.mxu0 %v996_v14  ;;  %966 = vmatprep.subr.bf16.mxu1 %v996_v14 }
  0x1f   : > { %861 = vmatpush3.bf16.msra.mxu0 %v997_v15  ;;  %974 = vmatpush3.bf16.msra.mxu1 %v997_v15 }
  0x20   : > { %862 = vmatprep.subr.bf16.mxu0 %v998_v16  ;;  %967 = vmatprep.subr.bf16.mxu1 %v998_v16 }
  0x23   : > { %863 = vmatpush3.bf16.msra.mxu0 %v999_v17  ;;  %975 = vmatpush3.bf16.msra.mxu1 %v999_v17 }
  0x26   : > { %538 = vmatmul.mubr.bf16.vlgmr.msra.gmra.mrb[0].mxu0 %v1000_v18  ;;  %602 = vmatmul.mubr.bf16.vlgmr.msra.gmra.mrb[0].mxu1 %v1003_v19 }
  0x27   : > { %545 = vmatprep.mubr.bf16.mxu0 %v1006_v20  ;;  %609 = vmatprep.mubr.bf16.mxu1 %v1008_v21 }
  0x2e   : > { %546 = vmatmul.mubr.bf16.gmra.mrb[4].mxu0 %v1010_v22  ;;  %610 = vmatmul.mubr.bf16.gmra.mrb[4].mxu1 %v1011_v23 }
  0x2f   : > { %553 = vmatprep.mubr.bf16.mxu0 %v1012_v24  ;;  %617 = vmatprep.mubr.bf16.mxu1 %v1014_v25 }
  0x36   : > { %554 = vmatmul.mubr.bf16.gmra.mrb[8].mxu0 %v1016_v26  ;;  %618 = vmatmul.mubr.bf16.gmra.mrb[8].mxu1 %v1017_v27 }
  0x37   : > { %561 = vmatprep.mubr.bf16.mxu0 %v1018_v28  ;;  %625 = vmatprep.mubr.bf16.mxu1 %v1020_v29 }
  0x3e   : > { %562 = vmatmul.mubr.bf16.gmra.mrb[12].mxu0 %v1022_v30  ;;  %626 = vmatmul.mubr.bf16.gmra.mrb[12].mxu1 %v1023_v31 }
  0x3f   : > { %569 = vmatprep.mubr.bf16.mxu0 %v1024_v32  ;;  %633 = vmatprep.mubr.bf16.mxu1 %v1026_v33 }
  0x46   : > { %570 = vmatmul.mubr.bf16.gmra.mrb[16].mxu0 %v1028_v34  ;;  %634 = vmatmul.mubr.bf16.gmra.mrb[16].mxu1 %v1029_v35 }
  0x47   : > { %577 = vmatprep.mubr.bf16.mxu0 %v1030_v36  ;;  %641 = vmatprep.mubr.bf16.mxu1 %v1032_v37 }
  0x4e   : > { %578 = vmatmul.mubr.bf16.gmra.mrb[20].mxu0 %v1034_v38  ;;  %642 = vmatmul.mubr.bf16.gmra.mrb[20].mxu1 %v1035_v39 }
  0x4f   : > { %585 = vmatprep.mubr.bf16.mxu0 %v1036_v40  ;;  %649 = vmatprep.mubr.bf16.mxu1 %v1038_v41 }
  0x56   : > { %586 = vmatmul.mubr.bf16.gmra.mrb[24].mxu0 %v1040_v42  ;;  %650 = vmatmul.mubr.bf16.gmra.mrb[24].mxu1 %v1041_v43 }
  0x57   : > { %593 = vmatprep.mubr.bf16.mxu0 %v1042_v44  ;;  %657 = vmatprep.mubr.bf16.mxu1 %v1044_v45 }
  0x5e   : > { %594 = vmatmul.mubr.bf16.gmra.mrb[28].mxu0 %v1046_v46  ;;  %658 = vmatmul.mubr.bf16.gmra.mrb[28].mxu1 %v1047_v47 }
  0xf9   : > { %v864_v48 = vpop.f32.mrb[0].mxu0  ;;  %v912_v49 = vpop.f32.mrb[0].mxu1 }
  0xfa   : > { %v865_v51 = vpop.f32.mrb[1].mxu0  ;;  %v913_v52 = vpop.f32.mrb[1].mxu1 }
  0xfb   : > { %v866_v53 = vadd.f32 %v865_v51, %v864_v48  ;;  %v914_v54 = vadd.f32 %v913_v52, %v912_v49  ;;  %v867_v55 = vpop.f32.mrb[2].mxu0  ;;  %v915_v56 = vpop.f32.mrb[2].mxu1 }
  0xfc   : > { %v868_v57 = vpop.f32.mrb[3].mxu0  ;;  %v916_v58 = vpop.f32.mrb[3].mxu1 }
  0xfd   : > { %v540_v59 = vadd.f32 %v866_v53, %v1241_v50  ;;  %v604_v60 = vadd.f32 %v914_v54, %v1241_v50  ;;  %v869_v61 = vadd.f32 %v868_v57, %v867_v55  ;;  %v917_v62 = vadd.f32 %v916_v58, %v915_v56 }
  0xff   : > { %1048 = vtanh.f32 %v540_v59  ;;  %v543_v63 = vadd.f32 %v869_v61, %v1241_v50  ;;  %v607_v0 = vadd.f32 %v917_v62, %v1241_v50 }
 0x100   : > { %1050 = vtanh.f32 %v604_v60 }
 0x101   : > { %1052 = vtanh.f32 %v543_v63  ;;  %v870_v1 = vpop.f32.mrb[4].mxu0  ;;  %v918_v2 = vpop.f32.mrb[4].mxu1 }
 0x102   : > { %1054 = vtanh.f32 %v607_v0  ;;  %v871_v3 = vpop.f32.mrb[5].mxu0  ;;  %v919_v4 = vpop.f32.mrb[5].mxu1 }
 0x103   : > { %v872_v5 = vadd.f32 %v871_v3, %v870_v1  ;;  %v920_v6 = vadd.f32 %v919_v4, %v918_v2  ;;  %v873_v7 = vpop.f32.mrb[6].mxu0  ;;  %v921_v8 = vpop.f32.mrb[6].mxu1 }
 0x104   : > { %v874_v9 = vpop.f32.mrb[7].mxu0  ;;  %v922_v10 = vpop.f32.mrb[7].mxu1 }
 0x105   : > { %v548_v11 = vadd.f32 %v872_v5, %v1241_v50  ;;  %v612_v12 = vadd.f32 %v920_v6, %v1241_v50  ;;  %v875_v13 = vadd.f32 %v874_v9, %v873_v7  ;;  %v923_v14 = vadd.f32 %v922_v10, %v921_v8 }
 0x107   : > { %1056 = vtanh.f32 %v548_v11  ;;  %v551_v15 = vadd.f32 %v875_v13, %v1241_v50  ;;  %v615_v16 = vadd.f32 %v923_v14, %v1241_v50 }
 0x108   : > { %1058 = vtanh.f32 %v612_v12 }
 0x109   : > { %v1049_v17 = vpop.eup %1048  ;;  %1060 = vtanh.f32 %v551_v15  ;;  %v876_v18 = vpop.f32.mrb[8].mxu0 }
 0x10a   : > { %v924_v19 = vpop.f32.mrb[8].mxu1  ;;  %v1051_v20 = vpop.eup %1050  ;;  %698 = vst [vmem:[%s1254_s30] sm:$0xff] %v1049_v17  ;;  %1062 = vtanh.f32 %v615_v16 }
 0x10b   : > { %v877_v21 = vpop.f32.mrb[9].mxu0  ;;  %v925_v22 = vpop.f32.mrb[9].mxu1  ;;  %714 = vst [vmem:[%s1254_s30 + $0x80] sm:$0xff] %v1051_v20 }
 0x10c   : > { %v1053_v23 = vpop.eup %1052  ;;  %v878_v24 = vadd.f32 %v877_v21, %v876_v18  ;;  %v926_v25 = vadd.f32 %v925_v22, %v924_v19  ;;  %v879_v26 = vpop.f32.mrb[10].mxu0 }
 0x10d   : > { %v927_v27 = vpop.f32.mrb[10].mxu1  ;;  %v1055_v28 = vpop.eup %1054  ;;  %699 = vst [vmem:[%s1254_s30 + $0x8] sm:$0xff] %v1053_v23 }
 0x10e   : > { %v880_v29 = vpop.f32.mrb[11].mxu0  ;;  %v928_v30 = vpop.f32.mrb[11].mxu1  ;;  %715 = vst [vmem:[%s1254_s30 + $0x88] sm:$0xff] %v1055_v28  ;;  %v556_v31 = vadd.f32 %v878_v24, %v1241_v50  ;;  %v620_v32 = vadd.f32 %v926_v25, %v1241_v50 }
 0x10f   : > { %v881_v33 = vadd.f32 %v880_v29, %v879_v26  ;;  %v929_v34 = vadd.f32 %v928_v30, %v927_v27 }
 0x110   : > { %1064 = vtanh.f32 %v556_v31 }
 0x111   : > { %v559_v35 = vadd.f32 %v881_v33, %v1241_v50  ;;  %v623_v36 = vadd.f32 %v929_v34, %v1241_v50  ;;  %1066 = vtanh.f32 %v620_v32  ;;  %v1057_v37 = vpop.eup %1056  ;;  %v882_v38 = vpop.f32.mrb[12].mxu0 }
 0x112   : > { %v930_v39 = vpop.f32.mrb[12].mxu1  ;;  %v1059_v40 = vpop.eup %1058  ;;  %700 = vst [vmem:[%s1254_s30 + $0x10] sm:$0xff] %v1057_v37 }
 0x113   : > { %1068 = vtanh.f32 %v559_v35  ;;  %v883_v41 = vpop.f32.mrb[13].mxu0  ;;  %v931_v42 = vpop.f32.mrb[13].mxu1  ;;  %716 = vst [vmem:[%s1254_s30 + $0x90] sm:$0xff] %v1059_v40 }
 0x114   : > { %1070 = vtanh.f32 %v623_v36  ;;  %v1061_v43 = vpop.eup %1060  ;;  %v884_v44 = vadd.f32 %v883_v41, %v882_v38  ;;  %v932_v45 = vadd.f32 %v931_v42, %v930_v39  ;;  %v885_v46 = vpop.f32.mrb[14].mxu0 }
 0x115   : > { %v933_v47 = vpop.f32.mrb[14].mxu1  ;;  %v1063_v48 = vpop.eup %1062  ;;  %701 = vst [vmem:[%s1254_s30 + $0x18] sm:$0xff] %v1061_v43 }
 0x116   : > { %v886_v49 = vpop.f32.mrb[15].mxu0  ;;  %v934_v51 = vpop.f32.mrb[15].mxu1  ;;  %717 = vst [vmem:[%s1254_s30 + $0x98] sm:$0xff] %v1063_v48  ;;  %v564_v52 = vadd.f32 %v884_v44, %v1241_v50  ;;  %v628_v53 = vadd.f32 %v932_v45, %v1241_v50 }
 0x117   : > { %v887_v54 = vadd.f32 %v886_v49, %v885_v46  ;;  %v935_v55 = vadd.f32 %v934_v51, %v933_v47 }
 0x118   : > { %1072 = vtanh.f32 %v564_v52 }
 0x119   : > { %v567_v56 = vadd.f32 %v887_v54, %v1241_v50  ;;  %v631_v57 = vadd.f32 %v935_v55, %v1241_v50  ;;  %1074 = vtanh.f32 %v628_v53  ;;  %v888_v59 = vpop.f32.mrb[16].mxu0  ;;  %v936_v60 = vpop.f32.mrb[16].mxu1 }
 0x11a   : > { %v1065_v58 = vpop.eup %1064  ;;  %v889_v62 = vpop.f32.mrb[17].mxu0 }
 0x11b   : > { %1076 = vtanh.f32 %v567_v56  ;;  %v1067_v61 = vpop.eup %1066  ;;  %702 = vst [vmem:[%s1254_s30 + $0x20] sm:$0xff] %v1065_v58  ;;  %v937_v63 = vpop.f32.mrb[17].mxu1  ;;  %v890_v1 = vadd.f32 %v889_v62, %v888_v59 }
 0x11c   : > { %1078 = vtanh.f32 %v631_v57  ;;  %718 = vst [vmem:[%s1254_s30 + $0xa0] sm:$0xff] %v1067_v61  ;;  %v938_v2 = vadd.f32 %v937_v63, %v936_v60  ;;  %v891_v3 = vpop.f32.mrb[18].mxu0  ;;  %v939_v4 = vpop.f32.mrb[18].mxu1 }
 0x11d   : > { %v1069_v0 = vpop.eup %1068  ;;  %v892_v6 = vpop.f32.mrb[19].mxu0  ;;  %v572_v8 = vadd.f32 %v890_v1, %v1241_v50 }
 0x11e   : > { %v1071_v5 = vpop.eup %1070  ;;  %703 = vst [vmem:[%s1254_s30 + $0x28] sm:$0xff] %v1069_v0  ;;  %v940_v7 = vpop.f32.mrb[19].mxu1  ;;  %v636_v9 = vadd.f32 %v938_v2, %v1241_v50  ;;  %v893_v10 = vadd.f32 %v892_v6, %v891_v3 }
 0x11f   : > { %719 = vst [vmem:[%s1254_s30 + $0xa8] sm:$0xff] %v1071_v5  ;;  %v941_v11 = vadd.f32 %v940_v7, %v939_v4  ;;  %1080 = vtanh.f32 %v572_v8 }
 0x120   : > { %v575_v12 = vadd.f32 %v893_v10, %v1241_v50  ;;  %1082 = vtanh.f32 %v636_v9 }
 0x121   : > { %v639_v13 = vadd.f32 %v941_v11, %v1241_v50  ;;  %v894_v15 = vpop.f32.mrb[20].mxu0  ;;  %v942_v16 = vpop.f32.mrb[20].mxu1 }
 0x122   : > { %v1073_v14 = vpop.eup %1072  ;;  %1084 = vtanh.f32 %v575_v12  ;;  %v895_v18 = vpop.f32.mrb[21].mxu0 }
 0x123   : > { %v1075_v17 = vpop.eup %1074  ;;  %704 = vst [vmem:[%s1254_s30 + $0x30] sm:$0xff] %v1073_v14  ;;  %1086 = vtanh.f32 %v639_v13  ;;  %v943_v19 = vpop.f32.mrb[21].mxu1  ;;  %v896_v21 = vadd.f32 %v895_v18, %v894_v15 }
 0x124   : > { %720 = vst [vmem:[%s1254_s30 + $0xb0] sm:$0xff] %v1075_v17  ;;  %v944_v22 = vadd.f32 %v943_v19, %v942_v16  ;;  %v897_v23 = vpop.f32.mrb[22].mxu0  ;;  %v945_v24 = vpop.f32.mrb[22].mxu1 }
 0x125   : > { %v1077_v20 = vpop.eup %1076  ;;  %v898_v26 = vpop.f32.mrb[23].mxu0  ;;  %v580_v28 = vadd.f32 %v896_v21, %v1241_v50 }
 0x126   : > { %v1079_v25 = vpop.eup %1078  ;;  %705 = vst [vmem:[%s1254_s30 + $0x38] sm:$0xff] %v1077_v20  ;;  %v946_v27 = vpop.f32.mrb[23].mxu1  ;;  %v644_v29 = vadd.f32 %v944_v22, %v1241_v50  ;;  %v899_v30 = vadd.f32 %v898_v26, %v897_v23 }
 0x127   : > { %721 = vst [vmem:[%s1254_s30 + $0xb8] sm:$0xff] %v1079_v25  ;;  %v947_v31 = vadd.f32 %v946_v27, %v945_v24  ;;  %1088 = vtanh.f32 %v580_v28 }
 0x128   : > { %v583_v32 = vadd.f32 %v899_v30, %v1241_v50  ;;  %1090 = vtanh.f32 %v644_v29 }
 0x129   : > { %v647_v33 = vadd.f32 %v947_v31, %v1241_v50  ;;  %v1081_v34 = vpop.eup %1080  ;;  %v900_v35 = vpop.f32.mrb[24].mxu0 }
 0x12a   : > { %1092 = vtanh.f32 %v583_v32  ;;  %v948_v36 = vpop.f32.mrb[24].mxu1  ;;  %v1083_v37 = vpop.eup %1082  ;;  %706 = vst [vmem:[%s1254_s30 + $0x40] sm:$0xff] %v1081_v34 }
 0x12b   : > { %1094 = vtanh.f32 %v647_v33  ;;  %v901_v38 = vpop.f32.mrb[25].mxu0  ;;  %v949_v39 = vpop.f32.mrb[25].mxu1  ;;  %722 = vst [vmem:[%s1254_s30 + $0xc0] sm:$0xff] %v1083_v37 }
 0x12c   : > { %v1085_v40 = vpop.eup %1084  ;;  %v902_v41 = vadd.f32 %v901_v38, %v900_v35  ;;  %v950_v42 = vadd.f32 %v949_v39, %v948_v36  ;;  %v903_v43 = vpop.f32.mrb[26].mxu0 }
 0x12d   : > { %v951_v44 = vpop.f32.mrb[26].mxu1  ;;  %v1087_v45 = vpop.eup %1086  ;;  %707 = vst [vmem:[%s1254_s30 + $0x48] sm:$0xff] %v1085_v40 }
 0x12e   : > { %v904_v46 = vpop.f32.mrb[27].mxu0  ;;  %v952_v47 = vpop.f32.mrb[27].mxu1  ;;  %723 = vst [vmem:[%s1254_s30 + $0xc8] sm:$0xff] %v1087_v45  ;;  %v588_v48 = vadd.f32 %v902_v41, %v1241_v50  ;;  %v652_v49 = vadd.f32 %v950_v42, %v1241_v50 }
 0x12f   : > { %v905_v51 = vadd.f32 %v904_v46, %v903_v43  ;;  %v953_v52 = vadd.f32 %v952_v47, %v951_v44 }
 0x130   : > { %1096 = vtanh.f32 %v588_v48 }
 0x131   : > { %v591_v53 = vadd.f32 %v905_v51, %v1241_v50  ;;  %v655_v54 = vadd.f32 %v953_v52, %v1241_v50  ;;  %1098 = vtanh.f32 %v652_v49  ;;  %v1089_v55 = vpop.eup %1088  ;;  %v906_v56 = vpop.f32.mrb[28].mxu0 }
 0x132   : > { %v954_v57 = vpop.f32.mrb[28].mxu1  ;;  %v1091_v58 = vpop.eup %1090  ;;  %708 = vst [vmem:[%s1254_s30 + $0x50] sm:$0xff] %v1089_v55 }
 0x133   : > { %1100 = vtanh.f32 %v591_v53  ;;  %v907_v59 = vpop.f32.mrb[29].mxu0  ;;  %v955_v60 = vpop.f32.mrb[29].mxu1  ;;  %724 = vst [vmem:[%s1254_s30 + $0xd0] sm:$0xff] %v1091_v58 }
 0x134   : > { %1102 = vtanh.f32 %v655_v54  ;;  %v1093_v61 = vpop.eup %1092  ;;  %v908_v62 = vadd.f32 %v907_v59, %v906_v56  ;;  %v956_v63 = vadd.f32 %v955_v60, %v954_v57  ;;  %v909_v0 = vpop.f32.mrb[30].mxu0 }
 0x135   : > { %v957_v1 = vpop.f32.mrb[30].mxu1  ;;  %v1095_v2 = vpop.eup %1094  ;;  %709 = vst [vmem:[%s1254_s30 + $0x58] sm:$0xff] %v1093_v61 }
 0x136   : > { %v910_v3 = vpop.f32.mrb[31].mxu0  ;;  %v958_v4 = vpop.f32.mrb[31].mxu1  ;;  %725 = vst [vmem:[%s1254_s30 + $0xd8] sm:$0xff] %v1095_v2  ;;  %v596_v5 = vadd.f32 %v908_v62, %v1241_v50  ;;  %v660_v6 = vadd.f32 %v956_v63, %v1241_v50 }
 0x137   : > { %v911_v7 = vadd.f32 %v910_v3, %v909_v0  ;;  %v959_v8 = vadd.f32 %v958_v4, %v957_v1 }
 0x138   : > { %1104 = vtanh.f32 %v596_v5 }
 0x139   : > { %v599_v9 = vadd.f32 %v911_v7, %v1241_v50  ;;  %v663_v10 = vadd.f32 %v959_v8, %v1241_v50  ;;  %1106 = vtanh.f32 %v660_v6 }
 0x13a   : > { %v1097_v11 = vpop.eup %1096 }
 0x13b   : > { %1108 = vtanh.f32 %v599_v9  ;;  %v1099_v12 = vpop.eup %1098  ;;  %710 = vst [vmem:[%s1254_s30 + $0x60] sm:$0xff] %v1097_v11 }
 0x13c   : > { %1110 = vtanh.f32 %v663_v10  ;;  %726 = vst [vmem:[%s1254_s30 + $0xe0] sm:$0xff] %v1099_v12 }
 0x13d   : > { %v1101_v13 = vpop.eup %1100 }
 0x13e   : > { %v1103_v14 = vpop.eup %1102  ;;  %711 = vst [vmem:[%s1254_s30 + $0x68] sm:$0xff] %v1101_v13 }
 0x13f   : > { %727 = vst [vmem:[%s1254_s30 + $0xe8] sm:$0xff] %v1103_v14 }
 0x142   : > { %v1105_v15 = vpop.eup %1104 }
 0x143   : > { %v1107_v16 = vpop.eup %1106  ;;  %712 = vst [vmem:[%s1254_s30 + $0x70] sm:$0xff] %v1105_v15 }
 0x144   : > { %728 = vst [vmem:[%s1254_s30 + $0xf0] sm:$0xff] %v1107_v16 }
 0x145   : > { %v1109_v17 = vpop.eup %1108 }
 0x146   : > { %v1111_v50 = vpop.eup %1110  ;;  %713 = vst [vmem:[%s1254_s30 + $0x78] sm:$0xff] %v1109_v17 }
 0x147   : > { %729 = vst [vmem:[%s1254_s30 + $0xf8] sm:$0xff] %v1111_v50 }
 0x148 PF: > { %s13_s12 = sadd.s32 1, %s1118_s12  }
 0x149   : > { %p10_p4 = scmp.ge.s32.totalorder %s13_s12, 4  }
 0x14b   :  { %12 = sbr.rel (!%p10_p4) target bundleno = 1 (0x1), region = 62 }

</bundles_post_ra>
